<compile_context>
chip_gen: v7x
topology: tpu7x:2x2x1
jax: 0.10.0
libtpu: 0.0.40
codegen_flags: <defaults>
</compile_context>

<pallas_src>
import functools

import jax
import jax.numpy as jnp
from jax.experimental import pallas as pl
from jax.experimental.pallas import tpu as pltpu

NUM_PEOPLE = 41
CPAD = 128          # lane-dense channel padding used throughout the conv trunk


# ----------------------------------------------------------------------------
# small helpers
# ----------------------------------------------------------------------------
def _round_up(x, m):
    return (x + m - 1) // m * m


def _pad2d(x, rows, cols):
    r, c = x.shape
    if r == rows and c == cols:
        return x
    return jnp.pad(x, ((0, rows - r), (0, cols - c)))


# ----------------------------------------------------------------------------
# Pallas kernel 1: single-shot matmul with fused bias + activation (convs)
# ----------------------------------------------------------------------------
def _mm_kernel(x_ref, w_ref, b_ref, o_ref, *, act):
    y = jnp.dot(x_ref[...], w_ref[...], preferred_element_type=jnp.float32)
    y = y + b_ref[...]
    if act == "relu":
        y = jnp.maximum(y, 0.0)
    elif act == "tanh":
        y = jnp.tanh(y)
    o_ref[...] = y.astype(o_ref.dtype)


def pallas_matmul(x, w_pad, b_pad, act="none", out_dtype=jnp.bfloat16):
    """y = act(x @ w + b).

    x: (M, K) any float dtype.  w_pad: (Kp, Np) bf16 pre-padded weights.
    b_pad: (1, Np) f32.  Returns (M, Np) in out_dtype (padded cols are exact 0).
    The K axis is collapsed into a single block (no k grid / accumulator).
    """
    M, K = x.shape
    Kp, Np = w_pad.shape

    Mp = _round_up(M, 16)                       # bf16 sublane packing
    xp = _pad2d(x.astype(jnp.bfloat16), Mp, Kp)

    # Split M into two "parallel" blocks when it is large enough so both v7x
    # TensorCores get work; otherwise a single block (grid step overhead is
    # the dominant cost at these sizes).
    tm = Mp // 2 if (Mp >= 512 and Mp % 32 == 0) else Mp
    tn = 256 if (Np % 256 == 0 and Np >= 256) else 128
    grid = (Mp // tm, Np // tn)

    out = pl.pallas_call(
        functools.partial(_mm_kernel, act=act),
        out_shape=jax.ShapeDtypeStruct((Mp, Np), out_dtype),
        grid_spec=pltpu.PrefetchScalarGridSpec(
            num_scalar_prefetch=0,
            grid=grid,
            in_specs=[
                pl.BlockSpec((tm, Kp), lambda i, j: (i, 0)),
                pl.BlockSpec((Kp, tn), lambda i, j: (0, j)),
                pl.BlockSpec((1, tn), lambda i, j: (0, j)),
            ],
            out_specs=pl.BlockSpec((tm, tn), lambda i, j: (i, j)),
        ),
        compiler_params=pltpu.CompilerParams(
            dimension_semantics=("parallel", "parallel")),
    )(xp, w_pad, b_pad)
    return out[:M]


# ----------------------------------------------------------------------------
# Pallas kernel 2: fused FC head  (6400 ->1024 ReLU ->128 Tanh ->41)
#   grid iterates over fc1 output tiles; fc2 is accumulated on the fly;
#   fc2-bias/Tanh/fc3 epilogue runs on the last grid step.
# ----------------------------------------------------------------------------
def _fc_head_kernel(x_ref, w1_ref, b1_ref, w2_ref, b2_ref, w3_ref, b3_ref,
                    o_ref, acc_ref):
    j = pl.program_id(0)

    @pl.when(j == 0)
    def _():
        acc_ref[...] = jnp.zeros_like(acc_ref)

    # fc1 column tile: relu(x @ W1[:, j_tile] + b1[j_tile])
    h = jnp.dot(x_ref[...], w1_ref[...], preferred_element_type=jnp.float32)
    h = jnp.maximum(h + b1_ref[...], 0.0)
    # stream into fc2:  acc += relu_tile @ W2[j_tile, :]
    acc_ref[...] += jnp.dot(h.astype(w2_ref.dtype), w2_ref[...],
                            preferred_element_type=jnp.float32)

    @pl.when(j == pl.num_programs(0) - 1)
    def _():
        h2 = jnp.tanh(acc_ref[...] + b2_ref[...])
        y = jnp.dot(h2.astype(w3_ref.dtype), w3_ref[...],
                    preferred_element_type=jnp.float32)
        o_ref[...] = (y + b3_ref[...]).astype(o_ref.dtype)


def pallas_fc_head(x, params, tn1=256):
    """Fused Linear(6400,1024)+ReLU -> Linear(1024,128)+Tanh -> Linear(128,41)."""
    M, _ = x.shape
    w1, b1 = params["fc1"]
    w2, b2 = params["fc2"]
    w3, b3 = params["fc3"]
    K1p, N1p = w1.shape          # (6400, 1024)
    N2p = w2.shape[1]            # 128
    N3p = w3.shape[1]            # 128 (41 padded)

    Mp = _round_up(M, 16)
    xp = _pad2d(x.astype(jnp.bfloat16), Mp, K1p)

    out = pl.pallas_call(
        _fc_head_kernel,
        out_shape=jax.ShapeDtypeStruct((Mp, N3p), jnp.float32),
        grid_spec=pltpu.PrefetchScalarGridSpec(
            num_scalar_prefetch=0,
            grid=(N1p // tn1,),
            in_specs=[
                pl.BlockSpec((Mp, K1p), lambda j: (0, 0)),   # x (resident)
                pl.BlockSpec((K1p, tn1), lambda j: (0, j)),  # W1 column tile
                pl.BlockSpec((1, tn1), lambda j: (0, j)),    # b1 tile
                pl.BlockSpec((tn1, N2p), lambda j: (j, 0)),  # W2 row tile
                pl.BlockSpec((1, N2p), lambda j: (0, 0)),    # b2 (resident)
                pl.BlockSpec((N2p, N3p), lambda j: (0, 0)),  # W3 (resident)
                pl.BlockSpec((1, N3p), lambda j: (0, 0)),    # b3 (resident)
            ],
            out_specs=pl.BlockSpec((Mp, N3p), lambda j: (0, 0)),
            scratch_shapes=[pltpu.VMEM((Mp, N2p), jnp.float32)],
        ),
        compiler_params=pltpu.CompilerParams(
            dimension_semantics=("arbitrary",)),
    )(xp, w1, b1, w2, b2, w3, b3)
    return out[:M, :NUM_PEOPLE]


# ----------------------------------------------------------------------------
# Conv / pool glue (im2col in plain JAX; all matmul compute in Pallas)
# ----------------------------------------------------------------------------
def _im2col1d(x, k=3, pad=1):
    # x: (B, L, C) -> (B*L, k*C), stride 1, 'same' zero padding.
    B, L, C = x.shape
    xp = jnp.pad(x, ((0, 0), (pad, pad), (0, 0)))
    cols = [xp[:, i:i + L, :] for i in range(k)]
    patches = jnp.stack(cols, axis=2)            # (B, L, k, C)
    return patches.reshape(B * L, k * C)


def conv1d_block(x, layer, act):
    """Conv1d(k=3, pad=1, stride=1) + bias (+ activation), channel-padded to 128."""
    B, L, _ = x.shape
    w_pad, b_pad = layer
    cols = _im2col1d(x, k=3, pad=1)
    y = pallas_matmul(cols, w_pad, b_pad, act=act)
    return y.reshape(B, L, w_pad.shape[1])


def maxpool1d(x, k):
    B, L, C = x.shape
    return x.reshape(B, L // k, k, C).max(axis=2)


# ----------------------------------------------------------------------------
# Deterministic (synthetic) parameters, pre-padded / pre-cast at init time
# ----------------------------------------------------------------------------
def _prep_conv(key, cin, cout, cin_pad, cout_pad=CPAD, k=3):
    kw_, kb = jax.random.split(key)
    fan = k * cin
    w = jax.random.normal(kw_, (k, cin, cout), jnp.float32) / jnp.sqrt(float(fan))
    b = 0.01 * jax.random.normal(kb, (cout,), jnp.float32)
    # Embed real weights into a channel-padded (k, cin_pad, cout_pad) tensor;
    # rows/cols for padded channels are exactly zero -> exact results.
    w_full = jnp.zeros((k, cin_pad, cout_pad), jnp.float32)
    w_full = w_full.at[:, :cin, :cout].set(w)
    wmat = w_full.reshape(k * cin_pad, cout_pad)
    Kp = _round_up(k * cin_pad, 128)
    wmat = _pad2d(wmat, Kp, cout_pad).astype(jnp.bfloat16)
    bmat = _pad2d(b.reshape(1, -1), 1, cout_pad)          # f32
    return wmat, bmat


def _prep_linear(key, fin, fout):
    kw_, kb = jax.random.split(key)
    w = jax.random.normal(kw_, (fin, fout), jnp.float32) / jnp.sqrt(float(fin))
    b = 0.01 * jax.random.normal(kb, (fout,), jnp.float32)
    Kp = _round_up(fin, 128)
    Np = _round_up(fout, 128)
    wmat = _pad2d(w, Kp, Np).astype(jnp.bfloat16)
    bmat = _pad2d(b.reshape(1, -1), 1, Np)                # f32
    return wmat, bmat


def init_params(key):
    ks = jax.random.split(key, 9)
    return {
        # conv1: Conv(1,32)+ReLU, Conv(32,32)+ReLU
        "c1a": _prep_conv(ks[0], cin=1, cout=32, cin_pad=1),
        "c1b": _prep_conv(ks[1], cin=32, cout=32, cin_pad=CPAD),
        # conv2: Conv(32,64)+ReLU, Conv(64,64), MaxPool(2), Dropout
        "c2a": _prep_conv(ks[2], cin=32, cout=64, cin_pad=CPAD),
        "c2b": _prep_conv(ks[3], cin=64, cout=64, cin_pad=CPAD),
        # conv3: Conv(64,128)+ReLU, Conv(128,128), MaxPool(4), Flatten
        "c3a": _prep_conv(ks[4], cin=64, cout=128, cin_pad=CPAD),
        "c3b": _prep_conv(ks[5], cin=128, cout=128, cin_pad=CPAD),
        # fc: Linear(6400,1024)+ReLU, Linear(1024,128)+Tanh, Linear(128,41)
        "fc1": _prep_linear(ks[6], 6400, 1024),
        "fc2": _prep_linear(ks[7], 1024, 128),
        "fc3": _prep_linear(ks[8], 128, NUM_PEOPLE),
    }


# ----------------------------------------------------------------------------
# Forward pass (matches sixlayersCNN.forward, eval-mode dropout)
# ----------------------------------------------------------------------------
@jax.jit
def forward(params, x):
    # x: (B, 1, L) — PyTorch Conv1d layout.
    x = jnp.transpose(x, (0, 2, 1))                    # -> (B, L, C=1)

    x = conv1d_block(x, params["c1a"], act="relu")     # conv1
    x = conv1d_block(x, params["c1b"], act="relu")

    x = conv1d_block(x, params["c2a"], act="relu")     # conv2
    x = conv1d_block(x, params["c2b"], act="none")     # (no ReLU before pool)
    x = maxpool1d(x, 2)
    # TODO(synk): Dropout(0.5) eval-mode identity.

    x = conv1d_block(x, params["c3a"], act="relu")     # conv3
    x = conv1d_block(x, params["c3b"], act="none")     # (no ReLU before pool)
    x = maxpool1d(x, 4)

    # Flatten in PyTorch order: (B, C, L) -> (B, C*L) = (B, 6400).
    B = x.shape[0]
    x = jnp.transpose(x, (0, 2, 1)).reshape(B, -1)

    return pallas_fc_head(x, params)                   # fused fc1/fc2/fc3


if __name__ == "__main__":
    key = jax.random.PRNGKey(0)
    pkey, xkey = jax.random.split(key)
    params = init_params(pkey)
    # L = 400 is implied by the module: Flatten -> 128 * (400/8) = 6400 = fc in.
    x = jax.random.normal(xkey, (2, 1, 400), jnp.float32)   # (B, C=1, L)
    y = jax.block_until_ready(forward(params, x))
    assert y.shape == (2, NUM_PEOPLE), y.shape
    print("KERNEL_OK")
</pallas_src>

<mosaic_0001>
module attributes {stable_mosaic.version = 11 : i64} {
  func.func @_mm_kernel(%arg0: i32, %arg1: i32, %arg2: memref<400x128xbf16, #tpu.memory_space<vmem>>, %arg3: memref<128x128xbf16, #tpu.memory_space<vmem>>, %arg4: memref<1x128xf32, #tpu.memory_space<vmem>>, %arg5: memref<400x128xbf16, #tpu.memory_space<vmem>>) attributes {dimension_semantics = [#tpu.dimension_semantics<parallel>, #tpu.dimension_semantics<parallel>], iteration_bounds = array<i64: 2, 1>, scalar_prefetch = 0 : i64, scratch_operands = 0 : i64, tpu.core_type = #tpu.core_type<tc>, window_params = [{transform_indices = @transform_0, window_bounds = array<i64: 400, 128>}, {transform_indices = @transform_1, window_bounds = array<i64: 128, 128>}, {transform_indices = @transform_2, window_bounds = array<i64: 1, 128>}, {transform_indices = @transform_3, window_bounds = array<i64: 400, 128>}]} {
    %c0 = arith.constant 0 : index
    %c0_0 = arith.constant 0 : index
    %0 = vector.load %arg2[%c0, %c0_0] : memref<400x128xbf16, #tpu.memory_space<vmem>>, vector<400x128xbf16>
    %c0_1 = arith.constant 0 : index
    %c0_2 = arith.constant 0 : index
    %1 = vector.load %arg3[%c0_1, %c0_2] : memref<128x128xbf16, #tpu.memory_space<vmem>>, vector<128x128xbf16>
    %cst = arith.constant dense<0.000000e+00> : vector<400x128xf32>
    %2 = tpu.matmul %0, %1, %cst {dimension_numbers = #tpu.dot_dimension_numbers<[1], [0], [0], [1], [0, 0, 1, 1], [], []>} : vector<400x128xbf16>, vector<128x128xbf16>, vector<400x128xf32> -> vector<400x128xf32>
    %c0_3 = arith.constant 0 : index
    %c0_4 = arith.constant 0 : index
    %3 = vector.load %arg4[%c0_3, %c0_4] : memref<1x128xf32, #tpu.memory_space<vmem>>, vector<1x128xf32>
    %4 = vector.broadcast %3 : vector<1x128xf32> to vector<400x128xf32>
    %5 = arith.addf %2, %4 : vector<400x128xf32>
    %cst_5 = arith.constant 0.000000e+00 : f32
    %6 = vector.broadcast %cst_5 : f32 to vector<400x128xf32>
    %7 = arith.maximumf %5, %6 : vector<400x128xf32>
    %8 = arith.truncf %7 : vector<400x128xf32> to vector<400x128xbf16>
    %c0_6 = arith.constant 0 : index
    %c0_7 = arith.constant 0 : index
    %9 = vector.load %arg5[%c0_6, %c0_7] : memref<400x128xbf16, #tpu.memory_space<vmem>>, vector<400x128xbf16>
    tpu.vector_store %arg5[%c0_6, %c0_7], %8 {strides = array<i32>} : memref<400x128xbf16, #tpu.memory_space<vmem>>, vector<400x128xbf16>,
    return
  }
  func.func @transform_0(%arg0: i32, %arg1: i32) -> (i32, i32) {
    %c0_i32 = arith.constant 0 : i32
    %c0_i32_0 = arith.constant 0 : i32
    return %arg0, %c0_i32 : i32, i32
  }
  func.func @transform_1(%arg0: i32, %arg1: i32) -> (i32, i32) {
    %c0_i32 = arith.constant 0 : i32
    %c0_i32_0 = arith.constant 0 : i32
    return %c0_i32, %arg1 : i32, i32
  }
  func.func @transform_2(%arg0: i32, %arg1: i32) -> (i32, i32) {
    %c0_i32 = arith.constant 0 : i32
    %c0_i32_0 = arith.constant 0 : i32
    return %c0_i32, %arg1 : i32, i32
  }
  func.func @transform_3(%arg0: i32, %arg1: i32) -> (i32, i32) {
    %c0_i32 = arith.constant 0 : i32
    return %arg0, %arg1 : i32, i32
  }
}

module attributes {stable_mosaic.version = 11 : i64} {
  func.func @_mm_kernel(%arg0: i32, %arg1: i32, %arg2: memref<400x384xbf16, #tpu.memory_space<vmem>>, %arg3: memref<384x128xbf16, #tpu.memory_space<vmem>>, %arg4: memref<1x128xf32, #tpu.memory_space<vmem>>, %arg5: memref<400x128xbf16, #tpu.memory_space<vmem>>) attributes {dimension_semantics = [#tpu.dimension_semantics<parallel>, #tpu.dimension_semantics<parallel>], iteration_bounds = array<i64: 2, 1>, scalar_prefetch = 0 : i64, scratch_operands = 0 : i64, tpu.core_type = #tpu.core_type<tc>, window_params = [{transform_indices = @transform_0, window_bounds = array<i64: 400, 384>}, {transform_indices = @transform_1, window_bounds = array<i64: 384, 128>}, {transform_indices = @transform_2, window_bounds = array<i64: 1, 128>}, {transform_indices = @transform_3, window_bounds = array<i64: 400, 128>}]} {
    %c0 = arith.constant 0 : index
    %c0_0 = arith.constant 0 : index
    %0 = vector.load %arg2[%c0, %c0_0] : memref<400x384xbf16, #tpu.memory_space<vmem>>, vector<400x384xbf16>
    %c0_1 = arith.constant 0 : index
    %c0_2 = arith.constant 0 : index
    %1 = vector.load %arg3[%c0_1, %c0_2] : memref<384x128xbf16, #tpu.memory_space<vmem>>, vector<384x128xbf16>
    %cst = arith.constant dense<0.000000e+00> : vector<400x128xf32>
    %2 = tpu.matmul %0, %1, %cst {dimension_numbers = #tpu.dot_dimension_numbers<[1], [0], [0], [1], [0, 0, 1, 1], [], []>} : vector<400x384xbf16>, vector<384x128xbf16>, vector<400x128xf32> -> vector<400x128xf32>
    %c0_3 = arith.constant 0 : index
    %c0_4 = arith.constant 0 : index
    %3 = vector.load %arg4[%c0_3, %c0_4] : memref<1x128xf32, #tpu.memory_space<vmem>>, vector<1x128xf32>
    %4 = vector.broadcast %3 : vector<1x128xf32> to vector<400x128xf32>
    %5 = arith.addf %2, %4 : vector<400x128xf32>
    %cst_5 = arith.constant 0.000000e+00 : f32
    %6 = vector.broadcast %cst_5 : f32 to vector<400x128xf32>
    %7 = arith.maximumf %5, %6 : vector<400x128xf32>
    %8 = arith.truncf %7 : vector<400x128xf32> to vector<400x128xbf16>
    %c0_6 = arith.constant 0 : index
    %c0_7 = arith.constant 0 : index
    %9 = vector.load %arg5[%c0_6, %c0_7] : memref<400x128xbf16, #tpu.memory_space<vmem>>, vector<400x128xbf16>
    tpu.vector_store %arg5[%c0_6, %c0_7], %8 {strides = array<i32>} : memref<400x128xbf16, #tpu.memory_space<vmem>>, vector<400x128xbf16>,
    return
  }
  func.func @transform_0(%arg0: i32, %arg1: i32) -> (i32, i32) {
    %c0_i32 = arith.constant 0 : i32
    %c0_i32_0 = arith.constant 0 : i32
    return %arg0, %c0_i32 : i32, i32
  }
  func.func @transform_1(%arg0: i32, %arg1: i32) -> (i32, i32) {
    %c0_i32 = arith.constant 0 : i32
    %c0_i32_0 = arith.constant 0 : i32
    return %c0_i32, %arg1 : i32, i32
  }
  func.func @transform_2(%arg0: i32, %arg1: i32) -> (i32, i32) {
    %c0_i32 = arith.constant 0 : i32
    %c0_i32_0 = arith.constant 0 : i32
    return %c0_i32, %arg1 : i32, i32
  }
  func.func @transform_3(%arg0: i32, %arg1: i32) -> (i32, i32) {
    %c0_i32 = arith.constant 0 : i32
    return %arg0, %arg1 : i32, i32
  }
}

module attributes {stable_mosaic.version = 11 : i64} {
  func.func @_mm_kernel(%arg0: i32, %arg1: i32, %arg2: memref<400x384xbf16, #tpu.memory_space<vmem>>, %arg3: memref<384x128xbf16, #tpu.memory_space<vmem>>, %arg4: memref<1x128xf32, #tpu.memory_space<vmem>>, %arg5: memref<400x128xbf16, #tpu.memory_space<vmem>>) attributes {dimension_semantics = [#tpu.dimension_semantics<parallel>, #tpu.dimension_semantics<parallel>], iteration_bounds = array<i64: 2, 1>, scalar_prefetch = 0 : i64, scratch_operands = 0 : i64, tpu.core_type = #tpu.core_type<tc>, window_params = [{transform_indices = @transform_0, window_bounds = array<i64: 400, 384>}, {transform_indices = @transform_1, window_bounds = array<i64: 384, 128>}, {transform_indices = @transform_2, window_bounds = array<i64: 1, 128>}, {transform_indices = @transform_3, window_bounds = array<i64: 400, 128>}]} {
    %c0 = arith.constant 0 : index
    %c0_0 = arith.constant 0 : index
    %0 = vector.load %arg2[%c0, %c0_0] : memref<400x384xbf16, #tpu.memory_space<vmem>>, vector<400x384xbf16>
    %c0_1 = arith.constant 0 : index
    %c0_2 = arith.constant 0 : index
    %1 = vector.load %arg3[%c0_1, %c0_2] : memref<384x128xbf16, #tpu.memory_space<vmem>>, vector<384x128xbf16>
    %cst = arith.constant dense<0.000000e+00> : vector<400x128xf32>
    %2 = tpu.matmul %0, %1, %cst {dimension_numbers = #tpu.dot_dimension_numbers<[1], [0], [0], [1], [0, 0, 1, 1], [], []>} : vector<400x384xbf16>, vector<384x128xbf16>, vector<400x128xf32> -> vector<400x128xf32>
    %c0_3 = arith.constant 0 : index
    %c0_4 = arith.constant 0 : index
    %3 = vector.load %arg4[%c0_3, %c0_4] : memref<1x128xf32, #tpu.memory_space<vmem>>, vector<1x128xf32>
    %4 = vector.broadcast %3 : vector<1x128xf32> to vector<400x128xf32>
    %5 = arith.addf %2, %4 : vector<400x128xf32>
    %6 = arith.truncf %5 : vector<400x128xf32> to vector<400x128xbf16>
    %c0_5 = arith.constant 0 : index
    %c0_6 = arith.constant 0 : index
    %7 = vector.load %arg5[%c0_5, %c0_6] : memref<400x128xbf16, #tpu.memory_space<vmem>>, vector<400x128xbf16>
    tpu.vector_store %arg5[%c0_5, %c0_6], %6 {strides = array<i32>} : memref<400x128xbf16, #tpu.memory_space<vmem>>, vector<400x128xbf16>,
    return
  }
  func.func @transform_0(%arg0: i32, %arg1: i32) -> (i32, i32) {
    %c0_i32 = arith.constant 0 : i32
    %c0_i32_0 = arith.constant 0 : i32
    return %arg0, %c0_i32 : i32, i32
  }
  func.func @transform_1(%arg0: i32, %arg1: i32) -> (i32, i32) {
    %c0_i32 = arith.constant 0 : i32
    %c0_i32_0 = arith.constant 0 : i32
    return %c0_i32, %arg1 : i32, i32
  }
  func.func @transform_2(%arg0: i32, %arg1: i32) -> (i32, i32) {
    %c0_i32 = arith.constant 0 : i32
    %c0_i32_0 = arith.constant 0 : i32
    return %c0_i32, %arg1 : i32, i32
  }
  func.func @transform_3(%arg0: i32, %arg1: i32) -> (i32, i32) {
    %c0_i32 = arith.constant 0 : i32
    return %arg0, %arg1 : i32, i32
  }
}

module attributes {stable_mosaic.version = 11 : i64} {
  func.func @_mm_kernel(%arg0: i32, %arg1: i32, %arg2: memref<400x384xbf16, #tpu.memory_space<vmem>>, %arg3: memref<384x128xbf16, #tpu.memory_space<vmem>>, %arg4: memref<1x128xf32, #tpu.memory_space<vmem>>, %arg5: memref<400x128xbf16, #tpu.memory_space<vmem>>) attributes {dimension_semantics = [#tpu.dimension_semantics<parallel>, #tpu.dimension_semantics<parallel>], iteration_bounds = array<i64: 1, 1>, scalar_prefetch = 0 : i64, scratch_operands = 0 : i64, tpu.core_type = #tpu.core_type<tc>, window_params = [{transform_indices = @transform_0, window_bounds = array<i64: 400, 384>}, {transform_indices = @transform_1, window_bounds = array<i64: 384, 128>}, {transform_indices = @transform_2, window_bounds = array<i64: 1, 128>}, {transform_indices = @transform_3, window_bounds = array<i64: 400, 128>}]} {
    %c0 = arith.constant 0 : index
    %c0_0 = arith.constant 0 : index
    %0 = vector.load %arg2[%c0, %c0_0] : memref<400x384xbf16, #tpu.memory_space<vmem>>, vector<400x384xbf16>
    %c0_1 = arith.constant 0 : index
    %c0_2 = arith.constant 0 : index
    %1 = vector.load %arg3[%c0_1, %c0_2] : memref<384x128xbf16, #tpu.memory_space<vmem>>, vector<384x128xbf16>
    %cst = arith.constant dense<0.000000e+00> : vector<400x128xf32>
    %2 = tpu.matmul %0, %1, %cst {dimension_numbers = #tpu.dot_dimension_numbers<[1], [0], [0], [1], [0, 0, 1, 1], [], []>} : vector<400x384xbf16>, vector<384x128xbf16>, vector<400x128xf32> -> vector<400x128xf32>
    %c0_3 = arith.constant 0 : index
    %c0_4 = arith.constant 0 : index
    %3 = vector.load %arg4[%c0_3, %c0_4] : memref<1x128xf32, #tpu.memory_space<vmem>>, vector<1x128xf32>
    %4 = vector.broadcast %3 : vector<1x128xf32> to vector<400x128xf32>
    %5 = arith.addf %2, %4 : vector<400x128xf32>
    %cst_5 = arith.constant 0.000000e+00 : f32
    %6 = vector.broadcast %cst_5 : f32 to vector<400x128xf32>
    %7 = arith.maximumf %5, %6 : vector<400x128xf32>
    %8 = arith.truncf %7 : vector<400x128xf32> to vector<400x128xbf16>
    %c0_6 = arith.constant 0 : index
    %c0_7 = arith.constant 0 : index
    %9 = vector.load %arg5[%c0_6, %c0_7] : memref<400x128xbf16, #tpu.memory_space<vmem>>, vector<400x128xbf16>
    tpu.vector_store %arg5[%c0_6, %c0_7], %8 {strides = array<i32>} : memref<400x128xbf16, #tpu.memory_space<vmem>>, vector<400x128xbf16>,
    return
  }
  func.func @transform_0(%arg0: i32, %arg1: i32) -> (i32, i32) {
    %c0_i32 = arith.constant 0 : i32
    %c0_i32_0 = arith.constant 0 : i32
    return %arg0, %c0_i32 : i32, i32
  }
  func.func @transform_1(%arg0: i32, %arg1: i32) -> (i32, i32) {
    %c0_i32 = arith.constant 0 : i32
    %c0_i32_0 = arith.constant 0 : i32
    return %c0_i32, %arg1 : i32, i32
  }
  func.func @transform_2(%arg0: i32, %arg1: i32) -> (i32, i32) {
    %c0_i32 = arith.constant 0 : i32
    %c0_i32_0 = arith.constant 0 : i32
    return %c0_i32, %arg1 : i32, i32
  }
  func.func @transform_3(%arg0: i32, %arg1: i32) -> (i32, i32) {
    %c0_i32 = arith.constant 0 : i32
    return %arg0, %arg1 : i32, i32
  }
}

module attributes {stable_mosaic.version = 11 : i64} {
  func.func @_mm_kernel(%arg0: i32, %arg1: i32, %arg2: memref<400x384xbf16, #tpu.memory_space<vmem>>, %arg3: memref<384x128xbf16, #tpu.memory_space<vmem>>, %arg4: memref<1x128xf32, #tpu.memory_space<vmem>>, %arg5: memref<400x128xbf16, #tpu.memory_space<vmem>>) attributes {dimension_semantics = [#tpu.dimension_semantics<parallel>, #tpu.dimension_semantics<parallel>], iteration_bounds = array<i64: 1, 1>, scalar_prefetch = 0 : i64, scratch_operands = 0 : i64, tpu.core_type = #tpu.core_type<tc>, window_params = [{transform_indices = @transform_0, window_bounds = array<i64: 400, 384>}, {transform_indices = @transform_1, window_bounds = array<i64: 384, 128>}, {transform_indices = @transform_2, window_bounds = array<i64: 1, 128>}, {transform_indices = @transform_3, window_bounds = array<i64: 400, 128>}]} {
    %c0 = arith.constant 0 : index
    %c0_0 = arith.constant 0 : index
    %0 = vector.load %arg2[%c0, %c0_0] : memref<400x384xbf16, #tpu.memory_space<vmem>>, vector<400x384xbf16>
    %c0_1 = arith.constant 0 : index
    %c0_2 = arith.constant 0 : index
    %1 = vector.load %arg3[%c0_1, %c0_2] : memref<384x128xbf16, #tpu.memory_space<vmem>>, vector<384x128xbf16>
    %cst = arith.constant dense<0.000000e+00> : vector<400x128xf32>
    %2 = tpu.matmul %0, %1, %cst {dimension_numbers = #tpu.dot_dimension_numbers<[1], [0], [0], [1], [0, 0, 1, 1], [], []>} : vector<400x384xbf16>, vector<384x128xbf16>, vector<400x128xf32> -> vector<400x128xf32>
    %c0_3 = arith.constant 0 : index
    %c0_4 = arith.constant 0 : index
    %3 = vector.load %arg4[%c0_3, %c0_4] : memref<1x128xf32, #tpu.memory_space<vmem>>, vector<1x128xf32>
    %4 = vector.broadcast %3 : vector<1x128xf32> to vector<400x128xf32>
    %5 = arith.addf %2, %4 : vector<400x128xf32>
    %6 = arith.truncf %5 : vector<400x128xf32> to vector<400x128xbf16>
    %c0_5 = arith.constant 0 : index
    %c0_6 = arith.constant 0 : index
    %7 = vector.load %arg5[%c0_5, %c0_6] : memref<400x128xbf16, #tpu.memory_space<vmem>>, vector<400x128xbf16>
    tpu.vector_store %arg5[%c0_5, %c0_6], %6 {strides = array<i32>} : memref<400x128xbf16, #tpu.memory_space<vmem>>, vector<400x128xbf16>,
    return
  }
  func.func @transform_0(%arg0: i32, %arg1: i32) -> (i32, i32) {
    %c0_i32 = arith.constant 0 : i32
    %c0_i32_0 = arith.constant 0 : i32
    return %arg0, %c0_i32 : i32, i32
  }
  func.func @transform_1(%arg0: i32, %arg1: i32) -> (i32, i32) {
    %c0_i32 = arith.constant 0 : i32
    %c0_i32_0 = arith.constant 0 : i32
    return %c0_i32, %arg1 : i32, i32
  }
  func.func @transform_2(%arg0: i32, %arg1: i32) -> (i32, i32) {
    %c0_i32 = arith.constant 0 : i32
    %c0_i32_0 = arith.constant 0 : i32
    return %c0_i32, %arg1 : i32, i32
  }
  func.func @transform_3(%arg0: i32, %arg1: i32) -> (i32, i32) {
    %c0_i32 = arith.constant 0 : i32
    return %arg0, %arg1 : i32, i32
  }
}

module attributes {stable_mosaic.version = 11 : i64} {
  func.func @_fc_head_kernel(%arg0: i32, %arg1: memref<16x6400xbf16, #tpu.memory_space<vmem>>, %arg2: memref<6400x256xbf16, #tpu.memory_space<vmem>>, %arg3: memref<1x256xf32, #tpu.memory_space<vmem>>, %arg4: memref<256x128xbf16, #tpu.memory_space<vmem>>, %arg5: memref<1x128xf32, #tpu.memory_space<vmem>>, %arg6: memref<128x128xbf16, #tpu.memory_space<vmem>>, %arg7: memref<1x128xf32, #tpu.memory_space<vmem>>, %arg8: memref<16x128xf32, #tpu.memory_space<vmem>>, %arg9: memref<16x128xf32, #tpu.memory_space<vmem>>) attributes {dimension_semantics = [#tpu.dimension_semantics<arbitrary>], iteration_bounds = array<i64: 4>, scalar_prefetch = 0 : i64, scratch_operands = 1 : i64, tpu.core_type = #tpu.core_type<tc>, window_params = [{pipeline_mode = #tpu.pipeline_mode<synchronous>, transform_indices = @transform_0, window_bounds = array<i64: 16, 6400>}, {transform_indices = @transform_1, window_bounds = array<i64: 6400, 256>}, {transform_indices = @transform_2, window_bounds = array<i64: 1, 256>}, {transform_indices = @transform_3, window_bounds = array<i64: 256, 128>}, {pipeline_mode = #tpu.pipeline_mode<synchronous>, transform_indices = @transform_4, window_bounds = array<i64: 1, 128>}, {pipeline_mode = #tpu.pipeline_mode<synchronous>, transform_indices = @transform_5, window_bounds = array<i64: 128, 128>}, {pipeline_mode = #tpu.pipeline_mode<synchronous>, transform_indices = @transform_6, window_bounds = array<i64: 1, 128>}, {pipeline_mode = #tpu.pipeline_mode<synchronous>, transform_indices = @transform_7, window_bounds = array<i64: 16, 128>}]} {
    %c0_i32 = arith.constant 0 : i32
    %0 = arith.cmpi eq, %arg0, %c0_i32 : i32
    %1 = arith.extui %0 : i1 to i32
    %c0_i32_0 = arith.constant 0 : i32
    %2 = arith.cmpi ne, %1, %c0_i32_0 : i32
    scf.if %2 {
      %cst_15 = arith.constant 0.000000e+00 : f32
      %20 = vector.broadcast %cst_15 : f32 to vector<16x128xf32>
      %c0_16 = arith.constant 0 : index
      %c0_17 = arith.constant 0 : index
      %21 = vector.load %arg9[%c0_16, %c0_17] : memref<16x128xf32, #tpu.memory_space<vmem>>, vector<16x128xf32>
      tpu.vector_store %arg9[%c0_16, %c0_17], %20 {strides = array<i32>} : memref<16x128xf32, #tpu.memory_space<vmem>>, vector<16x128xf32>,
    } else {
    }
    %c0 = arith.constant 0 : index
    %c0_1 = arith.constant 0 : index
    %3 = vector.load %arg1[%c0, %c0_1] : memref<16x6400xbf16, #tpu.memory_space<vmem>>, vector<16x6400xbf16>
    %c0_2 = arith.constant 0 : index
    %c0_3 = arith.constant 0 : index
    %4 = vector.load %arg2[%c0_2, %c0_3] : memref<6400x256xbf16, #tpu.memory_space<vmem>>, vector<6400x256xbf16>
    %cst = arith.constant dense<0.000000e+00> : vector<16x256xf32>
    %5 = tpu.matmul %3, %4, %cst {dimension_numbers = #tpu.dot_dimension_numbers<[1], [0], [0], [1], [0, 0, 1, 1], [], []>} : vector<16x6400xbf16>, vector<6400x256xbf16>, vector<16x256xf32> -> vector<16x256xf32>
    %c0_4 = arith.constant 0 : index
    %c0_5 = arith.constant 0 : index
    %6 = vector.load %arg3[%c0_4, %c0_5] : memref<1x256xf32, #tpu.memory_space<vmem>>, vector<1x256xf32>
    %7 = vector.broadcast %6 : vector<1x256xf32> to vector<16x256xf32>
    %8 = arith.addf %5, %7 : vector<16x256xf32>
    %cst_6 = arith.constant 0.000000e+00 : f32
    %9 = vector.broadcast %cst_6 : f32 to vector<16x256xf32>
    %10 = arith.maximumf %8, %9 : vector<16x256xf32>
    %c0_7 = arith.constant 0 : index
    %c0_8 = arith.constant 0 : index
    %11 = vector.load %arg9[%c0_7, %c0_8] : memref<16x128xf32, #tpu.memory_space<vmem>>, vector<16x128xf32>
    %12 = arith.truncf %10 : vector<16x256xf32> to vector<16x256xbf16>
    %c0_9 = arith.constant 0 : index
    %c0_10 = arith.constant 0 : index
    %13 = vector.load %arg4[%c0_9, %c0_10] : memref<256x128xbf16, #tpu.memory_space<vmem>>, vector<256x128xbf16>
    %cst_11 = arith.constant dense<0.000000e+00> : vector<16x128xf32>
    %14 = tpu.matmul %12, %13, %cst_11 {dimension_numbers = #tpu.dot_dimension_numbers<[1], [0], [0], [1], [0, 0, 1, 1], [], []>} : vector<16x256xbf16>, vector<256x128xbf16>, vector<16x128xf32> -> vector<16x128xf32>
    %15 = arith.addf %11, %14 : vector<16x128xf32>
    %c0_12 = arith.constant 0 : index
    %c0_13 = arith.constant 0 : index
    %16 = vector.load %arg9[%c0_12, %c0_13] : memref<16x128xf32, #tpu.memory_space<vmem>>, vector<16x128xf32>
    tpu.vector_store %arg9[%c0_12, %c0_13], %15 {strides = array<i32>} : memref<16x128xf32, #tpu.memory_space<vmem>>, vector<16x128xf32>,
    %c3_i32 = arith.constant 3 : i32
    %17 = arith.cmpi eq, %arg0, %c3_i32 : i32
    %18 = arith.extui %17 : i1 to i32
    %c0_i32_14 = arith.constant 0 : i32
    %19 = arith.cmpi ne, %18, %c0_i32_14 : i32
    scf.if %19 {
      %c0_15 = arith.constant 0 : index
      %c0_16 = arith.constant 0 : index
      %20 = vector.load %arg9[%c0_15, %c0_16] : memref<16x128xf32, #tpu.memory_space<vmem>>, vector<16x128xf32>
      %c0_17 = arith.constant 0 : index
      %c0_18 = arith.constant 0 : index
      %21 = vector.load %arg5[%c0_17, %c0_18] : memref<1x128xf32, #tpu.memory_space<vmem>>, vector<1x128xf32>
      %22 = vector.broadcast %21 : vector<1x128xf32> to vector<16x128xf32>
      %23 = arith.addf %20, %22 : vector<16x128xf32>
      %24 = math.tanh %23 : vector<16x128xf32>
      %25 = arith.truncf %24 : vector<16x128xf32> to vector<16x128xbf16>
      %c0_19 = arith.constant 0 : index
      %c0_20 = arith.constant 0 : index
      %26 = vector.load %arg6[%c0_19, %c0_20] : memref<128x128xbf16, #tpu.memory_space<vmem>>, vector<128x128xbf16>
      %cst_21 = arith.constant dense<0.000000e+00> : vector<16x128xf32>
      %27 = tpu.matmul %25, %26, %cst_21 {dimension_numbers = #tpu.dot_dimension_numbers<[1], [0], [0], [1], [0, 0, 1, 1], [], []>} : vector<16x128xbf16>, vector<128x128xbf16>, vector<16x128xf32> -> vector<16x128xf32>
      %c0_22 = arith.constant 0 : index
      %c0_23 = arith.constant 0 : index
      %28 = vector.load %arg7[%c0_22, %c0_23] : memref<1x128xf32, #tpu.memory_space<vmem>>, vector<1x128xf32>
      %29 = vector.broadcast %28 : vector<1x128xf32> to vector<16x128xf32>
      %30 = arith.addf %27, %29 : vector<16x128xf32>
      %c0_24 = arith.constant 0 : index
      %c0_25 = arith.constant 0 : index
      %31 = vector.load %arg8[%c0_24, %c0_25] : memref<16x128xf32, #tpu.memory_space<vmem>>, vector<16x128xf32>
      tpu.vector_store %arg8[%c0_24, %c0_25], %30 {strides = array<i32>} : memref<16x128xf32, #tpu.memory_space<vmem>>, vector<16x128xf32>,
    } else {
    }
    return
  }
  func.func @transform_0(%arg0: i32) -> (i32, i32) {
    %c0_i32 = arith.constant 0 : i32
    %c0_i32_0 = arith.constant 0 : i32
    %c0_i32_1 = arith.constant 0 : i32
    return %c0_i32, %c0_i32_0 : i32, i32
  }
  func.func @transform_1(%arg0: i32) -> (i32, i32) {
    %c0_i32 = arith.constant 0 : i32
    %c0_i32_0 = arith.constant 0 : i32
    return %c0_i32, %arg0 : i32, i32
  }
  func.func @transform_2(%arg0: i32) -> (i32, i32) {
    %c0_i32 = arith.constant 0 : i32
    %c0_i32_0 = arith.constant 0 : i32
    return %c0_i32, %arg0 : i32, i32
  }
  func.func @transform_3(%arg0: i32) -> (i32, i32) {
    %c0_i32 = arith.constant 0 : i32
    %c0_i32_0 = arith.constant 0 : i32
    return %arg0, %c0_i32 : i32, i32
  }
  func.func @transform_4(%arg0: i32) -> (i32, i32) {
    %c0_i32 = arith.constant 0 : i32
    %c0_i32_0 = arith.constant 0 : i32
    %c0_i32_1 = arith.constant 0 : i32
    return %c0_i32, %c0_i32_0 : i32, i32
  }
  func.func @transform_5(%arg0: i32) -> (i32, i32) {
    %c0_i32 = arith.constant 0 : i32
    %c0_i32_0 = arith.constant 0 : i32
    %c0_i32_1 = arith.constant 0 : i32
    return %c0_i32, %c0_i32_0 : i32, i32
  }
  func.func @transform_6(%arg0: i32) -> (i32, i32) {
    %c0_i32 = arith.constant 0 : i32
    %c0_i32_0 = arith.constant 0 : i32
    %c0_i32_1 = arith.constant 0 : i32
    return %c0_i32, %c0_i32_0 : i32, i32
  }
  func.func @transform_7(%arg0: i32) -> (i32, i32) {
    %c0_i32 = arith.constant 0 : i32
    %c0_i32_0 = arith.constant 0 : i32
    %c0_i32_1 = arith.constant 0 : i32
    return %c0_i32, %c0_i32_0 : i32, i32
  }
}

</mosaic_0001>

<bundles_post_ra>
// kernel: forward.7
= control target key start
LH: loop header
LB: loop body
LE: loop exit
PB: predicated region body
PF: predicated region fallthrough
CT: control target
= control target key end

     0   :  { %8 = vsyncpa [#allocation3], 0  ;;  %s2091_s0 = inlined_call_operand.vmem [shape: bf16[800,128], index: 0, kind: input, shape index: {}]   ;;  %s2092_s1 = inlined_call_operand.hbm [shape: bf16[128,128], index: 1, kind: input, shape index: {}]   ;;  %s2093_s2 = inlined_call_operand.hbm [shape: f32[1,128], index: 2, kind: input, shape index: {}]   ;;  %s2094_s3 = inlined_call_operand.vmem [shape: bf16[800,128], index: 3, kind: output, shape index: {}]  }
   0x1   :  { %9 = vsyncpa [#allocation5], 0  ;;  %s1799_s12 = smov 0   ;;  %s1801_s13 = smov 0  }
   0x2   :  { %s1803_s14 = smov 0  }
   0x3 LB: > { %s1142_s15 = sadd.s32 4294967295, %s1771_s14   ;;  %s27_s16 = sadd.s32 1, %s1767_s13  ;;  %s1771_s14 = sphi %s1803_s14, %s15_s14   ;;  %s1767_s13 = sphi %s1801_s13, %s2104_s13   ;;  %s1763_s12 = sphi %s1799_s12, %s2103_s12  }
   0x4   : > { %p29_p0 = scmp.ge.s32.totalorder %s27_s16, 2  ;;  %p1144_p1 = scmp.ge.s32.totalorder %s1771_s14, 1 }
   0x5   : > { %p138_p2 = scmp.lt.s32.totalorder %s1771_s14, 3  ;;  %p1824_p4 = scmp.eq.s32.totalorder %s1142_s15, 0 }
   0x6   : > { %s2106_s16 = smov (%p29_p0, %s27_s16), 0  ;;  %s1773_s19 = smov [#allocation2]  }
   0x7   : > { %p1820_p3 = pnand %p1144_p1, %p138_p2  ;;  %s152_s20 = sshll.u32 %s1773_s19, 4  ;;  %s153_s20 = int_to_ptr.vmem [resolvable:$true] %s152_s20 }
   0x8   : > { %s2099_s18 = scalar_select %p1824_p4, 1, 0 }
   0x9   : > { %s2098_s17 = scalar_select %p1820_p3, 1, 0 }
   0xa   : > { %p1611_p5 = pneg %p1820_p3  ;;  %s1774_s22 = smov [#allocation4]  }
   0xb   : > { %s168_s23 = sshll.u32 %s1774_s22, 4  ;;  %s1685_s26 = scalar_lea.hbm %s2092_s1, 1024  ;;  %s1836_s23 = int_to_ptr.vmem [resolvable:$true] %s168_s23 }
   0xc   : > { %p1832_p6 = pnand %p1824_p4, %p1611_p5  ;;  %p1686_p7 = scmp.ne.s32.totalorder %s2092_s1, %s1685_s26 }
   0xd   : > { %p1692_p11 = scmp.lt.u32.totalorder %s1685_s26, %s2092_s1 }
   0xe   : > { %p1687_p8 = pneg %p1832_p6 }
  0x10   : > { %p1688_p9 = pnand %p1687_p8, %p1686_p7 }
  0x12   : > { %p1689_p10 = pneg %p1688_p9 }
  0x14   : > { %p1694_p12 = pnand %p1692_p11, %p1689_p10 }
  0x16   : > { %1697 = shalt.err (!%p1694_p12)
}
  0x17   : > { %s1698_s4 = scalar_lea.vmem %s153_s20, 1024  ;;  %p1706_p2 = scmp.lt.s32.totalorder %s153_s20, %s153_s20 }
  0x18   : > { %p1699_p13 = scmp.ne.s32.totalorder %s153_s20, %s1698_s4  ;;  %p1707_p5 = scmp.lt.s32.totalorder %s1698_s4, %s1698_s4 }
  0x1a   : > { %p1701_p0 = pnand %p1699_p13, %p1687_p8  ;;  %p1708_p4 = por %p1707_p5, %p1706_p2 }
  0x1c   : > { %p1702_p1 = pneg %p1701_p0 }
  0x1e   : > { %p1709_p3 = pnand %p1708_p4, %p1702_p1 }
  0x20   : > { %1712 = shalt.err (!%p1709_p3)
}
  0x21   : > { %s1775_s5 = smov 64   ;;  %s1776_s6 = smov 4  }
  0x22   : > { %1614 = dma.hbm_to_vmem [thread:$0]  (!%p1832_p6), %s2092_s1, 1024, %s153_s20, [#allocation3], %s1775_s5, %s1775_s5, %s1776_s6  }
  0x23   : > { %s1713_s11 = scalar_lea.hbm %s2093_s2, 16 }
  0x24   : > { %p1714_p7 = scmp.ne.s32.totalorder %s2093_s2, %s1713_s11  ;;  %p1720_p9 = scmp.lt.u32.totalorder %s1713_s11, %s2093_s2 }
  0x26   : > { %p1716_p3 = pnand %p1714_p7, %p1687_p8 }
  0x28   : > { %p1717_p4 = pneg %p1716_p3 }
  0x2a   : > { %p1722_p10 = pnand %p1720_p9, %p1717_p4 }
  0x2c   : > { %1725 = shalt.err (!%p1722_p10)
}
  0x2d   : > { %s1726_s20 = scalar_lea.vmem %s1836_s23, 16  ;;  %s1733_s25 = scalar_lea.vmem %s1836_s23, 32 }
  0x2e   : > { %p1727_p11 = scmp.ne.s32.totalorder %s1836_s23, %s1726_s20  ;;  %p1734_p0 = scmp.lt.s32.totalorder %s1836_s23, %s1836_s23 }
  0x2f   : > { %p1735_p1 = scmp.lt.s32.totalorder %s1733_s25, %s1726_s20 }
  0x30   : > { %p1729_p12 = pnand %p1727_p11, %p1687_p8 }
  0x31   : > { %p1736_p2 = por %p1735_p1, %p1734_p0 }
  0x32   : > { %p1730_p13 = pneg %p1729_p12 }
  0x34   : > { %p1737_p5 = pnand %p1736_p2, %p1730_p13 }
  0x36   : > { %1740 = shalt.err (!%p1737_p5)
}
  0x37   : > { %1617 = dma.hbm_to_vmem [thread:$0]  (!%p1832_p6), %s2093_s2, 16, %s1836_s23, [#allocation5]  }
  0x38   : > { %p2101_p7 = scmp.ne.s32.totalorder %s2098_s17, 0 }
  0x39   : > { %p2102_p8 = scmp.ne.s32.totalorder (!%p2101_p7), %s2099_s18, 0 }
  0x3a   : > { %190 = sbr.rel (%p2101_p7) target bundleno = 419 (0x1a3), region = 32 }
  0x41   : > { %1754 = dma.done.wait (%p2102_p8), [#allocation3], 1024  }
  0x42   : > { %1756 = vsyncadd (%p2102_p8), [#allocation3], 4294966272 }
  0x43   : > { %1758 = dma.done.wait (%p2102_p8), [#allocation5], 16  }
  0x44   : > { %1760 = vsyncadd (%p2102_p8), [#allocation5], 4294967280  ;;  %s221_s21 = smul.u32 50, %s1763_s12  ;;  %v1777_v0 = vmov 0.0   ;;  %vm1778_vm0 = vmmov 0   ;;  %v1652_v1 = vld [vmem:[#allocation2] sm:$0xff]  }
  0x45   : > { %1471 = vmatprep.subr.bf16.mxu0 %v1777_v0  ;;  %1587 = vmatprep.subr.bf16.mxu1 %v1777_v0  ;;  %v1653_v2 = vld [vmem:[#allocation2 + $0x8] sm:$0xff]   ;;  %v1654_v3 = vld [vmem:[#allocation2 + $0x10] sm:$0xff]   ;;  %v1655_v4 = vld [vmem:[#allocation2 + $0x18] sm:$0xff]  }
  0x46   : > { %1487 = vmatprep.mubr.msk.bf16.mxu0 %vm1778_vm0, %v1777_v0  ;;  %1539 = vmatprep.mubr.msk.bf16.mxu1 %vm1778_vm0, %v1777_v0  ;;  %p222_p6 = scmp.lt.s32.totalorder %s221_s21, 99  ;;  %v1656_v5 = vld [vmem:[#allocation2 + $0x20] sm:$0xff]   ;;  %v1657_v6 = vld [vmem:[#allocation2 + $0x28] sm:$0xff]   ;;  %v1658_v7 = vld [vmem:[#allocation2 + $0x30] sm:$0xff]  }
  0x47   : > { %1472 = vmatpush3.bf16.msra.mxu0 %v1652_v1  ;;  %1595 = vmatpush3.bf16.msra.mxu1 %v1652_v1  ;;  %v1659_v8 = vld [vmem:[#allocation2 + $0x38] sm:$0xff]   ;;  %v1998_v34 = vld [vmem:[#allocation4] ss:$0 sm:$0xff] }
  0x48   : > { %s2108_s21 = smov (!%p222_p6, %s221_s21), 99  ;;  %1473 = vmatprep.subr.bf16.mxu0 %v1777_v0  ;;  %1588 = vmatprep.subr.bf16.mxu1 %v1777_v0 }
  0x49   : > { %s1151_s12 = sshll.u32 %s2108_s21, 2 }
  0x4a   : > { %s1915_s23 = scalar_lea.vmem %s2091_s0, %s1151_s12  ;;  %s2009_s30 = scalar_lea.vmem %s2094_s3, %s1151_s12 }
  0x4b   : > { %1474 = vmatpush3.bf16.msra.mxu0 %v1653_v2  ;;  %1596 = vmatpush3.bf16.msra.mxu1 %v1653_v2  ;;  %v1660_v9 = vld [vmem:[%s1915_s23] sm:$0xff]   ;;  %v1661_v10 = vld [vmem:[%s1915_s23 + $0x68] sm:$0xff]   ;;  %v1663_v12 = vld [vmem:[%s1915_s23 + $0x70] sm:$0xff]  }
  0x4c   : > { %1475 = vmatprep.subr.bf16.mxu0 %v1777_v0  ;;  %1589 = vmatprep.subr.bf16.mxu1 %v1777_v0  ;;  %v1662_v11 = vld [vmem:[%s1915_s23 + $0x8] sm:$0xff]   ;;  %v1664_v13 = vld [vmem:[%s1915_s23 + $0x10] sm:$0xff]   ;;  %v1665_v14 = vld [vmem:[%s1915_s23 + $0x78] sm:$0xff]  }
  0x4d   : > { %v1666_v15 = vld [vmem:[%s1915_s23 + $0x18] sm:$0xff]   ;;  %v1667_v16 = vld [vmem:[%s1915_s23 + $0x80] sm:$0xff]   ;;  %v1669_v18 = vld [vmem:[%s1915_s23 + $0x88] sm:$0xff]  }
  0x4e   : > { %v1668_v17 = vld [vmem:[%s1915_s23 + $0x20] sm:$0xff]   ;;  %v1670_v19 = vld [vmem:[%s1915_s23 + $0x28] sm:$0xff]   ;;  %v1671_v20 = vld [vmem:[%s1915_s23 + $0x90] sm:$0xff]  }
  0x4f   : > { %1476 = vmatpush3.bf16.msra.mxu0 %v1654_v3  ;;  %1597 = vmatpush3.bf16.msra.mxu1 %v1654_v3  ;;  %v1672_v21 = vld [vmem:[%s1915_s23 + $0x30] sm:$0xff]   ;;  %v1673_v22 = vld [vmem:[%s1915_s23 + $0x98] sm:$0xff]   ;;  %v1675_v24 = vld [vmem:[%s1915_s23 + $0xa0] sm:$0xff]  }
  0x50   : > { %1477 = vmatprep.subr.bf16.mxu0 %v1777_v0  ;;  %1590 = vmatprep.subr.bf16.mxu1 %v1777_v0  ;;  %v1674_v23 = vld [vmem:[%s1915_s23 + $0x38] sm:$0xff]   ;;  %v1676_v25 = vld [vmem:[%s1915_s23 + $0x40] sm:$0xff]   ;;  %v1677_v26 = vld [vmem:[%s1915_s23 + $0xa8] sm:$0xff]  }
  0x51   : > { %v1678_v27 = vld [vmem:[%s1915_s23 + $0x48] sm:$0xff]   ;;  %v1679_v28 = vld [vmem:[%s1915_s23 + $0xb0] sm:$0xff]   ;;  %v1681_v30 = vld [vmem:[%s1915_s23 + $0xb8] sm:$0xff]  }
  0x52   : > { %v1680_v29 = vld [vmem:[%s1915_s23 + $0x50] sm:$0xff]   ;;  %v1682_v31 = vld [vmem:[%s1915_s23 + $0x58] sm:$0xff]   ;;  %v1683_v32 = vld [vmem:[%s1915_s23 + $0xc0] sm:$0xff]  }
  0x53   : > { %1478 = vmatpush3.bf16.msra.mxu0 %v1655_v4  ;;  %1598 = vmatpush3.bf16.msra.mxu1 %v1655_v4  ;;  %v1684_v33 = vld [vmem:[%s1915_s23 + $0x60] sm:$0xff]  }
  0x54   : > { %1479 = vmatprep.subr.bf16.mxu0 %v1777_v0  ;;  %1591 = vmatprep.subr.bf16.mxu1 %v1777_v0 }
  0x57   : > { %1480 = vmatpush3.bf16.msra.mxu0 %v1656_v5  ;;  %1599 = vmatpush3.bf16.msra.mxu1 %v1656_v5 }
  0x58   : > { %1481 = vmatprep.subr.bf16.mxu0 %v1777_v0  ;;  %1592 = vmatprep.subr.bf16.mxu1 %v1777_v0 }
  0x5b   : > { %1482 = vmatpush3.bf16.msra.mxu0 %v1657_v6  ;;  %1600 = vmatpush3.bf16.msra.mxu1 %v1657_v6 }
  0x5c   : > { %1483 = vmatprep.subr.bf16.mxu0 %v1777_v0  ;;  %1593 = vmatprep.subr.bf16.mxu1 %v1777_v0 }
  0x5f   : > { %1484 = vmatpush3.bf16.msra.mxu0 %v1658_v7  ;;  %1601 = vmatpush3.bf16.msra.mxu1 %v1658_v7 }
  0x60   : > { %1485 = vmatprep.subr.bf16.mxu0 %v1777_v0  ;;  %1594 = vmatprep.subr.bf16.mxu1 %v1777_v0 }
  0x63   : > { %1486 = vmatpush3.bf16.msra.mxu0 %v1659_v8  ;;  %1602 = vmatpush3.bf16.msra.mxu1 %v1659_v8 }
  0x66   : > { %1488 = vmatmul.mubr.bf16.vlgmr.msra.gmra.mrb[0].mxu0 %v1660_v9  ;;  %1540 = vmatmul.mubr.bf16.vlgmr.msra.gmra.mrb[0].mxu1 %v1661_v10 }
  0x67   : > { %1491 = vmatprep.mubr.msk.bf16.mxu0 %vm1778_vm0, %v1777_v0  ;;  %1543 = vmatprep.mubr.msk.bf16.mxu1 %vm1778_vm0, %v1777_v0 }
  0x6e   : > { %1492 = vmatmul.mubr.bf16.gmra.mrb[4].mxu0 %v1662_v11  ;;  %1544 = vmatmul.mubr.bf16.gmra.mrb[4].mxu1 %v1663_v12 }
  0x6f   : > { %1495 = vmatprep.mubr.msk.bf16.mxu0 %vm1778_vm0, %v1777_v0  ;;  %1547 = vmatprep.mubr.msk.bf16.mxu1 %vm1778_vm0, %v1777_v0 }
  0x76   : > { %1496 = vmatmul.mubr.bf16.gmra.mrb[8].mxu0 %v1664_v13  ;;  %1548 = vmatmul.mubr.bf16.gmra.mrb[8].mxu1 %v1665_v14 }
  0x77   : > { %1499 = vmatprep.mubr.msk.bf16.mxu0 %vm1778_vm0, %v1777_v0  ;;  %1551 = vmatprep.mubr.msk.bf16.mxu1 %vm1778_vm0, %v1777_v0 }
  0x7e   : > { %1500 = vmatmul.mubr.bf16.gmra.mrb[12].mxu0 %v1666_v15  ;;  %1552 = vmatmul.mubr.bf16.gmra.mrb[12].mxu1 %v1667_v16 }
  0x7f   : > { %1503 = vmatprep.mubr.msk.bf16.mxu0 %vm1778_vm0, %v1777_v0  ;;  %1555 = vmatprep.mubr.msk.bf16.mxu1 %vm1778_vm0, %v1777_v0 }
  0x86   : > { %1504 = vmatmul.mubr.bf16.gmra.mrb[16].mxu0 %v1668_v17  ;;  %1556 = vmatmul.mubr.bf16.gmra.mrb[16].mxu1 %v1669_v18 }
  0x87   : > { %1507 = vmatprep.mubr.msk.bf16.mxu0 %vm1778_vm0, %v1777_v0  ;;  %1559 = vmatprep.mubr.msk.bf16.mxu1 %vm1778_vm0, %v1777_v0 }
  0x8e   : > { %1508 = vmatmul.mubr.bf16.gmra.mrb[20].mxu0 %v1670_v19  ;;  %1560 = vmatmul.mubr.bf16.gmra.mrb[20].mxu1 %v1671_v20 }
  0x8f   : > { %1511 = vmatprep.mubr.msk.bf16.mxu0 %vm1778_vm0, %v1777_v0  ;;  %1563 = vmatprep.mubr.msk.bf16.mxu1 %vm1778_vm0, %v1777_v0 }
  0x96   : > { %1512 = vmatmul.mubr.bf16.gmra.mrb[24].mxu0 %v1672_v21  ;;  %1564 = vmatmul.mubr.bf16.gmra.mrb[24].mxu1 %v1673_v22 }
  0x97   : > { %1515 = vmatprep.mubr.msk.bf16.mxu0 %vm1778_vm0, %v1777_v0  ;;  %1567 = vmatprep.mubr.msk.bf16.mxu1 %vm1778_vm0, %v1777_v0 }
  0x9e   : > { %1516 = vmatmul.mubr.bf16.gmra.mrb[28].mxu0 %v1674_v23  ;;  %1568 = vmatmul.mubr.bf16.gmra.mrb[28].mxu1 %v1675_v24 }
  0x9f   : > { %1519 = vmatprep.mubr.msk.bf16.mxu0 %vm1778_vm0, %v1777_v0  ;;  %1571 = vmatprep.mubr.msk.bf16.mxu1 %vm1778_vm0, %v1777_v0 }
  0xa6   : > { %1520 = vmatmul.mubr.bf16.gmra.mrb[32].mxu0 %v1676_v25  ;;  %1572 = vmatmul.mubr.bf16.gmra.mrb[32].mxu1 %v1677_v26 }
  0xa7   : > { %1523 = vmatprep.mubr.msk.bf16.mxu0 %vm1778_vm0, %v1777_v0  ;;  %1575 = vmatprep.mubr.msk.bf16.mxu1 %vm1778_vm0, %v1777_v0 }
  0xae   : > { %1524 = vmatmul.mubr.bf16.gmra.mrb[36].mxu0 %v1678_v27  ;;  %1576 = vmatmul.mubr.bf16.gmra.mrb[36].mxu1 %v1679_v28 }
  0xaf   : > { %1527 = vmatprep.mubr.msk.bf16.mxu0 %vm1778_vm0, %v1777_v0  ;;  %1579 = vmatprep.mubr.msk.bf16.mxu1 %vm1778_vm0, %v1777_v0 }
  0xb6   : > { %1528 = vmatmul.mubr.bf16.gmra.mrb[40].mxu0 %v1680_v29  ;;  %1580 = vmatmul.mubr.bf16.gmra.mrb[40].mxu1 %v1681_v30 }
  0xb7   : > { %1531 = vmatprep.mubr.msk.bf16.mxu0 %vm1778_vm0, %v1777_v0  ;;  %1583 = vmatprep.mubr.msk.bf16.mxu1 %vm1778_vm0, %v1777_v0 }
  0xbe   : > { %1532 = vmatmul.mubr.bf16.gmra.mrb[44].mxu0 %v1682_v31  ;;  %1584 = vmatmul.mubr.bf16.gmra.mrb[44].mxu1 %v1683_v32 }
  0xbf   : > { %1535 = vmatprep.mubr.msk.bf16.mxu0 %vm1778_vm0, %v1777_v0 }
  0xc6   : > { %1536 = vmatmul.mubr.bf16.gmra.mrb[48].mxu0 %v1684_v33 }
 0x139   : > { %v542_v35 = vpop.f32.mrb[0].mxu0  ;;  %v646_v36 = vpop.f32.mrb[0].mxu1 }
 0x13a   : > { %v543_v37 = vadd.f32 %v1998_v34, %v542_v35  ;;  %v1489_v38 = vpop.f32.mrb[1].mxu0  ;;  %v647_v39 = vadd.f32 %v1998_v34, %v646_v36  ;;  %v1541_v40 = vpop.f32.mrb[1].mxu1 }
 0x13b   : > { %v545_v41 = vpop.f32.mrb[2].mxu0  ;;  %v649_v42 = vpop.f32.mrb[2].mxu1 }
 0x13c   : > { %v546_v43 = vadd.f32 %v1998_v34, %v545_v41  ;;  %v1490_v44 = vpop.f32.mrb[3].mxu0  ;;  %v767_v45 = vmax.f32 %v647_v39, 0.0  ;;  %v650_v46 = vadd.f32 %v1998_v34, %v649_v42  ;;  %v1542_v47 = vpop.f32.mrb[3].mxu1  ;;  %v741_v48 = vmax.f32 %v543_v37, 0.0 }
 0x13e   : > { %v742_v49 = vmax.f32 %v546_v43, 0.0  ;;  %v768_v50 = vmax.f32 %v650_v46, 0.0 }
 0x140   : > { %v1292_v51 = vpack.c.bf16 %v742_v49, %v741_v48  ;;  %v1357_v52 = vpack.c.bf16 %v768_v50, %v767_v45 }
 0x141   : > { %v550_v53 = vpop.f32.mrb[4].mxu0  ;;  %v654_v54 = vpop.f32.mrb[4].mxu1 }
 0x142   : > { %1293 = vst [vmem:[%s2009_s30] sm:$0xff] %v1292_v51   ;;  %1426 = vst [vmem:[%s2009_s30 + $0x68] sm:$0xff] %v1357_v52   ;;  %v551_v55 = vadd.f32 %v1998_v34, %v550_v53  ;;  %v1493_v56 = vpop.f32.mrb[5].mxu0  ;;  %v655_v57 = vadd.f32 %v1998_v34, %v654_v54  ;;  %v1545_v58 = vpop.f32.mrb[5].mxu1 }
 0x143   : > { %v553_v59 = vpop.f32.mrb[6].mxu0  ;;  %v657_v60 = vpop.f32.mrb[6].mxu1 }
 0x144   : > { %v554_v61 = vadd.f32 %v1998_v34, %v553_v59  ;;  %v1494_v62 = vpop.f32.mrb[7].mxu0  ;;  %v769_v63 = vmax.f32 %v655_v57, 0.0  ;;  %v658_v0 = vadd.f32 %v1998_v34, %v657_v60  ;;  %v1546_v1 = vpop.f32.mrb[7].mxu1  ;;  %v743_v2 = vmax.f32 %v551_v55, 0.0 }
 0x146   : > { %v744_v3 = vmax.f32 %v554_v61, 0.0  ;;  %v770_v4 = vmax.f32 %v658_v0, 0.0 }
 0x148   : > { %v1297_v5 = vpack.c.bf16 %v744_v3, %v743_v2  ;;  %v1362_v6 = vpack.c.bf16 %v770_v4, %v769_v63 }
 0x149   : > { %v558_v7 = vpop.f32.mrb[8].mxu0  ;;  %v662_v8 = vpop.f32.mrb[8].mxu1 }
 0x14a   : > { %1414 = vst [vmem:[%s2009_s30 + $0x8] sm:$0xff] %v1297_v5   ;;  %1427 = vst [vmem:[%s2009_s30 + $0x70] sm:$0xff] %v1362_v6   ;;  %v559_v9 = vadd.f32 %v1998_v34, %v558_v7  ;;  %v1497_v10 = vpop.f32.mrb[9].mxu0  ;;  %v663_v11 = vadd.f32 %v1998_v34, %v662_v8  ;;  %v1549_v12 = vpop.f32.mrb[9].mxu1 }
 0x14b   : > { %v561_v13 = vpop.f32.mrb[10].mxu0  ;;  %v665_v14 = vpop.f32.mrb[10].mxu1 }
 0x14c   : > { %v562_v15 = vadd.f32 %v1998_v34, %v561_v13  ;;  %v1498_v16 = vpop.f32.mrb[11].mxu0  ;;  %v771_v17 = vmax.f32 %v663_v11, 0.0  ;;  %v666_v18 = vadd.f32 %v1998_v34, %v665_v14  ;;  %v1550_v19 = vpop.f32.mrb[11].mxu1  ;;  %v745_v20 = vmax.f32 %v559_v9, 0.0 }
 0x14e   : > { %v746_v21 = vmax.f32 %v562_v15, 0.0  ;;  %v772_v22 = vmax.f32 %v666_v18, 0.0 }
 0x150   : > { %v1302_v23 = vpack.c.bf16 %v746_v21, %v745_v20  ;;  %v1367_v24 = vpack.c.bf16 %v772_v22, %v771_v17 }
 0x151   : > { %v566_v25 = vpop.f32.mrb[12].mxu0  ;;  %v670_v26 = vpop.f32.mrb[12].mxu1 }
 0x152   : > { %1415 = vst [vmem:[%s2009_s30 + $0x10] sm:$0xff] %v1302_v23   ;;  %1428 = vst [vmem:[%s2009_s30 + $0x78] sm:$0xff] %v1367_v24   ;;  %v567_v27 = vadd.f32 %v1998_v34, %v566_v25  ;;  %v1501_v28 = vpop.f32.mrb[13].mxu0  ;;  %v671_v29 = vadd.f32 %v1998_v34, %v670_v26  ;;  %v1553_v30 = vpop.f32.mrb[13].mxu1 }
 0x153   : > { %v569_v31 = vpop.f32.mrb[14].mxu0  ;;  %v673_v32 = vpop.f32.mrb[14].mxu1 }
 0x154   : > { %v570_v33 = vadd.f32 %v1998_v34, %v569_v31  ;;  %v1502_v35 = vpop.f32.mrb[15].mxu0  ;;  %v773_v36 = vmax.f32 %v671_v29, 0.0  ;;  %v674_v37 = vadd.f32 %v1998_v34, %v673_v32  ;;  %v1554_v38 = vpop.f32.mrb[15].mxu1  ;;  %v747_v39 = vmax.f32 %v567_v27, 0.0 }
 0x156   : > { %v748_v40 = vmax.f32 %v570_v33, 0.0  ;;  %v774_v41 = vmax.f32 %v674_v37, 0.0 }
 0x158   : > { %v1307_v42 = vpack.c.bf16 %v748_v40, %v747_v39  ;;  %v1372_v43 = vpack.c.bf16 %v774_v41, %v773_v36 }
 0x159   : > { %v574_v44 = vpop.f32.mrb[16].mxu0  ;;  %v678_v45 = vpop.f32.mrb[16].mxu1 }
 0x15a   : > { %1416 = vst [vmem:[%s2009_s30 + $0x18] sm:$0xff] %v1307_v42   ;;  %1429 = vst [vmem:[%s2009_s30 + $0x80] sm:$0xff] %v1372_v43   ;;  %v575_v46 = vadd.f32 %v1998_v34, %v574_v44  ;;  %v1505_v47 = vpop.f32.mrb[17].mxu0  ;;  %v679_v48 = vadd.f32 %v1998_v34, %v678_v45  ;;  %v1557_v49 = vpop.f32.mrb[17].mxu1 }
 0x15b   : > { %v577_v50 = vpop.f32.mrb[18].mxu0  ;;  %v681_v51 = vpop.f32.mrb[18].mxu1 }
 0x15c   : > { %v578_v52 = vadd.f32 %v1998_v34, %v577_v50  ;;  %v1506_v53 = vpop.f32.mrb[19].mxu0  ;;  %v775_v54 = vmax.f32 %v679_v48, 0.0  ;;  %v682_v55 = vadd.f32 %v1998_v34, %v681_v51  ;;  %v1558_v56 = vpop.f32.mrb[19].mxu1  ;;  %v749_v57 = vmax.f32 %v575_v46, 0.0 }
 0x15e   : > { %v750_v58 = vmax.f32 %v578_v52, 0.0  ;;  %v776_v59 = vmax.f32 %v682_v55, 0.0 }
 0x160   : > { %v1312_v60 = vpack.c.bf16 %v750_v58, %v749_v57  ;;  %v1377_v61 = vpack.c.bf16 %v776_v59, %v775_v54 }
 0x161   : > { %v582_v62 = vpop.f32.mrb[20].mxu0  ;;  %v686_v63 = vpop.f32.mrb[20].mxu1 }
 0x162   : > { %1417 = vst [vmem:[%s2009_s30 + $0x20] sm:$0xff] %v1312_v60   ;;  %1430 = vst [vmem:[%s2009_s30 + $0x88] sm:$0xff] %v1377_v61   ;;  %v583_v0 = vadd.f32 %v1998_v34, %v582_v62  ;;  %v1509_v1 = vpop.f32.mrb[21].mxu0  ;;  %v687_v2 = vadd.f32 %v1998_v34, %v686_v63  ;;  %v1561_v3 = vpop.f32.mrb[21].mxu1 }
 0x163   : > { %v585_v4 = vpop.f32.mrb[22].mxu0  ;;  %v689_v5 = vpop.f32.mrb[22].mxu1 }
 0x164   : > { %v586_v6 = vadd.f32 %v1998_v34, %v585_v4  ;;  %v1510_v7 = vpop.f32.mrb[23].mxu0  ;;  %v777_v8 = vmax.f32 %v687_v2, 0.0  ;;  %v690_v9 = vadd.f32 %v1998_v34, %v689_v5  ;;  %v1562_v10 = vpop.f32.mrb[23].mxu1  ;;  %v751_v11 = vmax.f32 %v583_v0, 0.0 }
 0x166   : > { %v752_v12 = vmax.f32 %v586_v6, 0.0  ;;  %v778_v13 = vmax.f32 %v690_v9, 0.0 }
 0x168   : > { %v1317_v14 = vpack.c.bf16 %v752_v12, %v751_v11  ;;  %v1382_v15 = vpack.c.bf16 %v778_v13, %v777_v8 }
 0x169   : > { %v590_v16 = vpop.f32.mrb[24].mxu0  ;;  %v694_v17 = vpop.f32.mrb[24].mxu1 }
 0x16a   : > { %1418 = vst [vmem:[%s2009_s30 + $0x28] sm:$0xff] %v1317_v14   ;;  %1431 = vst [vmem:[%s2009_s30 + $0x90] sm:$0xff] %v1382_v15   ;;  %v591_v18 = vadd.f32 %v1998_v34, %v590_v16  ;;  %v1513_v19 = vpop.f32.mrb[25].mxu0  ;;  %v695_v20 = vadd.f32 %v1998_v34, %v694_v17  ;;  %v1565_v21 = vpop.f32.mrb[25].mxu1 }
 0x16b   : > { %v593_v22 = vpop.f32.mrb[26].mxu0  ;;  %v697_v23 = vpop.f32.mrb[26].mxu1 }
 0x16c   : > { %v594_v24 = vadd.f32 %v1998_v34, %v593_v22  ;;  %v1514_v25 = vpop.f32.mrb[27].mxu0  ;;  %v779_v26 = vmax.f32 %v695_v20, 0.0  ;;  %v698_v27 = vadd.f32 %v1998_v34, %v697_v23  ;;  %v1566_v28 = vpop.f32.mrb[27].mxu1  ;;  %v753_v29 = vmax.f32 %v591_v18, 0.0 }
 0x16e   : > { %v754_v30 = vmax.f32 %v594_v24, 0.0  ;;  %v780_v31 = vmax.f32 %v698_v27, 0.0 }
 0x170   : > { %v1322_v32 = vpack.c.bf16 %v754_v30, %v753_v29  ;;  %v1387_v33 = vpack.c.bf16 %v780_v31, %v779_v26 }
 0x171   : > { %v598_v35 = vpop.f32.mrb[28].mxu0  ;;  %v702_v36 = vpop.f32.mrb[28].mxu1 }
 0x172   : > { %1419 = vst [vmem:[%s2009_s30 + $0x30] sm:$0xff] %v1322_v32   ;;  %1432 = vst [vmem:[%s2009_s30 + $0x98] sm:$0xff] %v1387_v33   ;;  %v599_v37 = vadd.f32 %v1998_v34, %v598_v35  ;;  %v1517_v38 = vpop.f32.mrb[29].mxu0  ;;  %v703_v39 = vadd.f32 %v1998_v34, %v702_v36  ;;  %v1569_v40 = vpop.f32.mrb[29].mxu1 }
 0x173   : > { %v601_v41 = vpop.f32.mrb[30].mxu0  ;;  %v705_v42 = vpop.f32.mrb[30].mxu1 }
 0x174   : > { %v602_v43 = vadd.f32 %v1998_v34, %v601_v41  ;;  %v1518_v44 = vpop.f32.mrb[31].mxu0  ;;  %v781_v45 = vmax.f32 %v703_v39, 0.0  ;;  %v706_v46 = vadd.f32 %v1998_v34, %v705_v42  ;;  %v1570_v47 = vpop.f32.mrb[31].mxu1  ;;  %v755_v48 = vmax.f32 %v599_v37, 0.0 }
 0x176   : > { %v756_v49 = vmax.f32 %v602_v43, 0.0  ;;  %v782_v50 = vmax.f32 %v706_v46, 0.0 }
 0x178   : > { %v1327_v51 = vpack.c.bf16 %v756_v49, %v755_v48  ;;  %v1392_v52 = vpack.c.bf16 %v782_v50, %v781_v45 }
 0x179   : > { %v606_v53 = vpop.f32.mrb[32].mxu0  ;;  %v710_v54 = vpop.f32.mrb[32].mxu1 }
 0x17a   : > { %1420 = vst [vmem:[%s2009_s30 + $0x38] sm:$0xff] %v1327_v51   ;;  %1433 = vst [vmem:[%s2009_s30 + $0xa0] sm:$0xff] %v1392_v52   ;;  %v607_v55 = vadd.f32 %v1998_v34, %v606_v53  ;;  %v1521_v56 = vpop.f32.mrb[33].mxu0  ;;  %v711_v57 = vadd.f32 %v1998_v34, %v710_v54  ;;  %v1573_v58 = vpop.f32.mrb[33].mxu1 }
 0x17b   : > { %v609_v59 = vpop.f32.mrb[34].mxu0  ;;  %v713_v60 = vpop.f32.mrb[34].mxu1 }
 0x17c   : > { %v610_v61 = vadd.f32 %v1998_v34, %v609_v59  ;;  %v1522_v62 = vpop.f32.mrb[35].mxu0  ;;  %v783_v63 = vmax.f32 %v711_v57, 0.0  ;;  %v714_v0 = vadd.f32 %v1998_v34, %v713_v60  ;;  %v1574_v1 = vpop.f32.mrb[35].mxu1  ;;  %v757_v2 = vmax.f32 %v607_v55, 0.0 }
 0x17e   : > { %v758_v3 = vmax.f32 %v610_v61, 0.0  ;;  %v784_v4 = vmax.f32 %v714_v0, 0.0 }
 0x180   : > { %v1332_v5 = vpack.c.bf16 %v758_v3, %v757_v2  ;;  %v1397_v6 = vpack.c.bf16 %v784_v4, %v783_v63 }
 0x181   : > { %v614_v7 = vpop.f32.mrb[36].mxu0  ;;  %v718_v8 = vpop.f32.mrb[36].mxu1 }
 0x182   : > { %1421 = vst [vmem:[%s2009_s30 + $0x40] sm:$0xff] %v1332_v5   ;;  %1434 = vst [vmem:[%s2009_s30 + $0xa8] sm:$0xff] %v1397_v6   ;;  %v615_v9 = vadd.f32 %v1998_v34, %v614_v7  ;;  %v1525_v10 = vpop.f32.mrb[37].mxu0  ;;  %v719_v11 = vadd.f32 %v1998_v34, %v718_v8  ;;  %v1577_v12 = vpop.f32.mrb[37].mxu1 }
 0x183   : > { %v617_v13 = vpop.f32.mrb[38].mxu0  ;;  %v721_v14 = vpop.f32.mrb[38].mxu1 }
 0x184   : > { %v618_v15 = vadd.f32 %v1998_v34, %v617_v13  ;;  %v1526_v16 = vpop.f32.mrb[39].mxu0  ;;  %v785_v17 = vmax.f32 %v719_v11, 0.0  ;;  %v722_v18 = vadd.f32 %v1998_v34, %v721_v14  ;;  %v1578_v19 = vpop.f32.mrb[39].mxu1  ;;  %v759_v20 = vmax.f32 %v615_v9, 0.0 }
 0x186   : > { %v760_v21 = vmax.f32 %v618_v15, 0.0  ;;  %v786_v22 = vmax.f32 %v722_v18, 0.0 }
 0x188   : > { %v1337_v23 = vpack.c.bf16 %v760_v21, %v759_v20  ;;  %v1402_v24 = vpack.c.bf16 %v786_v22, %v785_v17 }
 0x189   : > { %v622_v25 = vpop.f32.mrb[40].mxu0  ;;  %v726_v26 = vpop.f32.mrb[40].mxu1 }
 0x18a   : > { %1422 = vst [vmem:[%s2009_s30 + $0x48] sm:$0xff] %v1337_v23   ;;  %1435 = vst [vmem:[%s2009_s30 + $0xb0] sm:$0xff] %v1402_v24   ;;  %v623_v27 = vadd.f32 %v1998_v34, %v622_v25  ;;  %v1529_v28 = vpop.f32.mrb[41].mxu0  ;;  %v727_v29 = vadd.f32 %v1998_v34, %v726_v26  ;;  %v1581_v30 = vpop.f32.mrb[41].mxu1 }
 0x18b   : > { %v625_v31 = vpop.f32.mrb[42].mxu0  ;;  %v729_v32 = vpop.f32.mrb[42].mxu1 }
 0x18c   : > { %v626_v33 = vadd.f32 %v1998_v34, %v625_v31  ;;  %v1530_v35 = vpop.f32.mrb[43].mxu0  ;;  %v787_v36 = vmax.f32 %v727_v29, 0.0  ;;  %v730_v37 = vadd.f32 %v1998_v34, %v729_v32  ;;  %v1582_v38 = vpop.f32.mrb[43].mxu1  ;;  %v761_v39 = vmax.f32 %v623_v27, 0.0 }
 0x18e   : > { %v762_v40 = vmax.f32 %v626_v33, 0.0  ;;  %v788_v41 = vmax.f32 %v730_v37, 0.0 }
 0x190   : > { %v1342_v42 = vpack.c.bf16 %v762_v40, %v761_v39  ;;  %v1407_v43 = vpack.c.bf16 %v788_v41, %v787_v36 }
 0x191   : > { %v630_v44 = vpop.f32.mrb[44].mxu0  ;;  %v734_v45 = vpop.f32.mrb[44].mxu1 }
 0x192   : > { %1423 = vst [vmem:[%s2009_s30 + $0x50] sm:$0xff] %v1342_v42   ;;  %1436 = vst [vmem:[%s2009_s30 + $0xb8] sm:$0xff] %v1407_v43   ;;  %v631_v46 = vadd.f32 %v1998_v34, %v630_v44  ;;  %v1533_v47 = vpop.f32.mrb[45].mxu0  ;;  %v735_v48 = vadd.f32 %v1998_v34, %v734_v45  ;;  %v1585_v49 = vpop.f32.mrb[45].mxu1 }
 0x193   : > { %v633_v50 = vpop.f32.mrb[46].mxu0  ;;  %v737_v51 = vpop.f32.mrb[46].mxu1 }
 0x194   : > { %v634_v52 = vadd.f32 %v1998_v34, %v633_v50  ;;  %v1534_v53 = vpop.f32.mrb[47].mxu0  ;;  %v789_v54 = vmax.f32 %v735_v48, 0.0  ;;  %v738_v55 = vadd.f32 %v1998_v34, %v737_v51  ;;  %v1586_v56 = vpop.f32.mrb[47].mxu1  ;;  %v763_v57 = vmax.f32 %v631_v46, 0.0 }
 0x196   : > { %v764_v58 = vmax.f32 %v634_v52, 0.0  ;;  %v790_v59 = vmax.f32 %v738_v55, 0.0 }
 0x198   : > { %v1347_v60 = vpack.c.bf16 %v764_v58, %v763_v57  ;;  %v1412_v61 = vpack.c.bf16 %v790_v59, %v789_v54 }
 0x199   : > { %v638_v62 = vpop.f32.mrb[48].mxu0 }
 0x19a   : > { %1424 = vst [vmem:[%s2009_s30 + $0x58] sm:$0xff] %v1347_v60   ;;  %1437 = vst [vmem:[%s2009_s30 + $0xc0] sm:$0xff] %v1412_v61   ;;  %v639_v63 = vadd.f32 %v1998_v34, %v638_v62  ;;  %v1537_v0 = vpop.f32.mrb[49].mxu0 }
 0x19b   : > { %v641_v1 = vpop.f32.mrb[50].mxu0 }
 0x19c   : > { %v642_v2 = vadd.f32 %v1998_v34, %v641_v1  ;;  %v1538_v3 = vpop.f32.mrb[51].mxu0  ;;  %v765_v4 = vmax.f32 %v639_v63, 0.0 }
 0x19e   : > { %v766_v5 = vmax.f32 %v642_v2, 0.0 }
 0x1a0   : > { %v1352_v6 = vpack.c.bf16 %v766_v5, %v765_v4 }
 0x1a2   : > { %1425 = vst [vmem:[%s2009_s30 + $0x60] sm:$0xff] %v1352_v6  }
 0x1a3 PF: > { %s15_s14 = sadd.s32 1, %s1771_s14   ;;  %s2103_s12 = smov %s1767_s13 }
 0x1a4   : > { %p12_p3 = scmp.ge.s32.totalorder %s15_s14, 4   ;;  %s2104_s13 = smov %s2106_s16 }
 0x1a6   :  { %14 = sbr.rel (!%p12_p3) target bundleno = 3 (0x3), region = 73 }
 0x1ad   :  { %1069 = vsyncpa [#allocation3], 1 }
 0x1ae   :  { %1071 = vsyncpa [#allocation3 + $0x1], 1 }
 0x1af   :  { %1072 = vsyncpa [#allocation5], 1 }

// kernel: forward.8
= control target key start
LH: loop header
LB: loop body
LE: loop exit
PB: predicated region body
PF: predicated region fallthrough
CT: control target
= control target key end

     0   :  { %8 = vsyncpa [#allocation3], 0  ;;  %s3054_s0 = inlined_call_operand.vmem [shape: bf16[800,384], index: 0, kind: input, shape index: {}]   ;;  %s3055_s1 = inlined_call_operand.hbm [shape: bf16[384,128], index: 1, kind: input, shape index: {}]   ;;  %s3056_s2 = inlined_call_operand.hbm [shape: f32[1,128], index: 2, kind: input, shape index: {}]   ;;  %s3057_s3 = inlined_call_operand.vmem [shape: bf16[800,128], index: 3, kind: output, shape index: {}]  }
   0x1   :  { %9 = vsyncpa [#allocation5], 0  ;;  %s2707_s12 = smov 0   ;;  %s2709_s13 = smov 0  }
   0x2   :  { %s2711_s14 = smov 0  }
   0x3 LB: > { %s1806_s15 = sadd.s32 4294967295, %s2678_s14   ;;  %s27_s16 = sadd.s32 1, %s2674_s13  ;;  %s2678_s14 = sphi %s2711_s14, %s15_s14   ;;  %s2674_s13 = sphi %s2709_s13, %s3067_s13   ;;  %s2670_s12 = sphi %s2707_s12, %s3066_s12  }
   0x4   : > { %p29_p0 = scmp.ge.s32.totalorder %s27_s16, 2  ;;  %p1808_p1 = scmp.ge.s32.totalorder %s2678_s14, 1 }
   0x5   : > { %p138_p2 = scmp.lt.s32.totalorder %s2678_s14, 3  ;;  %p2732_p4 = scmp.eq.s32.totalorder %s1806_s15, 0 }
   0x6   : > { %s3069_s16 = smov (%p29_p0, %s27_s16), 0  ;;  %s2680_s19 = smov [#allocation2]  }
   0x7   : > { %p2728_p3 = pnand %p1808_p1, %p138_p2  ;;  %s152_s20 = sshll.u32 %s2680_s19, 4  ;;  %s153_s20 = int_to_ptr.vmem [resolvable:$true] %s152_s20 }
   0x8   : > { %s3062_s18 = scalar_select %p2732_p4, 1, 0 }
   0x9   : > { %s3061_s17 = scalar_select %p2728_p3, 1, 0 }
   0xa   : > { %p2426_p5 = pneg %p2728_p3  ;;  %s2681_s22 = smov [#allocation4]  }
   0xb   : > { %s168_s23 = sshll.u32 %s2681_s22, 4  ;;  %s2592_s26 = scalar_lea.hbm %s3055_s1, 3072  ;;  %s2744_s23 = int_to_ptr.vmem [resolvable:$true] %s168_s23 }
   0xc   : > { %p2740_p6 = pnand %p2732_p4, %p2426_p5  ;;  %p2593_p7 = scmp.ne.s32.totalorder %s3055_s1, %s2592_s26 }
   0xd   : > { %p2599_p11 = scmp.lt.u32.totalorder %s2592_s26, %s3055_s1 }
   0xe   : > { %p2594_p8 = pneg %p2740_p6 }
  0x10   : > { %p2595_p9 = pnand %p2594_p8, %p2593_p7 }
  0x12   : > { %p2596_p10 = pneg %p2595_p9 }
  0x14   : > { %p2601_p12 = pnand %p2599_p11, %p2596_p10 }
  0x16   : > { %2604 = shalt.err (!%p2601_p12)
}
  0x17   : > { %s2605_s4 = scalar_lea.vmem %s153_s20, 3072  ;;  %p2613_p2 = scmp.lt.s32.totalorder %s153_s20, %s153_s20 }
  0x18   : > { %p2606_p13 = scmp.ne.s32.totalorder %s153_s20, %s2605_s4  ;;  %p2614_p5 = scmp.lt.s32.totalorder %s2605_s4, %s2605_s4 }
  0x1a   : > { %p2608_p0 = pnand %p2606_p13, %p2594_p8  ;;  %p2615_p4 = por %p2614_p5, %p2613_p2 }
  0x1c   : > { %p2609_p1 = pneg %p2608_p0 }
  0x1e   : > { %p2616_p3 = pnand %p2615_p4, %p2609_p1 }
  0x20   : > { %2619 = shalt.err (!%p2616_p3)
}
  0x21   : > { %s2682_s5 = smov 64   ;;  %s2683_s6 = smov 4  }
  0x22   : > { %2429 = dma.hbm_to_vmem [thread:$0]  (!%p2740_p6), %s3055_s1, 3072, %s153_s20, [#allocation3], %s2682_s5, %s2682_s5, %s2683_s6  }
  0x23   : > { %s2620_s11 = scalar_lea.hbm %s3056_s2, 16 }
  0x24   : > { %p2621_p7 = scmp.ne.s32.totalorder %s3056_s2, %s2620_s11  ;;  %p2627_p9 = scmp.lt.u32.totalorder %s2620_s11, %s3056_s2 }
  0x26   : > { %p2623_p3 = pnand %p2621_p7, %p2594_p8 }
  0x28   : > { %p2624_p4 = pneg %p2623_p3 }
  0x2a   : > { %p2629_p10 = pnand %p2627_p9, %p2624_p4 }
  0x2c   : > { %2632 = shalt.err (!%p2629_p10)
}
  0x2d   : > { %s2633_s20 = scalar_lea.vmem %s2744_s23, 16  ;;  %s2640_s25 = scalar_lea.vmem %s2744_s23, 32 }
  0x2e   : > { %p2634_p11 = scmp.ne.s32.totalorder %s2744_s23, %s2633_s20  ;;  %p2641_p0 = scmp.lt.s32.totalorder %s2744_s23, %s2744_s23 }
  0x2f   : > { %p2642_p1 = scmp.lt.s32.totalorder %s2640_s25, %s2633_s20 }
  0x30   : > { %p2636_p12 = pnand %p2634_p11, %p2594_p8 }
  0x31   : > { %p2643_p2 = por %p2642_p1, %p2641_p0 }
  0x32   : > { %p2637_p13 = pneg %p2636_p12 }
  0x34   : > { %p2644_p5 = pnand %p2643_p2, %p2637_p13 }
  0x36   : > { %2647 = shalt.err (!%p2644_p5)
}
  0x37   : > { %2432 = dma.hbm_to_vmem [thread:$0]  (!%p2740_p6), %s3056_s2, 16, %s2744_s23, [#allocation5]  }
  0x38   : > { %p3064_p7 = scmp.ne.s32.totalorder %s3061_s17, 0 }
  0x39   : > { %p3065_p8 = scmp.ne.s32.totalorder (!%p3064_p7), %s3062_s18, 0 }
  0x3a   : > { %191 = sbr.rel (%p3064_p7) target bundleno = 548 (0x224), region = 32 }
  0x41   : > { %2661 = dma.done.wait (%p3065_p8), [#allocation3], 3072  }
  0x42   : > { %2663 = vsyncadd (%p3065_p8), [#allocation3], 4294964224 }
  0x43   : > { %2665 = dma.done.wait (%p3065_p8), [#allocation5], 16  }
  0x44   : > { %2667 = vsyncadd (%p3065_p8), [#allocation5], 4294967280  ;;  %v2684_v0 = vmov 0   ;;  %v2685_v1 = vmov 0.0   ;;  %vm2686_vm0 = vmmov 0   ;;  %v2468_v2 = vld [vmem:[#allocation2] sm:$0xff]  }
  0x45   : > { %939 = vmatprep.subr.bf16.mxu1 %v2684_v0  ;;  %2201 = vmatprep.subr.bf16.mxu0 %v2685_v1  ;;  %v2469_v3 = vld [vmem:[#allocation2 + $0x8] sm:$0xff]   ;;  %v2470_v4 = vld [vmem:[#allocation2 + $0x10] sm:$0xff]   ;;  %s223_s17 = smul.u32 50, %s2670_s12  ;;  %v2476_v5 = vld [vmem:[#allocation2 + $0x80] sm:$0xff]  }
  0x46   : > { %2217 = vmatprep.mubr.msk.bf16.mxu0 %vm2686_vm0, %v2685_v1  ;;  %940 = vmatpush1.bf16.msra.mxu1 %v2468_v2  ;;  %v2471_v6 = vld [vmem:[#allocation2 + $0x18] sm:$0xff]   ;;  %v2478_v7 = vld [vmem:[#allocation2 + $0x88] sm:$0xff]   ;;  %v2472_v8 = vld [vmem:[#allocation2 + $0x20] sm:$0xff]  }
  0x47   : > { %941 = vmatprep.subr.bf16.mxu1 %v2684_v0  ;;  %2202 = vmatpush3.bf16.msra.mxu0 %v2476_v5  ;;  %p224_p6 = scmp.lt.s32.totalorder %s223_s17, 99  ;;  %v2480_v9 = vld [vmem:[#allocation2 + $0x90] sm:$0xff]   ;;  %v2473_v10 = vld [vmem:[#allocation2 + $0x28] sm:$0xff]   ;;  %v2482_v11 = vld [vmem:[#allocation2 + $0x98] sm:$0xff]  }
  0x48   : > { %2203 = vmatprep.subr.bf16.mxu0 %v2685_v1  ;;  %v2474_v12 = vld [vmem:[#allocation2 + $0x30] sm:$0xff]   ;;  %v2484_v13 = vld [vmem:[#allocation2 + $0xa0] sm:$0xff]   ;;  %v2475_v14 = vld [vmem:[#allocation2 + $0x38] sm:$0xff]  }
  0x49   : > { %s3071_s17 = smov (!%p224_p6, %s223_s17), 99  ;;  %v2486_v16 = vld [vmem:[#allocation2 + $0xa8] sm:$0xff]   ;;  %v2477_v17 = vld [vmem:[#allocation2 + $0x40] sm:$0xff]   ;;  %v2488_v18 = vld [vmem:[#allocation2 + $0xb0] sm:$0xff]  }
  0x4a   : > { %942 = vmatpush1.bf16.msra.mxu1 %v2469_v3  ;;  %s2417_s12 = smul.u32 12, %s3071_s17  ;;  %v2479_v19 = vld [vmem:[#allocation2 + $0x48] sm:$0xff]   ;;  %v2490_v20 = vld [vmem:[#allocation2 + $0xb8] sm:$0xff]   ;;  %v2481_v22 = vld [vmem:[#allocation2 + $0x50] sm:$0xff]   ;;  %s1816_s28 = sshll.u32 %s3071_s17, 2 }
  0x4b   : > { %943 = vmatprep.subr.bf16.mxu1 %v2684_v0  ;;  %2204 = vmatpush3.bf16.msra.mxu0 %v2478_v7  ;;  %v2483_v23 = vld [vmem:[#allocation2 + $0x58] sm:$0xff]   ;;  %v2485_v25 = vld [vmem:[#allocation2 + $0x60] sm:$0xff]   ;;  %v2487_v26 = vld [vmem:[#allocation2 + $0x68] sm:$0xff]   ;;  %s2970_s4 = scalar_lea.vmem %s3057_s3, %s1816_s28 }
  0x4c   : > { %2205 = vmatprep.subr.bf16.mxu0 %v2685_v1  ;;  %s2823_s23 = scalar_lea.vmem %s3054_s0, %s2417_s12  ;;  %v2489_v28 = vld [vmem:[#allocation2 + $0x70] sm:$0xff]   ;;  %v2491_v29 = vld [vmem:[#allocation2 + $0x78] sm:$0xff]  }
  0x4d   : > { %v2494_v15 = vld [vmem:[%s2823_s23 + $0x4] ss:$12 sps:$4 sm:$0xff]   ;;  %v2495_v21 = vld [vmem:[%s2823_s23 + $0x8] ss:$12 sps:$4 sm:$0xff]   ;;  %v2498_v24 = vld [vmem:[%s2823_s23 + $0x20] ss:$12 sps:$4 sm:$0xff]  }
  0x4e   : > { %944 = vmatpush1.bf16.msra.mxu1 %v2470_v4  ;;  %971 = vmatprep.mubr.bf16.mxu1 %v2494_v15  ;;  %v2502_v27 = vld [vmem:[%s2823_s23 + $0x38] ss:$12 sps:$4 sm:$0xff]   ;;  %v2492_v30 = vld [vmem:[%s2823_s23] ss:$12 sps:$4 sm:$0xff]   ;;  %v2506_v31 = vld [vmem:[%s2823_s23 + $0x50] ss:$12 sps:$4 sm:$0xff]  }
  0x4f   : > { %945 = vmatprep.subr.bf16.mxu1 %v2684_v0  ;;  %2206 = vmatpush3.bf16.msra.mxu0 %v2480_v9  ;;  %v2496_v32 = vld [vmem:[%s2823_s23 + $0x1c] ss:$12 sps:$4 sm:$0xff]   ;;  %v2499_v33 = vld [vmem:[%s2823_s23 + $0x18] ss:$12 sps:$4 sm:$0xff]   ;;  %v2500_v35 = vld [vmem:[%s2823_s23 + $0x34] ss:$12 sps:$4 sm:$0xff]  }
  0x50   : > { %2207 = vmatprep.subr.bf16.mxu0 %v2685_v1  ;;  %v2510_v34 = vld [vmem:[%s2823_s23 + $0x68] ss:$12 sps:$4 sm:$0xff]   ;;  %v2503_v36 = vld [vmem:[%s2823_s23 + $0x30] ss:$12 sps:$4 sm:$0xff]   ;;  %v2514_v37 = vld [vmem:[%s2823_s23 + $0x80] ss:$12 sps:$4 sm:$0xff]  }
  0x51   : > { %v2504_v38 = vld [vmem:[%s2823_s23 + $0x4c] ss:$12 sps:$4 sm:$0xff]   ;;  %v2507_v39 = vld [vmem:[%s2823_s23 + $0x48] ss:$12 sps:$4 sm:$0xff]   ;;  %v2508_v41 = vld [vmem:[%s2823_s23 + $0x64] ss:$12 sps:$4 sm:$0xff]  }
  0x52   : > { %946 = vmatpush1.bf16.msra.mxu1 %v2471_v6  ;;  %v2518_v40 = vld [vmem:[%s2823_s23 + $0x98] ss:$12 sps:$4 sm:$0xff]   ;;  %v2511_v42 = vld [vmem:[%s2823_s23 + $0x60] ss:$12 sps:$4 sm:$0xff]   ;;  %v2522_v43 = vld [vmem:[%s2823_s23 + $0xb0] ss:$12 sps:$4 sm:$0xff]  }
  0x53   : > { %947 = vmatprep.subr.bf16.mxu1 %v2684_v0  ;;  %2208 = vmatpush3.bf16.msra.mxu0 %v2482_v11  ;;  %v2512_v44 = vld [vmem:[%s2823_s23 + $0x7c] ss:$12 sps:$4 sm:$0xff]   ;;  %v2515_v45 = vld [vmem:[%s2823_s23 + $0x78] ss:$12 sps:$4 sm:$0xff]   ;;  %v2516_v47 = vld [vmem:[%s2823_s23 + $0x94] ss:$12 sps:$4 sm:$0xff]  }
  0x54   : > { %2209 = vmatprep.subr.bf16.mxu0 %v2685_v1  ;;  %v2526_v46 = vld [vmem:[%s2823_s23 + $0xc8] ss:$12 sps:$4 sm:$0xff]   ;;  %v2519_v48 = vld [vmem:[%s2823_s23 + $0x90] ss:$12 sps:$4 sm:$0xff]   ;;  %v2530_v49 = vld [vmem:[%s2823_s23 + $0xe0] ss:$12 sps:$4 sm:$0xff]  }
  0x55   : > { %v2520_v50 = vld [vmem:[%s2823_s23 + $0xac] ss:$12 sps:$4 sm:$0xff]   ;;  %v2523_v51 = vld [vmem:[%s2823_s23 + $0xa8] ss:$12 sps:$4 sm:$0xff]   ;;  %v2524_v53 = vld [vmem:[%s2823_s23 + $0xc4] ss:$12 sps:$4 sm:$0xff]  }
  0x56   : > { %948 = vmatpush1.bf16.msra.mxu1 %v2472_v8  ;;  %v2534_v52 = vld [vmem:[%s2823_s23 + $0xf8] ss:$12 sps:$4 sm:$0xff]   ;;  %v2527_v54 = vld [vmem:[%s2823_s23 + $0xc0] ss:$12 sps:$4 sm:$0xff]   ;;  %v2538_v55 = vld [vmem:[%s2823_s23 + $0x110] ss:$12 sps:$4 sm:$0xff]  }
  0x57   : > { %949 = vmatprep.subr.bf16.mxu1 %v2684_v0  ;;  %2210 = vmatpush3.bf16.msra.mxu0 %v2484_v13  ;;  %v2528_v56 = vld [vmem:[%s2823_s23 + $0xdc] ss:$12 sps:$4 sm:$0xff]   ;;  %v2531_v57 = vld [vmem:[%s2823_s23 + $0xd8] ss:$12 sps:$4 sm:$0xff]   ;;  %v2532_v59 = vld [vmem:[%s2823_s23 + $0xf4] ss:$12 sps:$4 sm:$0xff]  }
  0x58   : > { %2211 = vmatprep.subr.bf16.mxu0 %v2685_v1  ;;  %v2542_v58 = vld [vmem:[%s2823_s23 + $0x128] ss:$12 sps:$4 sm:$0xff]   ;;  %v2535_v60 = vld [vmem:[%s2823_s23 + $0xf0] ss:$12 sps:$4 sm:$0xff]   ;;  %v2546_v61 = vld [vmem:[%s2823_s23 + $0x140] ss:$12 sps:$4 sm:$0xff]  }
  0x59   : > { %v2536_v62 = vld [vmem:[%s2823_s23 + $0x10c] ss:$12 sps:$4 sm:$0xff]   ;;  %v2539_v63 = vld [vmem:[%s2823_s23 + $0x108] ss:$12 sps:$4 sm:$0xff]   ;;  %v2540_v2 = vld [vmem:[%s2823_s23 + $0x124] ss:$12 sps:$4 sm:$0xff]  }
  0x5a   : > { %950 = vmatpush1.bf16.msra.mxu1 %v2473_v10  ;;  %v2543_v3 = vld [vmem:[%s2823_s23 + $0x120] ss:$12 sps:$4 sm:$0xff]   ;;  %v2554_v4 = vld [vmem:[%s2823_s23 + $0x170] ss:$12 sps:$4 sm:$0xff]   ;;  %v2547_v6 = vld [vmem:[%s2823_s23 + $0x138] ss:$12 sps:$4 sm:$0xff]  }
  0x5b   : > { %951 = vmatprep.subr.bf16.mxu1 %v2684_v0  ;;  %2212 = vmatpush3.bf16.msra.mxu0 %v2486_v16  ;;  %v2544_v5 = vld [vmem:[%s2823_s23 + $0x13c] ss:$12 sps:$4 sm:$0xff]   ;;  %v2548_v8 = vld [vmem:[%s2823_s23 + $0x154] ss:$12 sps:$4 sm:$0xff]   ;;  %v2552_v11 = vld [vmem:[%s2823_s23 + $0x16c] ss:$12 sps:$4 sm:$0xff]  }
  0x5c   : > { %2213 = vmatprep.subr.bf16.mxu0 %v2685_v1  ;;  %v2558_v7 = vld [vmem:[%s2823_s23 + $0x188] ss:$12 sps:$4 sm:$0xff]   ;;  %v2551_v9 = vld [vmem:[%s2823_s23 + $0x150] ss:$12 sps:$4 sm:$0xff]   ;;  %v2562_v10 = vld [vmem:[%s2823_s23 + $0x1a0] ss:$12 sps:$4 sm:$0xff]  }
  0x5d   : > { %v2566_v13 = vld [vmem:[%s2823_s23 + $0x1b8] ss:$12 sps:$4 sm:$0xff]   ;;  %v2559_v15 = vld [vmem:[%s2823_s23 + $0x180] ss:$12 sps:$4 sm:$0xff]   ;;  %v2570_v16 = vld [vmem:[%s2823_s23 + $0x1d0] ss:$12 sps:$4 sm:$0xff]  }
  0x5e   : > { %952 = vmatpush1.bf16.msra.mxu1 %v2474_v12  ;;  %v2555_v12 = vld [vmem:[%s2823_s23 + $0x168] ss:$12 sps:$4 sm:$0xff]  }
  0x5f   : > { %953 = vmatprep.subr.bf16.mxu1 %v2684_v0  ;;  %2214 = vmatpush3.bf16.msra.mxu0 %v2488_v18  ;;  %v2563_v18 = vld [vmem:[%s2823_s23 + $0x198] ss:$12 sps:$4 sm:$0xff]  }
  0x60   : > { %2215 = vmatprep.subr.bf16.mxu0 %v2685_v1 }
  0x62   : > { %954 = vmatpush1.bf16.msra.mxu1 %v2475_v14  ;;  %v2556_v14 = vld [vmem:[%s2823_s23 + $0x184] ss:$12 sps:$4 sm:$0xff]  }
  0x63   : > { %955 = vmatprep.subr.bf16.mxu1 %v2684_v0  ;;  %2216 = vmatpush3.bf16.msra.mxu0 %v2490_v20  ;;  %v2564_v20 = vld [vmem:[%s2823_s23 + $0x1b4] ss:$12 sps:$4 sm:$0xff]  }
  0x66   : > { %956 = vmatpush1.bf16.msra.mxu1 %v2477_v17  ;;  %2218 = vmatmul.mubr.bf16.vlgmr.msra.gmra.mrb[0].mxu0 %v2495_v21  ;;  %v2560_v17 = vld [vmem:[%s2823_s23 + $0x19c] ss:$12 sps:$4 sm:$0xff]  }
  0x67   : > { %957 = vmatprep.subr.bf16.mxu1 %v2684_v0  ;;  %2221 = vmatprep.mubr.msk.bf16.mxu0 %vm2686_vm0, %v2685_v1  ;;  %v2567_v21 = vld [vmem:[%s2823_s23 + $0x1b0] ss:$12 sps:$4 sm:$0xff]  }
  0x6a   : > { %958 = vmatpush1.bf16.msra.mxu1 %v2479_v19  ;;  %v2574_v19 = vld [vmem:[%s2823_s23 + $0x1e8] ss:$12 sps:$4 sm:$0xff]  }
  0x6b   : > { %959 = vmatprep.subr.bf16.mxu1 %v2684_v0 }
  0x6e   : > { %960 = vmatpush1.bf16.msra.mxu1 %v2481_v22  ;;  %2222 = vmatmul.mubr.bf16.gmra.mrb[4].mxu0 %v2498_v24  ;;  %v2578_v22 = vld [vmem:[%s2823_s23 + $0x200] ss:$12 sps:$4 sm:$0xff]   ;;  %v2571_v24 = vld [vmem:[%s2823_s23 + $0x1c8] ss:$12 sps:$4 sm:$0xff]  }
  0x6f   : > { %961 = vmatprep.subr.bf16.mxu1 %v2684_v0  ;;  %2225 = vmatprep.mubr.msk.bf16.mxu0 %vm2686_vm0, %v2685_v1 }
  0x72   : > { %962 = vmatpush1.bf16.msra.mxu1 %v2483_v23  ;;  %v2568_v23 = vld [vmem:[%s2823_s23 + $0x1cc] ss:$12 sps:$4 sm:$0xff]  }
  0x73   : > { %963 = vmatprep.subr.bf16.mxu1 %v2684_v0 }
  0x76   : > { %964 = vmatpush1.bf16.msra.mxu1 %v2485_v25  ;;  %2226 = vmatmul.mubr.bf16.gmra.mrb[8].mxu0 %v2502_v27  ;;  %v2582_v25 = vld [vmem:[%s2823_s23 + $0x218] ss:$12 sps:$4 sm:$0xff]   ;;  %v2575_v27 = vld [vmem:[%s2823_s23 + $0x1e0] ss:$12 sps:$4 sm:$0xff]  }
  0x77   : > { %965 = vmatprep.subr.bf16.mxu1 %v2684_v0  ;;  %2229 = vmatprep.mubr.msk.bf16.mxu0 %vm2686_vm0, %v2685_v1 }
  0x7a   : > { %966 = vmatpush1.bf16.msra.mxu1 %v2487_v26  ;;  %v2572_v26 = vld [vmem:[%s2823_s23 + $0x1e4] ss:$12 sps:$4 sm:$0xff]  }
  0x7b   : > { %967 = vmatprep.subr.bf16.mxu1 %v2684_v0 }
  0x7e   : > { %968 = vmatpush1.bf16.msra.mxu1 %v2489_v28  ;;  %2230 = vmatmul.mubr.bf16.gmra.mrb[12].mxu0 %v2506_v31  ;;  %v2586_v28 = vld [vmem:[%s2823_s23 + $0x230] ss:$12 sps:$4 sm:$0xff]   ;;  %v2590_v31 = vld [vmem:[%s2823_s23 + $0x248] ss:$12 sps:$4 sm:$0xff]  }
  0x7f   : > { %969 = vmatprep.subr.bf16.mxu1 %v2684_v0  ;;  %2233 = vmatprep.mubr.msk.bf16.mxu0 %vm2686_vm0, %v2685_v1  ;;  %v2550_v0 = vld [vmem:[%s2823_s23 + $0x158] ss:$12 sps:$4 sm:$0xff]  }
  0x82   : > { %970 = vmatpush1.bf16.msra.mxu1 %v2491_v29  ;;  %v2576_v29 = vld [vmem:[%s2823_s23 + $0x1fc] ss:$12 sps:$4 sm:$0xff]  }
  0x85   : > { %972 = vmatmul.mubr.bf16.vlgmr.msra.gmra.mrb[0].mxu1 %v2492_v30  ;;  %v2579_v30 = vld [vmem:[%s2823_s23 + $0x1f8] ss:$12 sps:$4 sm:$0xff]  }
  0x86   : > { %979 = vmatprep.mubr.bf16.mxu1 %v2496_v32  ;;  %2234 = vmatmul.mubr.bf16.gmra.mrb[16].mxu0 %v2510_v34  ;;  %v2580_v32 = vld [vmem:[%s2823_s23 + $0x214] ss:$12 sps:$4 sm:$0xff]   ;;  %v2584_v34 = vld [vmem:[%s2823_s23 + $0x22c] ss:$12 sps:$4 sm:$0xff]  }
  0x87   : > { %2237 = vmatprep.mubr.msk.bf16.mxu0 %vm2686_vm0, %v2685_v1 }
  0x8d   : > { %980 = vmatmul.mubr.bf16.gmra.mrb[4].mxu1 %v2499_v33  ;;  %v2583_v33 = vld [vmem:[%s2823_s23 + $0x210] ss:$12 sps:$4 sm:$0xff]  }
  0x8e   : > { %987 = vmatprep.mubr.bf16.mxu1 %v2500_v35  ;;  %2238 = vmatmul.mubr.bf16.gmra.mrb[20].mxu0 %v2514_v37  ;;  %v2587_v35 = vld [vmem:[%s2823_s23 + $0x228] ss:$12 sps:$4 sm:$0xff]  }
  0x8f   : > { %2241 = vmatprep.mubr.msk.bf16.mxu0 %vm2686_vm0, %v2685_v1 }
  0x95   : > { %988 = vmatmul.mubr.bf16.gmra.mrb[8].mxu1 %v2503_v36  ;;  %v2588_v36 = vld [vmem:[%s2823_s23 + $0x244] ss:$12 sps:$4 sm:$0xff]  }
  0x96   : > { %995 = vmatprep.mubr.bf16.mxu1 %v2504_v38  ;;  %2242 = vmatmul.mubr.bf16.gmra.mrb[24].mxu0 %v2518_v40  ;;  %v2591_v38 = vld [vmem:[%s2823_s23 + $0x240] ss:$12 sps:$4 sm:$0xff]  }
  0x97   : > { %2245 = vmatprep.mubr.msk.bf16.mxu0 %vm2686_vm0, %v2685_v1 }
  0x9d   : > { %996 = vmatmul.mubr.bf16.gmra.mrb[12].mxu1 %v2507_v39 }
  0x9e   : > { %1003 = vmatprep.mubr.bf16.mxu1 %v2508_v41  ;;  %2246 = vmatmul.mubr.bf16.gmra.mrb[28].mxu0 %v2522_v43 }
  0x9f   : > { %2249 = vmatprep.mubr.msk.bf16.mxu0 %vm2686_vm0, %v2685_v1 }
  0xa5   : > { %1004 = vmatmul.mubr.bf16.gmra.mrb[16].mxu1 %v2511_v42 }
  0xa6   : > { %1011 = vmatprep.mubr.bf16.mxu1 %v2512_v44  ;;  %2250 = vmatmul.mubr.bf16.gmra.mrb[32].mxu0 %v2526_v46 }
  0xa7   : > { %2253 = vmatprep.mubr.msk.bf16.mxu0 %vm2686_vm0, %v2685_v1 }
  0xad   : > { %1012 = vmatmul.mubr.bf16.gmra.mrb[20].mxu1 %v2515_v45 }
  0xae   : > { %1019 = vmatprep.mubr.bf16.mxu1 %v2516_v47  ;;  %2254 = vmatmul.mubr.bf16.gmra.mrb[36].mxu0 %v2530_v49  ;;  %v2962_v49 = vld [vmem:[#allocation4] ss:$0 sm:$0xff] }
  0xaf   : > { %2257 = vmatprep.mubr.msk.bf16.mxu0 %vm2686_vm0, %v2685_v1 }
  0xb5   : > { %1020 = vmatmul.mubr.bf16.gmra.mrb[24].mxu1 %v2519_v48 }
  0xb6   : > { %1027 = vmatprep.mubr.bf16.mxu1 %v2520_v50  ;;  %2258 = vmatmul.mubr.bf16.gmra.mrb[40].mxu0 %v2534_v52 }
  0xb7   : > { %2261 = vmatprep.mubr.msk.bf16.mxu0 %vm2686_vm0, %v2685_v1 }
  0xbd   : > { %1028 = vmatmul.mubr.bf16.gmra.mrb[28].mxu1 %v2523_v51 }
  0xbe   : > { %1035 = vmatprep.mubr.bf16.mxu1 %v2524_v53  ;;  %2262 = vmatmul.mubr.bf16.gmra.mrb[44].mxu0 %v2538_v55 }
  0xbf   : > { %2265 = vmatprep.mubr.msk.bf16.mxu0 %vm2686_vm0, %v2685_v1 }
  0xc5   : > { %1036 = vmatmul.mubr.bf16.gmra.mrb[32].mxu1 %v2527_v54 }
  0xc6   : > { %1043 = vmatprep.mubr.bf16.mxu1 %v2528_v56  ;;  %2266 = vmatmul.mubr.bf16.gmra.mrb[48].mxu0 %v2542_v58 }
  0xc7   : > { %2269 = vmatprep.mubr.msk.bf16.mxu0 %vm2686_vm0, %v2685_v1 }
  0xcd   : > { %1044 = vmatmul.mubr.bf16.gmra.mrb[36].mxu1 %v2531_v57 }
  0xce   : > { %1051 = vmatprep.mubr.bf16.mxu1 %v2532_v59  ;;  %2270 = vmatmul.mubr.bf16.gmra.mrb[52].mxu0 %v2546_v61 }
  0xcf   : > { %2273 = vmatprep.mubr.msk.bf16.mxu0 %vm2686_vm0, %v2685_v1 }
  0xd5   : > { %1052 = vmatmul.mubr.bf16.gmra.mrb[40].mxu1 %v2535_v60 }
  0xd6   : > { %1059 = vmatprep.mubr.bf16.mxu1 %v2536_v62  ;;  %2274 = vmatmul.mubr.bf16.gmra.mrb[56].mxu0 %v2550_v0 }
  0xd7   : > { %2277 = vmatprep.mubr.msk.bf16.mxu0 %vm2686_vm0, %v2685_v1 }
  0xdd   : > { %1060 = vmatmul.mubr.bf16.gmra.mrb[44].mxu1 %v2539_v63 }
  0xde   : > { %1067 = vmatprep.mubr.bf16.mxu1 %v2540_v2  ;;  %2278 = vmatmul.mubr.bf16.gmra.mrb[60].mxu0 %v2554_v4 }
  0xdf   : > { %2281 = vmatprep.mubr.msk.bf16.mxu0 %vm2686_vm0, %v2685_v1 }
  0xe5   : > { %1068 = vmatmul.mubr.bf16.gmra.mrb[48].mxu1 %v2543_v3 }
  0xe6   : > { %1075 = vmatprep.mubr.bf16.mxu1 %v2544_v5  ;;  %2282 = vmatmul.mubr.bf16.gmra.mrb[64].mxu0 %v2558_v7 }
  0xe7   : > { %2285 = vmatprep.mubr.msk.bf16.mxu0 %vm2686_vm0, %v2685_v1 }
  0xed   : > { %1076 = vmatmul.mubr.bf16.gmra.mrb[52].mxu1 %v2547_v6 }
  0xee   : > { %1083 = vmatprep.mubr.bf16.mxu1 %v2548_v8  ;;  %2286 = vmatmul.mubr.bf16.gmra.mrb[68].mxu0 %v2562_v10 }
  0xef   : > { %2289 = vmatprep.mubr.msk.bf16.mxu0 %vm2686_vm0, %v2685_v1 }
  0xf5   : > { %1084 = vmatmul.mubr.bf16.gmra.mrb[56].mxu1 %v2551_v9 }
  0xf6   : > { %1091 = vmatprep.mubr.bf16.mxu1 %v2552_v11  ;;  %2290 = vmatmul.mubr.bf16.gmra.mrb[72].mxu0 %v2566_v13 }
  0xf7   : > { %2293 = vmatprep.mubr.msk.bf16.mxu0 %vm2686_vm0, %v2685_v1 }
  0xfd   : > { %1092 = vmatmul.mubr.bf16.gmra.mrb[60].mxu1 %v2555_v12 }
  0xfe   : > { %1099 = vmatprep.mubr.bf16.mxu1 %v2556_v14  ;;  %2294 = vmatmul.mubr.bf16.gmra.mrb[76].mxu0 %v2570_v16 }
  0xff   : > { %2297 = vmatprep.mubr.msk.bf16.mxu0 %vm2686_vm0, %v2685_v1 }
 0x105   : > { %1100 = vmatmul.mubr.bf16.gmra.mrb[64].mxu1 %v2559_v15 }
 0x106   : > { %1107 = vmatprep.mubr.bf16.mxu1 %v2560_v17  ;;  %2298 = vmatmul.mubr.bf16.gmra.mrb[80].mxu0 %v2574_v19 }
 0x107   : > { %2301 = vmatprep.mubr.msk.bf16.mxu0 %vm2686_vm0, %v2685_v1 }
 0x10d   : > { %1108 = vmatmul.mubr.bf16.gmra.mrb[68].mxu1 %v2563_v18 }
 0x10e   : > { %1115 = vmatprep.mubr.bf16.mxu1 %v2564_v20  ;;  %2302 = vmatmul.mubr.bf16.gmra.mrb[84].mxu0 %v2578_v22 }
 0x10f   : > { %2305 = vmatprep.mubr.msk.bf16.mxu0 %vm2686_vm0, %v2685_v1 }
 0x115   : > { %1116 = vmatmul.mubr.bf16.gmra.mrb[72].mxu1 %v2567_v21 }
 0x116   : > { %1123 = vmatprep.mubr.bf16.mxu1 %v2568_v23  ;;  %2306 = vmatmul.mubr.bf16.gmra.mrb[88].mxu0 %v2582_v25 }
 0x117   : > { %2309 = vmatprep.mubr.msk.bf16.mxu0 %vm2686_vm0, %v2685_v1 }
 0x11d   : > { %1124 = vmatmul.mubr.bf16.gmra.mrb[76].mxu1 %v2571_v24 }
 0x11e   : > { %1131 = vmatprep.mubr.bf16.mxu1 %v2572_v26  ;;  %2310 = vmatmul.mubr.bf16.gmra.mrb[92].mxu0 %v2586_v28 }
 0x11f   : > { %2313 = vmatprep.mubr.msk.bf16.mxu0 %vm2686_vm0, %v2685_v1 }
 0x125   : > { %1132 = vmatmul.mubr.bf16.gmra.mrb[80].mxu1 %v2575_v27 }
 0x126   : > { %1139 = vmatprep.mubr.bf16.mxu1 %v2576_v29  ;;  %2314 = vmatmul.mubr.bf16.gmra.mrb[96].mxu0 %v2590_v31 }
 0x12d   : > { %1140 = vmatmul.mubr.bf16.gmra.mrb[84].mxu1 %v2579_v30 }
 0x12e   : > { %1147 = vmatprep.mubr.bf16.mxu1 %v2580_v32 }
 0x135   : > { %1148 = vmatmul.mubr.bf16.gmra.mrb[88].mxu1 %v2583_v33 }
 0x136   : > { %1155 = vmatprep.mubr.bf16.mxu1 %v2584_v34 }
 0x139   : > { %v1206_v37 = vpop.f32.mrb[0].mxu0 }
 0x13a   : > { %v2219_v39 = vpop.f32.mrb[1].mxu0 }
 0x13b   : > { %v1209_v40 = vpop.f32.mrb[2].mxu0 }
 0x13c   : > { %v2220_v1 = vpop.f32.mrb[3].mxu0 }
 0x13d   : > { %1156 = vmatmul.mubr.bf16.gmra.mrb[92].mxu1 %v2587_v35 }
 0x13e   : > { %1163 = vmatprep.mubr.bf16.mxu1 %v2588_v36 }
 0x141   : > { %v1214_v41 = vpop.f32.mrb[4].mxu0 }
 0x142   : > { %v2223_v42 = vpop.f32.mrb[5].mxu0 }
 0x143   : > { %v1217_v43 = vpop.f32.mrb[6].mxu0 }
 0x144   : > { %v2224_v44 = vpop.f32.mrb[7].mxu0 }
 0x145   : > { %1164 = vmatmul.mubr.bf16.gmra.mrb[96].mxu1 %v2591_v38 }
 0x149   : > { %v1222_v45 = vpop.f32.mrb[8].mxu0 }
 0x14a   : > { %v2227_v46 = vpop.f32.mrb[9].mxu0 }
 0x14b   : > { %v1225_v47 = vpop.f32.mrb[10].mxu0 }
 0x14c   : > { %v2228_v48 = vpop.f32.mrb[11].mxu0 }
 0x151   : > { %v1230_v51 = vpop.f32.mrb[12].mxu0 }
 0x152   : > { %v2231_v54 = vpop.f32.mrb[13].mxu0 }
 0x153   : > { %v1233_v56 = vpop.f32.mrb[14].mxu0 }
 0x154   : > { %v2232_v60 = vpop.f32.mrb[15].mxu0 }
 0x158   : > { %v973_v50 = vpop.f32.mrb[0].mxu1 }
 0x159   : > { %v974_v52 = vadd.f32 %v2962_v49, %v973_v50  ;;  %v975_v53 = vpop.f32.mrb[1].mxu1  ;;  %v1238_v2 = vpop.f32.mrb[16].mxu0 }
 0x15a   : > { %v976_v55 = vpop.f32.mrb[2].mxu1  ;;  %v2235_v6 = vpop.f32.mrb[17].mxu0 }
 0x15b   : > { %v1207_v57 = vadd.f32 %v1206_v37, %v974_v52  ;;  %v977_v58 = vadd.f32 %v2962_v49, %v976_v55  ;;  %v978_v59 = vpop.f32.mrb[3].mxu1  ;;  %v1241_v8 = vpop.f32.mrb[18].mxu0 }
 0x15c   : > { %v2236_v12 = vpop.f32.mrb[19].mxu0 }
 0x15d   : > { %v1210_v61 = vadd.f32 %v1209_v40, %v977_v58  ;;  %v1405_v62 = vmax.f32 %v1207_v57, 0.0 }
 0x15f   : > { %v1406_v63 = vmax.f32 %v1210_v61, 0.0 }
 0x160   : > { %v981_v0 = vpop.f32.mrb[4].mxu1 }
 0x161   : > { %v2022_v3 = vpack.c.bf16 %v1406_v63, %v1405_v62  ;;  %v982_v4 = vadd.f32 %v2962_v49, %v981_v0  ;;  %v983_v5 = vpop.f32.mrb[5].mxu1  ;;  %v1246_v17 = vpop.f32.mrb[20].mxu0 }
 0x162   : > { %v984_v7 = vpop.f32.mrb[6].mxu1  ;;  %v2239_v21 = vpop.f32.mrb[21].mxu0 }
 0x163   : > { %2023 = vst [vmem:[%s2970_s4] sm:$0xff] %v2022_v3   ;;  %v1215_v9 = vadd.f32 %v1214_v41, %v982_v4  ;;  %v985_v10 = vadd.f32 %v2962_v49, %v984_v7  ;;  %v986_v11 = vpop.f32.mrb[7].mxu1  ;;  %v1249_v23 = vpop.f32.mrb[22].mxu0 }
 0x164   : > { %v2240_v27 = vpop.f32.mrb[23].mxu0 }
 0x165   : > { %v1218_v13 = vadd.f32 %v1217_v43, %v985_v10  ;;  %v1407_v14 = vmax.f32 %v1215_v9, 0.0 }
 0x167   : > { %v1408_v15 = vmax.f32 %v1218_v13, 0.0 }
 0x168   : > { %v989_v16 = vpop.f32.mrb[8].mxu1 }
 0x169   : > { %v2027_v18 = vpack.c.bf16 %v1408_v15, %v1407_v14  ;;  %v990_v19 = vadd.f32 %v2962_v49, %v989_v16  ;;  %v991_v20 = vpop.f32.mrb[9].mxu1  ;;  %v1254_v32 = vpop.f32.mrb[24].mxu0 }
 0x16a   : > { %v992_v22 = vpop.f32.mrb[10].mxu1  ;;  %v2243_v36 = vpop.f32.mrb[25].mxu0 }
 0x16b   : > { %2144 = vst [vmem:[%s2970_s4 + $0x8] sm:$0xff] %v2027_v18   ;;  %v1223_v24 = vadd.f32 %v1222_v45, %v990_v19  ;;  %v993_v25 = vadd.f32 %v2962_v49, %v992_v22  ;;  %v994_v26 = vpop.f32.mrb[11].mxu1  ;;  %v1257_v38 = vpop.f32.mrb[26].mxu0 }
 0x16c   : > { %v2244_v41 = vpop.f32.mrb[27].mxu0 }
 0x16d   : > { %v1226_v28 = vadd.f32 %v1225_v47, %v993_v25  ;;  %v1409_v29 = vmax.f32 %v1223_v24, 0.0 }
 0x16f   : > { %v1410_v30 = vmax.f32 %v1226_v28, 0.0 }
 0x170   : > { %v997_v31 = vpop.f32.mrb[12].mxu1 }
 0x171   : > { %v2032_v33 = vpack.c.bf16 %v1410_v30, %v1409_v29  ;;  %v998_v34 = vadd.f32 %v2962_v49, %v997_v31  ;;  %v999_v35 = vpop.f32.mrb[13].mxu1  ;;  %v1262_v46 = vpop.f32.mrb[28].mxu0 }
 0x172   : > { %v1000_v37 = vpop.f32.mrb[14].mxu1  ;;  %v2247_v52 = vpop.f32.mrb[29].mxu0 }
 0x173   : > { %2145 = vst [vmem:[%s2970_s4 + $0x10] sm:$0xff] %v2032_v33   ;;  %v1231_v39 = vadd.f32 %v1230_v51, %v998_v34  ;;  %v1001_v40 = vadd.f32 %v2962_v49, %v1000_v37  ;;  %v1002_v1 = vpop.f32.mrb[15].mxu1  ;;  %v1265_v54 = vpop.f32.mrb[30].mxu0 }
 0x174   : > { %v2248_v58 = vpop.f32.mrb[31].mxu0 }
 0x175   : > { %v1234_v42 = vadd.f32 %v1233_v56, %v1001_v40  ;;  %v1411_v43 = vmax.f32 %v1231_v39, 0.0 }
 0x177   : > { %v1412_v44 = vmax.f32 %v1234_v42, 0.0 }
 0x178   : > { %v1005_v45 = vpop.f32.mrb[16].mxu1 }
 0x179   : > { %v2037_v47 = vpack.c.bf16 %v1412_v44, %v1411_v43  ;;  %v1006_v48 = vadd.f32 %v2962_v49, %v1005_v45  ;;  %v1007_v50 = vpop.f32.mrb[17].mxu1  ;;  %v1270_v62 = vpop.f32.mrb[32].mxu0 }
 0x17a   : > { %v1008_v53 = vpop.f32.mrb[18].mxu1  ;;  %v2251_v4 = vpop.f32.mrb[33].mxu0 }
 0x17b   : > { %2146 = vst [vmem:[%s2970_s4 + $0x18] sm:$0xff] %v2037_v47   ;;  %v1239_v55 = vadd.f32 %v1238_v2, %v1006_v48  ;;  %v1009_v51 = vadd.f32 %v2962_v49, %v1008_v53  ;;  %v1010_v57 = vpop.f32.mrb[19].mxu1  ;;  %v1273_v6 = vpop.f32.mrb[34].mxu0 }
 0x17c   : > { %v2252_v10 = vpop.f32.mrb[35].mxu0 }
 0x17d   : > { %v1242_v59 = vadd.f32 %v1241_v8, %v1009_v51  ;;  %v1413_v56 = vmax.f32 %v1239_v55, 0.0 }
 0x17f   : > { %v1414_v60 = vmax.f32 %v1242_v59, 0.0 }
 0x180   : > { %v1013_v61 = vpop.f32.mrb[20].mxu1 }
 0x181   : > { %v2042_v63 = vpack.c.bf16 %v1414_v60, %v1413_v56  ;;  %v1014_v0 = vadd.f32 %v2962_v49, %v1013_v61  ;;  %v1015_v3 = vpop.f32.mrb[21].mxu1  ;;  %v1278_v14 = vpop.f32.mrb[36].mxu0 }
 0x182   : > { %v1016_v5 = vpop.f32.mrb[22].mxu1  ;;  %v2255_v19 = vpop.f32.mrb[37].mxu0 }
 0x183   : > { %2147 = vst [vmem:[%s2970_s4 + $0x20] sm:$0xff] %v2042_v63   ;;  %v1247_v7 = vadd.f32 %v1246_v17, %v1014_v0  ;;  %v1017_v2 = vadd.f32 %v2962_v49, %v1016_v5  ;;  %v1018_v9 = vpop.f32.mrb[23].mxu1  ;;  %v1281_v21 = vpop.f32.mrb[38].mxu0 }
 0x184   : > { %v2256_v25 = vpop.f32.mrb[39].mxu0 }
 0x185   : > { %v1250_v11 = vadd.f32 %v1249_v23, %v1017_v2  ;;  %v1415_v8 = vmax.f32 %v1247_v7, 0.0 }
 0x187   : > { %v1416_v12 = vmax.f32 %v1250_v11, 0.0 }
 0x188   : > { %v1021_v13 = vpop.f32.mrb[24].mxu1 }
 0x189   : > { %v2047_v15 = vpack.c.bf16 %v1416_v12, %v1415_v8  ;;  %v1022_v16 = vadd.f32 %v2962_v49, %v1021_v13  ;;  %v1023_v18 = vpop.f32.mrb[25].mxu1  ;;  %v1286_v29 = vpop.f32.mrb[40].mxu0 }
 0x18a   : > { %v1024_v20 = vpop.f32.mrb[26].mxu1  ;;  %v2259_v34 = vpop.f32.mrb[41].mxu0 }
 0x18b   : > { %2148 = vst [vmem:[%s2970_s4 + $0x28] sm:$0xff] %v2047_v15   ;;  %v1255_v22 = vadd.f32 %v1254_v32, %v1022_v16  ;;  %v1025_v17 = vadd.f32 %v2962_v49, %v1024_v20  ;;  %v1026_v24 = vpop.f32.mrb[27].mxu1  ;;  %v1289_v36 = vpop.f32.mrb[42].mxu0 }
 0x18c   : > { %v2260_v40 = vpop.f32.mrb[43].mxu0 }
 0x18d   : > { %v1258_v26 = vadd.f32 %v1257_v38, %v1025_v17  ;;  %v1417_v23 = vmax.f32 %v1255_v22, 0.0 }
 0x18f   : > { %v1418_v27 = vmax.f32 %v1258_v26, 0.0 }
 0x190   : > { %v1029_v28 = vpop.f32.mrb[28].mxu1 }
 0x191   : > { %v2052_v30 = vpack.c.bf16 %v1418_v27, %v1417_v23  ;;  %v1030_v31 = vadd.f32 %v2962_v49, %v1029_v28  ;;  %v1031_v33 = vpop.f32.mrb[29].mxu1  ;;  %v1294_v43 = vpop.f32.mrb[44].mxu0 }
 0x192   : > { %v1032_v35 = vpop.f32.mrb[30].mxu1  ;;  %v2263_v48 = vpop.f32.mrb[45].mxu0 }
 0x193   : > { %2149 = vst [vmem:[%s2970_s4 + $0x30] sm:$0xff] %v2052_v30   ;;  %v1263_v37 = vadd.f32 %v1262_v46, %v1030_v31  ;;  %v1033_v32 = vadd.f32 %v2962_v49, %v1032_v35  ;;  %v1034_v39 = vpop.f32.mrb[31].mxu1  ;;  %v1297_v52 = vpop.f32.mrb[46].mxu0 }
 0x194   : > { %v2264_v51 = vpop.f32.mrb[47].mxu0 }
 0x195   : > { %v1266_v1 = vadd.f32 %v1265_v54, %v1033_v32  ;;  %v1419_v38 = vmax.f32 %v1263_v37, 0.0 }
 0x197   : > { %v1420_v41 = vmax.f32 %v1266_v1, 0.0 }
 0x198   : > { %v1037_v42 = vpop.f32.mrb[32].mxu1 }
 0x199   : > { %v2057_v44 = vpack.c.bf16 %v1420_v41, %v1419_v38  ;;  %v1038_v45 = vadd.f32 %v2962_v49, %v1037_v42  ;;  %v1039_v47 = vpop.f32.mrb[33].mxu1  ;;  %v1302_v56 = vpop.f32.mrb[48].mxu0 }
 0x19a   : > { %v1040_v50 = vpop.f32.mrb[34].mxu1  ;;  %v2267_v0 = vpop.f32.mrb[49].mxu0 }
 0x19b   : > { %2150 = vst [vmem:[%s2970_s4 + $0x38] sm:$0xff] %v2057_v44   ;;  %v1271_v53 = vadd.f32 %v1270_v62, %v1038_v45  ;;  %v1041_v46 = vadd.f32 %v2962_v49, %v1040_v50  ;;  %v1042_v55 = vpop.f32.mrb[35].mxu1  ;;  %v1305_v4 = vpop.f32.mrb[50].mxu0 }
 0x19c   : > { %v2268_v2 = vpop.f32.mrb[51].mxu0 }
 0x19d   : > { %v1274_v57 = vadd.f32 %v1273_v6, %v1041_v46  ;;  %v1421_v54 = vmax.f32 %v1271_v53, 0.0 }
 0x19f   : > { %v1422_v58 = vmax.f32 %v1274_v57, 0.0 }
 0x1a0   : > { %v1045_v59 = vpop.f32.mrb[36].mxu1 }
 0x1a1   : > { %v2062_v60 = vpack.c.bf16 %v1422_v58, %v1421_v54  ;;  %v1046_v61 = vadd.f32 %v2962_v49, %v1045_v59  ;;  %v1047_v63 = vpop.f32.mrb[37].mxu1  ;;  %v1310_v8 = vpop.f32.mrb[52].mxu0 }
 0x1a2   : > { %v1048_v3 = vpop.f32.mrb[38].mxu1  ;;  %v2271_v16 = vpop.f32.mrb[53].mxu0 }
 0x1a3   : > { %2151 = vst [vmem:[%s2970_s4 + $0x40] sm:$0xff] %v2062_v60   ;;  %v1279_v5 = vadd.f32 %v1278_v14, %v1046_v61  ;;  %v1049_v62 = vadd.f32 %v2962_v49, %v1048_v3  ;;  %v1050_v7 = vpop.f32.mrb[39].mxu1  ;;  %v1313_v19 = vpop.f32.mrb[54].mxu0 }
 0x1a4   : > { %v2272_v17 = vpop.f32.mrb[55].mxu0 }
 0x1a5   : > { %v1282_v9 = vadd.f32 %v1281_v21, %v1049_v62  ;;  %v1423_v6 = vmax.f32 %v1279_v5, 0.0 }
 0x1a7   : > { %v1424_v10 = vmax.f32 %v1282_v9, 0.0 }
 0x1a8   : > { %v1053_v11 = vpop.f32.mrb[40].mxu1 }
 0x1a9   : > { %v2067_v12 = vpack.c.bf16 %v1424_v10, %v1423_v6  ;;  %v1054_v13 = vadd.f32 %v2962_v49, %v1053_v11  ;;  %v1055_v15 = vpop.f32.mrb[41].mxu1  ;;  %v1318_v23 = vpop.f32.mrb[56].mxu0 }
 0x1aa   : > { %v1056_v18 = vpop.f32.mrb[42].mxu1  ;;  %v2275_v31 = vpop.f32.mrb[57].mxu0 }
 0x1ab   : > { %2152 = vst [vmem:[%s2970_s4 + $0x48] sm:$0xff] %v2067_v12   ;;  %v1287_v20 = vadd.f32 %v1286_v29, %v1054_v13  ;;  %v1057_v14 = vadd.f32 %v2962_v49, %v1056_v18  ;;  %v1058_v22 = vpop.f32.mrb[43].mxu1  ;;  %v1321_v34 = vpop.f32.mrb[58].mxu0 }
 0x1ac   : > { %v2276_v32 = vpop.f32.mrb[59].mxu0 }
 0x1ad   : > { %v1290_v24 = vadd.f32 %v1289_v36, %v1057_v14  ;;  %v1425_v21 = vmax.f32 %v1287_v20, 0.0 }
 0x1af   : > { %v1426_v25 = vmax.f32 %v1290_v24, 0.0 }
 0x1b0   : > { %v1061_v26 = vpop.f32.mrb[44].mxu1 }
 0x1b1   : > { %v2072_v27 = vpack.c.bf16 %v1426_v25, %v1425_v21  ;;  %v1062_v28 = vadd.f32 %v2962_v49, %v1061_v26  ;;  %v1063_v30 = vpop.f32.mrb[45].mxu1  ;;  %v1326_v38 = vpop.f32.mrb[60].mxu0 }
 0x1b2   : > { %v1064_v33 = vpop.f32.mrb[46].mxu1  ;;  %v2279_v45 = vpop.f32.mrb[61].mxu0 }
 0x1b3   : > { %2153 = vst [vmem:[%s2970_s4 + $0x50] sm:$0xff] %v2072_v27   ;;  %v1295_v35 = vadd.f32 %v1294_v43, %v1062_v28  ;;  %v1065_v29 = vadd.f32 %v2962_v49, %v1064_v33  ;;  %v1066_v37 = vpop.f32.mrb[47].mxu1  ;;  %v1329_v48 = vpop.f32.mrb[62].mxu0 }
 0x1b4   : > { %v2280_v46 = vpop.f32.mrb[63].mxu0 }
 0x1b5   : > { %v1298_v39 = vadd.f32 %v1297_v52, %v1065_v29  ;;  %v1427_v36 = vmax.f32 %v1295_v35, 0.0 }
 0x1b7   : > { %v1428_v40 = vmax.f32 %v1298_v39, 0.0 }
 0x1b8   : > { %v1069_v1 = vpop.f32.mrb[48].mxu1 }
 0x1b9   : > { %v2077_v41 = vpack.c.bf16 %v1428_v40, %v1427_v36  ;;  %v1070_v42 = vadd.f32 %v2962_v49, %v1069_v1  ;;  %v1071_v44 = vpop.f32.mrb[49].mxu1  ;;  %v1334_v54 = vpop.f32.mrb[64].mxu0 }
 0x1ba   : > { %v1072_v47 = vpop.f32.mrb[50].mxu1  ;;  %v2283_v61 = vpop.f32.mrb[65].mxu0 }
 0x1bb   : > { %2154 = vst [vmem:[%s2970_s4 + $0x58] sm:$0xff] %v2077_v41   ;;  %v1303_v50 = vadd.f32 %v1302_v56, %v1070_v42  ;;  %v1073_v43 = vadd.f32 %v2962_v49, %v1072_v47  ;;  %v1074_v53 = vpop.f32.mrb[51].mxu1  ;;  %v1337_v0 = vpop.f32.mrb[66].mxu0 }
 0x1bc   : > { %v2284_v62 = vpop.f32.mrb[67].mxu0 }
 0x1bd   : > { %v1306_v55 = vadd.f32 %v1305_v4, %v1073_v43  ;;  %v1429_v52 = vmax.f32 %v1303_v50, 0.0 }
 0x1bf   : > { %v1430_v51 = vmax.f32 %v1306_v55, 0.0 }
 0x1c0   : > { %v1077_v57 = vpop.f32.mrb[52].mxu1 }
 0x1c1   : > { %v2082_v58 = vpack.c.bf16 %v1430_v51, %v1429_v52  ;;  %v1078_v59 = vadd.f32 %v2962_v49, %v1077_v57  ;;  %v1079_v60 = vpop.f32.mrb[53].mxu1  ;;  %v1342_v6 = vpop.f32.mrb[68].mxu0 }
 0x1c2   : > { %v1080_v63 = vpop.f32.mrb[54].mxu1  ;;  %v2287_v13 = vpop.f32.mrb[69].mxu0 }
 0x1c3   : > { %2155 = vst [vmem:[%s2970_s4 + $0x60] sm:$0xff] %v2082_v58   ;;  %v1311_v3 = vadd.f32 %v1310_v8, %v1078_v59  ;;  %v1081_v56 = vadd.f32 %v2962_v49, %v1080_v63  ;;  %v1082_v5 = vpop.f32.mrb[55].mxu1  ;;  %v1345_v16 = vpop.f32.mrb[70].mxu0 }
 0x1c4   : > { %v2288_v14 = vpop.f32.mrb[71].mxu0 }
 0x1c5   : > { %v1314_v7 = vadd.f32 %v1313_v19, %v1081_v56  ;;  %v1431_v4 = vmax.f32 %v1311_v3, 0.0 }
 0x1c7   : > { %v1432_v2 = vmax.f32 %v1314_v7, 0.0 }
 0x1c8   : > { %v1085_v9 = vpop.f32.mrb[56].mxu1 }
 0x1c9   : > { %v2087_v10 = vpack.c.bf16 %v1432_v2, %v1431_v4  ;;  %v1086_v11 = vadd.f32 %v2962_v49, %v1085_v9  ;;  %v1087_v12 = vpop.f32.mrb[57].mxu1  ;;  %v1350_v21 = vpop.f32.mrb[72].mxu0 }
 0x1ca   : > { %v1088_v15 = vpop.f32.mrb[58].mxu1  ;;  %v2291_v28 = vpop.f32.mrb[73].mxu0 }
 0x1cb   : > { %2156 = vst [vmem:[%s2970_s4 + $0x68] sm:$0xff] %v2087_v10   ;;  %v1319_v18 = vadd.f32 %v1318_v23, %v1086_v11  ;;  %v1089_v8 = vadd.f32 %v2962_v49, %v1088_v15  ;;  %v1090_v20 = vpop.f32.mrb[59].mxu1  ;;  %v1353_v31 = vpop.f32.mrb[74].mxu0 }
 0x1cc   : > { %v2292_v29 = vpop.f32.mrb[75].mxu0 }
 0x1cd   : > { %v1322_v22 = vadd.f32 %v1321_v34, %v1089_v8  ;;  %v1433_v19 = vmax.f32 %v1319_v18, 0.0 }
 0x1cf   : > { %v1434_v17 = vmax.f32 %v1322_v22, 0.0 }
 0x1d0   : > { %v1093_v24 = vpop.f32.mrb[60].mxu1 }
 0x1d1   : > { %v2092_v25 = vpack.c.bf16 %v1434_v17, %v1433_v19  ;;  %v1094_v26 = vadd.f32 %v2962_v49, %v1093_v24  ;;  %v1095_v27 = vpop.f32.mrb[61].mxu1  ;;  %v1358_v36 = vpop.f32.mrb[76].mxu0 }
 0x1d2   : > { %v1096_v30 = vpop.f32.mrb[62].mxu1  ;;  %v2295_v42 = vpop.f32.mrb[77].mxu0 }
 0x1d3   : > { %2157 = vst [vmem:[%s2970_s4 + $0x70] sm:$0xff] %v2092_v25   ;;  %v1327_v33 = vadd.f32 %v1326_v38, %v1094_v26  ;;  %v1097_v23 = vadd.f32 %v2962_v49, %v1096_v30  ;;  %v1098_v35 = vpop.f32.mrb[63].mxu1  ;;  %v1361_v45 = vpop.f32.mrb[78].mxu0 }
 0x1d4   : > { %v2296_v43 = vpop.f32.mrb[79].mxu0 }
 0x1d5   : > { %v1330_v37 = vadd.f32 %v1329_v48, %v1097_v23  ;;  %v1435_v34 = vmax.f32 %v1327_v33, 0.0 }
 0x1d7   : > { %v1436_v32 = vmax.f32 %v1330_v37, 0.0 }
 0x1d8   : > { %v1101_v39 = vpop.f32.mrb[64].mxu1 }
 0x1d9   : > { %v2097_v40 = vpack.c.bf16 %v1436_v32, %v1435_v34  ;;  %v1102_v1 = vadd.f32 %v2962_v49, %v1101_v39  ;;  %v1103_v41 = vpop.f32.mrb[65].mxu1  ;;  %v1366_v52 = vpop.f32.mrb[80].mxu0 }
 0x1da   : > { %v1104_v44 = vpop.f32.mrb[66].mxu1  ;;  %v2299_v59 = vpop.f32.mrb[81].mxu0 }
 0x1db   : > { %2158 = vst [vmem:[%s2970_s4 + $0x78] sm:$0xff] %v2097_v40   ;;  %v1335_v47 = vadd.f32 %v1334_v54, %v1102_v1  ;;  %v1105_v38 = vadd.f32 %v2962_v49, %v1104_v44  ;;  %v1106_v50 = vpop.f32.mrb[67].mxu1  ;;  %v1369_v61 = vpop.f32.mrb[82].mxu0 }
 0x1dc   : > { %v2300_v56 = vpop.f32.mrb[83].mxu0 }
 0x1dd   : > { %v1338_v53 = vadd.f32 %v1337_v0, %v1105_v38  ;;  %v1437_v48 = vmax.f32 %v1335_v47, 0.0 }
 0x1df   : > { %v1438_v46 = vmax.f32 %v1338_v53, 0.0 }
 0x1e0   : > { %v1109_v55 = vpop.f32.mrb[68].mxu1 }
 0x1e1   : > { %v2102_v51 = vpack.c.bf16 %v1438_v46, %v1437_v48  ;;  %v1110_v57 = vadd.f32 %v2962_v49, %v1109_v55  ;;  %v1111_v58 = vpop.f32.mrb[69].mxu1  ;;  %v1374_v4 = vpop.f32.mrb[84].mxu0 }
 0x1e2   : > { %v1112_v60 = vpop.f32.mrb[70].mxu1  ;;  %v2303_v11 = vpop.f32.mrb[85].mxu0 }
 0x1e3   : > { %2159 = vst [vmem:[%s2970_s4 + $0x80] sm:$0xff] %v2102_v51   ;;  %v1343_v63 = vadd.f32 %v1342_v6, %v1110_v57  ;;  %v1113_v54 = vadd.f32 %v2962_v49, %v1112_v60  ;;  %v1114_v3 = vpop.f32.mrb[71].mxu1  ;;  %v1377_v13 = vpop.f32.mrb[86].mxu0 }
 0x1e4   : > { %v2304_v8 = vpop.f32.mrb[87].mxu0 }
 0x1e5   : > { %v1346_v5 = vadd.f32 %v1345_v16, %v1113_v54  ;;  %v1439_v0 = vmax.f32 %v1343_v63, 0.0 }
 0x1e7   : > { %v1440_v62 = vmax.f32 %v1346_v5, 0.0 }
 0x1e8   : > { %v1117_v7 = vpop.f32.mrb[72].mxu1 }
 0x1e9   : > { %v2107_v2 = vpack.c.bf16 %v1440_v62, %v1439_v0  ;;  %v1118_v9 = vadd.f32 %v2962_v49, %v1117_v7  ;;  %v1119_v10 = vpop.f32.mrb[73].mxu1  ;;  %v1382_v19 = vpop.f32.mrb[88].mxu0 }
 0x1ea   : > { %v1120_v12 = vpop.f32.mrb[74].mxu1  ;;  %v2307_v26 = vpop.f32.mrb[89].mxu0 }
 0x1eb   : > { %2160 = vst [vmem:[%s2970_s4 + $0x88] sm:$0xff] %v2107_v2   ;;  %v1351_v15 = vadd.f32 %v1350_v21, %v1118_v9  ;;  %v1121_v6 = vadd.f32 %v2962_v49, %v1120_v12  ;;  %v1122_v18 = vpop.f32.mrb[75].mxu1  ;;  %v1385_v28 = vpop.f32.mrb[90].mxu0 }
 0x1ec   : > { %v2308_v23 = vpop.f32.mrb[91].mxu0 }
 0x1ed   : > { %v1354_v20 = vadd.f32 %v1353_v31, %v1121_v6  ;;  %v1441_v16 = vmax.f32 %v1351_v15, 0.0 }
 0x1ef   : > { %v1442_v14 = vmax.f32 %v1354_v20, 0.0 }
 0x1f0   : > { %v1125_v22 = vpop.f32.mrb[76].mxu1 }
 0x1f1   : > { %v2112_v17 = vpack.c.bf16 %v1442_v14, %v1441_v16  ;;  %v1126_v24 = vadd.f32 %v2962_v49, %v1125_v22  ;;  %v1127_v25 = vpop.f32.mrb[77].mxu1  ;;  %v1390_v34 = vpop.f32.mrb[92].mxu0 }
 0x1f2   : > { %v1128_v27 = vpop.f32.mrb[78].mxu1  ;;  %v2311_v1 = vpop.f32.mrb[93].mxu0 }
 0x1f3   : > { %2161 = vst [vmem:[%s2970_s4 + $0x90] sm:$0xff] %v2112_v17   ;;  %v1359_v30 = vadd.f32 %v1358_v36, %v1126_v24  ;;  %v1129_v21 = vadd.f32 %v2962_v49, %v1128_v27  ;;  %v1130_v33 = vpop.f32.mrb[79].mxu1  ;;  %v1393_v42 = vpop.f32.mrb[94].mxu0 }
 0x1f4   : > { %v2312_v38 = vpop.f32.mrb[95].mxu0 }
 0x1f5   : > { %v1362_v35 = vadd.f32 %v1361_v45, %v1129_v21  ;;  %v1443_v31 = vmax.f32 %v1359_v30, 0.0 }
 0x1f7   : > { %v1444_v29 = vmax.f32 %v1362_v35, 0.0 }
 0x1f8   : > { %v1133_v37 = vpop.f32.mrb[80].mxu1 }
 0x1f9   : > { %v2117_v32 = vpack.c.bf16 %v1444_v29, %v1443_v31  ;;  %v1134_v39 = vadd.f32 %v2962_v49, %v1133_v37  ;;  %v1135_v40 = vpop.f32.mrb[81].mxu1  ;;  %v1398_v48 = vpop.f32.mrb[96].mxu0 }
 0x1fa   : > { %v1136_v41 = vpop.f32.mrb[82].mxu1  ;;  %v2315_v57 = vpop.f32.mrb[97].mxu0 }
 0x1fb   : > { %2162 = vst [vmem:[%s2970_s4 + $0x98] sm:$0xff] %v2117_v32   ;;  %v1367_v44 = vadd.f32 %v1366_v52, %v1134_v39  ;;  %v1137_v36 = vadd.f32 %v2962_v49, %v1136_v41  ;;  %v1138_v47 = vpop.f32.mrb[83].mxu1  ;;  %v1401_v59 = vpop.f32.mrb[98].mxu0 }
 0x1fc   : > { %v2316_v54 = vpop.f32.mrb[99].mxu0 }
 0x1fd   : > { %v1370_v50 = vadd.f32 %v1369_v61, %v1137_v36  ;;  %v1445_v45 = vmax.f32 %v1367_v44, 0.0 }
 0x1ff   : > { %v1446_v43 = vmax.f32 %v1370_v50, 0.0 }
 0x200   : > { %v1141_v53 = vpop.f32.mrb[84].mxu1 }
 0x201   : > { %v2122_v46 = vpack.c.bf16 %v1446_v43, %v1445_v45  ;;  %v1142_v55 = vadd.f32 %v2962_v49, %v1141_v53  ;;  %v1143_v51 = vpop.f32.mrb[85].mxu1 }
 0x202   : > { %v1144_v58 = vpop.f32.mrb[86].mxu1 }
 0x203   : > { %2163 = vst [vmem:[%s2970_s4 + $0xa0] sm:$0xff] %v2122_v46   ;;  %v1375_v60 = vadd.f32 %v1374_v4, %v1142_v55  ;;  %v1145_v52 = vadd.f32 %v2962_v49, %v1144_v58  ;;  %v1146_v63 = vpop.f32.mrb[87].mxu1 }
 0x205   : > { %v1378_v3 = vadd.f32 %v1377_v13, %v1145_v52  ;;  %v1447_v61 = vmax.f32 %v1375_v60, 0.0 }
 0x207   : > { %v1448_v56 = vmax.f32 %v1378_v3, 0.0 }
 0x208   : > { %v1149_v5 = vpop.f32.mrb[88].mxu1 }
 0x209   : > { %v2127_v0 = vpack.c.bf16 %v1448_v56, %v1447_v61  ;;  %v1150_v62 = vadd.f32 %v2962_v49, %v1149_v5  ;;  %v1151_v7 = vpop.f32.mrb[89].mxu1 }
 0x20a   : > { %v1152_v2 = vpop.f32.mrb[90].mxu1 }
 0x20b   : > { %2164 = vst [vmem:[%s2970_s4 + $0xa8] sm:$0xff] %v2127_v0   ;;  %v1383_v9 = vadd.f32 %v1382_v19, %v1150_v62  ;;  %v1153_v10 = vadd.f32 %v2962_v49, %v1152_v2  ;;  %v1154_v11 = vpop.f32.mrb[91].mxu1 }
 0x20d   : > { %v1386_v4 = vadd.f32 %v1385_v28, %v1153_v10  ;;  %v1449_v12 = vmax.f32 %v1383_v9, 0.0 }
 0x20f   : > { %v1450_v15 = vmax.f32 %v1386_v4, 0.0 }
 0x210   : > { %v1157_v6 = vpop.f32.mrb[92].mxu1 }
 0x211   : > { %v2132_v18 = vpack.c.bf16 %v1450_v15, %v1449_v12  ;;  %v1158_v13 = vadd.f32 %v2962_v49, %v1157_v6  ;;  %v1159_v8 = vpop.f32.mrb[93].mxu1 }
 0x212   : > { %v1160_v20 = vpop.f32.mrb[94].mxu1 }
 0x213   : > { %2165 = vst [vmem:[%s2970_s4 + $0xb0] sm:$0xff] %v2132_v18   ;;  %v1391_v16 = vadd.f32 %v1390_v34, %v1158_v13  ;;  %v1161_v14 = vadd.f32 %v2962_v49, %v1160_v20  ;;  %v1162_v22 = vpop.f32.mrb[95].mxu1 }
 0x215   : > { %v1394_v17 = vadd.f32 %v1393_v42, %v1161_v14  ;;  %v1451_v19 = vmax.f32 %v1391_v16, 0.0 }
 0x217   : > { %v1452_v24 = vmax.f32 %v1394_v17, 0.0 }
 0x218   : > { %v1165_v25 = vpop.f32.mrb[96].mxu1 }
 0x219   : > { %v2137_v26 = vpack.c.bf16 %v1452_v24, %v1451_v19  ;;  %v1166_v27 = vadd.f32 %v2962_v49, %v1165_v25  ;;  %v1167_v28 = vpop.f32.mrb[97].mxu1 }
 0x21a   : > { %v1168_v30 = vpop.f32.mrb[98].mxu1 }
 0x21b   : > { %2166 = vst [vmem:[%s2970_s4 + $0xb8] sm:$0xff] %v2137_v26   ;;  %v1399_v21 = vadd.f32 %v1398_v48, %v1166_v27  ;;  %v1169_v33 = vadd.f32 %v2962_v49, %v1168_v30  ;;  %v1170_v23 = vpop.f32.mrb[99].mxu1 }
 0x21d   : > { %v1402_v35 = vadd.f32 %v1401_v59, %v1169_v33  ;;  %v1453_v31 = vmax.f32 %v1399_v21, 0.0 }
 0x21f   : > { %v1454_v29 = vmax.f32 %v1402_v35, 0.0 }
 0x221   : > { %v2142_v37 = vpack.c.bf16 %v1454_v29, %v1453_v31 }
 0x223   : > { %2167 = vst [vmem:[%s2970_s4 + $0xc0] sm:$0xff] %v2142_v37  }
 0x224 PF: > { %s15_s14 = sadd.s32 1, %s2678_s14   ;;  %s3066_s12 = smov %s2674_s13 }
 0x225   : > { %p12_p3 = scmp.ge.s32.totalorder %s15_s14, 4   ;;  %s3067_s13 = smov %s3069_s16 }
 0x227   :  { %14 = sbr.rel (!%p12_p3) target bundleno = 3 (0x3), region = 73 }
 0x22e   :  { %1733 = vsyncpa [#allocation3], 1 }
 0x22f   :  { %1735 = vsyncpa [#allocation3 + $0x1], 1 }
 0x230   :  { %1736 = vsyncpa [#allocation5], 1 }

// kernel: forward.10
= control target key start
LH: loop header
LB: loop body
LE: loop exit
PB: predicated region body
PF: predicated region fallthrough
CT: control target
= control target key end

     0   :  { %s2554_s12 = smov 0   ;;  %s2556_s13 = smov 0   ;;  %s2899_s0 = inlined_call_operand.vmem [shape: bf16[800,384], index: 0, kind: input, shape index: {}]   ;;  %s2900_s1 = inlined_call_operand.vmem [shape: bf16[384,128], index: 1, kind: input, shape index: {}]   ;;  %s2901_s2 = inlined_call_operand.vmem [shape: f32[1,128], index: 2, kind: input, shape index: {}]   ;;  %s2902_s3 = inlined_call_operand.vmem [shape: bf16[800,128], index: 3, kind: output, shape index: {}]  }
   0x1   :  { %s2558_s14 = smov 0  }
   0x2 LB: > { %s25_s15 = sadd.s32 1, %s2525_s13  ;;  %p1752_p0 = scmp.ge.s32.totalorder %s2529_s14, 1  ;;  %s2529_s14 = sphi %s2558_s14, %s13_s14   ;;  %s2525_s13 = sphi %s2556_s13, %s2904_s13   ;;  %s2521_s12 = sphi %s2554_s12, %s2903_s12  }
   0x3   : > { %p27_p1 = scmp.ge.s32.totalorder %s25_s15, 2  ;;  %p170_p2 = scmp.lt.s32.totalorder %s2529_s14, 3 }
   0x5   : > { %s2906_s15 = smov (%p27_p1, %s25_s15), 0  ;;  %p171_p3 = pnand %p1752_p0, %p170_p2 }
   0x6   : > { %v2383_v0 = vld [vmem:[%s2900_s1] sm:$0xff] (!%p171_p3)   ;;  %v2531_v1 = vmov (!%p171_p3), 0   ;;  %v2384_v2 = vld [vmem:[%s2900_s1 + $0x8] sm:$0xff] (!%p171_p3)   ;;  %v2532_v3 = vmov (!%p171_p3), 0.0   ;;  %vm2533_vm0 = vmmov (!%p171_p3), 0   ;;  %v2385_v4 = vld [vmem:[%s2900_s1 + $0x10] sm:$0xff] (!%p171_p3)  }
   0x7   : > { %174 = sbr.rel (%p171_p3) target bundleno = 484 (0x1e4), region = 32  ;;  %928 = vmatprep.subr.bf16.mxu1 (!%p171_p3), %v2531_v1  ;;  %2139 = vmatprep.subr.bf16.mxu0 (!%p171_p3), %v2532_v3  ;;  %v2391_v5 = vld [vmem:[%s2900_s1 + $0x80] sm:$0xff] (!%p171_p3)   ;;  %v2386_v6 = vld [vmem:[%s2900_s1 + $0x18] sm:$0xff] (!%p171_p3)   ;;  %v2393_v7 = vld [vmem:[%s2900_s1 + $0x88] sm:$0xff] (!%p171_p3)  }
   0x8   : > { %929 = vmatpush1.bf16.msra.mxu1 (!%p171_p3), %v2383_v0  ;;  %2155 = vmatprep.mubr.msk.bf16.mxu0 (!%p171_p3), %vm2533_vm0, %v2532_v3  ;;  %s205_s22 = smul.u32 (!%p171_p3), 50, %s2521_s12  ;;  %v2387_v8 = vld [vmem:[%s2900_s1 + $0x20] sm:$0xff] (!%p171_p3)   ;;  %v2395_v9 = vld [vmem:[%s2900_s1 + $0x90] sm:$0xff] (!%p171_p3)   ;;  %v2388_v10 = vld [vmem:[%s2900_s1 + $0x28] sm:$0xff] (!%p171_p3)  }
   0x9   : > { %930 = vmatprep.subr.bf16.mxu1 (!%p171_p3), %v2531_v1  ;;  %2140 = vmatpush3.bf16.msra.mxu0 (!%p171_p3), %v2391_v5  ;;  %v2397_v11 = vld [vmem:[%s2900_s1 + $0x98] sm:$0xff] (!%p171_p3)   ;;  %v2389_v12 = vld [vmem:[%s2900_s1 + $0x30] sm:$0xff] (!%p171_p3)   ;;  %v2399_v13 = vld [vmem:[%s2900_s1 + $0xa0] sm:$0xff] (!%p171_p3)  }
   0xa   : > { %p206_p4 = scmp.lt.s32.totalorder (!%p171_p3), %s205_s22, 99  ;;  %2141 = vmatprep.subr.bf16.mxu0 (!%p171_p3), %v2532_v3  ;;  %v2390_v14 = vld [vmem:[%s2900_s1 + $0x38] sm:$0xff] (!%p171_p3)   ;;  %v2401_v16 = vld [vmem:[%s2900_s1 + $0xa8] sm:$0xff] (!%p171_p3)   ;;  %v2392_v17 = vld [vmem:[%s2900_s1 + $0x40] sm:$0xff] (!%p171_p3)  }
   0xb   : > { %v2403_v18 = vld [vmem:[%s2900_s1 + $0xb0] sm:$0xff] (!%p171_p3)   ;;  %v2394_v19 = vld [vmem:[%s2900_s1 + $0x48] sm:$0xff] (!%p171_p3)   ;;  %v2405_v20 = vld [vmem:[%s2900_s1 + $0xb8] sm:$0xff] (!%p171_p3)  }
   0xc   : > { %931 = vmatpush1.bf16.msra.mxu1 (!%p171_p3), %v2384_v2  ;;  %v2396_v22 = vld [vmem:[%s2900_s1 + $0x50] sm:$0xff] (!%p171_p3)   ;;  %v2398_v23 = vld [vmem:[%s2900_s1 + $0x58] sm:$0xff] (!%p171_p3)   ;;  %v2400_v25 = vld [vmem:[%s2900_s1 + $0x60] sm:$0xff] (!%p171_p3)  }
   0xd   : > { %932 = vmatprep.subr.bf16.mxu1 (!%p171_p3), %v2531_v1  ;;  %2142 = vmatpush3.bf16.msra.mxu0 (!%p171_p3), %v2393_v7  ;;  %v2402_v26 = vld [vmem:[%s2900_s1 + $0x68] sm:$0xff] (!%p171_p3)   ;;  %v2404_v28 = vld [vmem:[%s2900_s1 + $0x70] sm:$0xff] (!%p171_p3)   ;;  %v2406_v29 = vld [vmem:[%s2900_s1 + $0x78] sm:$0xff] (!%p171_p3)  }
   0xe   : > { %s2908_s22 = smov (!%p206_p4, %s205_s22), 99  ;;  %2143 = vmatprep.subr.bf16.mxu0 %v2532_v3 }
   0xf   : > { %s2355_s10 = smul.u32 12, %s2908_s22 }
  0x10   : > { %933 = vmatpush1.bf16.msra.mxu1 %v2385_v4 }
  0x11   : > { %934 = vmatprep.subr.bf16.mxu1 %v2531_v1  ;;  %2144 = vmatpush3.bf16.msra.mxu0 %v2395_v9  ;;  %s2629_s20 = scalar_lea.vmem %s2899_s0, %s2355_s10 }
  0x12   : > { %2145 = vmatprep.subr.bf16.mxu0 %v2532_v3  ;;  %v2409_v15 = vld [vmem:[%s2629_s20 + $0x4] ss:$12 sps:$4 sm:$0xff]   ;;  %v2410_v21 = vld [vmem:[%s2629_s20 + $0x8] ss:$12 sps:$4 sm:$0xff]   ;;  %v2413_v24 = vld [vmem:[%s2629_s20 + $0x20] ss:$12 sps:$4 sm:$0xff]  }
  0x13   : > { %960 = vmatprep.mubr.bf16.mxu1 %v2409_v15  ;;  %v2417_v27 = vld [vmem:[%s2629_s20 + $0x38] ss:$12 sps:$4 sm:$0xff]   ;;  %v2407_v30 = vld [vmem:[%s2629_s20] ss:$12 sps:$4 sm:$0xff]   ;;  %v2421_v31 = vld [vmem:[%s2629_s20 + $0x50] ss:$12 sps:$4 sm:$0xff]  }
  0x14   : > { %935 = vmatpush1.bf16.msra.mxu1 %v2386_v6  ;;  %v2411_v32 = vld [vmem:[%s2629_s20 + $0x1c] ss:$12 sps:$4 sm:$0xff]   ;;  %v2414_v33 = vld [vmem:[%s2629_s20 + $0x18] ss:$12 sps:$4 sm:$0xff]   ;;  %v2415_v35 = vld [vmem:[%s2629_s20 + $0x34] ss:$12 sps:$4 sm:$0xff]  }
  0x15   : > { %936 = vmatprep.subr.bf16.mxu1 %v2531_v1  ;;  %2146 = vmatpush3.bf16.msra.mxu0 %v2397_v11  ;;  %v2425_v34 = vld [vmem:[%s2629_s20 + $0x68] ss:$12 sps:$4 sm:$0xff]   ;;  %v2418_v36 = vld [vmem:[%s2629_s20 + $0x30] ss:$12 sps:$4 sm:$0xff]   ;;  %v2429_v37 = vld [vmem:[%s2629_s20 + $0x80] ss:$12 sps:$4 sm:$0xff]  }
  0x16   : > { %2147 = vmatprep.subr.bf16.mxu0 %v2532_v3  ;;  %v2419_v38 = vld [vmem:[%s2629_s20 + $0x4c] ss:$12 sps:$4 sm:$0xff]   ;;  %v2422_v39 = vld [vmem:[%s2629_s20 + $0x48] ss:$12 sps:$4 sm:$0xff]   ;;  %v2423_v41 = vld [vmem:[%s2629_s20 + $0x64] ss:$12 sps:$4 sm:$0xff]  }
  0x17   : > { %v2433_v40 = vld [vmem:[%s2629_s20 + $0x98] ss:$12 sps:$4 sm:$0xff]   ;;  %v2426_v42 = vld [vmem:[%s2629_s20 + $0x60] ss:$12 sps:$4 sm:$0xff]   ;;  %v2437_v43 = vld [vmem:[%s2629_s20 + $0xb0] ss:$12 sps:$4 sm:$0xff]  }
  0x18   : > { %937 = vmatpush1.bf16.msra.mxu1 %v2387_v8  ;;  %v2427_v44 = vld [vmem:[%s2629_s20 + $0x7c] ss:$12 sps:$4 sm:$0xff]   ;;  %v2430_v45 = vld [vmem:[%s2629_s20 + $0x78] ss:$12 sps:$4 sm:$0xff]   ;;  %v2431_v47 = vld [vmem:[%s2629_s20 + $0x94] ss:$12 sps:$4 sm:$0xff]  }
  0x19   : > { %938 = vmatprep.subr.bf16.mxu1 %v2531_v1  ;;  %2148 = vmatpush3.bf16.msra.mxu0 %v2399_v13  ;;  %v2441_v46 = vld [vmem:[%s2629_s20 + $0xc8] ss:$12 sps:$4 sm:$0xff]   ;;  %v2434_v48 = vld [vmem:[%s2629_s20 + $0x90] ss:$12 sps:$4 sm:$0xff]   ;;  %v2445_v49 = vld [vmem:[%s2629_s20 + $0xe0] ss:$12 sps:$4 sm:$0xff]  }
  0x1a   : > { %2149 = vmatprep.subr.bf16.mxu0 %v2532_v3  ;;  %v2435_v50 = vld [vmem:[%s2629_s20 + $0xac] ss:$12 sps:$4 sm:$0xff]   ;;  %v2438_v51 = vld [vmem:[%s2629_s20 + $0xa8] ss:$12 sps:$4 sm:$0xff]   ;;  %v2439_v53 = vld [vmem:[%s2629_s20 + $0xc4] ss:$12 sps:$4 sm:$0xff]  }
  0x1b   : > { %v2449_v52 = vld [vmem:[%s2629_s20 + $0xf8] ss:$12 sps:$4 sm:$0xff]   ;;  %v2442_v54 = vld [vmem:[%s2629_s20 + $0xc0] ss:$12 sps:$4 sm:$0xff]   ;;  %v2453_v55 = vld [vmem:[%s2629_s20 + $0x110] ss:$12 sps:$4 sm:$0xff]  }
  0x1c   : > { %939 = vmatpush1.bf16.msra.mxu1 %v2388_v10  ;;  %v2443_v56 = vld [vmem:[%s2629_s20 + $0xdc] ss:$12 sps:$4 sm:$0xff]   ;;  %v2446_v57 = vld [vmem:[%s2629_s20 + $0xd8] ss:$12 sps:$4 sm:$0xff]   ;;  %v2447_v59 = vld [vmem:[%s2629_s20 + $0xf4] ss:$12 sps:$4 sm:$0xff]  }
  0x1d   : > { %940 = vmatprep.subr.bf16.mxu1 %v2531_v1  ;;  %2150 = vmatpush3.bf16.msra.mxu0 %v2401_v16  ;;  %v2457_v58 = vld [vmem:[%s2629_s20 + $0x128] ss:$12 sps:$4 sm:$0xff]   ;;  %v2450_v60 = vld [vmem:[%s2629_s20 + $0xf0] ss:$12 sps:$4 sm:$0xff]   ;;  %v2461_v61 = vld [vmem:[%s2629_s20 + $0x140] ss:$12 sps:$4 sm:$0xff]  }
  0x1e   : > { %2151 = vmatprep.subr.bf16.mxu0 %v2532_v3  ;;  %v2451_v62 = vld [vmem:[%s2629_s20 + $0x10c] ss:$12 sps:$4 sm:$0xff]   ;;  %v2454_v63 = vld [vmem:[%s2629_s20 + $0x108] ss:$12 sps:$4 sm:$0xff]   ;;  %v2469_v4 = vld [vmem:[%s2629_s20 + $0x170] ss:$12 sps:$4 sm:$0xff]  }
  0x1f   : > { %v2465_v0 = vld [vmem:[%s2629_s20 + $0x158] ss:$12 sps:$4 sm:$0xff]   ;;  %v2458_v2 = vld [vmem:[%s2629_s20 + $0x120] ss:$12 sps:$4 sm:$0xff]   ;;  %v2459_v5 = vld [vmem:[%s2629_s20 + $0x13c] ss:$12 sps:$4 sm:$0xff]  }
  0x20   : > { %941 = vmatpush1.bf16.msra.mxu1 %v2389_v12  ;;  %v2462_v6 = vld [vmem:[%s2629_s20 + $0x138] ss:$12 sps:$4 sm:$0xff]   ;;  %v2473_v7 = vld [vmem:[%s2629_s20 + $0x188] ss:$12 sps:$4 sm:$0xff]   ;;  %v2466_v9 = vld [vmem:[%s2629_s20 + $0x150] ss:$12 sps:$4 sm:$0xff]  }
  0x21   : > { %942 = vmatprep.subr.bf16.mxu1 %v2531_v1  ;;  %2152 = vmatpush3.bf16.msra.mxu0 %v2403_v18  ;;  %v2463_v8 = vld [vmem:[%s2629_s20 + $0x154] ss:$12 sps:$4 sm:$0xff]   ;;  %v2467_v11 = vld [vmem:[%s2629_s20 + $0x16c] ss:$12 sps:$4 sm:$0xff]   ;;  %v2485_v16 = vld [vmem:[%s2629_s20 + $0x1d0] ss:$12 sps:$4 sm:$0xff]  }
  0x22   : > { %2153 = vmatprep.subr.bf16.mxu0 %v2532_v3  ;;  %v2477_v10 = vld [vmem:[%s2629_s20 + $0x1a0] ss:$12 sps:$4 sm:$0xff]   ;;  %v2470_v12 = vld [vmem:[%s2629_s20 + $0x168] ss:$12 sps:$4 sm:$0xff]   ;;  %v2481_v13 = vld [vmem:[%s2629_s20 + $0x1b8] ss:$12 sps:$4 sm:$0xff]  }
  0x23   : > { %v2474_v15 = vld [vmem:[%s2629_s20 + $0x180] ss:$12 sps:$4 sm:$0xff]   ;;  %v2478_v18 = vld [vmem:[%s2629_s20 + $0x198] ss:$12 sps:$4 sm:$0xff]  }
  0x24   : > { %943 = vmatpush1.bf16.msra.mxu1 %v2390_v14  ;;  %v2471_v14 = vld [vmem:[%s2629_s20 + $0x184] ss:$12 sps:$4 sm:$0xff]  }
  0x25   : > { %944 = vmatprep.subr.bf16.mxu1 %v2531_v1  ;;  %2154 = vmatpush3.bf16.msra.mxu0 %v2405_v20  ;;  %v2479_v20 = vld [vmem:[%s2629_s20 + $0x1b4] ss:$12 sps:$4 sm:$0xff]  }
  0x28   : > { %945 = vmatpush1.bf16.msra.mxu1 %v2392_v17  ;;  %2156 = vmatmul.mubr.bf16.vlgmr.msra.gmra.mrb[0].mxu0 %v2410_v21  ;;  %v2475_v17 = vld [vmem:[%s2629_s20 + $0x19c] ss:$12 sps:$4 sm:$0xff]  }
  0x29   : > { %946 = vmatprep.subr.bf16.mxu1 %v2531_v1  ;;  %2159 = vmatprep.mubr.msk.bf16.mxu0 %vm2533_vm0, %v2532_v3  ;;  %v2482_v21 = vld [vmem:[%s2629_s20 + $0x1b0] ss:$12 sps:$4 sm:$0xff]  }
  0x2c   : > { %947 = vmatpush1.bf16.msra.mxu1 %v2394_v19  ;;  %v2489_v19 = vld [vmem:[%s2629_s20 + $0x1e8] ss:$12 sps:$4 sm:$0xff]  }
  0x2d   : > { %948 = vmatprep.subr.bf16.mxu1 %v2531_v1 }
  0x30   : > { %949 = vmatpush1.bf16.msra.mxu1 %v2396_v22  ;;  %2160 = vmatmul.mubr.bf16.gmra.mrb[4].mxu0 %v2413_v24  ;;  %v2493_v22 = vld [vmem:[%s2629_s20 + $0x200] ss:$12 sps:$4 sm:$0xff]   ;;  %v2486_v24 = vld [vmem:[%s2629_s20 + $0x1c8] ss:$12 sps:$4 sm:$0xff]  }
  0x31   : > { %950 = vmatprep.subr.bf16.mxu1 %v2531_v1  ;;  %2163 = vmatprep.mubr.msk.bf16.mxu0 %vm2533_vm0, %v2532_v3 }
  0x34   : > { %951 = vmatpush1.bf16.msra.mxu1 %v2398_v23  ;;  %v2483_v23 = vld [vmem:[%s2629_s20 + $0x1cc] ss:$12 sps:$4 sm:$0xff]  }
  0x35   : > { %952 = vmatprep.subr.bf16.mxu1 %v2531_v1 }
  0x38   : > { %953 = vmatpush1.bf16.msra.mxu1 %v2400_v25  ;;  %2164 = vmatmul.mubr.bf16.gmra.mrb[8].mxu0 %v2417_v27  ;;  %v2497_v25 = vld [vmem:[%s2629_s20 + $0x218] ss:$12 sps:$4 sm:$0xff]   ;;  %v2490_v27 = vld [vmem:[%s2629_s20 + $0x1e0] ss:$12 sps:$4 sm:$0xff]  }
  0x39   : > { %954 = vmatprep.subr.bf16.mxu1 %v2531_v1  ;;  %2167 = vmatprep.mubr.msk.bf16.mxu0 %vm2533_vm0, %v2532_v3 }
  0x3c   : > { %955 = vmatpush1.bf16.msra.mxu1 %v2402_v26  ;;  %v2487_v26 = vld [vmem:[%s2629_s20 + $0x1e4] ss:$12 sps:$4 sm:$0xff]  }
  0x3d   : > { %956 = vmatprep.subr.bf16.mxu1 %v2531_v1 }
  0x40   : > { %957 = vmatpush1.bf16.msra.mxu1 %v2404_v28  ;;  %2168 = vmatmul.mubr.bf16.gmra.mrb[12].mxu0 %v2421_v31  ;;  %v2501_v28 = vld [vmem:[%s2629_s20 + $0x230] ss:$12 sps:$4 sm:$0xff]   ;;  %v2505_v31 = vld [vmem:[%s2629_s20 + $0x248] ss:$12 sps:$4 sm:$0xff]  }
  0x41   : > { %958 = vmatprep.subr.bf16.mxu1 %v2531_v1  ;;  %2171 = vmatprep.mubr.msk.bf16.mxu0 %vm2533_vm0, %v2532_v3  ;;  %v2455_v1 = vld [vmem:[%s2629_s20 + $0x124] ss:$12 sps:$4 sm:$0xff]  }
  0x44   : > { %959 = vmatpush1.bf16.msra.mxu1 %v2406_v29  ;;  %v2491_v29 = vld [vmem:[%s2629_s20 + $0x1fc] ss:$12 sps:$4 sm:$0xff]  }
  0x47   : > { %961 = vmatmul.mubr.bf16.vlgmr.msra.gmra.mrb[0].mxu1 %v2407_v30  ;;  %v2494_v30 = vld [vmem:[%s2629_s20 + $0x1f8] ss:$12 sps:$4 sm:$0xff]  }
  0x48   : > { %968 = vmatprep.mubr.bf16.mxu1 %v2411_v32  ;;  %2172 = vmatmul.mubr.bf16.gmra.mrb[16].mxu0 %v2425_v34  ;;  %v2495_v32 = vld [vmem:[%s2629_s20 + $0x214] ss:$12 sps:$4 sm:$0xff]   ;;  %v2499_v34 = vld [vmem:[%s2629_s20 + $0x22c] ss:$12 sps:$4 sm:$0xff]  }
  0x49   : > { %2175 = vmatprep.mubr.msk.bf16.mxu0 %vm2533_vm0, %v2532_v3 }
  0x4f   : > { %969 = vmatmul.mubr.bf16.gmra.mrb[4].mxu1 %v2414_v33  ;;  %v2498_v33 = vld [vmem:[%s2629_s20 + $0x210] ss:$12 sps:$4 sm:$0xff]  }
  0x50   : > { %976 = vmatprep.mubr.bf16.mxu1 %v2415_v35  ;;  %2176 = vmatmul.mubr.bf16.gmra.mrb[20].mxu0 %v2429_v37  ;;  %v2502_v35 = vld [vmem:[%s2629_s20 + $0x228] ss:$12 sps:$4 sm:$0xff]  }
  0x51   : > { %2179 = vmatprep.mubr.msk.bf16.mxu0 %vm2533_vm0, %v2532_v3 }
  0x57   : > { %977 = vmatmul.mubr.bf16.gmra.mrb[8].mxu1 %v2418_v36  ;;  %v2503_v36 = vld [vmem:[%s2629_s20 + $0x244] ss:$12 sps:$4 sm:$0xff]  }
  0x58   : > { %984 = vmatprep.mubr.bf16.mxu1 %v2419_v38  ;;  %2180 = vmatmul.mubr.bf16.gmra.mrb[24].mxu0 %v2433_v40  ;;  %v2506_v38 = vld [vmem:[%s2629_s20 + $0x240] ss:$12 sps:$4 sm:$0xff]   ;;  %s1754_s20 = sshll.u32 %s2908_s22, 2 }
  0x59   : > { %2183 = vmatprep.mubr.msk.bf16.mxu0 %vm2533_vm0, %v2532_v3  ;;  %s2815_s28 = scalar_lea.vmem %s2902_s3, %s1754_s20 }
  0x5f   : > { %985 = vmatmul.mubr.bf16.gmra.mrb[12].mxu1 %v2422_v39 }
  0x60   : > { %992 = vmatprep.mubr.bf16.mxu1 %v2423_v41  ;;  %2184 = vmatmul.mubr.bf16.gmra.mrb[28].mxu0 %v2437_v43 }
  0x61   : > { %2187 = vmatprep.mubr.msk.bf16.mxu0 %vm2533_vm0, %v2532_v3 }
  0x67   : > { %993 = vmatmul.mubr.bf16.gmra.mrb[16].mxu1 %v2426_v42 }
  0x68   : > { %1000 = vmatprep.mubr.bf16.mxu1 %v2427_v44  ;;  %2188 = vmatmul.mubr.bf16.gmra.mrb[32].mxu0 %v2441_v46 }
  0x69   : > { %2191 = vmatprep.mubr.msk.bf16.mxu0 %vm2533_vm0, %v2532_v3 }
  0x6f   : > { %1001 = vmatmul.mubr.bf16.gmra.mrb[20].mxu1 %v2430_v45 }
  0x70   : > { %1008 = vmatprep.mubr.bf16.mxu1 %v2431_v47  ;;  %2192 = vmatmul.mubr.bf16.gmra.mrb[36].mxu0 %v2445_v49  ;;  %v2807_v49 = vld [vmem:[%s2901_s2] ss:$0 sm:$0xff] }
  0x71   : > { %2195 = vmatprep.mubr.msk.bf16.mxu0 %vm2533_vm0, %v2532_v3 }
  0x77   : > { %1009 = vmatmul.mubr.bf16.gmra.mrb[24].mxu1 %v2434_v48 }
  0x78   : > { %1016 = vmatprep.mubr.bf16.mxu1 %v2435_v50  ;;  %2196 = vmatmul.mubr.bf16.gmra.mrb[40].mxu0 %v2449_v52 }
  0x79   : > { %2199 = vmatprep.mubr.msk.bf16.mxu0 %vm2533_vm0, %v2532_v3 }
  0x7f   : > { %1017 = vmatmul.mubr.bf16.gmra.mrb[28].mxu1 %v2438_v51 }
  0x80   : > { %1024 = vmatprep.mubr.bf16.mxu1 %v2439_v53  ;;  %2200 = vmatmul.mubr.bf16.gmra.mrb[44].mxu0 %v2453_v55 }
  0x81   : > { %2203 = vmatprep.mubr.msk.bf16.mxu0 %vm2533_vm0, %v2532_v3 }
  0x87   : > { %1025 = vmatmul.mubr.bf16.gmra.mrb[32].mxu1 %v2442_v54 }
  0x88   : > { %1032 = vmatprep.mubr.bf16.mxu1 %v2443_v56  ;;  %2204 = vmatmul.mubr.bf16.gmra.mrb[48].mxu0 %v2457_v58 }
  0x89   : > { %2207 = vmatprep.mubr.msk.bf16.mxu0 %vm2533_vm0, %v2532_v3 }
  0x8f   : > { %1033 = vmatmul.mubr.bf16.gmra.mrb[36].mxu1 %v2446_v57 }
  0x90   : > { %1040 = vmatprep.mubr.bf16.mxu1 %v2447_v59  ;;  %2208 = vmatmul.mubr.bf16.gmra.mrb[52].mxu0 %v2461_v61 }
  0x91   : > { %2211 = vmatprep.mubr.msk.bf16.mxu0 %vm2533_vm0, %v2532_v3 }
  0x97   : > { %1041 = vmatmul.mubr.bf16.gmra.mrb[40].mxu1 %v2450_v60 }
  0x98   : > { %1048 = vmatprep.mubr.bf16.mxu1 %v2451_v62  ;;  %2212 = vmatmul.mubr.bf16.gmra.mrb[56].mxu0 %v2465_v0 }
  0x99   : > { %2215 = vmatprep.mubr.msk.bf16.mxu0 %vm2533_vm0, %v2532_v3 }
  0x9f   : > { %1049 = vmatmul.mubr.bf16.gmra.mrb[44].mxu1 %v2454_v63 }
  0xa0   : > { %1056 = vmatprep.mubr.bf16.mxu1 %v2455_v1  ;;  %2216 = vmatmul.mubr.bf16.gmra.mrb[60].mxu0 %v2469_v4 }
  0xa1   : > { %2219 = vmatprep.mubr.msk.bf16.mxu0 %vm2533_vm0, %v2532_v3 }
  0xa7   : > { %1057 = vmatmul.mubr.bf16.gmra.mrb[48].mxu1 %v2458_v2 }
  0xa8   : > { %1064 = vmatprep.mubr.bf16.mxu1 %v2459_v5  ;;  %2220 = vmatmul.mubr.bf16.gmra.mrb[64].mxu0 %v2473_v7 }
  0xa9   : > { %2223 = vmatprep.mubr.msk.bf16.mxu0 %vm2533_vm0, %v2532_v3 }
  0xaf   : > { %1065 = vmatmul.mubr.bf16.gmra.mrb[52].mxu1 %v2462_v6 }
  0xb0   : > { %1072 = vmatprep.mubr.bf16.mxu1 %v2463_v8  ;;  %2224 = vmatmul.mubr.bf16.gmra.mrb[68].mxu0 %v2477_v10 }
  0xb1   : > { %2227 = vmatprep.mubr.msk.bf16.mxu0 %vm2533_vm0, %v2532_v3 }
  0xb7   : > { %1073 = vmatmul.mubr.bf16.gmra.mrb[56].mxu1 %v2466_v9 }
  0xb8   : > { %1080 = vmatprep.mubr.bf16.mxu1 %v2467_v11  ;;  %2228 = vmatmul.mubr.bf16.gmra.mrb[72].mxu0 %v2481_v13 }
  0xb9   : > { %2231 = vmatprep.mubr.msk.bf16.mxu0 %vm2533_vm0, %v2532_v3 }
  0xbf   : > { %1081 = vmatmul.mubr.bf16.gmra.mrb[60].mxu1 %v2470_v12 }
  0xc0   : > { %1088 = vmatprep.mubr.bf16.mxu1 %v2471_v14  ;;  %2232 = vmatmul.mubr.bf16.gmra.mrb[76].mxu0 %v2485_v16 }
  0xc1   : > { %2235 = vmatprep.mubr.msk.bf16.mxu0 %vm2533_vm0, %v2532_v3 }
  0xc7   : > { %1089 = vmatmul.mubr.bf16.gmra.mrb[64].mxu1 %v2474_v15 }
  0xc8   : > { %1096 = vmatprep.mubr.bf16.mxu1 %v2475_v17  ;;  %2236 = vmatmul.mubr.bf16.gmra.mrb[80].mxu0 %v2489_v19 }
  0xc9   : > { %2239 = vmatprep.mubr.msk.bf16.mxu0 %vm2533_vm0, %v2532_v3 }
  0xcf   : > { %1097 = vmatmul.mubr.bf16.gmra.mrb[68].mxu1 %v2478_v18 }
  0xd0   : > { %1104 = vmatprep.mubr.bf16.mxu1 %v2479_v20  ;;  %2240 = vmatmul.mubr.bf16.gmra.mrb[84].mxu0 %v2493_v22 }
  0xd1   : > { %2243 = vmatprep.mubr.msk.bf16.mxu0 %vm2533_vm0, %v2532_v3 }
  0xd7   : > { %1105 = vmatmul.mubr.bf16.gmra.mrb[72].mxu1 %v2482_v21 }
  0xd8   : > { %1112 = vmatprep.mubr.bf16.mxu1 %v2483_v23  ;;  %2244 = vmatmul.mubr.bf16.gmra.mrb[88].mxu0 %v2497_v25 }
  0xd9   : > { %2247 = vmatprep.mubr.msk.bf16.mxu0 %vm2533_vm0, %v2532_v3 }
  0xdf   : > { %1113 = vmatmul.mubr.bf16.gmra.mrb[76].mxu1 %v2486_v24 }
  0xe0   : > { %1120 = vmatprep.mubr.bf16.mxu1 %v2487_v26  ;;  %2248 = vmatmul.mubr.bf16.gmra.mrb[92].mxu0 %v2501_v28 }
  0xe1   : > { %2251 = vmatprep.mubr.msk.bf16.mxu0 %vm2533_vm0, %v2532_v3 }
  0xe7   : > { %1121 = vmatmul.mubr.bf16.gmra.mrb[80].mxu1 %v2490_v27 }
  0xe8   : > { %1128 = vmatprep.mubr.bf16.mxu1 %v2491_v29  ;;  %2252 = vmatmul.mubr.bf16.gmra.mrb[96].mxu0 %v2505_v31 }
  0xef   : > { %1129 = vmatmul.mubr.bf16.gmra.mrb[84].mxu1 %v2494_v30 }
  0xf0   : > { %1136 = vmatprep.mubr.bf16.mxu1 %v2495_v32 }
  0xf7   : > { %1137 = vmatmul.mubr.bf16.gmra.mrb[88].mxu1 %v2498_v33 }
  0xf8   : > { %1144 = vmatprep.mubr.bf16.mxu1 %v2499_v34 }
  0xfb   : > { %v1195_v37 = vpop.f32.mrb[0].mxu0 }
  0xfc   : > { %v2157_v39 = vpop.f32.mrb[1].mxu0 }
  0xfd   : > { %v1198_v40 = vpop.f32.mrb[2].mxu0 }
  0xfe   : > { %v2158_v3 = vpop.f32.mrb[3].mxu0 }
  0xff   : > { %1145 = vmatmul.mubr.bf16.gmra.mrb[92].mxu1 %v2502_v35 }
 0x100   : > { %1152 = vmatprep.mubr.bf16.mxu1 %v2503_v36 }
 0x103   : > { %v1203_v41 = vpop.f32.mrb[4].mxu0 }
 0x104   : > { %v2161_v42 = vpop.f32.mrb[5].mxu0 }
 0x105   : > { %v1206_v43 = vpop.f32.mrb[6].mxu0 }
 0x106   : > { %v2162_v44 = vpop.f32.mrb[7].mxu0 }
 0x107   : > { %1153 = vmatmul.mubr.bf16.gmra.mrb[96].mxu1 %v2506_v38 }
 0x10b   : > { %v1211_v45 = vpop.f32.mrb[8].mxu0 }
 0x10c   : > { %v2165_v46 = vpop.f32.mrb[9].mxu0 }
 0x10d   : > { %v1214_v47 = vpop.f32.mrb[10].mxu0 }
 0x10e   : > { %v2166_v48 = vpop.f32.mrb[11].mxu0 }
 0x113   : > { %v1219_v51 = vpop.f32.mrb[12].mxu0 }
 0x114   : > { %v2169_v54 = vpop.f32.mrb[13].mxu0 }
 0x115   : > { %v1222_v56 = vpop.f32.mrb[14].mxu0 }
 0x116   : > { %v2170_v60 = vpop.f32.mrb[15].mxu0 }
 0x11a   : > { %v962_v50 = vpop.f32.mrb[0].mxu1 }
 0x11b   : > { %v963_v52 = vadd.f32 %v2807_v49, %v962_v50  ;;  %v964_v53 = vpop.f32.mrb[1].mxu1  ;;  %v1227_v0 = vpop.f32.mrb[16].mxu0 }
 0x11c   : > { %v965_v55 = vpop.f32.mrb[2].mxu1  ;;  %v2173_v4 = vpop.f32.mrb[17].mxu0 }
 0x11d   : > { %v1196_v57 = vadd.f32 %v1195_v37, %v963_v52  ;;  %v966_v58 = vadd.f32 %v2807_v49, %v965_v55  ;;  %v967_v59 = vpop.f32.mrb[3].mxu1  ;;  %v1230_v6 = vpop.f32.mrb[18].mxu0 }
 0x11e   : > { %v2174_v10 = vpop.f32.mrb[19].mxu0 }
 0x11f   : > { %v1199_v61 = vadd.f32 %v1198_v40, %v966_v58 }
 0x121   : > { %v1960_v62 = vpack.c.bf16 %v1199_v61, %v1196_v57 }
 0x122   : > { %v970_v63 = vpop.f32.mrb[4].mxu1 }
 0x123   : > { %1961 = vst [vmem:[%s2815_s28] sm:$0xff] %v1960_v62   ;;  %v971_v1 = vadd.f32 %v2807_v49, %v970_v63  ;;  %v972_v2 = vpop.f32.mrb[5].mxu1  ;;  %v1235_v14 = vpop.f32.mrb[20].mxu0 }
 0x124   : > { %v973_v5 = vpop.f32.mrb[6].mxu1  ;;  %v2177_v17 = vpop.f32.mrb[21].mxu0 }
 0x125   : > { %v1204_v7 = vadd.f32 %v1203_v41, %v971_v1  ;;  %v974_v8 = vadd.f32 %v2807_v49, %v973_v5  ;;  %v975_v9 = vpop.f32.mrb[7].mxu1  ;;  %v1238_v19 = vpop.f32.mrb[22].mxu0 }
 0x126   : > { %v2178_v23 = vpop.f32.mrb[23].mxu0 }
 0x127   : > { %v1207_v11 = vadd.f32 %v1206_v43, %v974_v8 }
 0x129   : > { %v1965_v12 = vpack.c.bf16 %v1207_v11, %v1204_v7 }
 0x12a   : > { %v978_v13 = vpop.f32.mrb[8].mxu1 }
 0x12b   : > { %2082 = vst [vmem:[%s2815_s28 + $0x8] sm:$0xff] %v1965_v12   ;;  %v979_v15 = vadd.f32 %v2807_v49, %v978_v13  ;;  %v980_v16 = vpop.f32.mrb[9].mxu1  ;;  %v1243_v27 = vpop.f32.mrb[24].mxu0 }
 0x12c   : > { %v981_v18 = vpop.f32.mrb[10].mxu1  ;;  %v2181_v30 = vpop.f32.mrb[25].mxu0 }
 0x12d   : > { %v1212_v20 = vadd.f32 %v1211_v45, %v979_v15  ;;  %v982_v21 = vadd.f32 %v2807_v49, %v981_v18  ;;  %v983_v22 = vpop.f32.mrb[11].mxu1  ;;  %v1246_v32 = vpop.f32.mrb[26].mxu0 }
 0x12e   : > { %v2182_v36 = vpop.f32.mrb[27].mxu0 }
 0x12f   : > { %v1215_v24 = vadd.f32 %v1214_v47, %v982_v21 }
 0x131   : > { %v1970_v25 = vpack.c.bf16 %v1215_v24, %v1212_v20 }
 0x132   : > { %v986_v26 = vpop.f32.mrb[12].mxu1 }
 0x133   : > { %2083 = vst [vmem:[%s2815_s28 + $0x10] sm:$0xff] %v1970_v25   ;;  %v987_v28 = vadd.f32 %v2807_v49, %v986_v26  ;;  %v988_v29 = vpop.f32.mrb[13].mxu1  ;;  %v1251_v40 = vpop.f32.mrb[28].mxu0 }
 0x134   : > { %v989_v31 = vpop.f32.mrb[14].mxu1  ;;  %v2185_v42 = vpop.f32.mrb[29].mxu0 }
 0x135   : > { %v1220_v33 = vadd.f32 %v1219_v51, %v987_v28  ;;  %v990_v34 = vadd.f32 %v2807_v49, %v989_v31  ;;  %v991_v35 = vpop.f32.mrb[15].mxu1  ;;  %v1254_v44 = vpop.f32.mrb[30].mxu0 }
 0x136   : > { %v2186_v48 = vpop.f32.mrb[31].mxu0 }
 0x137   : > { %v1223_v37 = vadd.f32 %v1222_v56, %v990_v34 }
 0x139   : > { %v1975_v38 = vpack.c.bf16 %v1223_v37, %v1220_v33 }
 0x13a   : > { %v994_v39 = vpop.f32.mrb[16].mxu1 }
 0x13b   : > { %2084 = vst [vmem:[%s2815_s28 + $0x18] sm:$0xff] %v1975_v38   ;;  %v995_v3 = vadd.f32 %v2807_v49, %v994_v39  ;;  %v996_v41 = vpop.f32.mrb[17].mxu1  ;;  %v1259_v53 = vpop.f32.mrb[32].mxu0 }
 0x13c   : > { %v997_v43 = vpop.f32.mrb[18].mxu1  ;;  %v2189_v56 = vpop.f32.mrb[33].mxu0 }
 0x13d   : > { %v1228_v45 = vadd.f32 %v1227_v0, %v995_v3  ;;  %v998_v46 = vadd.f32 %v2807_v49, %v997_v43  ;;  %v999_v47 = vpop.f32.mrb[19].mxu1  ;;  %v1262_v58 = vpop.f32.mrb[34].mxu0 }
 0x13e   : > { %v2190_v62 = vpop.f32.mrb[35].mxu0 }
 0x13f   : > { %v1231_v50 = vadd.f32 %v1230_v6, %v998_v46 }
 0x141   : > { %v1980_v51 = vpack.c.bf16 %v1231_v50, %v1228_v45 }
 0x142   : > { %v1002_v52 = vpop.f32.mrb[20].mxu1 }
 0x143   : > { %2085 = vst [vmem:[%s2815_s28 + $0x20] sm:$0xff] %v1980_v51   ;;  %v1003_v54 = vadd.f32 %v2807_v49, %v1002_v52  ;;  %v1004_v55 = vpop.f32.mrb[21].mxu1  ;;  %v1267_v2 = vpop.f32.mrb[36].mxu0 }
 0x144   : > { %v1005_v57 = vpop.f32.mrb[22].mxu1  ;;  %v2193_v6 = vpop.f32.mrb[37].mxu0 }
 0x145   : > { %v1236_v59 = vadd.f32 %v1235_v14, %v1003_v54  ;;  %v1006_v60 = vadd.f32 %v2807_v49, %v1005_v57  ;;  %v1007_v61 = vpop.f32.mrb[23].mxu1  ;;  %v1270_v8 = vpop.f32.mrb[38].mxu0 }
 0x146   : > { %v2194_v12 = vpop.f32.mrb[39].mxu0 }
 0x147   : > { %v1239_v63 = vadd.f32 %v1238_v19, %v1006_v60 }
 0x149   : > { %v1985_v0 = vpack.c.bf16 %v1239_v63, %v1236_v59 }
 0x14a   : > { %v1010_v1 = vpop.f32.mrb[24].mxu1 }
 0x14b   : > { %2086 = vst [vmem:[%s2815_s28 + $0x28] sm:$0xff] %v1985_v0   ;;  %v1011_v4 = vadd.f32 %v2807_v49, %v1010_v1  ;;  %v1012_v5 = vpop.f32.mrb[25].mxu1  ;;  %v1275_v16 = vpop.f32.mrb[40].mxu0 }
 0x14c   : > { %v1013_v7 = vpop.f32.mrb[26].mxu1  ;;  %v2197_v19 = vpop.f32.mrb[41].mxu0 }
 0x14d   : > { %v1244_v9 = vadd.f32 %v1243_v27, %v1011_v4  ;;  %v1014_v10 = vadd.f32 %v2807_v49, %v1013_v7  ;;  %v1015_v11 = vpop.f32.mrb[27].mxu1  ;;  %v1278_v21 = vpop.f32.mrb[42].mxu0 }
 0x14e   : > { %v2198_v25 = vpop.f32.mrb[43].mxu0 }
 0x14f   : > { %v1247_v13 = vadd.f32 %v1246_v32, %v1014_v10 }
 0x151   : > { %v1990_v14 = vpack.c.bf16 %v1247_v13, %v1244_v9 }
 0x152   : > { %v1018_v15 = vpop.f32.mrb[28].mxu1 }
 0x153   : > { %2087 = vst [vmem:[%s2815_s28 + $0x30] sm:$0xff] %v1990_v14   ;;  %v1019_v17 = vadd.f32 %v2807_v49, %v1018_v15  ;;  %v1020_v18 = vpop.f32.mrb[29].mxu1  ;;  %v1283_v29 = vpop.f32.mrb[44].mxu0 }
 0x154   : > { %v1021_v20 = vpop.f32.mrb[30].mxu1  ;;  %v2201_v32 = vpop.f32.mrb[45].mxu0 }
 0x155   : > { %v1252_v22 = vadd.f32 %v1251_v40, %v1019_v17  ;;  %v1022_v23 = vadd.f32 %v2807_v49, %v1021_v20  ;;  %v1023_v24 = vpop.f32.mrb[31].mxu1  ;;  %v1286_v34 = vpop.f32.mrb[46].mxu0 }
 0x156   : > { %v2202_v38 = vpop.f32.mrb[47].mxu0 }
 0x157   : > { %v1255_v26 = vadd.f32 %v1254_v44, %v1022_v23 }
 0x159   : > { %v1995_v27 = vpack.c.bf16 %v1255_v26, %v1252_v22 }
 0x15a   : > { %v1026_v28 = vpop.f32.mrb[32].mxu1 }
 0x15b   : > { %2088 = vst [vmem:[%s2815_s28 + $0x38] sm:$0xff] %v1995_v27   ;;  %v1027_v30 = vadd.f32 %v2807_v49, %v1026_v28  ;;  %v1028_v31 = vpop.f32.mrb[33].mxu1  ;;  %v1291_v41 = vpop.f32.mrb[48].mxu0 }
 0x15c   : > { %v1029_v33 = vpop.f32.mrb[34].mxu1  ;;  %v2205_v44 = vpop.f32.mrb[49].mxu0 }
 0x15d   : > { %v1260_v35 = vadd.f32 %v1259_v53, %v1027_v30  ;;  %v1030_v36 = vadd.f32 %v2807_v49, %v1029_v33  ;;  %v1031_v37 = vpop.f32.mrb[35].mxu1  ;;  %v1294_v46 = vpop.f32.mrb[50].mxu0 }
 0x15e   : > { %v2206_v51 = vpop.f32.mrb[51].mxu0 }
 0x15f   : > { %v1263_v39 = vadd.f32 %v1262_v58, %v1030_v36 }
 0x161   : > { %v2000_v40 = vpack.c.bf16 %v1263_v39, %v1260_v35 }
 0x162   : > { %v1034_v3 = vpop.f32.mrb[36].mxu1 }
 0x163   : > { %2089 = vst [vmem:[%s2815_s28 + $0x40] sm:$0xff] %v2000_v40   ;;  %v1035_v42 = vadd.f32 %v2807_v49, %v1034_v3  ;;  %v1036_v43 = vpop.f32.mrb[37].mxu1  ;;  %v1299_v55 = vpop.f32.mrb[52].mxu0 }
 0x164   : > { %v1037_v45 = vpop.f32.mrb[38].mxu1  ;;  %v2209_v58 = vpop.f32.mrb[53].mxu0 }
 0x165   : > { %v1268_v47 = vadd.f32 %v1267_v2, %v1035_v42  ;;  %v1038_v48 = vadd.f32 %v2807_v49, %v1037_v45  ;;  %v1039_v50 = vpop.f32.mrb[39].mxu1  ;;  %v1302_v60 = vpop.f32.mrb[54].mxu0 }
 0x166   : > { %v2210_v0 = vpop.f32.mrb[55].mxu0 }
 0x167   : > { %v1271_v52 = vadd.f32 %v1270_v8, %v1038_v48 }
 0x169   : > { %v2005_v53 = vpack.c.bf16 %v1271_v52, %v1268_v47 }
 0x16a   : > { %v1042_v54 = vpop.f32.mrb[40].mxu1 }
 0x16b   : > { %2090 = vst [vmem:[%s2815_s28 + $0x48] sm:$0xff] %v2005_v53   ;;  %v1043_v56 = vadd.f32 %v2807_v49, %v1042_v54  ;;  %v1044_v57 = vpop.f32.mrb[41].mxu1  ;;  %v1307_v5 = vpop.f32.mrb[56].mxu0 }
 0x16c   : > { %v1045_v59 = vpop.f32.mrb[42].mxu1  ;;  %v2213_v8 = vpop.f32.mrb[57].mxu0 }
 0x16d   : > { %v1276_v61 = vadd.f32 %v1275_v16, %v1043_v56  ;;  %v1046_v62 = vadd.f32 %v2807_v49, %v1045_v59  ;;  %v1047_v63 = vpop.f32.mrb[43].mxu1  ;;  %v1310_v10 = vpop.f32.mrb[58].mxu0 }
 0x16e   : > { %v2214_v14 = vpop.f32.mrb[59].mxu0 }
 0x16f   : > { %v1279_v1 = vadd.f32 %v1278_v21, %v1046_v62 }
 0x171   : > { %v2010_v2 = vpack.c.bf16 %v1279_v1, %v1276_v61 }
 0x172   : > { %v1050_v4 = vpop.f32.mrb[44].mxu1 }
 0x173   : > { %2091 = vst [vmem:[%s2815_s28 + $0x50] sm:$0xff] %v2010_v2   ;;  %v1051_v6 = vadd.f32 %v2807_v49, %v1050_v4  ;;  %v1052_v7 = vpop.f32.mrb[45].mxu1  ;;  %v1315_v18 = vpop.f32.mrb[60].mxu0 }
 0x174   : > { %v1053_v9 = vpop.f32.mrb[46].mxu1  ;;  %v2217_v21 = vpop.f32.mrb[61].mxu0 }
 0x175   : > { %v1284_v11 = vadd.f32 %v1283_v29, %v1051_v6  ;;  %v1054_v12 = vadd.f32 %v2807_v49, %v1053_v9  ;;  %v1055_v13 = vpop.f32.mrb[47].mxu1  ;;  %v1318_v23 = vpop.f32.mrb[62].mxu0 }
 0x176   : > { %v2218_v27 = vpop.f32.mrb[63].mxu0 }
 0x177   : > { %v1287_v15 = vadd.f32 %v1286_v34, %v1054_v12 }
 0x179   : > { %v2015_v16 = vpack.c.bf16 %v1287_v15, %v1284_v11 }
 0x17a   : > { %v1058_v17 = vpop.f32.mrb[48].mxu1 }
 0x17b   : > { %2092 = vst [vmem:[%s2815_s28 + $0x58] sm:$0xff] %v2015_v16   ;;  %v1059_v19 = vadd.f32 %v2807_v49, %v1058_v17  ;;  %v1060_v20 = vpop.f32.mrb[49].mxu1  ;;  %v1323_v31 = vpop.f32.mrb[64].mxu0 }
 0x17c   : > { %v1061_v22 = vpop.f32.mrb[50].mxu1  ;;  %v2221_v34 = vpop.f32.mrb[65].mxu0 }
 0x17d   : > { %v1292_v24 = vadd.f32 %v1291_v41, %v1059_v19  ;;  %v1062_v25 = vadd.f32 %v2807_v49, %v1061_v22  ;;  %v1063_v26 = vpop.f32.mrb[51].mxu1  ;;  %v1326_v36 = vpop.f32.mrb[66].mxu0 }
 0x17e   : > { %v2222_v40 = vpop.f32.mrb[67].mxu0 }
 0x17f   : > { %v1295_v28 = vadd.f32 %v1294_v46, %v1062_v25 }
 0x181   : > { %v2020_v29 = vpack.c.bf16 %v1295_v28, %v1292_v24 }
 0x182   : > { %v1066_v30 = vpop.f32.mrb[52].mxu1 }
 0x183   : > { %2093 = vst [vmem:[%s2815_s28 + $0x60] sm:$0xff] %v2020_v29   ;;  %v1067_v32 = vadd.f32 %v2807_v49, %v1066_v30  ;;  %v1068_v33 = vpop.f32.mrb[53].mxu1  ;;  %v1331_v43 = vpop.f32.mrb[68].mxu0 }
 0x184   : > { %v1069_v35 = vpop.f32.mrb[54].mxu1  ;;  %v2225_v46 = vpop.f32.mrb[69].mxu0 }
 0x185   : > { %v1300_v37 = vadd.f32 %v1299_v55, %v1067_v32  ;;  %v1070_v38 = vadd.f32 %v2807_v49, %v1069_v35  ;;  %v1071_v39 = vpop.f32.mrb[55].mxu1  ;;  %v1334_v48 = vpop.f32.mrb[70].mxu0 }
 0x186   : > { %v2226_v53 = vpop.f32.mrb[71].mxu0 }
 0x187   : > { %v1303_v3 = vadd.f32 %v1302_v60, %v1070_v38 }
 0x189   : > { %v2025_v41 = vpack.c.bf16 %v1303_v3, %v1300_v37 }
 0x18a   : > { %v1074_v42 = vpop.f32.mrb[56].mxu1 }
 0x18b   : > { %2094 = vst [vmem:[%s2815_s28 + $0x68] sm:$0xff] %v2025_v41   ;;  %v1075_v44 = vadd.f32 %v2807_v49, %v1074_v42  ;;  %v1076_v45 = vpop.f32.mrb[57].mxu1  ;;  %v1339_v57 = vpop.f32.mrb[72].mxu0 }
 0x18c   : > { %v1077_v47 = vpop.f32.mrb[58].mxu1  ;;  %v2229_v60 = vpop.f32.mrb[73].mxu0 }
 0x18d   : > { %v1308_v50 = vadd.f32 %v1307_v5, %v1075_v44  ;;  %v1078_v51 = vadd.f32 %v2807_v49, %v1077_v47  ;;  %v1079_v52 = vpop.f32.mrb[59].mxu1  ;;  %v1342_v62 = vpop.f32.mrb[74].mxu0 }
 0x18e   : > { %v2230_v2 = vpop.f32.mrb[75].mxu0 }
 0x18f   : > { %v1311_v54 = vadd.f32 %v1310_v10, %v1078_v51 }
 0x191   : > { %v2030_v55 = vpack.c.bf16 %v1311_v54, %v1308_v50 }
 0x192   : > { %v1082_v56 = vpop.f32.mrb[60].mxu1 }
 0x193   : > { %2095 = vst [vmem:[%s2815_s28 + $0x70] sm:$0xff] %v2030_v55   ;;  %v1083_v58 = vadd.f32 %v2807_v49, %v1082_v56  ;;  %v1084_v59 = vpop.f32.mrb[61].mxu1  ;;  %v1347_v7 = vpop.f32.mrb[76].mxu0 }
 0x194   : > { %v1085_v61 = vpop.f32.mrb[62].mxu1  ;;  %v2233_v10 = vpop.f32.mrb[77].mxu0 }
 0x195   : > { %v1316_v63 = vadd.f32 %v1315_v18, %v1083_v58  ;;  %v1086_v0 = vadd.f32 %v2807_v49, %v1085_v61  ;;  %v1087_v1 = vpop.f32.mrb[63].mxu1  ;;  %v1350_v12 = vpop.f32.mrb[78].mxu0 }
 0x196   : > { %v2234_v16 = vpop.f32.mrb[79].mxu0 }
 0x197   : > { %v1319_v4 = vadd.f32 %v1318_v23, %v1086_v0 }
 0x199   : > { %v2035_v5 = vpack.c.bf16 %v1319_v4, %v1316_v63 }
 0x19a   : > { %v1090_v6 = vpop.f32.mrb[64].mxu1 }
 0x19b   : > { %2096 = vst [vmem:[%s2815_s28 + $0x78] sm:$0xff] %v2035_v5   ;;  %v1091_v8 = vadd.f32 %v2807_v49, %v1090_v6  ;;  %v1092_v9 = vpop.f32.mrb[65].mxu1  ;;  %v1355_v20 = vpop.f32.mrb[80].mxu0 }
 0x19c   : > { %v1093_v11 = vpop.f32.mrb[66].mxu1  ;;  %v2237_v23 = vpop.f32.mrb[81].mxu0 }
 0x19d   : > { %v1324_v13 = vadd.f32 %v1323_v31, %v1091_v8  ;;  %v1094_v14 = vadd.f32 %v2807_v49, %v1093_v11  ;;  %v1095_v15 = vpop.f32.mrb[67].mxu1  ;;  %v1358_v25 = vpop.f32.mrb[82].mxu0 }
 0x19e   : > { %v2238_v29 = vpop.f32.mrb[83].mxu0 }
 0x19f   : > { %v1327_v17 = vadd.f32 %v1326_v36, %v1094_v14 }
 0x1a1   : > { %v2040_v18 = vpack.c.bf16 %v1327_v17, %v1324_v13 }
 0x1a2   : > { %v1098_v19 = vpop.f32.mrb[68].mxu1 }
 0x1a3   : > { %2097 = vst [vmem:[%s2815_s28 + $0x80] sm:$0xff] %v2040_v18   ;;  %v1099_v21 = vadd.f32 %v2807_v49, %v1098_v19  ;;  %v1100_v22 = vpop.f32.mrb[69].mxu1  ;;  %v1363_v33 = vpop.f32.mrb[84].mxu0 }
 0x1a4   : > { %v1101_v24 = vpop.f32.mrb[70].mxu1  ;;  %v2241_v36 = vpop.f32.mrb[85].mxu0 }
 0x1a5   : > { %v1332_v26 = vadd.f32 %v1331_v43, %v1099_v21  ;;  %v1102_v27 = vadd.f32 %v2807_v49, %v1101_v24  ;;  %v1103_v28 = vpop.f32.mrb[71].mxu1  ;;  %v1366_v38 = vpop.f32.mrb[86].mxu0 }
 0x1a6   : > { %v2242_v41 = vpop.f32.mrb[87].mxu0 }
 0x1a7   : > { %v1335_v30 = vadd.f32 %v1334_v48, %v1102_v27 }
 0x1a9   : > { %v2045_v31 = vpack.c.bf16 %v1335_v30, %v1332_v26 }
 0x1aa   : > { %v1106_v32 = vpop.f32.mrb[72].mxu1 }
 0x1ab   : > { %2098 = vst [vmem:[%s2815_s28 + $0x88] sm:$0xff] %v2045_v31   ;;  %v1107_v34 = vadd.f32 %v2807_v49, %v1106_v32  ;;  %v1108_v35 = vpop.f32.mrb[73].mxu1  ;;  %v1371_v45 = vpop.f32.mrb[88].mxu0 }
 0x1ac   : > { %v1109_v37 = vpop.f32.mrb[74].mxu1  ;;  %v2245_v48 = vpop.f32.mrb[89].mxu0 }
 0x1ad   : > { %v1340_v39 = vadd.f32 %v1339_v57, %v1107_v34  ;;  %v1110_v40 = vadd.f32 %v2807_v49, %v1109_v37  ;;  %v1111_v3 = vpop.f32.mrb[75].mxu1  ;;  %v1374_v51 = vpop.f32.mrb[90].mxu0 }
 0x1ae   : > { %v2246_v55 = vpop.f32.mrb[91].mxu0 }
 0x1af   : > { %v1343_v42 = vadd.f32 %v1342_v62, %v1110_v40 }
 0x1b1   : > { %v2050_v43 = vpack.c.bf16 %v1343_v42, %v1340_v39 }
 0x1b2   : > { %v1114_v44 = vpop.f32.mrb[76].mxu1 }
 0x1b3   : > { %2099 = vst [vmem:[%s2815_s28 + $0x90] sm:$0xff] %v2050_v43   ;;  %v1115_v46 = vadd.f32 %v2807_v49, %v1114_v44  ;;  %v1116_v47 = vpop.f32.mrb[77].mxu1  ;;  %v1379_v59 = vpop.f32.mrb[92].mxu0 }
 0x1b4   : > { %v1117_v50 = vpop.f32.mrb[78].mxu1  ;;  %v2249_v62 = vpop.f32.mrb[93].mxu0 }
 0x1b5   : > { %v1348_v52 = vadd.f32 %v1347_v7, %v1115_v46  ;;  %v1118_v53 = vadd.f32 %v2807_v49, %v1117_v50  ;;  %v1119_v54 = vpop.f32.mrb[79].mxu1  ;;  %v1382_v0 = vpop.f32.mrb[94].mxu0 }
 0x1b6   : > { %v2250_v5 = vpop.f32.mrb[95].mxu0 }
 0x1b7   : > { %v1351_v56 = vadd.f32 %v1350_v12, %v1118_v53 }
 0x1b9   : > { %v2055_v57 = vpack.c.bf16 %v1351_v56, %v1348_v52 }
 0x1ba   : > { %v1122_v58 = vpop.f32.mrb[80].mxu1 }
 0x1bb   : > { %2100 = vst [vmem:[%s2815_s28 + $0x98] sm:$0xff] %v2055_v57   ;;  %v1123_v60 = vadd.f32 %v2807_v49, %v1122_v58  ;;  %v1124_v61 = vpop.f32.mrb[81].mxu1  ;;  %v1387_v9 = vpop.f32.mrb[96].mxu0 }
 0x1bc   : > { %v1125_v63 = vpop.f32.mrb[82].mxu1  ;;  %v2253_v12 = vpop.f32.mrb[97].mxu0 }
 0x1bd   : > { %v1356_v1 = vadd.f32 %v1355_v20, %v1123_v60  ;;  %v1126_v2 = vadd.f32 %v2807_v49, %v1125_v63  ;;  %v1127_v4 = vpop.f32.mrb[83].mxu1  ;;  %v1390_v14 = vpop.f32.mrb[98].mxu0 }
 0x1be   : > { %v2254_v18 = vpop.f32.mrb[99].mxu0 }
 0x1bf   : > { %v1359_v6 = vadd.f32 %v1358_v25, %v1126_v2 }
 0x1c1   : > { %v2060_v7 = vpack.c.bf16 %v1359_v6, %v1356_v1 }
 0x1c2   : > { %v1130_v8 = vpop.f32.mrb[84].mxu1 }
 0x1c3   : > { %2101 = vst [vmem:[%s2815_s28 + $0xa0] sm:$0xff] %v2060_v7   ;;  %v1131_v10 = vadd.f32 %v2807_v49, %v1130_v8  ;;  %v1132_v11 = vpop.f32.mrb[85].mxu1 }
 0x1c4   : > { %v1133_v13 = vpop.f32.mrb[86].mxu1 }
 0x1c5   : > { %v1364_v15 = vadd.f32 %v1363_v33, %v1131_v10  ;;  %v1134_v16 = vadd.f32 %v2807_v49, %v1133_v13  ;;  %v1135_v17 = vpop.f32.mrb[87].mxu1 }
 0x1c7   : > { %v1367_v19 = vadd.f32 %v1366_v38, %v1134_v16 }
 0x1c9   : > { %v2065_v20 = vpack.c.bf16 %v1367_v19, %v1364_v15 }
 0x1ca   : > { %v1138_v21 = vpop.f32.mrb[88].mxu1 }
 0x1cb   : > { %2102 = vst [vmem:[%s2815_s28 + $0xa8] sm:$0xff] %v2065_v20   ;;  %v1139_v22 = vadd.f32 %v2807_v49, %v1138_v21  ;;  %v1140_v23 = vpop.f32.mrb[89].mxu1 }
 0x1cc   : > { %v1141_v24 = vpop.f32.mrb[90].mxu1 }
 0x1cd   : > { %v1372_v25 = vadd.f32 %v1371_v45, %v1139_v22  ;;  %v1142_v26 = vadd.f32 %v2807_v49, %v1141_v24  ;;  %v1143_v27 = vpop.f32.mrb[91].mxu1 }
 0x1cf   : > { %v1375_v28 = vadd.f32 %v1374_v51, %v1142_v26 }
 0x1d1   : > { %v2070_v29 = vpack.c.bf16 %v1375_v28, %v1372_v25 }
 0x1d2   : > { %v1146_v30 = vpop.f32.mrb[92].mxu1 }
 0x1d3   : > { %2103 = vst [vmem:[%s2815_s28 + $0xb0] sm:$0xff] %v2070_v29   ;;  %v1147_v31 = vadd.f32 %v2807_v49, %v1146_v30  ;;  %v1148_v32 = vpop.f32.mrb[93].mxu1 }
 0x1d4   : > { %v1149_v33 = vpop.f32.mrb[94].mxu1 }
 0x1d5   : > { %v1380_v34 = vadd.f32 %v1379_v59, %v1147_v31  ;;  %v1150_v35 = vadd.f32 %v2807_v49, %v1149_v33  ;;  %v1151_v36 = vpop.f32.mrb[95].mxu1 }
 0x1d7   : > { %v1383_v37 = vadd.f32 %v1382_v0, %v1150_v35 }
 0x1d9   : > { %v2075_v38 = vpack.c.bf16 %v1383_v37, %v1380_v34 }
 0x1da   : > { %v1154_v39 = vpop.f32.mrb[96].mxu1 }
 0x1db   : > { %2104 = vst [vmem:[%s2815_s28 + $0xb8] sm:$0xff] %v2075_v38   ;;  %v1155_v40 = vadd.f32 %v2807_v49, %v1154_v39  ;;  %v1156_v3 = vpop.f32.mrb[97].mxu1 }
 0x1dc   : > { %v1157_v41 = vpop.f32.mrb[98].mxu1 }
 0x1dd   : > { %v1388_v42 = vadd.f32 %v1387_v9, %v1155_v40  ;;  %v1158_v43 = vadd.f32 %v2807_v49, %v1157_v41  ;;  %v1159_v44 = vpop.f32.mrb[99].mxu1 }
 0x1df   : > { %v1391_v45 = vadd.f32 %v1390_v14, %v1158_v43 }
 0x1e1   : > { %v2080_v46 = vpack.c.bf16 %v1391_v45, %v1388_v42 }
 0x1e3   : > { %2105 = vst [vmem:[%s2815_s28 + $0xc0] sm:$0xff] %v2080_v46  }
 0x1e4 PF: > { %s13_s14 = sadd.s32 1, %s2529_s14   ;;  %s2903_s12 = smov %s2525_s13 }
 0x1e5   : > { %p10_p5 = scmp.ge.s32.totalorder %s13_s14, 4   ;;  %s2904_s13 = smov %s2906_s15 }
 0x1e7   :  { %12 = sbr.rel (!%p10_p5) target bundleno = 2 (0x2), region = 68 }

// kernel: forward.11
= control target key start
LH: loop header
LB: loop body
LE: loop exit
PB: predicated region body
PF: predicated region fallthrough
CT: control target
= control target key end

     0   :  { %v2209_v0 = vmov 0   ;;  %v2210_v2 = vmov 0.0   ;;  %vm2211_vm0 = vmmov 0   ;;  %s2733_s1 = inlined_call_operand.vmem [shape: bf16[384,128], index: 1, kind: input, shape index: {}]   ;;  %s2734_s0 = inlined_call_operand.vmem [shape: bf16[400,384], index: 0, kind: input, shape index: {}]   ;;  %s2735_s2 = inlined_call_operand.vmem [shape: f32[1,128], index: 2, kind: input, shape index: {}]   ;;  %s2736_s3 = inlined_call_operand.vmem [shape: bf16[400,128], index: 3, kind: output, shape index: {}]  }
   0x1   :  { %714 = vmatprep.subr.bf16.mxu1 %v2209_v0  ;;  %v2085_v1 = vld [vmem:[%s2733_s1] sm:$0xff]   ;;  %1866 = vmatprep.subr.bf16.mxu0 %v2210_v2  ;;  %v2086_v3 = vld [vmem:[%s2733_s1 + $0x8] sm:$0xff]   ;;  %v2087_v4 = vld [vmem:[%s2733_s1 + $0x10] sm:$0xff]  }
   0x2   :  { %1882 = vmatprep.mubr.msk.bf16.mxu0 %vm2211_vm0, %v2210_v2  ;;  %715 = vmatpush1.bf16.msra.mxu1 %v2085_v1  ;;  %v2093_v5 = vld [vmem:[%s2733_s1 + $0x80] sm:$0xff]   ;;  %v2088_v6 = vld [vmem:[%s2733_s1 + $0x18] sm:$0xff]   ;;  %v2095_v7 = vld [vmem:[%s2733_s1 + $0x88] sm:$0xff]  }
   0x3   :  { %716 = vmatprep.subr.bf16.mxu1 %v2209_v0  ;;  %1867 = vmatpush3.bf16.msra.mxu0 %v2093_v5  ;;  %v2089_v8 = vld [vmem:[%s2733_s1 + $0x20] sm:$0xff]   ;;  %v2097_v9 = vld [vmem:[%s2733_s1 + $0x90] sm:$0xff]   ;;  %v2090_v10 = vld [vmem:[%s2733_s1 + $0x28] sm:$0xff]  }
   0x4   :  { %1868 = vmatprep.subr.bf16.mxu0 %v2210_v2  ;;  %v2099_v11 = vld [vmem:[%s2733_s1 + $0x98] sm:$0xff]   ;;  %v2091_v12 = vld [vmem:[%s2733_s1 + $0x30] sm:$0xff]   ;;  %v2101_v13 = vld [vmem:[%s2733_s1 + $0xa0] sm:$0xff]  }
   0x5   :  { %v2092_v14 = vld [vmem:[%s2733_s1 + $0x38] sm:$0xff]   ;;  %v2111_v15 = vld [vmem:[%s2734_s0 + $0x4] ss:$12 sps:$4 sm:$0xff]   ;;  %v2103_v16 = vld [vmem:[%s2733_s1 + $0xa8] sm:$0xff]  }
   0x6   :  { %717 = vmatpush1.bf16.msra.mxu1 %v2086_v3  ;;  %746 = vmatprep.mubr.bf16.mxu1 %v2111_v15  ;;  %v2094_v17 = vld [vmem:[%s2733_s1 + $0x40] sm:$0xff]   ;;  %v2105_v18 = vld [vmem:[%s2733_s1 + $0xb0] sm:$0xff]   ;;  %v2096_v19 = vld [vmem:[%s2733_s1 + $0x48] sm:$0xff]  }
   0x7   :  { %718 = vmatprep.subr.bf16.mxu1 %v2209_v0  ;;  %1869 = vmatpush3.bf16.msra.mxu0 %v2095_v7  ;;  %v2107_v20 = vld [vmem:[%s2733_s1 + $0xb8] sm:$0xff]   ;;  %v2112_v21 = vld [vmem:[%s2734_s0 + $0x8] ss:$12 sps:$4 sm:$0xff]   ;;  %v2115_v24 = vld [vmem:[%s2734_s0 + $0x20] ss:$12 sps:$4 sm:$0xff]  }
   0x8   :  { %1870 = vmatprep.subr.bf16.mxu0 %v2210_v2  ;;  %v2098_v22 = vld [vmem:[%s2733_s1 + $0x50] sm:$0xff]   ;;  %v2100_v23 = vld [vmem:[%s2733_s1 + $0x58] sm:$0xff]   ;;  %v2102_v25 = vld [vmem:[%s2733_s1 + $0x60] sm:$0xff]  }
   0x9   :  { %v2104_v26 = vld [vmem:[%s2733_s1 + $0x68] sm:$0xff]   ;;  %v2119_v27 = vld [vmem:[%s2734_s0 + $0x38] ss:$12 sps:$4 sm:$0xff]   ;;  %v2106_v28 = vld [vmem:[%s2733_s1 + $0x70] sm:$0xff]  }
   0xa   :  { %719 = vmatpush1.bf16.msra.mxu1 %v2087_v4  ;;  %v2108_v29 = vld [vmem:[%s2733_s1 + $0x78] sm:$0xff]   ;;  %v2109_v30 = vld [vmem:[%s2734_s0] ss:$12 sps:$4 sm:$0xff]   ;;  %v2127_v34 = vld [vmem:[%s2734_s0 + $0x68] ss:$12 sps:$4 sm:$0xff]  }
   0xb   :  { %720 = vmatprep.subr.bf16.mxu1 %v2209_v0  ;;  %1871 = vmatpush3.bf16.msra.mxu0 %v2097_v9  ;;  %v2123_v31 = vld [vmem:[%s2734_s0 + $0x50] ss:$12 sps:$4 sm:$0xff]   ;;  %v2116_v33 = vld [vmem:[%s2734_s0 + $0x18] ss:$12 sps:$4 sm:$0xff]   ;;  %v2117_v35 = vld [vmem:[%s2734_s0 + $0x34] ss:$12 sps:$4 sm:$0xff]  }
   0xc   :  { %1872 = vmatprep.subr.bf16.mxu0 %v2210_v2  ;;  %v2113_v32 = vld [vmem:[%s2734_s0 + $0x1c] ss:$12 sps:$4 sm:$0xff]   ;;  %v2131_v37 = vld [vmem:[%s2734_s0 + $0x80] ss:$12 sps:$4 sm:$0xff]   ;;  %v2135_v40 = vld [vmem:[%s2734_s0 + $0x98] ss:$12 sps:$4 sm:$0xff]  }
   0xd   :  { %v2120_v36 = vld [vmem:[%s2734_s0 + $0x30] ss:$12 sps:$4 sm:$0xff]   ;;  %v2121_v38 = vld [vmem:[%s2734_s0 + $0x4c] ss:$12 sps:$4 sm:$0xff]   ;;  %v2124_v39 = vld [vmem:[%s2734_s0 + $0x48] ss:$12 sps:$4 sm:$0xff]  }
   0xe   :  { %721 = vmatpush1.bf16.msra.mxu1 %v2088_v6  ;;  %v2125_v41 = vld [vmem:[%s2734_s0 + $0x64] ss:$12 sps:$4 sm:$0xff]   ;;  %v2128_v42 = vld [vmem:[%s2734_s0 + $0x60] ss:$12 sps:$4 sm:$0xff]   ;;  %v2129_v44 = vld [vmem:[%s2734_s0 + $0x7c] ss:$12 sps:$4 sm:$0xff]  }
   0xf   :  { %722 = vmatprep.subr.bf16.mxu1 %v2209_v0  ;;  %1873 = vmatpush3.bf16.msra.mxu0 %v2099_v11  ;;  %v2139_v43 = vld [vmem:[%s2734_s0 + $0xb0] ss:$12 sps:$4 sm:$0xff]   ;;  %v2132_v45 = vld [vmem:[%s2734_s0 + $0x78] ss:$12 sps:$4 sm:$0xff]   ;;  %v2143_v46 = vld [vmem:[%s2734_s0 + $0xc8] ss:$12 sps:$4 sm:$0xff]  }
  0x10   :  { %1874 = vmatprep.subr.bf16.mxu0 %v2210_v2  ;;  %v2133_v47 = vld [vmem:[%s2734_s0 + $0x94] ss:$12 sps:$4 sm:$0xff]   ;;  %v2136_v48 = vld [vmem:[%s2734_s0 + $0x90] ss:$12 sps:$4 sm:$0xff]   ;;  %v2137_v50 = vld [vmem:[%s2734_s0 + $0xac] ss:$12 sps:$4 sm:$0xff]  }
  0x11   :  { %v2147_v49 = vld [vmem:[%s2734_s0 + $0xe0] ss:$12 sps:$4 sm:$0xff]   ;;  %v2140_v51 = vld [vmem:[%s2734_s0 + $0xa8] ss:$12 sps:$4 sm:$0xff]   ;;  %v2151_v52 = vld [vmem:[%s2734_s0 + $0xf8] ss:$12 sps:$4 sm:$0xff]  }
  0x12   :  { %723 = vmatpush1.bf16.msra.mxu1 %v2089_v8  ;;  %v2141_v53 = vld [vmem:[%s2734_s0 + $0xc4] ss:$12 sps:$4 sm:$0xff]   ;;  %v2144_v54 = vld [vmem:[%s2734_s0 + $0xc0] ss:$12 sps:$4 sm:$0xff]   ;;  %v2145_v56 = vld [vmem:[%s2734_s0 + $0xdc] ss:$12 sps:$4 sm:$0xff]  }
  0x13   :  { %724 = vmatprep.subr.bf16.mxu1 %v2209_v0  ;;  %1875 = vmatpush3.bf16.msra.mxu0 %v2101_v13  ;;  %v2155_v55 = vld [vmem:[%s2734_s0 + $0x110] ss:$12 sps:$4 sm:$0xff]   ;;  %v2148_v57 = vld [vmem:[%s2734_s0 + $0xd8] ss:$12 sps:$4 sm:$0xff]   ;;  %v2159_v58 = vld [vmem:[%s2734_s0 + $0x128] ss:$12 sps:$4 sm:$0xff]  }
  0x14   :  { %1876 = vmatprep.subr.bf16.mxu0 %v2210_v2  ;;  %v2149_v59 = vld [vmem:[%s2734_s0 + $0xf4] ss:$12 sps:$4 sm:$0xff]   ;;  %v2152_v60 = vld [vmem:[%s2734_s0 + $0xf0] ss:$12 sps:$4 sm:$0xff]   ;;  %v2153_v62 = vld [vmem:[%s2734_s0 + $0x10c] ss:$12 sps:$4 sm:$0xff]  }
  0x15   :  { %v2163_v61 = vld [vmem:[%s2734_s0 + $0x140] ss:$12 sps:$4 sm:$0xff]   ;;  %v2156_v63 = vld [vmem:[%s2734_s0 + $0x108] ss:$12 sps:$4 sm:$0xff]   ;;  %v2157_v1 = vld [vmem:[%s2734_s0 + $0x124] ss:$12 sps:$4 sm:$0xff]  }
  0x16   :  { %725 = vmatpush1.bf16.msra.mxu1 %v2090_v10  ;;  %v2160_v3 = vld [vmem:[%s2734_s0 + $0x120] ss:$12 sps:$4 sm:$0xff]   ;;  %v2171_v4 = vld [vmem:[%s2734_s0 + $0x170] ss:$12 sps:$4 sm:$0xff]   ;;  %v2164_v6 = vld [vmem:[%s2734_s0 + $0x138] ss:$12 sps:$4 sm:$0xff]  }
  0x17   :  { %726 = vmatprep.subr.bf16.mxu1 %v2209_v0  ;;  %1877 = vmatpush3.bf16.msra.mxu0 %v2103_v16  ;;  %v2161_v5 = vld [vmem:[%s2734_s0 + $0x13c] ss:$12 sps:$4 sm:$0xff]   ;;  %v2165_v8 = vld [vmem:[%s2734_s0 + $0x154] ss:$12 sps:$4 sm:$0xff]   ;;  %v2169_v11 = vld [vmem:[%s2734_s0 + $0x16c] ss:$12 sps:$4 sm:$0xff]  }
  0x18   :  { %1878 = vmatprep.subr.bf16.mxu0 %v2210_v2  ;;  %v2175_v7 = vld [vmem:[%s2734_s0 + $0x188] ss:$12 sps:$4 sm:$0xff]   ;;  %v2168_v9 = vld [vmem:[%s2734_s0 + $0x150] ss:$12 sps:$4 sm:$0xff]   ;;  %v2179_v10 = vld [vmem:[%s2734_s0 + $0x1a0] ss:$12 sps:$4 sm:$0xff]  }
  0x19   :  { %v2183_v13 = vld [vmem:[%s2734_s0 + $0x1b8] ss:$12 sps:$4 sm:$0xff]   ;;  %v2176_v15 = vld [vmem:[%s2734_s0 + $0x180] ss:$12 sps:$4 sm:$0xff]   ;;  %v2187_v16 = vld [vmem:[%s2734_s0 + $0x1d0] ss:$12 sps:$4 sm:$0xff]  }
  0x1a   :  { %727 = vmatpush1.bf16.msra.mxu1 %v2091_v12  ;;  %v2172_v12 = vld [vmem:[%s2734_s0 + $0x168] ss:$12 sps:$4 sm:$0xff]  }
  0x1b   :  { %728 = vmatprep.subr.bf16.mxu1 %v2209_v0  ;;  %1879 = vmatpush3.bf16.msra.mxu0 %v2105_v18  ;;  %v2180_v18 = vld [vmem:[%s2734_s0 + $0x198] ss:$12 sps:$4 sm:$0xff]  }
  0x1c   :  { %1880 = vmatprep.subr.bf16.mxu0 %v2210_v2 }
  0x1e   :  { %729 = vmatpush1.bf16.msra.mxu1 %v2092_v14  ;;  %v2173_v14 = vld [vmem:[%s2734_s0 + $0x184] ss:$12 sps:$4 sm:$0xff]  }
  0x1f   :  { %730 = vmatprep.subr.bf16.mxu1 %v2209_v0  ;;  %1881 = vmatpush3.bf16.msra.mxu0 %v2107_v20  ;;  %v2181_v20 = vld [vmem:[%s2734_s0 + $0x1b4] ss:$12 sps:$4 sm:$0xff]  }
  0x22   :  { %731 = vmatpush1.bf16.msra.mxu1 %v2094_v17  ;;  %1883 = vmatmul.mubr.bf16.vlgmr.msra.gmra.mrb[0].mxu0 %v2112_v21  ;;  %v2177_v17 = vld [vmem:[%s2734_s0 + $0x19c] ss:$12 sps:$4 sm:$0xff]  }
  0x23   :  { %732 = vmatprep.subr.bf16.mxu1 %v2209_v0  ;;  %1886 = vmatprep.mubr.msk.bf16.mxu0 %vm2211_vm0, %v2210_v2  ;;  %v2184_v21 = vld [vmem:[%s2734_s0 + $0x1b0] ss:$12 sps:$4 sm:$0xff]  }
  0x26   :  { %733 = vmatpush1.bf16.msra.mxu1 %v2096_v19  ;;  %v2191_v19 = vld [vmem:[%s2734_s0 + $0x1e8] ss:$12 sps:$4 sm:$0xff]  }
  0x27   :  { %734 = vmatprep.subr.bf16.mxu1 %v2209_v0 }
  0x2a   :  { %735 = vmatpush1.bf16.msra.mxu1 %v2098_v22  ;;  %1887 = vmatmul.mubr.bf16.gmra.mrb[4].mxu0 %v2115_v24  ;;  %v2195_v22 = vld [vmem:[%s2734_s0 + $0x200] ss:$12 sps:$4 sm:$0xff]   ;;  %v2188_v24 = vld [vmem:[%s2734_s0 + $0x1c8] ss:$12 sps:$4 sm:$0xff]  }
  0x2b   :  { %736 = vmatprep.subr.bf16.mxu1 %v2209_v0  ;;  %1890 = vmatprep.mubr.msk.bf16.mxu0 %vm2211_vm0, %v2210_v2 }
  0x2e   :  { %737 = vmatpush1.bf16.msra.mxu1 %v2100_v23  ;;  %v2185_v23 = vld [vmem:[%s2734_s0 + $0x1cc] ss:$12 sps:$4 sm:$0xff]  }
  0x2f   :  { %738 = vmatprep.subr.bf16.mxu1 %v2209_v0 }
  0x32   :  { %739 = vmatpush1.bf16.msra.mxu1 %v2102_v25  ;;  %1891 = vmatmul.mubr.bf16.gmra.mrb[8].mxu0 %v2119_v27  ;;  %v2199_v25 = vld [vmem:[%s2734_s0 + $0x218] ss:$12 sps:$4 sm:$0xff]   ;;  %v2192_v27 = vld [vmem:[%s2734_s0 + $0x1e0] ss:$12 sps:$4 sm:$0xff]  }
  0x33   :  { %740 = vmatprep.subr.bf16.mxu1 %v2209_v0  ;;  %1894 = vmatprep.mubr.msk.bf16.mxu0 %vm2211_vm0, %v2210_v2 }
  0x36   :  { %741 = vmatpush1.bf16.msra.mxu1 %v2104_v26  ;;  %v2189_v26 = vld [vmem:[%s2734_s0 + $0x1e4] ss:$12 sps:$4 sm:$0xff]  }
  0x37   :  { %742 = vmatprep.subr.bf16.mxu1 %v2209_v0 }
  0x3a   :  { %743 = vmatpush1.bf16.msra.mxu1 %v2106_v28  ;;  %1895 = vmatmul.mubr.bf16.gmra.mrb[12].mxu0 %v2123_v31  ;;  %v2203_v28 = vld [vmem:[%s2734_s0 + $0x230] ss:$12 sps:$4 sm:$0xff]   ;;  %v2207_v31 = vld [vmem:[%s2734_s0 + $0x248] ss:$12 sps:$4 sm:$0xff]  }
  0x3b   :  { %744 = vmatprep.subr.bf16.mxu1 %v2209_v0  ;;  %1898 = vmatprep.mubr.msk.bf16.mxu0 %vm2211_vm0, %v2210_v2  ;;  %v2167_v0 = vld [vmem:[%s2734_s0 + $0x158] ss:$12 sps:$4 sm:$0xff]  }
  0x3e   :  { %745 = vmatpush1.bf16.msra.mxu1 %v2108_v29  ;;  %v2193_v29 = vld [vmem:[%s2734_s0 + $0x1fc] ss:$12 sps:$4 sm:$0xff]  }
  0x41   :  { %747 = vmatmul.mubr.bf16.vlgmr.msra.gmra.mrb[0].mxu1 %v2109_v30  ;;  %v2196_v30 = vld [vmem:[%s2734_s0 + $0x1f8] ss:$12 sps:$4 sm:$0xff]  }
  0x42   :  { %754 = vmatprep.mubr.bf16.mxu1 %v2113_v32  ;;  %1899 = vmatmul.mubr.bf16.gmra.mrb[16].mxu0 %v2127_v34  ;;  %v2197_v32 = vld [vmem:[%s2734_s0 + $0x214] ss:$12 sps:$4 sm:$0xff]  }
  0x43   :  { %1902 = vmatprep.mubr.msk.bf16.mxu0 %vm2211_vm0, %v2210_v2  ;;  %v2204_v34 = vld [vmem:[%s2734_s0 + $0x228] ss:$12 sps:$4 sm:$0xff]  }
  0x49   :  { %755 = vmatmul.mubr.bf16.gmra.mrb[4].mxu1 %v2116_v33  ;;  %v2200_v33 = vld [vmem:[%s2734_s0 + $0x210] ss:$12 sps:$4 sm:$0xff]  }
  0x4a   :  { %762 = vmatprep.mubr.bf16.mxu1 %v2117_v35  ;;  %1903 = vmatmul.mubr.bf16.gmra.mrb[20].mxu0 %v2131_v37  ;;  %v2205_v35 = vld [vmem:[%s2734_s0 + $0x244] ss:$12 sps:$4 sm:$0xff]   ;;  %v2208_v37 = vld [vmem:[%s2734_s0 + $0x240] ss:$12 sps:$4 sm:$0xff]  }
  0x4b   :  { %1906 = vmatprep.mubr.msk.bf16.mxu0 %vm2211_vm0, %v2210_v2 }
  0x51   :  { %763 = vmatmul.mubr.bf16.gmra.mrb[8].mxu1 %v2120_v36 }
  0x52   :  { %770 = vmatprep.mubr.bf16.mxu1 %v2121_v38  ;;  %1907 = vmatmul.mubr.bf16.gmra.mrb[24].mxu0 %v2135_v40 }
  0x53   :  { %1910 = vmatprep.mubr.msk.bf16.mxu0 %vm2211_vm0, %v2210_v2 }
  0x59   :  { %771 = vmatmul.mubr.bf16.gmra.mrb[12].mxu1 %v2124_v39 }
  0x5a   :  { %778 = vmatprep.mubr.bf16.mxu1 %v2125_v41  ;;  %1911 = vmatmul.mubr.bf16.gmra.mrb[28].mxu0 %v2139_v43 }
  0x5b   :  { %1914 = vmatprep.mubr.msk.bf16.mxu0 %vm2211_vm0, %v2210_v2 }
  0x61   :  { %779 = vmatmul.mubr.bf16.gmra.mrb[16].mxu1 %v2128_v42 }
  0x62   :  { %786 = vmatprep.mubr.bf16.mxu1 %v2129_v44  ;;  %1915 = vmatmul.mubr.bf16.gmra.mrb[32].mxu0 %v2143_v46 }
  0x63   :  { %1918 = vmatprep.mubr.msk.bf16.mxu0 %vm2211_vm0, %v2210_v2 }
  0x69   :  { %787 = vmatmul.mubr.bf16.gmra.mrb[20].mxu1 %v2132_v45 }
  0x6a   :  { %794 = vmatprep.mubr.bf16.mxu1 %v2133_v47  ;;  %1919 = vmatmul.mubr.bf16.gmra.mrb[36].mxu0 %v2147_v49  ;;  %v2606_v49 = vld [vmem:[%s2735_s2] ss:$0 sm:$0xff] }
  0x6b   :  { %1922 = vmatprep.mubr.msk.bf16.mxu0 %vm2211_vm0, %v2210_v2 }
  0x71   :  { %795 = vmatmul.mubr.bf16.gmra.mrb[24].mxu1 %v2136_v48 }
  0x72   :  { %802 = vmatprep.mubr.bf16.mxu1 %v2137_v50  ;;  %1923 = vmatmul.mubr.bf16.gmra.mrb[40].mxu0 %v2151_v52 }
  0x73   :  { %1926 = vmatprep.mubr.msk.bf16.mxu0 %vm2211_vm0, %v2210_v2 }
  0x79   :  { %803 = vmatmul.mubr.bf16.gmra.mrb[28].mxu1 %v2140_v51 }
  0x7a   :  { %810 = vmatprep.mubr.bf16.mxu1 %v2141_v53  ;;  %1927 = vmatmul.mubr.bf16.gmra.mrb[44].mxu0 %v2155_v55 }
  0x7b   :  { %1930 = vmatprep.mubr.msk.bf16.mxu0 %vm2211_vm0, %v2210_v2 }
  0x81   :  { %811 = vmatmul.mubr.bf16.gmra.mrb[32].mxu1 %v2144_v54 }
  0x82   :  { %818 = vmatprep.mubr.bf16.mxu1 %v2145_v56  ;;  %1931 = vmatmul.mubr.bf16.gmra.mrb[48].mxu0 %v2159_v58 }
  0x83   :  { %1934 = vmatprep.mubr.msk.bf16.mxu0 %vm2211_vm0, %v2210_v2 }
  0x89   :  { %819 = vmatmul.mubr.bf16.gmra.mrb[36].mxu1 %v2148_v57 }
  0x8a   :  { %826 = vmatprep.mubr.bf16.mxu1 %v2149_v59  ;;  %1935 = vmatmul.mubr.bf16.gmra.mrb[52].mxu0 %v2163_v61 }
  0x8b   :  { %1938 = vmatprep.mubr.msk.bf16.mxu0 %vm2211_vm0, %v2210_v2 }
  0x91   :  { %827 = vmatmul.mubr.bf16.gmra.mrb[40].mxu1 %v2152_v60 }
  0x92   :  { %834 = vmatprep.mubr.bf16.mxu1 %v2153_v62  ;;  %1939 = vmatmul.mubr.bf16.gmra.mrb[56].mxu0 %v2167_v0 }
  0x93   :  { %1942 = vmatprep.mubr.msk.bf16.mxu0 %vm2211_vm0, %v2210_v2 }
  0x99   :  { %835 = vmatmul.mubr.bf16.gmra.mrb[44].mxu1 %v2156_v63 }
  0x9a   :  { %842 = vmatprep.mubr.bf16.mxu1 %v2157_v1  ;;  %1943 = vmatmul.mubr.bf16.gmra.mrb[60].mxu0 %v2171_v4 }
  0x9b   :  { %1946 = vmatprep.mubr.msk.bf16.mxu0 %vm2211_vm0, %v2210_v2 }
  0xa1   :  { %843 = vmatmul.mubr.bf16.gmra.mrb[48].mxu1 %v2160_v3 }
  0xa2   :  { %850 = vmatprep.mubr.bf16.mxu1 %v2161_v5  ;;  %1947 = vmatmul.mubr.bf16.gmra.mrb[64].mxu0 %v2175_v7 }
  0xa3   :  { %1950 = vmatprep.mubr.msk.bf16.mxu0 %vm2211_vm0, %v2210_v2 }
  0xa9   :  { %851 = vmatmul.mubr.bf16.gmra.mrb[52].mxu1 %v2164_v6 }
  0xaa   :  { %858 = vmatprep.mubr.bf16.mxu1 %v2165_v8  ;;  %1951 = vmatmul.mubr.bf16.gmra.mrb[68].mxu0 %v2179_v10 }
  0xab   :  { %1954 = vmatprep.mubr.msk.bf16.mxu0 %vm2211_vm0, %v2210_v2 }
  0xb1   :  { %859 = vmatmul.mubr.bf16.gmra.mrb[56].mxu1 %v2168_v9 }
  0xb2   :  { %866 = vmatprep.mubr.bf16.mxu1 %v2169_v11  ;;  %1955 = vmatmul.mubr.bf16.gmra.mrb[72].mxu0 %v2183_v13 }
  0xb3   :  { %1958 = vmatprep.mubr.msk.bf16.mxu0 %vm2211_vm0, %v2210_v2 }
  0xb9   :  { %867 = vmatmul.mubr.bf16.gmra.mrb[60].mxu1 %v2172_v12 }
  0xba   :  { %874 = vmatprep.mubr.bf16.mxu1 %v2173_v14  ;;  %1959 = vmatmul.mubr.bf16.gmra.mrb[76].mxu0 %v2187_v16 }
  0xbb   :  { %1962 = vmatprep.mubr.msk.bf16.mxu0 %vm2211_vm0, %v2210_v2 }
  0xc1   :  { %875 = vmatmul.mubr.bf16.gmra.mrb[64].mxu1 %v2176_v15 }
  0xc2   :  { %882 = vmatprep.mubr.bf16.mxu1 %v2177_v17  ;;  %1963 = vmatmul.mubr.bf16.gmra.mrb[80].mxu0 %v2191_v19 }
  0xc3   :  { %1966 = vmatprep.mubr.msk.bf16.mxu0 %vm2211_vm0, %v2210_v2 }
  0xc9   :  { %883 = vmatmul.mubr.bf16.gmra.mrb[68].mxu1 %v2180_v18 }
  0xca   :  { %890 = vmatprep.mubr.bf16.mxu1 %v2181_v20  ;;  %1967 = vmatmul.mubr.bf16.gmra.mrb[84].mxu0 %v2195_v22 }
  0xcb   :  { %1970 = vmatprep.mubr.msk.bf16.mxu0 %vm2211_vm0, %v2210_v2 }
  0xd1   :  { %891 = vmatmul.mubr.bf16.gmra.mrb[72].mxu1 %v2184_v21 }
  0xd2   :  { %898 = vmatprep.mubr.bf16.mxu1 %v2185_v23  ;;  %1971 = vmatmul.mubr.bf16.gmra.mrb[88].mxu0 %v2199_v25 }
  0xd3   :  { %1974 = vmatprep.mubr.msk.bf16.mxu0 %vm2211_vm0, %v2210_v2 }
  0xd9   :  { %899 = vmatmul.mubr.bf16.gmra.mrb[76].mxu1 %v2188_v24 }
  0xda   :  { %906 = vmatprep.mubr.bf16.mxu1 %v2189_v26  ;;  %1975 = vmatmul.mubr.bf16.gmra.mrb[92].mxu0 %v2203_v28 }
  0xdb   :  { %1978 = vmatprep.mubr.msk.bf16.mxu0 %vm2211_vm0, %v2210_v2  ;;  %v2201_v2 = vld [vmem:[%s2734_s0 + $0x22c] ss:$12 sps:$4 sm:$0xff]  }
  0xe1   :  { %907 = vmatmul.mubr.bf16.gmra.mrb[80].mxu1 %v2192_v27 }
  0xe2   :  { %914 = vmatprep.mubr.bf16.mxu1 %v2193_v29  ;;  %1979 = vmatmul.mubr.bf16.gmra.mrb[96].mxu0 %v2207_v31 }
  0xe9   :  { %915 = vmatmul.mubr.bf16.gmra.mrb[84].mxu1 %v2196_v30 }
  0xea   :  { %922 = vmatprep.mubr.bf16.mxu1 %v2197_v32 }
  0xf1   :  { %923 = vmatmul.mubr.bf16.gmra.mrb[88].mxu1 %v2200_v33 }
  0xf2   :  { %930 = vmatprep.mubr.bf16.mxu1 %v2201_v2 }
  0xf5   :  { %v981_v36 = vpop.f32.mrb[0].mxu0 }
  0xf6   :  { %v1884_v38 = vpop.f32.mrb[1].mxu0 }
  0xf7   :  { %v984_v39 = vpop.f32.mrb[2].mxu0 }
  0xf8   :  { %v1885_v40 = vpop.f32.mrb[3].mxu0 }
  0xf9   :  { %931 = vmatmul.mubr.bf16.gmra.mrb[92].mxu1 %v2204_v34 }
  0xfa   :  { %938 = vmatprep.mubr.bf16.mxu1 %v2205_v35 }
  0xfd   :  { %v989_v41 = vpop.f32.mrb[4].mxu0 }
  0xfe   :  { %v1888_v42 = vpop.f32.mrb[5].mxu0 }
  0xff   :  { %v992_v43 = vpop.f32.mrb[6].mxu0 }
 0x100   :  { %v1889_v44 = vpop.f32.mrb[7].mxu0 }
 0x101   :  { %939 = vmatmul.mubr.bf16.gmra.mrb[96].mxu1 %v2208_v37 }
 0x105   :  { %v997_v45 = vpop.f32.mrb[8].mxu0 }
 0x106   :  { %v1892_v46 = vpop.f32.mrb[9].mxu0 }
 0x107   :  { %v1000_v47 = vpop.f32.mrb[10].mxu0 }
 0x108   :  { %v1893_v48 = vpop.f32.mrb[11].mxu0 }
 0x10d   :  { %v1005_v51 = vpop.f32.mrb[12].mxu0 }
 0x10e   :  { %v1896_v54 = vpop.f32.mrb[13].mxu0 }
 0x10f   :  { %v1008_v56 = vpop.f32.mrb[14].mxu0 }
 0x110   :  { %v1897_v60 = vpop.f32.mrb[15].mxu0 }
 0x114   :  { %v748_v50 = vpop.f32.mrb[0].mxu1 }
 0x115   :  { %v749_v52 = vadd.f32 %v2606_v49, %v748_v50  ;;  %v750_v53 = vpop.f32.mrb[1].mxu1  ;;  %v1013_v1 = vpop.f32.mrb[16].mxu0 }
 0x116   :  { %v751_v55 = vpop.f32.mrb[2].mxu1  ;;  %v1900_v6 = vpop.f32.mrb[17].mxu0 }
 0x117   :  { %v982_v57 = vadd.f32 %v981_v36, %v749_v52  ;;  %v752_v58 = vadd.f32 %v2606_v49, %v751_v55  ;;  %v753_v59 = vpop.f32.mrb[3].mxu1  ;;  %v1016_v8 = vpop.f32.mrb[18].mxu0 }
 0x118   :  { %v1901_v12 = vpop.f32.mrb[19].mxu0 }
 0x119   :  { %v985_v61 = vadd.f32 %v984_v39, %v752_v58  ;;  %v1180_v62 = vmax.f32 %v982_v57, 0.0 }
 0x11b   :  { %v1181_v63 = vmax.f32 %v985_v61, 0.0 }
 0x11c   :  { %v756_v0 = vpop.f32.mrb[4].mxu1 }
 0x11d   :  { %v1687_v3 = vpack.c.bf16 %v1181_v63, %v1180_v62  ;;  %v757_v4 = vadd.f32 %v2606_v49, %v756_v0  ;;  %v758_v5 = vpop.f32.mrb[5].mxu1  ;;  %v1021_v17 = vpop.f32.mrb[20].mxu0 }
 0x11e   :  { %v759_v7 = vpop.f32.mrb[6].mxu1  ;;  %v1904_v21 = vpop.f32.mrb[21].mxu0 }
 0x11f   :  { %1688 = vst [vmem:[%s2736_s3] sm:$0xff] %v1687_v3   ;;  %v990_v9 = vadd.f32 %v989_v41, %v757_v4  ;;  %v760_v10 = vadd.f32 %v2606_v49, %v759_v7  ;;  %v761_v11 = vpop.f32.mrb[7].mxu1  ;;  %v1024_v23 = vpop.f32.mrb[22].mxu0 }
 0x120   :  { %v1905_v27 = vpop.f32.mrb[23].mxu0 }
 0x121   :  { %v993_v13 = vadd.f32 %v992_v43, %v760_v10  ;;  %v1182_v14 = vmax.f32 %v990_v9, 0.0 }
 0x123   :  { %v1183_v15 = vmax.f32 %v993_v13, 0.0 }
 0x124   :  { %v764_v16 = vpop.f32.mrb[8].mxu1 }
 0x125   :  { %v1692_v18 = vpack.c.bf16 %v1183_v15, %v1182_v14  ;;  %v765_v19 = vadd.f32 %v2606_v49, %v764_v16  ;;  %v766_v20 = vpop.f32.mrb[9].mxu1  ;;  %v1029_v32 = vpop.f32.mrb[24].mxu0 }
 0x126   :  { %v767_v22 = vpop.f32.mrb[10].mxu1  ;;  %v1908_v35 = vpop.f32.mrb[25].mxu0 }
 0x127   :  { %1809 = vst [vmem:[%s2736_s3 + $0x8] sm:$0xff] %v1692_v18   ;;  %v998_v24 = vadd.f32 %v997_v45, %v765_v19  ;;  %v768_v25 = vadd.f32 %v2606_v49, %v767_v22  ;;  %v769_v26 = vpop.f32.mrb[11].mxu1  ;;  %v1032_v37 = vpop.f32.mrb[26].mxu0 }
 0x128   :  { %v1909_v41 = vpop.f32.mrb[27].mxu0 }
 0x129   :  { %v1001_v28 = vadd.f32 %v1000_v47, %v768_v25  ;;  %v1184_v29 = vmax.f32 %v998_v24, 0.0 }
 0x12b   :  { %v1185_v30 = vmax.f32 %v1001_v28, 0.0 }
 0x12c   :  { %v772_v31 = vpop.f32.mrb[12].mxu1 }
 0x12d   :  { %v1697_v33 = vpack.c.bf16 %v1185_v30, %v1184_v29  ;;  %v773_v2 = vadd.f32 %v2606_v49, %v772_v31  ;;  %v774_v34 = vpop.f32.mrb[13].mxu1  ;;  %v1037_v46 = vpop.f32.mrb[28].mxu0 }
 0x12e   :  { %v775_v36 = vpop.f32.mrb[14].mxu1  ;;  %v1912_v52 = vpop.f32.mrb[29].mxu0 }
 0x12f   :  { %1810 = vst [vmem:[%s2736_s3 + $0x10] sm:$0xff] %v1697_v33   ;;  %v1006_v38 = vadd.f32 %v1005_v51, %v773_v2  ;;  %v776_v39 = vadd.f32 %v2606_v49, %v775_v36  ;;  %v777_v40 = vpop.f32.mrb[15].mxu1  ;;  %v1040_v54 = vpop.f32.mrb[30].mxu0 }
 0x131   :  { %v1009_v42 = vadd.f32 %v1008_v56, %v776_v39  ;;  %v1186_v43 = vmax.f32 %v1006_v38, 0.0  ;;  %v1913_v56 = vpop.f32.mrb[31].mxu0 }
 0x133   :  { %v1187_v44 = vmax.f32 %v1009_v42, 0.0 }
 0x134   :  { %v780_v45 = vpop.f32.mrb[16].mxu1 }
 0x135   :  { %v1702_v47 = vpack.c.bf16 %v1187_v44, %v1186_v43  ;;  %v781_v48 = vadd.f32 %v2606_v49, %v780_v45  ;;  %v782_v50 = vpop.f32.mrb[17].mxu1  ;;  %v1045_v62 = vpop.f32.mrb[32].mxu0 }
 0x136   :  { %v783_v53 = vpop.f32.mrb[18].mxu1  ;;  %v1916_v4 = vpop.f32.mrb[33].mxu0 }
 0x137   :  { %1811 = vst [vmem:[%s2736_s3 + $0x18] sm:$0xff] %v1702_v47   ;;  %v1014_v51 = vadd.f32 %v1013_v1, %v781_v48  ;;  %v784_v55 = vadd.f32 %v2606_v49, %v783_v53  ;;  %v785_v57 = vpop.f32.mrb[19].mxu1  ;;  %v1048_v6 = vpop.f32.mrb[34].mxu0 }
 0x139   :  { %v1017_v58 = vadd.f32 %v1016_v8, %v784_v55  ;;  %v1188_v59 = vmax.f32 %v1014_v51, 0.0  ;;  %v1917_v8 = vpop.f32.mrb[35].mxu0 }
 0x13b   :  { %v1189_v60 = vmax.f32 %v1017_v58, 0.0 }
 0x13c   :  { %v788_v61 = vpop.f32.mrb[20].mxu1 }
 0x13d   :  { %v1707_v63 = vpack.c.bf16 %v1189_v60, %v1188_v59  ;;  %v789_v0 = vadd.f32 %v2606_v49, %v788_v61  ;;  %v790_v3 = vpop.f32.mrb[21].mxu1  ;;  %v1053_v14 = vpop.f32.mrb[36].mxu0 }
 0x13e   :  { %v791_v5 = vpop.f32.mrb[22].mxu1  ;;  %v1920_v19 = vpop.f32.mrb[37].mxu0 }
 0x13f   :  { %1812 = vst [vmem:[%s2736_s3 + $0x20] sm:$0xff] %v1707_v63   ;;  %v1022_v1 = vadd.f32 %v1021_v17, %v789_v0  ;;  %v792_v7 = vadd.f32 %v2606_v49, %v791_v5  ;;  %v793_v9 = vpop.f32.mrb[23].mxu1  ;;  %v1056_v21 = vpop.f32.mrb[38].mxu0 }
 0x141   :  { %v1025_v10 = vadd.f32 %v1024_v23, %v792_v7  ;;  %v1190_v11 = vmax.f32 %v1022_v1, 0.0  ;;  %v1921_v23 = vpop.f32.mrb[39].mxu0 }
 0x143   :  { %v1191_v12 = vmax.f32 %v1025_v10, 0.0 }
 0x144   :  { %v796_v13 = vpop.f32.mrb[24].mxu1 }
 0x145   :  { %v1712_v15 = vpack.c.bf16 %v1191_v12, %v1190_v11  ;;  %v797_v16 = vadd.f32 %v2606_v49, %v796_v13  ;;  %v798_v18 = vpop.f32.mrb[25].mxu1  ;;  %v1061_v29 = vpop.f32.mrb[40].mxu0 }
 0x146   :  { %v799_v20 = vpop.f32.mrb[26].mxu1  ;;  %v1924_v2 = vpop.f32.mrb[41].mxu0 }
 0x147   :  { %1813 = vst [vmem:[%s2736_s3 + $0x28] sm:$0xff] %v1712_v15   ;;  %v1030_v17 = vadd.f32 %v1029_v32, %v797_v16  ;;  %v800_v22 = vadd.f32 %v2606_v49, %v799_v20  ;;  %v801_v24 = vpop.f32.mrb[27].mxu1  ;;  %v1064_v35 = vpop.f32.mrb[42].mxu0 }
 0x149   :  { %v1033_v25 = vadd.f32 %v1032_v37, %v800_v22  ;;  %v1192_v26 = vmax.f32 %v1030_v17, 0.0  ;;  %v1925_v37 = vpop.f32.mrb[43].mxu0 }
 0x14b   :  { %v1193_v27 = vmax.f32 %v1033_v25, 0.0 }
 0x14c   :  { %v804_v28 = vpop.f32.mrb[28].mxu1 }
 0x14d   :  { %v1717_v30 = vpack.c.bf16 %v1193_v27, %v1192_v26  ;;  %v805_v31 = vadd.f32 %v2606_v49, %v804_v28  ;;  %v806_v33 = vpop.f32.mrb[29].mxu1  ;;  %v1069_v43 = vpop.f32.mrb[44].mxu0 }
 0x14e   :  { %v807_v34 = vpop.f32.mrb[30].mxu1  ;;  %v1928_v48 = vpop.f32.mrb[45].mxu0 }
 0x14f   :  { %1814 = vst [vmem:[%s2736_s3 + $0x30] sm:$0xff] %v1717_v30   ;;  %v1038_v32 = vadd.f32 %v1037_v46, %v805_v31  ;;  %v808_v36 = vadd.f32 %v2606_v49, %v807_v34  ;;  %v809_v38 = vpop.f32.mrb[31].mxu1  ;;  %v1072_v52 = vpop.f32.mrb[46].mxu0 }
 0x151   :  { %v1041_v39 = vadd.f32 %v1040_v54, %v808_v36  ;;  %v1194_v40 = vmax.f32 %v1038_v32, 0.0  ;;  %v1929_v54 = vpop.f32.mrb[47].mxu0 }
 0x153   :  { %v1195_v41 = vmax.f32 %v1041_v39, 0.0 }
 0x154   :  { %v812_v42 = vpop.f32.mrb[32].mxu1 }
 0x155   :  { %v1722_v44 = vpack.c.bf16 %v1195_v41, %v1194_v40  ;;  %v813_v45 = vadd.f32 %v2606_v49, %v812_v42  ;;  %v814_v47 = vpop.f32.mrb[33].mxu1  ;;  %v1077_v59 = vpop.f32.mrb[48].mxu0 }
 0x156   :  { %v815_v50 = vpop.f32.mrb[34].mxu1  ;;  %v1932_v0 = vpop.f32.mrb[49].mxu0 }
 0x157   :  { %1815 = vst [vmem:[%s2736_s3 + $0x38] sm:$0xff] %v1722_v44   ;;  %v1046_v46 = vadd.f32 %v1045_v62, %v813_v45  ;;  %v816_v53 = vadd.f32 %v2606_v49, %v815_v50  ;;  %v817_v51 = vpop.f32.mrb[35].mxu1  ;;  %v1080_v4 = vpop.f32.mrb[50].mxu0 }
 0x159   :  { %v1049_v55 = vadd.f32 %v1048_v6, %v816_v53  ;;  %v1196_v57 = vmax.f32 %v1046_v46, 0.0  ;;  %v1933_v6 = vpop.f32.mrb[51].mxu0 }
 0x15b   :  { %v1197_v56 = vmax.f32 %v1049_v55, 0.0 }
 0x15c   :  { %v820_v58 = vpop.f32.mrb[36].mxu1 }
 0x15d   :  { %v1727_v60 = vpack.c.bf16 %v1197_v56, %v1196_v57  ;;  %v821_v61 = vadd.f32 %v2606_v49, %v820_v58  ;;  %v822_v63 = vpop.f32.mrb[37].mxu1  ;;  %v1085_v11 = vpop.f32.mrb[52].mxu0 }
 0x15e   :  { %v823_v3 = vpop.f32.mrb[38].mxu1  ;;  %v1936_v16 = vpop.f32.mrb[53].mxu0 }
 0x15f   :  { %1816 = vst [vmem:[%s2736_s3 + $0x40] sm:$0xff] %v1727_v60   ;;  %v1054_v62 = vadd.f32 %v1053_v14, %v821_v61  ;;  %v824_v5 = vadd.f32 %v2606_v49, %v823_v3  ;;  %v825_v1 = vpop.f32.mrb[39].mxu1  ;;  %v1088_v19 = vpop.f32.mrb[54].mxu0 }
 0x161   :  { %v1057_v7 = vadd.f32 %v1056_v21, %v824_v5  ;;  %v1198_v9 = vmax.f32 %v1054_v62, 0.0  ;;  %v1937_v21 = vpop.f32.mrb[55].mxu0 }
 0x163   :  { %v1199_v8 = vmax.f32 %v1057_v7, 0.0 }
 0x164   :  { %v828_v10 = vpop.f32.mrb[40].mxu1 }
 0x165   :  { %v1732_v12 = vpack.c.bf16 %v1199_v8, %v1198_v9  ;;  %v829_v13 = vadd.f32 %v2606_v49, %v828_v10  ;;  %v830_v15 = vpop.f32.mrb[41].mxu1  ;;  %v1093_v26 = vpop.f32.mrb[56].mxu0 }
 0x166   :  { %v831_v18 = vpop.f32.mrb[42].mxu1  ;;  %v1940_v31 = vpop.f32.mrb[57].mxu0 }
 0x167   :  { %1817 = vst [vmem:[%s2736_s3 + $0x48] sm:$0xff] %v1732_v12   ;;  %v1062_v14 = vadd.f32 %v1061_v29, %v829_v13  ;;  %v832_v20 = vadd.f32 %v2606_v49, %v831_v18  ;;  %v833_v17 = vpop.f32.mrb[43].mxu1  ;;  %v1096_v2 = vpop.f32.mrb[58].mxu0 }
 0x169   :  { %v1065_v22 = vadd.f32 %v1064_v35, %v832_v20  ;;  %v1200_v24 = vmax.f32 %v1062_v14, 0.0  ;;  %v1941_v35 = vpop.f32.mrb[59].mxu0 }
 0x16b   :  { %v1201_v23 = vmax.f32 %v1065_v22, 0.0 }
 0x16c   :  { %v836_v25 = vpop.f32.mrb[44].mxu1 }
 0x16d   :  { %v1737_v27 = vpack.c.bf16 %v1201_v23, %v1200_v24  ;;  %v837_v28 = vadd.f32 %v2606_v49, %v836_v25  ;;  %v838_v30 = vpop.f32.mrb[45].mxu1  ;;  %v1101_v40 = vpop.f32.mrb[60].mxu0 }
 0x16e   :  { %v839_v33 = vpop.f32.mrb[46].mxu1  ;;  %v1944_v45 = vpop.f32.mrb[61].mxu0 }
 0x16f   :  { %1818 = vst [vmem:[%s2736_s3 + $0x50] sm:$0xff] %v1737_v27   ;;  %v1070_v29 = vadd.f32 %v1069_v43, %v837_v28  ;;  %v840_v34 = vadd.f32 %v2606_v49, %v839_v33  ;;  %v841_v32 = vpop.f32.mrb[47].mxu1  ;;  %v1104_v48 = vpop.f32.mrb[62].mxu0 }
 0x171   :  { %v1073_v36 = vadd.f32 %v1072_v52, %v840_v34  ;;  %v1202_v38 = vmax.f32 %v1070_v29, 0.0  ;;  %v1945_v52 = vpop.f32.mrb[63].mxu0 }
 0x173   :  { %v1203_v37 = vmax.f32 %v1073_v36, 0.0 }
 0x174   :  { %v844_v39 = vpop.f32.mrb[48].mxu1 }
 0x175   :  { %v1742_v41 = vpack.c.bf16 %v1203_v37, %v1202_v38  ;;  %v845_v42 = vadd.f32 %v2606_v49, %v844_v39  ;;  %v846_v44 = vpop.f32.mrb[49].mxu1  ;;  %v1109_v57 = vpop.f32.mrb[64].mxu0 }
 0x176   :  { %v847_v47 = vpop.f32.mrb[50].mxu1  ;;  %v1948_v61 = vpop.f32.mrb[65].mxu0 }
 0x177   :  { %1819 = vst [vmem:[%s2736_s3 + $0x58] sm:$0xff] %v1742_v41   ;;  %v1078_v43 = vadd.f32 %v1077_v59, %v845_v42  ;;  %v848_v50 = vadd.f32 %v2606_v49, %v847_v47  ;;  %v849_v46 = vpop.f32.mrb[51].mxu1  ;;  %v1112_v0 = vpop.f32.mrb[66].mxu0 }
 0x179   :  { %v1081_v53 = vadd.f32 %v1080_v4, %v848_v50  ;;  %v1204_v51 = vmax.f32 %v1078_v43, 0.0  ;;  %v1949_v4 = vpop.f32.mrb[67].mxu0 }
 0x17b   :  { %v1205_v54 = vmax.f32 %v1081_v53, 0.0 }
 0x17c   :  { %v852_v55 = vpop.f32.mrb[52].mxu1 }
 0x17d   :  { %v1747_v56 = vpack.c.bf16 %v1205_v54, %v1204_v51  ;;  %v853_v58 = vadd.f32 %v2606_v49, %v852_v55  ;;  %v854_v60 = vpop.f32.mrb[53].mxu1  ;;  %v1117_v9 = vpop.f32.mrb[68].mxu0 }
 0x17e   :  { %v855_v63 = vpop.f32.mrb[54].mxu1  ;;  %v1952_v13 = vpop.f32.mrb[69].mxu0 }
 0x17f   :  { %1820 = vst [vmem:[%s2736_s3 + $0x60] sm:$0xff] %v1747_v56   ;;  %v1086_v59 = vadd.f32 %v1085_v11, %v853_v58  ;;  %v856_v3 = vadd.f32 %v2606_v49, %v855_v63  ;;  %v857_v62 = vpop.f32.mrb[55].mxu1  ;;  %v1120_v16 = vpop.f32.mrb[70].mxu0 }
 0x181   :  { %v1089_v5 = vadd.f32 %v1088_v19, %v856_v3  ;;  %v1206_v1 = vmax.f32 %v1086_v59, 0.0  ;;  %v1953_v19 = vpop.f32.mrb[71].mxu0 }
 0x183   :  { %v1207_v6 = vmax.f32 %v1089_v5, 0.0 }
 0x184   :  { %v860_v7 = vpop.f32.mrb[56].mxu1 }
 0x185   :  { %v1752_v8 = vpack.c.bf16 %v1207_v6, %v1206_v1  ;;  %v861_v10 = vadd.f32 %v2606_v49, %v860_v7  ;;  %v862_v12 = vpop.f32.mrb[57].mxu1  ;;  %v1125_v24 = vpop.f32.mrb[72].mxu0 }
 0x186   :  { %v863_v15 = vpop.f32.mrb[58].mxu1  ;;  %v1956_v28 = vpop.f32.mrb[73].mxu0 }
 0x187   :  { %1821 = vst [vmem:[%s2736_s3 + $0x68] sm:$0xff] %v1752_v8   ;;  %v1094_v11 = vadd.f32 %v1093_v26, %v861_v10  ;;  %v864_v18 = vadd.f32 %v2606_v49, %v863_v15  ;;  %v865_v14 = vpop.f32.mrb[59].mxu1  ;;  %v1128_v31 = vpop.f32.mrb[74].mxu0 }
 0x189   :  { %v1097_v20 = vadd.f32 %v1096_v2, %v864_v18  ;;  %v1208_v17 = vmax.f32 %v1094_v11, 0.0  ;;  %v1957_v2 = vpop.f32.mrb[75].mxu0 }
 0x18b   :  { %v1209_v21 = vmax.f32 %v1097_v20, 0.0 }
 0x18c   :  { %v868_v22 = vpop.f32.mrb[60].mxu1 }
 0x18d   :  { %v1757_v23 = vpack.c.bf16 %v1209_v21, %v1208_v17  ;;  %v869_v25 = vadd.f32 %v2606_v49, %v868_v22  ;;  %v870_v27 = vpop.f32.mrb[61].mxu1  ;;  %v1133_v38 = vpop.f32.mrb[76].mxu0 }
 0x18e   :  { %v871_v30 = vpop.f32.mrb[62].mxu1  ;;  %v1960_v42 = vpop.f32.mrb[77].mxu0 }
 0x18f   :  { %1822 = vst [vmem:[%s2736_s3 + $0x70] sm:$0xff] %v1757_v23   ;;  %v1102_v26 = vadd.f32 %v1101_v40, %v869_v25  ;;  %v872_v33 = vadd.f32 %v2606_v49, %v871_v30  ;;  %v873_v29 = vpop.f32.mrb[63].mxu1  ;;  %v1136_v45 = vpop.f32.mrb[78].mxu0 }
 0x191   :  { %v1105_v34 = vadd.f32 %v1104_v48, %v872_v33  ;;  %v1210_v32 = vmax.f32 %v1102_v26, 0.0  ;;  %v1961_v48 = vpop.f32.mrb[79].mxu0 }
 0x193   :  { %v1211_v35 = vmax.f32 %v1105_v34, 0.0 }
 0x194   :  { %v876_v36 = vpop.f32.mrb[64].mxu1 }
 0x195   :  { %v1762_v37 = vpack.c.bf16 %v1211_v35, %v1210_v32  ;;  %v877_v39 = vadd.f32 %v2606_v49, %v876_v36  ;;  %v878_v41 = vpop.f32.mrb[65].mxu1  ;;  %v1141_v51 = vpop.f32.mrb[80].mxu0 }
 0x196   :  { %v879_v44 = vpop.f32.mrb[66].mxu1  ;;  %v1964_v58 = vpop.f32.mrb[81].mxu0 }
 0x197   :  { %1823 = vst [vmem:[%s2736_s3 + $0x78] sm:$0xff] %v1762_v37   ;;  %v1110_v40 = vadd.f32 %v1109_v57, %v877_v39  ;;  %v880_v47 = vadd.f32 %v2606_v49, %v879_v44  ;;  %v881_v43 = vpop.f32.mrb[67].mxu1  ;;  %v1144_v61 = vpop.f32.mrb[82].mxu0 }
 0x199   :  { %v1113_v50 = vadd.f32 %v1112_v0, %v880_v47  ;;  %v1212_v46 = vmax.f32 %v1110_v40, 0.0  ;;  %v1965_v0 = vpop.f32.mrb[83].mxu0 }
 0x19b   :  { %v1213_v52 = vmax.f32 %v1113_v50, 0.0 }
 0x19c   :  { %v884_v53 = vpop.f32.mrb[68].mxu1 }
 0x19d   :  { %v1767_v54 = vpack.c.bf16 %v1213_v52, %v1212_v46  ;;  %v885_v55 = vadd.f32 %v2606_v49, %v884_v53  ;;  %v886_v56 = vpop.f32.mrb[69].mxu1  ;;  %v1149_v1 = vpop.f32.mrb[84].mxu0 }
 0x19e   :  { %v887_v60 = vpop.f32.mrb[70].mxu1  ;;  %v1968_v10 = vpop.f32.mrb[85].mxu0 }
 0x19f   :  { %1824 = vst [vmem:[%s2736_s3 + $0x80] sm:$0xff] %v1767_v54   ;;  %v1118_v57 = vadd.f32 %v1117_v9, %v885_v55  ;;  %v888_v63 = vadd.f32 %v2606_v49, %v887_v60  ;;  %v889_v59 = vpop.f32.mrb[71].mxu1  ;;  %v1152_v13 = vpop.f32.mrb[86].mxu0 }
 0x1a1   :  { %v1121_v3 = vadd.f32 %v1120_v16, %v888_v63  ;;  %v1214_v62 = vmax.f32 %v1118_v57, 0.0  ;;  %v1969_v16 = vpop.f32.mrb[87].mxu0 }
 0x1a3   :  { %v1215_v4 = vmax.f32 %v1121_v3, 0.0 }
 0x1a4   :  { %v892_v5 = vpop.f32.mrb[72].mxu1 }
 0x1a5   :  { %v1772_v6 = vpack.c.bf16 %v1215_v4, %v1214_v62  ;;  %v893_v7 = vadd.f32 %v2606_v49, %v892_v5  ;;  %v894_v8 = vpop.f32.mrb[73].mxu1  ;;  %v1157_v17 = vpop.f32.mrb[88].mxu0 }
 0x1a6   :  { %v895_v12 = vpop.f32.mrb[74].mxu1  ;;  %v1972_v25 = vpop.f32.mrb[89].mxu0 }
 0x1a7   :  { %1825 = vst [vmem:[%s2736_s3 + $0x88] sm:$0xff] %v1772_v6   ;;  %v1126_v9 = vadd.f32 %v1125_v24, %v893_v7  ;;  %v896_v15 = vadd.f32 %v2606_v49, %v895_v12  ;;  %v897_v11 = vpop.f32.mrb[75].mxu1  ;;  %v1160_v28 = vpop.f32.mrb[90].mxu0 }
 0x1a9   :  { %v1129_v18 = vadd.f32 %v1128_v31, %v896_v15  ;;  %v1216_v14 = vmax.f32 %v1126_v9, 0.0  ;;  %v1973_v31 = vpop.f32.mrb[91].mxu0 }
 0x1ab   :  { %v1217_v19 = vmax.f32 %v1129_v18, 0.0 }
 0x1ac   :  { %v900_v20 = vpop.f32.mrb[76].mxu1 }
 0x1ad   :  { %v1777_v21 = vpack.c.bf16 %v1217_v19, %v1216_v14  ;;  %v901_v22 = vadd.f32 %v2606_v49, %v900_v20  ;;  %v902_v23 = vpop.f32.mrb[77].mxu1  ;;  %v1165_v32 = vpop.f32.mrb[92].mxu0 }
 0x1ae   :  { %v903_v27 = vpop.f32.mrb[78].mxu1  ;;  %v1976_v39 = vpop.f32.mrb[93].mxu0 }
 0x1af   :  { %1826 = vst [vmem:[%s2736_s3 + $0x90] sm:$0xff] %v1777_v21   ;;  %v1134_v24 = vadd.f32 %v1133_v38, %v901_v22  ;;  %v904_v30 = vadd.f32 %v2606_v49, %v903_v27  ;;  %v905_v26 = vpop.f32.mrb[79].mxu1  ;;  %v1168_v42 = vpop.f32.mrb[94].mxu0 }
 0x1b1   :  { %v1137_v33 = vadd.f32 %v1136_v45, %v904_v30  ;;  %v1218_v29 = vmax.f32 %v1134_v24, 0.0  ;;  %v1977_v45 = vpop.f32.mrb[95].mxu0 }
 0x1b3   :  { %v1219_v2 = vmax.f32 %v1137_v33, 0.0 }
 0x1b4   :  { %v908_v34 = vpop.f32.mrb[80].mxu1 }
 0x1b5   :  { %v1782_v35 = vpack.c.bf16 %v1219_v2, %v1218_v29  ;;  %v909_v36 = vadd.f32 %v2606_v49, %v908_v34  ;;  %v910_v37 = vpop.f32.mrb[81].mxu1  ;;  %v1173_v46 = vpop.f32.mrb[96].mxu0 }
 0x1b6   :  { %v911_v41 = vpop.f32.mrb[82].mxu1  ;;  %v1980_v55 = vpop.f32.mrb[97].mxu0 }
 0x1b7   :  { %1827 = vst [vmem:[%s2736_s3 + $0x98] sm:$0xff] %v1782_v35   ;;  %v1142_v38 = vadd.f32 %v1141_v51, %v909_v36  ;;  %v912_v44 = vadd.f32 %v2606_v49, %v911_v41  ;;  %v913_v40 = vpop.f32.mrb[83].mxu1  ;;  %v1176_v58 = vpop.f32.mrb[98].mxu0 }
 0x1b9   :  { %v1145_v47 = vadd.f32 %v1144_v61, %v912_v44  ;;  %v1220_v43 = vmax.f32 %v1142_v38, 0.0  ;;  %v1981_v61 = vpop.f32.mrb[99].mxu0 }
 0x1bb   :  { %v1221_v48 = vmax.f32 %v1145_v47, 0.0 }
 0x1bc   :  { %v916_v50 = vpop.f32.mrb[84].mxu1 }
 0x1bd   :  { %v1787_v52 = vpack.c.bf16 %v1221_v48, %v1220_v43  ;;  %v917_v53 = vadd.f32 %v2606_v49, %v916_v50  ;;  %v918_v54 = vpop.f32.mrb[85].mxu1 }
 0x1be   :  { %v919_v56 = vpop.f32.mrb[86].mxu1 }
 0x1bf   :  { %1828 = vst [vmem:[%s2736_s3 + $0xa0] sm:$0xff] %v1787_v52   ;;  %v1150_v51 = vadd.f32 %v1149_v1, %v917_v53  ;;  %v920_v60 = vadd.f32 %v2606_v49, %v919_v56  ;;  %v921_v57 = vpop.f32.mrb[87].mxu1 }
 0x1c1   :  { %v1153_v63 = vadd.f32 %v1152_v13, %v920_v60  ;;  %v1222_v59 = vmax.f32 %v1150_v51, 0.0 }
 0x1c3   :  { %v1223_v0 = vmax.f32 %v1153_v63, 0.0 }
 0x1c4   :  { %v924_v3 = vpop.f32.mrb[88].mxu1 }
 0x1c5   :  { %v1792_v62 = vpack.c.bf16 %v1223_v0, %v1222_v59  ;;  %v925_v4 = vadd.f32 %v2606_v49, %v924_v3  ;;  %v926_v5 = vpop.f32.mrb[89].mxu1 }
 0x1c6   :  { %v927_v6 = vpop.f32.mrb[90].mxu1 }
 0x1c7   :  { %1829 = vst [vmem:[%s2736_s3 + $0xa8] sm:$0xff] %v1792_v62   ;;  %v1158_v7 = vadd.f32 %v1157_v17, %v925_v4  ;;  %v928_v1 = vadd.f32 %v2606_v49, %v927_v6  ;;  %v929_v8 = vpop.f32.mrb[91].mxu1 }
 0x1c9   :  { %v1161_v10 = vadd.f32 %v1160_v28, %v928_v1  ;;  %v1224_v12 = vmax.f32 %v1158_v7, 0.0 }
 0x1cb   :  { %v1225_v9 = vmax.f32 %v1161_v10, 0.0 }
 0x1cc   :  { %v932_v13 = vpop.f32.mrb[92].mxu1 }
 0x1cd   :  { %v1797_v15 = vpack.c.bf16 %v1225_v9, %v1224_v12  ;;  %v933_v11 = vadd.f32 %v2606_v49, %v932_v13  ;;  %v934_v16 = vpop.f32.mrb[93].mxu1 }
 0x1ce   :  { %v935_v18 = vpop.f32.mrb[94].mxu1 }
 0x1cf   :  { %1830 = vst [vmem:[%s2736_s3 + $0xb0] sm:$0xff] %v1797_v15   ;;  %v1166_v14 = vadd.f32 %v1165_v32, %v933_v11  ;;  %v936_v19 = vadd.f32 %v2606_v49, %v935_v18  ;;  %v937_v20 = vpop.f32.mrb[95].mxu1 }
 0x1d1   :  { %v1169_v17 = vadd.f32 %v1168_v42, %v936_v19  ;;  %v1226_v21 = vmax.f32 %v1166_v14, 0.0 }
 0x1d3   :  { %v1227_v22 = vmax.f32 %v1169_v17, 0.0 }
 0x1d4   :  { %v940_v23 = vpop.f32.mrb[96].mxu1 }
 0x1d5   :  { %v1802_v25 = vpack.c.bf16 %v1227_v22, %v1226_v21  ;;  %v941_v27 = vadd.f32 %v2606_v49, %v940_v23  ;;  %v942_v28 = vpop.f32.mrb[97].mxu1 }
 0x1d6   :  { %v943_v24 = vpop.f32.mrb[98].mxu1 }
 0x1d7   :  { %1831 = vst [vmem:[%s2736_s3 + $0xb8] sm:$0xff] %v1802_v25   ;;  %v1174_v30 = vadd.f32 %v1173_v46, %v941_v27  ;;  %v944_v26 = vadd.f32 %v2606_v49, %v943_v24  ;;  %v945_v31 = vpop.f32.mrb[99].mxu1 }
 0x1d9   :  { %v1177_v33 = vadd.f32 %v1176_v58, %v944_v26  ;;  %v1228_v29 = vmax.f32 %v1174_v30, 0.0 }
 0x1db   :  { %v1229_v2 = vmax.f32 %v1177_v33, 0.0 }
 0x1dd   :  { %v1807_v34 = vpack.c.bf16 %v1229_v2, %v1228_v29 }
 0x1df   :  { %1832 = vst [vmem:[%s2736_s3 + $0xc0] sm:$0xff] %v1807_v34  }

// kernel: forward.12
= control target key start
LH: loop header
LB: loop body
LE: loop exit
PB: predicated region body
PF: predicated region fallthrough
CT: control target
= control target key end

     0   :  { %v2159_v0 = vmov 0   ;;  %v2160_v2 = vmov 0.0   ;;  %vm2161_vm0 = vmmov 0   ;;  %s2683_s1 = inlined_call_operand.vmem [shape: bf16[384,128], index: 1, kind: input, shape index: {}]   ;;  %s2684_s0 = inlined_call_operand.vmem [shape: bf16[400,384], index: 0, kind: input, shape index: {}]   ;;  %s2685_s2 = inlined_call_operand.vmem [shape: f32[1,128], index: 2, kind: input, shape index: {}]   ;;  %s2686_s3 = inlined_call_operand.vmem [shape: bf16[400,128], index: 3, kind: output, shape index: {}]  }
   0x1   :  { %714 = vmatprep.subr.bf16.mxu1 %v2159_v0  ;;  %v2035_v1 = vld [vmem:[%s2683_s1] sm:$0xff]   ;;  %1816 = vmatprep.subr.bf16.mxu0 %v2160_v2  ;;  %v2036_v3 = vld [vmem:[%s2683_s1 + $0x8] sm:$0xff]   ;;  %v2037_v4 = vld [vmem:[%s2683_s1 + $0x10] sm:$0xff]  }
   0x2   :  { %1832 = vmatprep.mubr.msk.bf16.mxu0 %vm2161_vm0, %v2160_v2  ;;  %715 = vmatpush1.bf16.msra.mxu1 %v2035_v1  ;;  %v2043_v5 = vld [vmem:[%s2683_s1 + $0x80] sm:$0xff]   ;;  %v2038_v6 = vld [vmem:[%s2683_s1 + $0x18] sm:$0xff]   ;;  %v2045_v7 = vld [vmem:[%s2683_s1 + $0x88] sm:$0xff]  }
   0x3   :  { %716 = vmatprep.subr.bf16.mxu1 %v2159_v0  ;;  %1817 = vmatpush3.bf16.msra.mxu0 %v2043_v5  ;;  %v2039_v8 = vld [vmem:[%s2683_s1 + $0x20] sm:$0xff]   ;;  %v2047_v9 = vld [vmem:[%s2683_s1 + $0x90] sm:$0xff]   ;;  %v2040_v10 = vld [vmem:[%s2683_s1 + $0x28] sm:$0xff]  }
   0x4   :  { %1818 = vmatprep.subr.bf16.mxu0 %v2160_v2  ;;  %v2049_v11 = vld [vmem:[%s2683_s1 + $0x98] sm:$0xff]   ;;  %v2041_v12 = vld [vmem:[%s2683_s1 + $0x30] sm:$0xff]   ;;  %v2051_v13 = vld [vmem:[%s2683_s1 + $0xa0] sm:$0xff]  }
   0x5   :  { %v2042_v14 = vld [vmem:[%s2683_s1 + $0x38] sm:$0xff]   ;;  %v2061_v15 = vld [vmem:[%s2684_s0 + $0x4] ss:$12 sps:$4 sm:$0xff]   ;;  %v2053_v16 = vld [vmem:[%s2683_s1 + $0xa8] sm:$0xff]  }
   0x6   :  { %717 = vmatpush1.bf16.msra.mxu1 %v2036_v3  ;;  %746 = vmatprep.mubr.bf16.mxu1 %v2061_v15  ;;  %v2044_v17 = vld [vmem:[%s2683_s1 + $0x40] sm:$0xff]   ;;  %v2055_v18 = vld [vmem:[%s2683_s1 + $0xb0] sm:$0xff]   ;;  %v2046_v19 = vld [vmem:[%s2683_s1 + $0x48] sm:$0xff]  }
   0x7   :  { %718 = vmatprep.subr.bf16.mxu1 %v2159_v0  ;;  %1819 = vmatpush3.bf16.msra.mxu0 %v2045_v7  ;;  %v2057_v20 = vld [vmem:[%s2683_s1 + $0xb8] sm:$0xff]   ;;  %v2062_v21 = vld [vmem:[%s2684_s0 + $0x8] ss:$12 sps:$4 sm:$0xff]   ;;  %v2065_v24 = vld [vmem:[%s2684_s0 + $0x20] ss:$12 sps:$4 sm:$0xff]  }
   0x8   :  { %1820 = vmatprep.subr.bf16.mxu0 %v2160_v2  ;;  %v2048_v22 = vld [vmem:[%s2683_s1 + $0x50] sm:$0xff]   ;;  %v2050_v23 = vld [vmem:[%s2683_s1 + $0x58] sm:$0xff]   ;;  %v2052_v25 = vld [vmem:[%s2683_s1 + $0x60] sm:$0xff]  }
   0x9   :  { %v2054_v26 = vld [vmem:[%s2683_s1 + $0x68] sm:$0xff]   ;;  %v2069_v27 = vld [vmem:[%s2684_s0 + $0x38] ss:$12 sps:$4 sm:$0xff]   ;;  %v2056_v28 = vld [vmem:[%s2683_s1 + $0x70] sm:$0xff]  }
   0xa   :  { %719 = vmatpush1.bf16.msra.mxu1 %v2037_v4  ;;  %v2058_v29 = vld [vmem:[%s2683_s1 + $0x78] sm:$0xff]   ;;  %v2059_v30 = vld [vmem:[%s2684_s0] ss:$12 sps:$4 sm:$0xff]   ;;  %v2077_v34 = vld [vmem:[%s2684_s0 + $0x68] ss:$12 sps:$4 sm:$0xff]  }
   0xb   :  { %720 = vmatprep.subr.bf16.mxu1 %v2159_v0  ;;  %1821 = vmatpush3.bf16.msra.mxu0 %v2047_v9  ;;  %v2073_v31 = vld [vmem:[%s2684_s0 + $0x50] ss:$12 sps:$4 sm:$0xff]   ;;  %v2066_v33 = vld [vmem:[%s2684_s0 + $0x18] ss:$12 sps:$4 sm:$0xff]   ;;  %v2067_v35 = vld [vmem:[%s2684_s0 + $0x34] ss:$12 sps:$4 sm:$0xff]  }
   0xc   :  { %1822 = vmatprep.subr.bf16.mxu0 %v2160_v2  ;;  %v2063_v32 = vld [vmem:[%s2684_s0 + $0x1c] ss:$12 sps:$4 sm:$0xff]   ;;  %v2081_v37 = vld [vmem:[%s2684_s0 + $0x80] ss:$12 sps:$4 sm:$0xff]   ;;  %v2085_v40 = vld [vmem:[%s2684_s0 + $0x98] ss:$12 sps:$4 sm:$0xff]  }
   0xd   :  { %v2070_v36 = vld [vmem:[%s2684_s0 + $0x30] ss:$12 sps:$4 sm:$0xff]   ;;  %v2071_v38 = vld [vmem:[%s2684_s0 + $0x4c] ss:$12 sps:$4 sm:$0xff]   ;;  %v2074_v39 = vld [vmem:[%s2684_s0 + $0x48] ss:$12 sps:$4 sm:$0xff]  }
   0xe   :  { %721 = vmatpush1.bf16.msra.mxu1 %v2038_v6  ;;  %v2075_v41 = vld [vmem:[%s2684_s0 + $0x64] ss:$12 sps:$4 sm:$0xff]   ;;  %v2078_v42 = vld [vmem:[%s2684_s0 + $0x60] ss:$12 sps:$4 sm:$0xff]   ;;  %v2079_v44 = vld [vmem:[%s2684_s0 + $0x7c] ss:$12 sps:$4 sm:$0xff]  }
   0xf   :  { %722 = vmatprep.subr.bf16.mxu1 %v2159_v0  ;;  %1823 = vmatpush3.bf16.msra.mxu0 %v2049_v11  ;;  %v2089_v43 = vld [vmem:[%s2684_s0 + $0xb0] ss:$12 sps:$4 sm:$0xff]   ;;  %v2082_v45 = vld [vmem:[%s2684_s0 + $0x78] ss:$12 sps:$4 sm:$0xff]   ;;  %v2093_v46 = vld [vmem:[%s2684_s0 + $0xc8] ss:$12 sps:$4 sm:$0xff]  }
  0x10   :  { %1824 = vmatprep.subr.bf16.mxu0 %v2160_v2  ;;  %v2083_v47 = vld [vmem:[%s2684_s0 + $0x94] ss:$12 sps:$4 sm:$0xff]   ;;  %v2086_v48 = vld [vmem:[%s2684_s0 + $0x90] ss:$12 sps:$4 sm:$0xff]   ;;  %v2087_v50 = vld [vmem:[%s2684_s0 + $0xac] ss:$12 sps:$4 sm:$0xff]  }
  0x11   :  { %v2097_v49 = vld [vmem:[%s2684_s0 + $0xe0] ss:$12 sps:$4 sm:$0xff]   ;;  %v2090_v51 = vld [vmem:[%s2684_s0 + $0xa8] ss:$12 sps:$4 sm:$0xff]   ;;  %v2101_v52 = vld [vmem:[%s2684_s0 + $0xf8] ss:$12 sps:$4 sm:$0xff]  }
  0x12   :  { %723 = vmatpush1.bf16.msra.mxu1 %v2039_v8  ;;  %v2091_v53 = vld [vmem:[%s2684_s0 + $0xc4] ss:$12 sps:$4 sm:$0xff]   ;;  %v2094_v54 = vld [vmem:[%s2684_s0 + $0xc0] ss:$12 sps:$4 sm:$0xff]   ;;  %v2095_v56 = vld [vmem:[%s2684_s0 + $0xdc] ss:$12 sps:$4 sm:$0xff]  }
  0x13   :  { %724 = vmatprep.subr.bf16.mxu1 %v2159_v0  ;;  %1825 = vmatpush3.bf16.msra.mxu0 %v2051_v13  ;;  %v2105_v55 = vld [vmem:[%s2684_s0 + $0x110] ss:$12 sps:$4 sm:$0xff]   ;;  %v2098_v57 = vld [vmem:[%s2684_s0 + $0xd8] ss:$12 sps:$4 sm:$0xff]   ;;  %v2109_v58 = vld [vmem:[%s2684_s0 + $0x128] ss:$12 sps:$4 sm:$0xff]  }
  0x14   :  { %1826 = vmatprep.subr.bf16.mxu0 %v2160_v2  ;;  %v2099_v59 = vld [vmem:[%s2684_s0 + $0xf4] ss:$12 sps:$4 sm:$0xff]   ;;  %v2102_v60 = vld [vmem:[%s2684_s0 + $0xf0] ss:$12 sps:$4 sm:$0xff]   ;;  %v2103_v62 = vld [vmem:[%s2684_s0 + $0x10c] ss:$12 sps:$4 sm:$0xff]  }
  0x15   :  { %v2113_v61 = vld [vmem:[%s2684_s0 + $0x140] ss:$12 sps:$4 sm:$0xff]   ;;  %v2106_v63 = vld [vmem:[%s2684_s0 + $0x108] ss:$12 sps:$4 sm:$0xff]   ;;  %v2107_v1 = vld [vmem:[%s2684_s0 + $0x124] ss:$12 sps:$4 sm:$0xff]  }
  0x16   :  { %725 = vmatpush1.bf16.msra.mxu1 %v2040_v10  ;;  %v2110_v3 = vld [vmem:[%s2684_s0 + $0x120] ss:$12 sps:$4 sm:$0xff]   ;;  %v2121_v4 = vld [vmem:[%s2684_s0 + $0x170] ss:$12 sps:$4 sm:$0xff]   ;;  %v2114_v6 = vld [vmem:[%s2684_s0 + $0x138] ss:$12 sps:$4 sm:$0xff]  }
  0x17   :  { %726 = vmatprep.subr.bf16.mxu1 %v2159_v0  ;;  %1827 = vmatpush3.bf16.msra.mxu0 %v2053_v16  ;;  %v2111_v5 = vld [vmem:[%s2684_s0 + $0x13c] ss:$12 sps:$4 sm:$0xff]   ;;  %v2115_v8 = vld [vmem:[%s2684_s0 + $0x154] ss:$12 sps:$4 sm:$0xff]   ;;  %v2119_v11 = vld [vmem:[%s2684_s0 + $0x16c] ss:$12 sps:$4 sm:$0xff]  }
  0x18   :  { %1828 = vmatprep.subr.bf16.mxu0 %v2160_v2  ;;  %v2125_v7 = vld [vmem:[%s2684_s0 + $0x188] ss:$12 sps:$4 sm:$0xff]   ;;  %v2118_v9 = vld [vmem:[%s2684_s0 + $0x150] ss:$12 sps:$4 sm:$0xff]   ;;  %v2129_v10 = vld [vmem:[%s2684_s0 + $0x1a0] ss:$12 sps:$4 sm:$0xff]  }
  0x19   :  { %v2133_v13 = vld [vmem:[%s2684_s0 + $0x1b8] ss:$12 sps:$4 sm:$0xff]   ;;  %v2126_v15 = vld [vmem:[%s2684_s0 + $0x180] ss:$12 sps:$4 sm:$0xff]   ;;  %v2137_v16 = vld [vmem:[%s2684_s0 + $0x1d0] ss:$12 sps:$4 sm:$0xff]  }
  0x1a   :  { %727 = vmatpush1.bf16.msra.mxu1 %v2041_v12  ;;  %v2122_v12 = vld [vmem:[%s2684_s0 + $0x168] ss:$12 sps:$4 sm:$0xff]  }
  0x1b   :  { %728 = vmatprep.subr.bf16.mxu1 %v2159_v0  ;;  %1829 = vmatpush3.bf16.msra.mxu0 %v2055_v18  ;;  %v2130_v18 = vld [vmem:[%s2684_s0 + $0x198] ss:$12 sps:$4 sm:$0xff]  }
  0x1c   :  { %1830 = vmatprep.subr.bf16.mxu0 %v2160_v2 }
  0x1e   :  { %729 = vmatpush1.bf16.msra.mxu1 %v2042_v14  ;;  %v2123_v14 = vld [vmem:[%s2684_s0 + $0x184] ss:$12 sps:$4 sm:$0xff]  }
  0x1f   :  { %730 = vmatprep.subr.bf16.mxu1 %v2159_v0  ;;  %1831 = vmatpush3.bf16.msra.mxu0 %v2057_v20  ;;  %v2131_v20 = vld [vmem:[%s2684_s0 + $0x1b4] ss:$12 sps:$4 sm:$0xff]  }
  0x22   :  { %731 = vmatpush1.bf16.msra.mxu1 %v2044_v17  ;;  %1833 = vmatmul.mubr.bf16.vlgmr.msra.gmra.mrb[0].mxu0 %v2062_v21  ;;  %v2127_v17 = vld [vmem:[%s2684_s0 + $0x19c] ss:$12 sps:$4 sm:$0xff]  }
  0x23   :  { %732 = vmatprep.subr.bf16.mxu1 %v2159_v0  ;;  %1836 = vmatprep.mubr.msk.bf16.mxu0 %vm2161_vm0, %v2160_v2  ;;  %v2134_v21 = vld [vmem:[%s2684_s0 + $0x1b0] ss:$12 sps:$4 sm:$0xff]  }
  0x26   :  { %733 = vmatpush1.bf16.msra.mxu1 %v2046_v19  ;;  %v2141_v19 = vld [vmem:[%s2684_s0 + $0x1e8] ss:$12 sps:$4 sm:$0xff]  }
  0x27   :  { %734 = vmatprep.subr.bf16.mxu1 %v2159_v0 }
  0x2a   :  { %735 = vmatpush1.bf16.msra.mxu1 %v2048_v22  ;;  %1837 = vmatmul.mubr.bf16.gmra.mrb[4].mxu0 %v2065_v24  ;;  %v2145_v22 = vld [vmem:[%s2684_s0 + $0x200] ss:$12 sps:$4 sm:$0xff]   ;;  %v2138_v24 = vld [vmem:[%s2684_s0 + $0x1c8] ss:$12 sps:$4 sm:$0xff]  }
  0x2b   :  { %736 = vmatprep.subr.bf16.mxu1 %v2159_v0  ;;  %1840 = vmatprep.mubr.msk.bf16.mxu0 %vm2161_vm0, %v2160_v2 }
  0x2e   :  { %737 = vmatpush1.bf16.msra.mxu1 %v2050_v23  ;;  %v2135_v23 = vld [vmem:[%s2684_s0 + $0x1cc] ss:$12 sps:$4 sm:$0xff]  }
  0x2f   :  { %738 = vmatprep.subr.bf16.mxu1 %v2159_v0 }
  0x32   :  { %739 = vmatpush1.bf16.msra.mxu1 %v2052_v25  ;;  %1841 = vmatmul.mubr.bf16.gmra.mrb[8].mxu0 %v2069_v27  ;;  %v2149_v25 = vld [vmem:[%s2684_s0 + $0x218] ss:$12 sps:$4 sm:$0xff]   ;;  %v2142_v27 = vld [vmem:[%s2684_s0 + $0x1e0] ss:$12 sps:$4 sm:$0xff]  }
  0x33   :  { %740 = vmatprep.subr.bf16.mxu1 %v2159_v0  ;;  %1844 = vmatprep.mubr.msk.bf16.mxu0 %vm2161_vm0, %v2160_v2 }
  0x36   :  { %741 = vmatpush1.bf16.msra.mxu1 %v2054_v26  ;;  %v2139_v26 = vld [vmem:[%s2684_s0 + $0x1e4] ss:$12 sps:$4 sm:$0xff]  }
  0x37   :  { %742 = vmatprep.subr.bf16.mxu1 %v2159_v0 }
  0x3a   :  { %743 = vmatpush1.bf16.msra.mxu1 %v2056_v28  ;;  %1845 = vmatmul.mubr.bf16.gmra.mrb[12].mxu0 %v2073_v31  ;;  %v2153_v28 = vld [vmem:[%s2684_s0 + $0x230] ss:$12 sps:$4 sm:$0xff]   ;;  %v2157_v31 = vld [vmem:[%s2684_s0 + $0x248] ss:$12 sps:$4 sm:$0xff]  }
  0x3b   :  { %744 = vmatprep.subr.bf16.mxu1 %v2159_v0  ;;  %1848 = vmatprep.mubr.msk.bf16.mxu0 %vm2161_vm0, %v2160_v2  ;;  %v2117_v0 = vld [vmem:[%s2684_s0 + $0x158] ss:$12 sps:$4 sm:$0xff]  }
  0x3e   :  { %745 = vmatpush1.bf16.msra.mxu1 %v2058_v29  ;;  %v2143_v29 = vld [vmem:[%s2684_s0 + $0x1fc] ss:$12 sps:$4 sm:$0xff]  }
  0x41   :  { %747 = vmatmul.mubr.bf16.vlgmr.msra.gmra.mrb[0].mxu1 %v2059_v30  ;;  %v2146_v30 = vld [vmem:[%s2684_s0 + $0x1f8] ss:$12 sps:$4 sm:$0xff]  }
  0x42   :  { %754 = vmatprep.mubr.bf16.mxu1 %v2063_v32  ;;  %1849 = vmatmul.mubr.bf16.gmra.mrb[16].mxu0 %v2077_v34  ;;  %v2147_v32 = vld [vmem:[%s2684_s0 + $0x214] ss:$12 sps:$4 sm:$0xff]  }
  0x43   :  { %1852 = vmatprep.mubr.msk.bf16.mxu0 %vm2161_vm0, %v2160_v2  ;;  %v2154_v34 = vld [vmem:[%s2684_s0 + $0x228] ss:$12 sps:$4 sm:$0xff]  }
  0x49   :  { %755 = vmatmul.mubr.bf16.gmra.mrb[4].mxu1 %v2066_v33  ;;  %v2150_v33 = vld [vmem:[%s2684_s0 + $0x210] ss:$12 sps:$4 sm:$0xff]  }
  0x4a   :  { %762 = vmatprep.mubr.bf16.mxu1 %v2067_v35  ;;  %1853 = vmatmul.mubr.bf16.gmra.mrb[20].mxu0 %v2081_v37  ;;  %v2155_v35 = vld [vmem:[%s2684_s0 + $0x244] ss:$12 sps:$4 sm:$0xff]   ;;  %v2158_v37 = vld [vmem:[%s2684_s0 + $0x240] ss:$12 sps:$4 sm:$0xff]  }
  0x4b   :  { %1856 = vmatprep.mubr.msk.bf16.mxu0 %vm2161_vm0, %v2160_v2 }
  0x51   :  { %763 = vmatmul.mubr.bf16.gmra.mrb[8].mxu1 %v2070_v36 }
  0x52   :  { %770 = vmatprep.mubr.bf16.mxu1 %v2071_v38  ;;  %1857 = vmatmul.mubr.bf16.gmra.mrb[24].mxu0 %v2085_v40 }
  0x53   :  { %1860 = vmatprep.mubr.msk.bf16.mxu0 %vm2161_vm0, %v2160_v2 }
  0x59   :  { %771 = vmatmul.mubr.bf16.gmra.mrb[12].mxu1 %v2074_v39 }
  0x5a   :  { %778 = vmatprep.mubr.bf16.mxu1 %v2075_v41  ;;  %1861 = vmatmul.mubr.bf16.gmra.mrb[28].mxu0 %v2089_v43 }
  0x5b   :  { %1864 = vmatprep.mubr.msk.bf16.mxu0 %vm2161_vm0, %v2160_v2 }
  0x61   :  { %779 = vmatmul.mubr.bf16.gmra.mrb[16].mxu1 %v2078_v42 }
  0x62   :  { %786 = vmatprep.mubr.bf16.mxu1 %v2079_v44  ;;  %1865 = vmatmul.mubr.bf16.gmra.mrb[32].mxu0 %v2093_v46 }
  0x63   :  { %1868 = vmatprep.mubr.msk.bf16.mxu0 %vm2161_vm0, %v2160_v2 }
  0x69   :  { %787 = vmatmul.mubr.bf16.gmra.mrb[20].mxu1 %v2082_v45 }
  0x6a   :  { %794 = vmatprep.mubr.bf16.mxu1 %v2083_v47  ;;  %1869 = vmatmul.mubr.bf16.gmra.mrb[36].mxu0 %v2097_v49  ;;  %v2556_v49 = vld [vmem:[%s2685_s2] ss:$0 sm:$0xff] }
  0x6b   :  { %1872 = vmatprep.mubr.msk.bf16.mxu0 %vm2161_vm0, %v2160_v2 }
  0x71   :  { %795 = vmatmul.mubr.bf16.gmra.mrb[24].mxu1 %v2086_v48 }
  0x72   :  { %802 = vmatprep.mubr.bf16.mxu1 %v2087_v50  ;;  %1873 = vmatmul.mubr.bf16.gmra.mrb[40].mxu0 %v2101_v52 }
  0x73   :  { %1876 = vmatprep.mubr.msk.bf16.mxu0 %vm2161_vm0, %v2160_v2 }
  0x79   :  { %803 = vmatmul.mubr.bf16.gmra.mrb[28].mxu1 %v2090_v51 }
  0x7a   :  { %810 = vmatprep.mubr.bf16.mxu1 %v2091_v53  ;;  %1877 = vmatmul.mubr.bf16.gmra.mrb[44].mxu0 %v2105_v55 }
  0x7b   :  { %1880 = vmatprep.mubr.msk.bf16.mxu0 %vm2161_vm0, %v2160_v2 }
  0x81   :  { %811 = vmatmul.mubr.bf16.gmra.mrb[32].mxu1 %v2094_v54 }
  0x82   :  { %818 = vmatprep.mubr.bf16.mxu1 %v2095_v56  ;;  %1881 = vmatmul.mubr.bf16.gmra.mrb[48].mxu0 %v2109_v58 }
  0x83   :  { %1884 = vmatprep.mubr.msk.bf16.mxu0 %vm2161_vm0, %v2160_v2 }
  0x89   :  { %819 = vmatmul.mubr.bf16.gmra.mrb[36].mxu1 %v2098_v57 }
  0x8a   :  { %826 = vmatprep.mubr.bf16.mxu1 %v2099_v59  ;;  %1885 = vmatmul.mubr.bf16.gmra.mrb[52].mxu0 %v2113_v61 }
  0x8b   :  { %1888 = vmatprep.mubr.msk.bf16.mxu0 %vm2161_vm0, %v2160_v2 }
  0x91   :  { %827 = vmatmul.mubr.bf16.gmra.mrb[40].mxu1 %v2102_v60 }
  0x92   :  { %834 = vmatprep.mubr.bf16.mxu1 %v2103_v62  ;;  %1889 = vmatmul.mubr.bf16.gmra.mrb[56].mxu0 %v2117_v0 }
  0x93   :  { %1892 = vmatprep.mubr.msk.bf16.mxu0 %vm2161_vm0, %v2160_v2 }
  0x99   :  { %835 = vmatmul.mubr.bf16.gmra.mrb[44].mxu1 %v2106_v63 }
  0x9a   :  { %842 = vmatprep.mubr.bf16.mxu1 %v2107_v1  ;;  %1893 = vmatmul.mubr.bf16.gmra.mrb[60].mxu0 %v2121_v4 }
  0x9b   :  { %1896 = vmatprep.mubr.msk.bf16.mxu0 %vm2161_vm0, %v2160_v2 }
  0xa1   :  { %843 = vmatmul.mubr.bf16.gmra.mrb[48].mxu1 %v2110_v3 }
  0xa2   :  { %850 = vmatprep.mubr.bf16.mxu1 %v2111_v5  ;;  %1897 = vmatmul.mubr.bf16.gmra.mrb[64].mxu0 %v2125_v7 }
  0xa3   :  { %1900 = vmatprep.mubr.msk.bf16.mxu0 %vm2161_vm0, %v2160_v2 }
  0xa9   :  { %851 = vmatmul.mubr.bf16.gmra.mrb[52].mxu1 %v2114_v6 }
  0xaa   :  { %858 = vmatprep.mubr.bf16.mxu1 %v2115_v8  ;;  %1901 = vmatmul.mubr.bf16.gmra.mrb[68].mxu0 %v2129_v10 }
  0xab   :  { %1904 = vmatprep.mubr.msk.bf16.mxu0 %vm2161_vm0, %v2160_v2 }
  0xb1   :  { %859 = vmatmul.mubr.bf16.gmra.mrb[56].mxu1 %v2118_v9 }
  0xb2   :  { %866 = vmatprep.mubr.bf16.mxu1 %v2119_v11  ;;  %1905 = vmatmul.mubr.bf16.gmra.mrb[72].mxu0 %v2133_v13 }
  0xb3   :  { %1908 = vmatprep.mubr.msk.bf16.mxu0 %vm2161_vm0, %v2160_v2 }
  0xb9   :  { %867 = vmatmul.mubr.bf16.gmra.mrb[60].mxu1 %v2122_v12 }
  0xba   :  { %874 = vmatprep.mubr.bf16.mxu1 %v2123_v14  ;;  %1909 = vmatmul.mubr.bf16.gmra.mrb[76].mxu0 %v2137_v16 }
  0xbb   :  { %1912 = vmatprep.mubr.msk.bf16.mxu0 %vm2161_vm0, %v2160_v2 }
  0xc1   :  { %875 = vmatmul.mubr.bf16.gmra.mrb[64].mxu1 %v2126_v15 }
  0xc2   :  { %882 = vmatprep.mubr.bf16.mxu1 %v2127_v17  ;;  %1913 = vmatmul.mubr.bf16.gmra.mrb[80].mxu0 %v2141_v19 }
  0xc3   :  { %1916 = vmatprep.mubr.msk.bf16.mxu0 %vm2161_vm0, %v2160_v2 }
  0xc9   :  { %883 = vmatmul.mubr.bf16.gmra.mrb[68].mxu1 %v2130_v18 }
  0xca   :  { %890 = vmatprep.mubr.bf16.mxu1 %v2131_v20  ;;  %1917 = vmatmul.mubr.bf16.gmra.mrb[84].mxu0 %v2145_v22 }
  0xcb   :  { %1920 = vmatprep.mubr.msk.bf16.mxu0 %vm2161_vm0, %v2160_v2 }
  0xd1   :  { %891 = vmatmul.mubr.bf16.gmra.mrb[72].mxu1 %v2134_v21 }
  0xd2   :  { %898 = vmatprep.mubr.bf16.mxu1 %v2135_v23  ;;  %1921 = vmatmul.mubr.bf16.gmra.mrb[88].mxu0 %v2149_v25 }
  0xd3   :  { %1924 = vmatprep.mubr.msk.bf16.mxu0 %vm2161_vm0, %v2160_v2 }
  0xd9   :  { %899 = vmatmul.mubr.bf16.gmra.mrb[76].mxu1 %v2138_v24 }
  0xda   :  { %906 = vmatprep.mubr.bf16.mxu1 %v2139_v26  ;;  %1925 = vmatmul.mubr.bf16.gmra.mrb[92].mxu0 %v2153_v28 }
  0xdb   :  { %1928 = vmatprep.mubr.msk.bf16.mxu0 %vm2161_vm0, %v2160_v2  ;;  %v2151_v2 = vld [vmem:[%s2684_s0 + $0x22c] ss:$12 sps:$4 sm:$0xff]  }
  0xe1   :  { %907 = vmatmul.mubr.bf16.gmra.mrb[80].mxu1 %v2142_v27 }
  0xe2   :  { %914 = vmatprep.mubr.bf16.mxu1 %v2143_v29  ;;  %1929 = vmatmul.mubr.bf16.gmra.mrb[96].mxu0 %v2157_v31 }
  0xe9   :  { %915 = vmatmul.mubr.bf16.gmra.mrb[84].mxu1 %v2146_v30 }
  0xea   :  { %922 = vmatprep.mubr.bf16.mxu1 %v2147_v32 }
  0xf1   :  { %923 = vmatmul.mubr.bf16.gmra.mrb[88].mxu1 %v2150_v33 }
  0xf2   :  { %930 = vmatprep.mubr.bf16.mxu1 %v2151_v2 }
  0xf5   :  { %v981_v36 = vpop.f32.mrb[0].mxu0 }
  0xf6   :  { %v1834_v38 = vpop.f32.mrb[1].mxu0 }
  0xf7   :  { %v984_v39 = vpop.f32.mrb[2].mxu0 }
  0xf8   :  { %v1835_v40 = vpop.f32.mrb[3].mxu0 }
  0xf9   :  { %931 = vmatmul.mubr.bf16.gmra.mrb[92].mxu1 %v2154_v34 }
  0xfa   :  { %938 = vmatprep.mubr.bf16.mxu1 %v2155_v35 }
  0xfd   :  { %v989_v41 = vpop.f32.mrb[4].mxu0 }
  0xfe   :  { %v1838_v42 = vpop.f32.mrb[5].mxu0 }
  0xff   :  { %v992_v43 = vpop.f32.mrb[6].mxu0 }
 0x100   :  { %v1839_v44 = vpop.f32.mrb[7].mxu0 }
 0x101   :  { %939 = vmatmul.mubr.bf16.gmra.mrb[96].mxu1 %v2158_v37 }
 0x105   :  { %v997_v45 = vpop.f32.mrb[8].mxu0 }
 0x106   :  { %v1842_v46 = vpop.f32.mrb[9].mxu0 }
 0x107   :  { %v1000_v47 = vpop.f32.mrb[10].mxu0 }
 0x108   :  { %v1843_v48 = vpop.f32.mrb[11].mxu0 }
 0x10d   :  { %v1005_v51 = vpop.f32.mrb[12].mxu0 }
 0x10e   :  { %v1846_v54 = vpop.f32.mrb[13].mxu0 }
 0x10f   :  { %v1008_v56 = vpop.f32.mrb[14].mxu0 }
 0x110   :  { %v1847_v60 = vpop.f32.mrb[15].mxu0 }
 0x114   :  { %v748_v50 = vpop.f32.mrb[0].mxu1 }
 0x115   :  { %v749_v52 = vadd.f32 %v2556_v49, %v748_v50  ;;  %v750_v53 = vpop.f32.mrb[1].mxu1  ;;  %v1013_v0 = vpop.f32.mrb[16].mxu0 }
 0x116   :  { %v751_v55 = vpop.f32.mrb[2].mxu1  ;;  %v1850_v4 = vpop.f32.mrb[17].mxu0 }
 0x117   :  { %v982_v57 = vadd.f32 %v981_v36, %v749_v52  ;;  %v752_v58 = vadd.f32 %v2556_v49, %v751_v55  ;;  %v753_v59 = vpop.f32.mrb[3].mxu1  ;;  %v1016_v6 = vpop.f32.mrb[18].mxu0 }
 0x118   :  { %v1851_v10 = vpop.f32.mrb[19].mxu0 }
 0x119   :  { %v985_v61 = vadd.f32 %v984_v39, %v752_v58 }
 0x11b   :  { %v1637_v62 = vpack.c.bf16 %v985_v61, %v982_v57 }
 0x11c   :  { %v756_v63 = vpop.f32.mrb[4].mxu1 }
 0x11d   :  { %1638 = vst [vmem:[%s2686_s3] sm:$0xff] %v1637_v62   ;;  %v757_v1 = vadd.f32 %v2556_v49, %v756_v63  ;;  %v758_v3 = vpop.f32.mrb[5].mxu1  ;;  %v1021_v14 = vpop.f32.mrb[20].mxu0 }
 0x11e   :  { %v759_v5 = vpop.f32.mrb[6].mxu1  ;;  %v1854_v17 = vpop.f32.mrb[21].mxu0 }
 0x11f   :  { %v990_v7 = vadd.f32 %v989_v41, %v757_v1  ;;  %v760_v8 = vadd.f32 %v2556_v49, %v759_v5  ;;  %v761_v9 = vpop.f32.mrb[7].mxu1  ;;  %v1024_v19 = vpop.f32.mrb[22].mxu0 }
 0x120   :  { %v1855_v23 = vpop.f32.mrb[23].mxu0 }
 0x121   :  { %v993_v11 = vadd.f32 %v992_v43, %v760_v8 }
 0x123   :  { %v1642_v12 = vpack.c.bf16 %v993_v11, %v990_v7 }
 0x124   :  { %v764_v13 = vpop.f32.mrb[8].mxu1 }
 0x125   :  { %1759 = vst [vmem:[%s2686_s3 + $0x8] sm:$0xff] %v1642_v12   ;;  %v765_v15 = vadd.f32 %v2556_v49, %v764_v13  ;;  %v766_v16 = vpop.f32.mrb[9].mxu1  ;;  %v1029_v27 = vpop.f32.mrb[24].mxu0 }
 0x126   :  { %v767_v18 = vpop.f32.mrb[10].mxu1  ;;  %v1858_v30 = vpop.f32.mrb[25].mxu0 }
 0x127   :  { %v998_v20 = vadd.f32 %v997_v45, %v765_v15  ;;  %v768_v21 = vadd.f32 %v2556_v49, %v767_v18  ;;  %v769_v22 = vpop.f32.mrb[11].mxu1  ;;  %v1032_v32 = vpop.f32.mrb[26].mxu0 }
 0x128   :  { %v1859_v35 = vpop.f32.mrb[27].mxu0 }
 0x129   :  { %v1001_v24 = vadd.f32 %v1000_v47, %v768_v21 }
 0x12b   :  { %v1647_v25 = vpack.c.bf16 %v1001_v24, %v998_v20 }
 0x12c   :  { %v772_v26 = vpop.f32.mrb[12].mxu1 }
 0x12d   :  { %1760 = vst [vmem:[%s2686_s3 + $0x10] sm:$0xff] %v1647_v25   ;;  %v773_v28 = vadd.f32 %v2556_v49, %v772_v26  ;;  %v774_v29 = vpop.f32.mrb[13].mxu1  ;;  %v1037_v39 = vpop.f32.mrb[28].mxu0 }
 0x12e   :  { %v775_v31 = vpop.f32.mrb[14].mxu1  ;;  %v1862_v42 = vpop.f32.mrb[29].mxu0 }
 0x12f   :  { %v1006_v33 = vadd.f32 %v1005_v51, %v773_v28  ;;  %v776_v2 = vadd.f32 %v2556_v49, %v775_v31  ;;  %v777_v34 = vpop.f32.mrb[15].mxu1  ;;  %v1040_v44 = vpop.f32.mrb[30].mxu0 }
 0x130   :  { %v1863_v48 = vpop.f32.mrb[31].mxu0 }
 0x131   :  { %v1009_v36 = vadd.f32 %v1008_v56, %v776_v2 }
 0x133   :  { %v1652_v37 = vpack.c.bf16 %v1009_v36, %v1006_v33 }
 0x134   :  { %v780_v38 = vpop.f32.mrb[16].mxu1 }
 0x135   :  { %1761 = vst [vmem:[%s2686_s3 + $0x18] sm:$0xff] %v1652_v37   ;;  %v781_v40 = vadd.f32 %v2556_v49, %v780_v38  ;;  %v782_v41 = vpop.f32.mrb[17].mxu1  ;;  %v1045_v53 = vpop.f32.mrb[32].mxu0 }
 0x136   :  { %v783_v43 = vpop.f32.mrb[18].mxu1  ;;  %v1866_v56 = vpop.f32.mrb[33].mxu0 }
 0x137   :  { %v1014_v45 = vadd.f32 %v1013_v0, %v781_v40  ;;  %v784_v46 = vadd.f32 %v2556_v49, %v783_v43  ;;  %v785_v47 = vpop.f32.mrb[19].mxu1  ;;  %v1048_v58 = vpop.f32.mrb[34].mxu0 }
 0x138   :  { %v1867_v62 = vpop.f32.mrb[35].mxu0 }
 0x139   :  { %v1017_v50 = vadd.f32 %v1016_v6, %v784_v46 }
 0x13b   :  { %v1657_v51 = vpack.c.bf16 %v1017_v50, %v1014_v45 }
 0x13c   :  { %v788_v52 = vpop.f32.mrb[20].mxu1 }
 0x13d   :  { %1762 = vst [vmem:[%s2686_s3 + $0x20] sm:$0xff] %v1657_v51   ;;  %v789_v54 = vadd.f32 %v2556_v49, %v788_v52  ;;  %v790_v55 = vpop.f32.mrb[21].mxu1  ;;  %v1053_v3 = vpop.f32.mrb[36].mxu0 }
 0x13e   :  { %v791_v57 = vpop.f32.mrb[22].mxu1  ;;  %v1870_v6 = vpop.f32.mrb[37].mxu0 }
 0x13f   :  { %v1022_v59 = vadd.f32 %v1021_v14, %v789_v54  ;;  %v792_v60 = vadd.f32 %v2556_v49, %v791_v57  ;;  %v793_v61 = vpop.f32.mrb[23].mxu1  ;;  %v1056_v8 = vpop.f32.mrb[38].mxu0 }
 0x140   :  { %v1871_v12 = vpop.f32.mrb[39].mxu0 }
 0x141   :  { %v1025_v63 = vadd.f32 %v1024_v19, %v792_v60 }
 0x143   :  { %v1662_v0 = vpack.c.bf16 %v1025_v63, %v1022_v59 }
 0x144   :  { %v796_v1 = vpop.f32.mrb[24].mxu1 }
 0x145   :  { %1763 = vst [vmem:[%s2686_s3 + $0x28] sm:$0xff] %v1662_v0   ;;  %v797_v4 = vadd.f32 %v2556_v49, %v796_v1  ;;  %v798_v5 = vpop.f32.mrb[25].mxu1  ;;  %v1061_v16 = vpop.f32.mrb[40].mxu0 }
 0x146   :  { %v799_v7 = vpop.f32.mrb[26].mxu1  ;;  %v1874_v19 = vpop.f32.mrb[41].mxu0 }
 0x147   :  { %v1030_v9 = vadd.f32 %v1029_v27, %v797_v4  ;;  %v800_v10 = vadd.f32 %v2556_v49, %v799_v7  ;;  %v801_v11 = vpop.f32.mrb[27].mxu1  ;;  %v1064_v21 = vpop.f32.mrb[42].mxu0 }
 0x148   :  { %v1875_v25 = vpop.f32.mrb[43].mxu0 }
 0x149   :  { %v1033_v13 = vadd.f32 %v1032_v32, %v800_v10 }
 0x14b   :  { %v1667_v14 = vpack.c.bf16 %v1033_v13, %v1030_v9 }
 0x14c   :  { %v804_v15 = vpop.f32.mrb[28].mxu1 }
 0x14d   :  { %1764 = vst [vmem:[%s2686_s3 + $0x30] sm:$0xff] %v1667_v14   ;;  %v805_v17 = vadd.f32 %v2556_v49, %v804_v15  ;;  %v806_v18 = vpop.f32.mrb[29].mxu1  ;;  %v1069_v29 = vpop.f32.mrb[44].mxu0 }
 0x14e   :  { %v807_v20 = vpop.f32.mrb[30].mxu1  ;;  %v1878_v32 = vpop.f32.mrb[45].mxu0 }
 0x14f   :  { %v1038_v22 = vadd.f32 %v1037_v39, %v805_v17  ;;  %v808_v23 = vadd.f32 %v2556_v49, %v807_v20  ;;  %v809_v24 = vpop.f32.mrb[31].mxu1  ;;  %v1072_v2 = vpop.f32.mrb[46].mxu0 }
 0x150   :  { %v1879_v37 = vpop.f32.mrb[47].mxu0 }
 0x151   :  { %v1041_v26 = vadd.f32 %v1040_v44, %v808_v23 }
 0x153   :  { %v1672_v27 = vpack.c.bf16 %v1041_v26, %v1038_v22 }
 0x154   :  { %v812_v28 = vpop.f32.mrb[32].mxu1 }
 0x155   :  { %1765 = vst [vmem:[%s2686_s3 + $0x38] sm:$0xff] %v1672_v27   ;;  %v813_v30 = vadd.f32 %v2556_v49, %v812_v28  ;;  %v814_v31 = vpop.f32.mrb[33].mxu1  ;;  %v1077_v41 = vpop.f32.mrb[48].mxu0 }
 0x156   :  { %v815_v33 = vpop.f32.mrb[34].mxu1  ;;  %v1882_v44 = vpop.f32.mrb[49].mxu0 }
 0x157   :  { %v1046_v34 = vadd.f32 %v1045_v53, %v813_v30  ;;  %v816_v35 = vadd.f32 %v2556_v49, %v815_v33  ;;  %v817_v36 = vpop.f32.mrb[35].mxu1  ;;  %v1080_v46 = vpop.f32.mrb[50].mxu0 }
 0x158   :  { %v1883_v51 = vpop.f32.mrb[51].mxu0 }
 0x159   :  { %v1049_v38 = vadd.f32 %v1048_v58, %v816_v35 }
 0x15b   :  { %v1677_v39 = vpack.c.bf16 %v1049_v38, %v1046_v34 }
 0x15c   :  { %v820_v40 = vpop.f32.mrb[36].mxu1 }
 0x15d   :  { %1766 = vst [vmem:[%s2686_s3 + $0x40] sm:$0xff] %v1677_v39   ;;  %v821_v42 = vadd.f32 %v2556_v49, %v820_v40  ;;  %v822_v43 = vpop.f32.mrb[37].mxu1  ;;  %v1085_v55 = vpop.f32.mrb[52].mxu0 }
 0x15e   :  { %v823_v45 = vpop.f32.mrb[38].mxu1  ;;  %v1886_v58 = vpop.f32.mrb[53].mxu0 }
 0x15f   :  { %v1054_v47 = vadd.f32 %v1053_v3, %v821_v42  ;;  %v824_v48 = vadd.f32 %v2556_v49, %v823_v45  ;;  %v825_v50 = vpop.f32.mrb[39].mxu1  ;;  %v1088_v60 = vpop.f32.mrb[54].mxu0 }
 0x160   :  { %v1887_v0 = vpop.f32.mrb[55].mxu0 }
 0x161   :  { %v1057_v52 = vadd.f32 %v1056_v8, %v824_v48 }
 0x163   :  { %v1682_v53 = vpack.c.bf16 %v1057_v52, %v1054_v47 }
 0x164   :  { %v828_v54 = vpop.f32.mrb[40].mxu1 }
 0x165   :  { %1767 = vst [vmem:[%s2686_s3 + $0x48] sm:$0xff] %v1682_v53   ;;  %v829_v56 = vadd.f32 %v2556_v49, %v828_v54  ;;  %v830_v57 = vpop.f32.mrb[41].mxu1  ;;  %v1093_v5 = vpop.f32.mrb[56].mxu0 }
 0x166   :  { %v831_v59 = vpop.f32.mrb[42].mxu1  ;;  %v1890_v8 = vpop.f32.mrb[57].mxu0 }
 0x167   :  { %v1062_v61 = vadd.f32 %v1061_v16, %v829_v56  ;;  %v832_v62 = vadd.f32 %v2556_v49, %v831_v59  ;;  %v833_v63 = vpop.f32.mrb[43].mxu1  ;;  %v1096_v10 = vpop.f32.mrb[58].mxu0 }
 0x168   :  { %v1891_v14 = vpop.f32.mrb[59].mxu0 }
 0x169   :  { %v1065_v1 = vadd.f32 %v1064_v21, %v832_v62 }
 0x16b   :  { %v1687_v3 = vpack.c.bf16 %v1065_v1, %v1062_v61 }
 0x16c   :  { %v836_v4 = vpop.f32.mrb[44].mxu1 }
 0x16d   :  { %1768 = vst [vmem:[%s2686_s3 + $0x50] sm:$0xff] %v1687_v3   ;;  %v837_v6 = vadd.f32 %v2556_v49, %v836_v4  ;;  %v838_v7 = vpop.f32.mrb[45].mxu1  ;;  %v1101_v18 = vpop.f32.mrb[60].mxu0 }
 0x16e   :  { %v839_v9 = vpop.f32.mrb[46].mxu1  ;;  %v1894_v21 = vpop.f32.mrb[61].mxu0 }
 0x16f   :  { %v1070_v11 = vadd.f32 %v1069_v29, %v837_v6  ;;  %v840_v12 = vadd.f32 %v2556_v49, %v839_v9  ;;  %v841_v13 = vpop.f32.mrb[47].mxu1  ;;  %v1104_v23 = vpop.f32.mrb[62].mxu0 }
 0x170   :  { %v1895_v27 = vpop.f32.mrb[63].mxu0 }
 0x171   :  { %v1073_v15 = vadd.f32 %v1072_v2, %v840_v12 }
 0x173   :  { %v1692_v16 = vpack.c.bf16 %v1073_v15, %v1070_v11 }
 0x174   :  { %v844_v17 = vpop.f32.mrb[48].mxu1 }
 0x175   :  { %1769 = vst [vmem:[%s2686_s3 + $0x58] sm:$0xff] %v1692_v16   ;;  %v845_v19 = vadd.f32 %v2556_v49, %v844_v17  ;;  %v846_v20 = vpop.f32.mrb[49].mxu1  ;;  %v1109_v31 = vpop.f32.mrb[64].mxu0 }
 0x176   :  { %v847_v22 = vpop.f32.mrb[50].mxu1  ;;  %v1898_v2 = vpop.f32.mrb[65].mxu0 }
 0x177   :  { %v1078_v24 = vadd.f32 %v1077_v41, %v845_v19  ;;  %v848_v25 = vadd.f32 %v2556_v49, %v847_v22  ;;  %v849_v26 = vpop.f32.mrb[51].mxu1  ;;  %v1112_v35 = vpop.f32.mrb[66].mxu0 }
 0x178   :  { %v1899_v39 = vpop.f32.mrb[67].mxu0 }
 0x179   :  { %v1081_v28 = vadd.f32 %v1080_v46, %v848_v25 }
 0x17b   :  { %v1697_v29 = vpack.c.bf16 %v1081_v28, %v1078_v24 }
 0x17c   :  { %v852_v30 = vpop.f32.mrb[52].mxu1 }
 0x17d   :  { %1770 = vst [vmem:[%s2686_s3 + $0x60] sm:$0xff] %v1697_v29   ;;  %v853_v32 = vadd.f32 %v2556_v49, %v852_v30  ;;  %v854_v33 = vpop.f32.mrb[53].mxu1  ;;  %v1117_v43 = vpop.f32.mrb[68].mxu0 }
 0x17e   :  { %v855_v34 = vpop.f32.mrb[54].mxu1  ;;  %v1902_v46 = vpop.f32.mrb[69].mxu0 }
 0x17f   :  { %v1086_v36 = vadd.f32 %v1085_v55, %v853_v32  ;;  %v856_v37 = vadd.f32 %v2556_v49, %v855_v34  ;;  %v857_v38 = vpop.f32.mrb[55].mxu1  ;;  %v1120_v48 = vpop.f32.mrb[70].mxu0 }
 0x180   :  { %v1903_v53 = vpop.f32.mrb[71].mxu0 }
 0x181   :  { %v1089_v40 = vadd.f32 %v1088_v60, %v856_v37 }
 0x183   :  { %v1702_v41 = vpack.c.bf16 %v1089_v40, %v1086_v36 }
 0x184   :  { %v860_v42 = vpop.f32.mrb[56].mxu1 }
 0x185   :  { %1771 = vst [vmem:[%s2686_s3 + $0x68] sm:$0xff] %v1702_v41   ;;  %v861_v44 = vadd.f32 %v2556_v49, %v860_v42  ;;  %v862_v45 = vpop.f32.mrb[57].mxu1  ;;  %v1125_v57 = vpop.f32.mrb[72].mxu0 }
 0x186   :  { %v863_v47 = vpop.f32.mrb[58].mxu1  ;;  %v1906_v60 = vpop.f32.mrb[73].mxu0 }
 0x187   :  { %v1094_v50 = vadd.f32 %v1093_v5, %v861_v44  ;;  %v864_v51 = vadd.f32 %v2556_v49, %v863_v47  ;;  %v865_v52 = vpop.f32.mrb[59].mxu1  ;;  %v1128_v62 = vpop.f32.mrb[74].mxu0 }
 0x188   :  { %v1907_v3 = vpop.f32.mrb[75].mxu0 }
 0x189   :  { %v1097_v54 = vadd.f32 %v1096_v10, %v864_v51 }
 0x18b   :  { %v1707_v55 = vpack.c.bf16 %v1097_v54, %v1094_v50 }
 0x18c   :  { %v868_v56 = vpop.f32.mrb[60].mxu1 }
 0x18d   :  { %1772 = vst [vmem:[%s2686_s3 + $0x70] sm:$0xff] %v1707_v55   ;;  %v869_v58 = vadd.f32 %v2556_v49, %v868_v56  ;;  %v870_v59 = vpop.f32.mrb[61].mxu1  ;;  %v1133_v7 = vpop.f32.mrb[76].mxu0 }
 0x18e   :  { %v871_v61 = vpop.f32.mrb[62].mxu1  ;;  %v1910_v10 = vpop.f32.mrb[77].mxu0 }
 0x18f   :  { %v1102_v63 = vadd.f32 %v1101_v18, %v869_v58  ;;  %v872_v0 = vadd.f32 %v2556_v49, %v871_v61  ;;  %v873_v1 = vpop.f32.mrb[63].mxu1  ;;  %v1136_v12 = vpop.f32.mrb[78].mxu0 }
 0x190   :  { %v1911_v16 = vpop.f32.mrb[79].mxu0 }
 0x191   :  { %v1105_v4 = vadd.f32 %v1104_v23, %v872_v0 }
 0x193   :  { %v1712_v5 = vpack.c.bf16 %v1105_v4, %v1102_v63 }
 0x194   :  { %v876_v6 = vpop.f32.mrb[64].mxu1 }
 0x195   :  { %1773 = vst [vmem:[%s2686_s3 + $0x78] sm:$0xff] %v1712_v5   ;;  %v877_v8 = vadd.f32 %v2556_v49, %v876_v6  ;;  %v878_v9 = vpop.f32.mrb[65].mxu1  ;;  %v1141_v20 = vpop.f32.mrb[80].mxu0 }
 0x196   :  { %v879_v11 = vpop.f32.mrb[66].mxu1  ;;  %v1914_v23 = vpop.f32.mrb[81].mxu0 }
 0x197   :  { %v1110_v13 = vadd.f32 %v1109_v31, %v877_v8  ;;  %v880_v14 = vadd.f32 %v2556_v49, %v879_v11  ;;  %v881_v15 = vpop.f32.mrb[67].mxu1  ;;  %v1144_v25 = vpop.f32.mrb[82].mxu0 }
 0x198   :  { %v1915_v29 = vpop.f32.mrb[83].mxu0 }
 0x199   :  { %v1113_v17 = vadd.f32 %v1112_v35, %v880_v14 }
 0x19b   :  { %v1717_v18 = vpack.c.bf16 %v1113_v17, %v1110_v13 }
 0x19c   :  { %v884_v19 = vpop.f32.mrb[68].mxu1 }
 0x19d   :  { %1774 = vst [vmem:[%s2686_s3 + $0x80] sm:$0xff] %v1717_v18   ;;  %v885_v21 = vadd.f32 %v2556_v49, %v884_v19  ;;  %v886_v22 = vpop.f32.mrb[69].mxu1  ;;  %v1149_v33 = vpop.f32.mrb[84].mxu0 }
 0x19e   :  { %v887_v24 = vpop.f32.mrb[70].mxu1  ;;  %v1918_v35 = vpop.f32.mrb[85].mxu0 }
 0x19f   :  { %v1118_v26 = vadd.f32 %v1117_v43, %v885_v21  ;;  %v888_v27 = vadd.f32 %v2556_v49, %v887_v24  ;;  %v889_v28 = vpop.f32.mrb[71].mxu1  ;;  %v1152_v37 = vpop.f32.mrb[86].mxu0 }
 0x1a0   :  { %v1919_v41 = vpop.f32.mrb[87].mxu0 }
 0x1a1   :  { %v1121_v30 = vadd.f32 %v1120_v48, %v888_v27 }
 0x1a3   :  { %v1722_v31 = vpack.c.bf16 %v1121_v30, %v1118_v26 }
 0x1a4   :  { %v892_v32 = vpop.f32.mrb[72].mxu1 }
 0x1a5   :  { %1775 = vst [vmem:[%s2686_s3 + $0x88] sm:$0xff] %v1722_v31   ;;  %v893_v2 = vadd.f32 %v2556_v49, %v892_v32  ;;  %v894_v34 = vpop.f32.mrb[73].mxu1  ;;  %v1157_v45 = vpop.f32.mrb[88].mxu0 }
 0x1a6   :  { %v895_v36 = vpop.f32.mrb[74].mxu1  ;;  %v1922_v48 = vpop.f32.mrb[89].mxu0 }
 0x1a7   :  { %v1126_v38 = vadd.f32 %v1125_v57, %v893_v2  ;;  %v896_v39 = vadd.f32 %v2556_v49, %v895_v36  ;;  %v897_v40 = vpop.f32.mrb[75].mxu1  ;;  %v1160_v51 = vpop.f32.mrb[90].mxu0 }
 0x1a8   :  { %v1923_v55 = vpop.f32.mrb[91].mxu0 }
 0x1a9   :  { %v1129_v42 = vadd.f32 %v1128_v62, %v896_v39 }
 0x1ab   :  { %v1727_v43 = vpack.c.bf16 %v1129_v42, %v1126_v38 }
 0x1ac   :  { %v900_v44 = vpop.f32.mrb[76].mxu1 }
 0x1ad   :  { %1776 = vst [vmem:[%s2686_s3 + $0x90] sm:$0xff] %v1727_v43   ;;  %v901_v46 = vadd.f32 %v2556_v49, %v900_v44  ;;  %v902_v47 = vpop.f32.mrb[77].mxu1  ;;  %v1165_v59 = vpop.f32.mrb[92].mxu0 }
 0x1ae   :  { %v903_v50 = vpop.f32.mrb[78].mxu1  ;;  %v1926_v62 = vpop.f32.mrb[93].mxu0 }
 0x1af   :  { %v1134_v52 = vadd.f32 %v1133_v7, %v901_v46  ;;  %v904_v53 = vadd.f32 %v2556_v49, %v903_v50  ;;  %v905_v54 = vpop.f32.mrb[79].mxu1  ;;  %v1168_v0 = vpop.f32.mrb[94].mxu0 }
 0x1b0   :  { %v1927_v5 = vpop.f32.mrb[95].mxu0 }
 0x1b1   :  { %v1137_v56 = vadd.f32 %v1136_v12, %v904_v53 }
 0x1b3   :  { %v1732_v57 = vpack.c.bf16 %v1137_v56, %v1134_v52 }
 0x1b4   :  { %v908_v58 = vpop.f32.mrb[80].mxu1 }
 0x1b5   :  { %1777 = vst [vmem:[%s2686_s3 + $0x98] sm:$0xff] %v1732_v57   ;;  %v909_v60 = vadd.f32 %v2556_v49, %v908_v58  ;;  %v910_v61 = vpop.f32.mrb[81].mxu1  ;;  %v1173_v9 = vpop.f32.mrb[96].mxu0 }
 0x1b6   :  { %v911_v63 = vpop.f32.mrb[82].mxu1  ;;  %v1930_v12 = vpop.f32.mrb[97].mxu0 }
 0x1b7   :  { %v1142_v1 = vadd.f32 %v1141_v20, %v909_v60  ;;  %v912_v3 = vadd.f32 %v2556_v49, %v911_v63  ;;  %v913_v4 = vpop.f32.mrb[83].mxu1  ;;  %v1176_v14 = vpop.f32.mrb[98].mxu0 }
 0x1b8   :  { %v1931_v18 = vpop.f32.mrb[99].mxu0 }
 0x1b9   :  { %v1145_v6 = vadd.f32 %v1144_v25, %v912_v3 }
 0x1bb   :  { %v1737_v7 = vpack.c.bf16 %v1145_v6, %v1142_v1 }
 0x1bc   :  { %v916_v8 = vpop.f32.mrb[84].mxu1 }
 0x1bd   :  { %1778 = vst [vmem:[%s2686_s3 + $0xa0] sm:$0xff] %v1737_v7   ;;  %v917_v10 = vadd.f32 %v2556_v49, %v916_v8  ;;  %v918_v11 = vpop.f32.mrb[85].mxu1 }
 0x1be   :  { %v919_v13 = vpop.f32.mrb[86].mxu1 }
 0x1bf   :  { %v1150_v15 = vadd.f32 %v1149_v33, %v917_v10  ;;  %v920_v16 = vadd.f32 %v2556_v49, %v919_v13  ;;  %v921_v17 = vpop.f32.mrb[87].mxu1 }
 0x1c1   :  { %v1153_v19 = vadd.f32 %v1152_v37, %v920_v16 }
 0x1c3   :  { %v1742_v20 = vpack.c.bf16 %v1153_v19, %v1150_v15 }
 0x1c4   :  { %v924_v21 = vpop.f32.mrb[88].mxu1 }
 0x1c5   :  { %1779 = vst [vmem:[%s2686_s3 + $0xa8] sm:$0xff] %v1742_v20   ;;  %v925_v22 = vadd.f32 %v2556_v49, %v924_v21  ;;  %v926_v23 = vpop.f32.mrb[89].mxu1 }
 0x1c6   :  { %v927_v24 = vpop.f32.mrb[90].mxu1 }
 0x1c7   :  { %v1158_v25 = vadd.f32 %v1157_v45, %v925_v22  ;;  %v928_v26 = vadd.f32 %v2556_v49, %v927_v24  ;;  %v929_v27 = vpop.f32.mrb[91].mxu1 }
 0x1c9   :  { %v1161_v28 = vadd.f32 %v1160_v51, %v928_v26 }
 0x1cb   :  { %v1747_v29 = vpack.c.bf16 %v1161_v28, %v1158_v25 }
 0x1cc   :  { %v932_v30 = vpop.f32.mrb[92].mxu1 }
 0x1cd   :  { %1780 = vst [vmem:[%s2686_s3 + $0xb0] sm:$0xff] %v1747_v29   ;;  %v933_v31 = vadd.f32 %v2556_v49, %v932_v30  ;;  %v934_v32 = vpop.f32.mrb[93].mxu1 }
 0x1ce   :  { %v935_v33 = vpop.f32.mrb[94].mxu1 }
 0x1cf   :  { %v1166_v2 = vadd.f32 %v1165_v59, %v933_v31  ;;  %v936_v34 = vadd.f32 %v2556_v49, %v935_v33  ;;  %v937_v35 = vpop.f32.mrb[95].mxu1 }
 0x1d1   :  { %v1169_v36 = vadd.f32 %v1168_v0, %v936_v34 }
 0x1d3   :  { %v1752_v37 = vpack.c.bf16 %v1169_v36, %v1166_v2 }
 0x1d4   :  { %v940_v38 = vpop.f32.mrb[96].mxu1 }
 0x1d5   :  { %1781 = vst [vmem:[%s2686_s3 + $0xb8] sm:$0xff] %v1752_v37   ;;  %v941_v39 = vadd.f32 %v2556_v49, %v940_v38  ;;  %v942_v40 = vpop.f32.mrb[97].mxu1 }
 0x1d6   :  { %v943_v41 = vpop.f32.mrb[98].mxu1 }
 0x1d7   :  { %v1174_v42 = vadd.f32 %v1173_v9, %v941_v39  ;;  %v944_v43 = vadd.f32 %v2556_v49, %v943_v41  ;;  %v945_v44 = vpop.f32.mrb[99].mxu1 }
 0x1d9   :  { %v1177_v45 = vadd.f32 %v1176_v14, %v944_v43 }
 0x1db   :  { %v1757_v46 = vpack.c.bf16 %v1177_v45, %v1174_v42 }
 0x1dd   :  { %1782 = vst [vmem:[%s2686_s3 + $0xc0] sm:$0xff] %v1757_v46  }

// kernel: forward.13
= control target key start
LH: loop header
LB: loop body
LE: loop exit
PB: predicated region body
PF: predicated region fallthrough
CT: control target
= control target key end

     0   :  { %s15787_s24 = smov 0   ;;  %s15789_s25 = smov 0   ;;  %s18464_s0 = inlined_call_operand.vmem [shape: bf16[16,6400], index: 0, kind: input, shape index: {}]   ;;  %s18465_s1 = inlined_call_operand.vmem [shape: bf16[6400,1024], index: 1, kind: input, shape index: {}]   ;;  %s18466_s2 = inlined_call_operand.vmem [shape: f32[1,1024], index: 2, kind: input, shape index: {}]   ;;  %s18467_s3 = inlined_call_operand.vmem [shape: bf16[1024,128], index: 3, kind: input, shape index: {}]   ;;  %s18468_s4 = inlined_call_operand.vmem [shape: f32[1,128], index: 4, kind: input, shape index: {}]   ;;  %s18469_s5 = inlined_call_operand.vmem [shape: bf16[128,128], index: 5, kind: input, shape index: {}]   ;;  %s18470_s6 = inlined_call_operand.vmem [shape: f32[1,128], index: 6, kind: input, shape index: {}]   ;;  %s18471_s7 = inlined_call_operand.vmem [shape: f32[16,128], index: 7, kind: output, shape index: {}]  }
   0x1   :  { %s15791_s26 = smov 0  }
   0x2 LB: > { %s15803_s27 = sadd.s32 4294967295, %s15742_s26   ;;  %s15806_s28 = sadd.s32 1, %s15742_s26   ;;  %s15742_s26 = sphi %s15791_s26, %s18474_s26   ;;  %s15738_s25 = sphi %s15789_s25, %s18473_s25   ;;  %s15734_s24 = sphi %s15787_s24, %s18472_s24  }
   0x3   : > { %s42_s29 = ssub.s32 %s15742_s26, %s15806_s28  ;;  %s45_s30 = sadd.s32 1, %s15738_s25 }
   0x4   : > { %p43_p0 = scmp.eq.s32.totalorder %s42_s29, 0  ;;  %p52_p1 = scmp.ne.s32.totalorder %s15738_s25, %s15734_s24 }
   0x5   : > { %p53_p2 = scmp.eq.s32.totalorder %s15742_s26, 0  ;;  %p13349_p4 = scmp.ge.s32.totalorder %s15742_s26, 4 }
   0x6   : > { %s15815_s8 = scalar_select %p43_p0, %s15738_s25, %s45_s30  }
   0x7   : > { %p54_p3 = por %p53_p2, %p52_p1  ;;  %226 = sbr.rel (%p13349_p4) target bundleno = 818 (0x332), region = 32 }
   0xe   : > { %229 = sbr.rel (!%p54_p3) target bundleno = 818 (0x332), region = 36  ;;  %s231_s9 = sand.u32 (%p54_p3), 1, %s15738_s25  }
   0xf   : > { %s14236_s10 = sshll.u32 (%p54_p3), %s15742_s26, 3  ;;  %s14388_s11 = smul.u32 (%p54_p3), 6400, %s231_s9 }
  0x10   : > { %s15823_s14 = scalar_lea.vmem (%p54_p3), %s18465_s1, %s14236_s10 }
  0x11   : > { %v1865_v0 = vld [vmem:[%s15823_s14] sm:$0xff] (%p54_p3)  ;;  %s15831_s15 = scalar_lea.vmem (%p54_p3), [#allocation3], %s14388_s11 }
  0x12   : > { %v1867_v1 = vld [vmem:[%s15823_s14 + $0x20] sm:$0xff] (%p54_p3)  ;;  %1866 = vst [vmem:[%s15831_s15] sm:$0xff] (%p54_p3), %v1865_v0 }
  0x13   : > { %v1869_v2 = vld [vmem:[%s15823_s14 + $0x40] sm:$0xff] (%p54_p3)  ;;  %1868 = vst [vmem:[%s15831_s15 + $0x8] sm:$0xff] (%p54_p3), %v1867_v1 }
  0x14   : > { %v1871_v3 = vld [vmem:[%s15823_s14 + $0x60] sm:$0xff] (%p54_p3)  ;;  %1870 = vst [vmem:[%s15831_s15 + $0x10] sm:$0xff] (%p54_p3), %v1869_v2 }
  0x15   : > { %v1873_v4 = vld [vmem:[%s15823_s14 + $0x80] sm:$0xff]  ;;  %1872 = vst [vmem:[%s15831_s15 + $0x18] sm:$0xff] %v1871_v3 }
  0x16   : > { %v1875_v5 = vld [vmem:[%s15823_s14 + $0xa0] sm:$0xff]  ;;  %1874 = vst [vmem:[%s15831_s15 + $0x20] sm:$0xff] %v1873_v4 }
  0x17   : > { %1876 = vst [vmem:[%s15831_s15 + $0x28] sm:$0xff] %v1875_v5  ;;  %v1877_v6 = vld [vmem:[%s15823_s14 + $0xc0] sm:$0xff] }
  0x18   : > { %v1879_v7 = vld [vmem:[%s15823_s14 + $0xe0] sm:$0xff]  ;;  %1878 = vst [vmem:[%s15831_s15 + $0x30] sm:$0xff] %v1877_v6 }
  0x19   : > { %v1881_v8 = vld [vmem:[%s15823_s14 + $0x100] sm:$0xff]  ;;  %1880 = vst [vmem:[%s15831_s15 + $0x38] sm:$0xff] %v1879_v7 }
  0x1a   : > { %1882 = vst [vmem:[%s15831_s15 + $0x40] sm:$0xff] %v1881_v8  ;;  %v1883_v9 = vld [vmem:[%s15823_s14 + $0x120] sm:$0xff] }
  0x1b   : > { %v1885_v10 = vld [vmem:[%s15823_s14 + $0x140] sm:$0xff]  ;;  %1884 = vst [vmem:[%s15831_s15 + $0x48] sm:$0xff] %v1883_v9 }
  0x1c   : > { %v1887_v11 = vld [vmem:[%s15823_s14 + $0x160] sm:$0xff]  ;;  %1886 = vst [vmem:[%s15831_s15 + $0x50] sm:$0xff] %v1885_v10 }
  0x1d   : > { %1888 = vst [vmem:[%s15831_s15 + $0x58] sm:$0xff] %v1887_v11  ;;  %v1889_v12 = vld [vmem:[%s15823_s14 + $0x180] sm:$0xff] }
  0x1e   : > { %v1891_v13 = vld [vmem:[%s15823_s14 + $0x1a0] sm:$0xff]  ;;  %1890 = vst [vmem:[%s15831_s15 + $0x60] sm:$0xff] %v1889_v12 }
  0x1f   : > { %v1893_v14 = vld [vmem:[%s15823_s14 + $0x1c0] sm:$0xff]  ;;  %1892 = vst [vmem:[%s15831_s15 + $0x68] sm:$0xff] %v1891_v13 }
  0x20   : > { %1894 = vst [vmem:[%s15831_s15 + $0x70] sm:$0xff] %v1893_v14  ;;  %v1895_v15 = vld [vmem:[%s15823_s14 + $0x1e0] sm:$0xff] }
  0x21   : > { %v1897_v16 = vld [vmem:[%s15823_s14 + $0x200] sm:$0xff]  ;;  %1896 = vst [vmem:[%s15831_s15 + $0x78] sm:$0xff] %v1895_v15 }
  0x22   : > { %v1899_v17 = vld [vmem:[%s15823_s14 + $0x220] sm:$0xff]  ;;  %1898 = vst [vmem:[%s15831_s15 + $0x80] sm:$0xff] %v1897_v16 }
  0x23   : > { %1900 = vst [vmem:[%s15831_s15 + $0x88] sm:$0xff] %v1899_v17  ;;  %v1901_v18 = vld [vmem:[%s15823_s14 + $0x240] sm:$0xff] }
  0x24   : > { %v1903_v19 = vld [vmem:[%s15823_s14 + $0x260] sm:$0xff]  ;;  %1902 = vst [vmem:[%s15831_s15 + $0x90] sm:$0xff] %v1901_v18 }
  0x25   : > { %v1905_v20 = vld [vmem:[%s15823_s14 + $0x280] sm:$0xff]  ;;  %1904 = vst [vmem:[%s15831_s15 + $0x98] sm:$0xff] %v1903_v19 }
  0x26   : > { %1906 = vst [vmem:[%s15831_s15 + $0xa0] sm:$0xff] %v1905_v20  ;;  %v1907_v21 = vld [vmem:[%s15823_s14 + $0x2a0] sm:$0xff] }
  0x27   : > { %v1909_v22 = vld [vmem:[%s15823_s14 + $0x2c0] sm:$0xff]  ;;  %1908 = vst [vmem:[%s15831_s15 + $0xa8] sm:$0xff] %v1907_v21 }
  0x28   : > { %v1911_v23 = vld [vmem:[%s15823_s14 + $0x2e0] sm:$0xff]  ;;  %1910 = vst [vmem:[%s15831_s15 + $0xb0] sm:$0xff] %v1909_v22 }
  0x29   : > { %1912 = vst [vmem:[%s15831_s15 + $0xb8] sm:$0xff] %v1911_v23  ;;  %v1913_v24 = vld [vmem:[%s15823_s14 + $0x300] sm:$0xff] }
  0x2a   : > { %v1915_v25 = vld [vmem:[%s15823_s14 + $0x320] sm:$0xff]  ;;  %1914 = vst [vmem:[%s15831_s15 + $0xc0] sm:$0xff] %v1913_v24 }
  0x2b   : > { %v1917_v26 = vld [vmem:[%s15823_s14 + $0x340] sm:$0xff]  ;;  %1916 = vst [vmem:[%s15831_s15 + $0xc8] sm:$0xff] %v1915_v25 }
  0x2c   : > { %1918 = vst [vmem:[%s15831_s15 + $0xd0] sm:$0xff] %v1917_v26  ;;  %v1919_v27 = vld [vmem:[%s15823_s14 + $0x360] sm:$0xff] }
  0x2d   : > { %v1921_v28 = vld [vmem:[%s15823_s14 + $0x380] sm:$0xff]  ;;  %1920 = vst [vmem:[%s15831_s15 + $0xd8] sm:$0xff] %v1919_v27 }
  0x2e   : > { %v1923_v29 = vld [vmem:[%s15823_s14 + $0x3a0] sm:$0xff]  ;;  %1922 = vst [vmem:[%s15831_s15 + $0xe0] sm:$0xff] %v1921_v28 }
  0x2f   : > { %1924 = vst [vmem:[%s15831_s15 + $0xe8] sm:$0xff] %v1923_v29  ;;  %v1925_v30 = vld [vmem:[%s15823_s14 + $0x3c0] sm:$0xff] }
  0x30   : > { %v1927_v31 = vld [vmem:[%s15823_s14 + $0x3e0] sm:$0xff]  ;;  %1926 = vst [vmem:[%s15831_s15 + $0xf0] sm:$0xff] %v1925_v30 }
  0x31   : > { %v1929_v32 = vld [vmem:[%s15823_s14 + $0x400] sm:$0xff]  ;;  %1928 = vst [vmem:[%s15831_s15 + $0xf8] sm:$0xff] %v1927_v31 }
  0x32   : > { %1930 = vst [vmem:[%s15831_s15 + $0x100] sm:$0xff] %v1929_v32  ;;  %v1931_v33 = vld [vmem:[%s15823_s14 + $0x420] sm:$0xff] }
  0x33   : > { %v1933_v34 = vld [vmem:[%s15823_s14 + $0x440] sm:$0xff]  ;;  %1932 = vst [vmem:[%s15831_s15 + $0x108] sm:$0xff] %v1931_v33 }
  0x34   : > { %v1935_v35 = vld [vmem:[%s15823_s14 + $0x460] sm:$0xff]  ;;  %1934 = vst [vmem:[%s15831_s15 + $0x110] sm:$0xff] %v1933_v34 }
  0x35   : > { %1936 = vst [vmem:[%s15831_s15 + $0x118] sm:$0xff] %v1935_v35  ;;  %v1937_v36 = vld [vmem:[%s15823_s14 + $0x480] sm:$0xff] }
  0x36   : > { %v1939_v37 = vld [vmem:[%s15823_s14 + $0x4a0] sm:$0xff]  ;;  %1938 = vst [vmem:[%s15831_s15 + $0x120] sm:$0xff] %v1937_v36 }
  0x37   : > { %v1941_v38 = vld [vmem:[%s15823_s14 + $0x4c0] sm:$0xff]  ;;  %1940 = vst [vmem:[%s15831_s15 + $0x128] sm:$0xff] %v1939_v37 }
  0x38   : > { %1942 = vst [vmem:[%s15831_s15 + $0x130] sm:$0xff] %v1941_v38  ;;  %v1943_v39 = vld [vmem:[%s15823_s14 + $0x4e0] sm:$0xff] }
  0x39   : > { %v1945_v40 = vld [vmem:[%s15823_s14 + $0x500] sm:$0xff]  ;;  %1944 = vst [vmem:[%s15831_s15 + $0x138] sm:$0xff] %v1943_v39 }
  0x3a   : > { %v1947_v41 = vld [vmem:[%s15823_s14 + $0x520] sm:$0xff]  ;;  %1946 = vst [vmem:[%s15831_s15 + $0x140] sm:$0xff] %v1945_v40 }
  0x3b   : > { %1948 = vst [vmem:[%s15831_s15 + $0x148] sm:$0xff] %v1947_v41  ;;  %v1949_v42 = vld [vmem:[%s15823_s14 + $0x540] sm:$0xff] }
  0x3c   : > { %v1951_v43 = vld [vmem:[%s15823_s14 + $0x560] sm:$0xff]  ;;  %1950 = vst [vmem:[%s15831_s15 + $0x150] sm:$0xff] %v1949_v42 }
  0x3d   : > { %v1953_v44 = vld [vmem:[%s15823_s14 + $0x580] sm:$0xff]  ;;  %1952 = vst [vmem:[%s15831_s15 + $0x158] sm:$0xff] %v1951_v43 }
  0x3e   : > { %1954 = vst [vmem:[%s15831_s15 + $0x160] sm:$0xff] %v1953_v44  ;;  %v1955_v45 = vld [vmem:[%s15823_s14 + $0x5a0] sm:$0xff] }
  0x3f   : > { %v1957_v46 = vld [vmem:[%s15823_s14 + $0x5c0] sm:$0xff]  ;;  %1956 = vst [vmem:[%s15831_s15 + $0x168] sm:$0xff] %v1955_v45 }
  0x40   : > { %v1959_v47 = vld [vmem:[%s15823_s14 + $0x5e0] sm:$0xff]  ;;  %1958 = vst [vmem:[%s15831_s15 + $0x170] sm:$0xff] %v1957_v46 }
  0x41   : > { %1960 = vst [vmem:[%s15831_s15 + $0x178] sm:$0xff] %v1959_v47  ;;  %v1961_v48 = vld [vmem:[%s15823_s14 + $0x600] sm:$0xff] }
  0x42   : > { %v1963_v49 = vld [vmem:[%s15823_s14 + $0x620] sm:$0xff]  ;;  %1962 = vst [vmem:[%s15831_s15 + $0x180] sm:$0xff] %v1961_v48 }
  0x43   : > { %v1965_v50 = vld [vmem:[%s15823_s14 + $0x640] sm:$0xff]  ;;  %1964 = vst [vmem:[%s15831_s15 + $0x188] sm:$0xff] %v1963_v49 }
  0x44   : > { %1966 = vst [vmem:[%s15831_s15 + $0x190] sm:$0xff] %v1965_v50  ;;  %v1967_v51 = vld [vmem:[%s15823_s14 + $0x660] sm:$0xff] }
  0x45   : > { %v1969_v52 = vld [vmem:[%s15823_s14 + $0x680] sm:$0xff]  ;;  %1968 = vst [vmem:[%s15831_s15 + $0x198] sm:$0xff] %v1967_v51 }
  0x46   : > { %v1971_v53 = vld [vmem:[%s15823_s14 + $0x6a0] sm:$0xff]  ;;  %1970 = vst [vmem:[%s15831_s15 + $0x1a0] sm:$0xff] %v1969_v52 }
  0x47   : > { %1972 = vst [vmem:[%s15831_s15 + $0x1a8] sm:$0xff] %v1971_v53  ;;  %v1973_v54 = vld [vmem:[%s15823_s14 + $0x6c0] sm:$0xff] }
  0x48   : > { %v1975_v55 = vld [vmem:[%s15823_s14 + $0x6e0] sm:$0xff]  ;;  %1974 = vst [vmem:[%s15831_s15 + $0x1b0] sm:$0xff] %v1973_v54 }
  0x49   : > { %v1977_v56 = vld [vmem:[%s15823_s14 + $0x700] sm:$0xff]  ;;  %1976 = vst [vmem:[%s15831_s15 + $0x1b8] sm:$0xff] %v1975_v55 }
  0x4a   : > { %1978 = vst [vmem:[%s15831_s15 + $0x1c0] sm:$0xff] %v1977_v56  ;;  %v1979_v57 = vld [vmem:[%s15823_s14 + $0x720] sm:$0xff] }
  0x4b   : > { %v1981_v58 = vld [vmem:[%s15823_s14 + $0x740] sm:$0xff]  ;;  %1980 = vst [vmem:[%s15831_s15 + $0x1c8] sm:$0xff] %v1979_v57 }
  0x4c   : > { %v1983_v59 = vld [vmem:[%s15823_s14 + $0x760] sm:$0xff]  ;;  %1982 = vst [vmem:[%s15831_s15 + $0x1d0] sm:$0xff] %v1981_v58 }
  0x4d   : > { %1984 = vst [vmem:[%s15831_s15 + $0x1d8] sm:$0xff] %v1983_v59  ;;  %v1985_v60 = vld [vmem:[%s15823_s14 + $0x780] sm:$0xff] }
  0x4e   : > { %v1987_v61 = vld [vmem:[%s15823_s14 + $0x7a0] sm:$0xff]  ;;  %1986 = vst [vmem:[%s15831_s15 + $0x1e0] sm:$0xff] %v1985_v60 }
  0x4f   : > { %v1989_v62 = vld [vmem:[%s15823_s14 + $0x7c0] sm:$0xff]  ;;  %1988 = vst [vmem:[%s15831_s15 + $0x1e8] sm:$0xff] %v1987_v61 }
  0x50   : > { %1990 = vst [vmem:[%s15831_s15 + $0x1f0] sm:$0xff] %v1989_v62  ;;  %v1991_v63 = vld [vmem:[%s15823_s14 + $0x7e0] sm:$0xff] }
  0x51   : > { %v1993_v0 = vld [vmem:[%s15823_s14 + $0x800] sm:$0xff]  ;;  %1992 = vst [vmem:[%s15831_s15 + $0x1f8] sm:$0xff] %v1991_v63 }
  0x52   : > { %v1995_v1 = vld [vmem:[%s15823_s14 + $0x820] sm:$0xff]  ;;  %1994 = vst [vmem:[%s15831_s15 + $0x200] sm:$0xff] %v1993_v0 }
  0x53   : > { %1996 = vst [vmem:[%s15831_s15 + $0x208] sm:$0xff] %v1995_v1  ;;  %v1997_v2 = vld [vmem:[%s15823_s14 + $0x840] sm:$0xff] }
  0x54   : > { %v1999_v3 = vld [vmem:[%s15823_s14 + $0x860] sm:$0xff]  ;;  %1998 = vst [vmem:[%s15831_s15 + $0x210] sm:$0xff] %v1997_v2 }
  0x55   : > { %v2001_v4 = vld [vmem:[%s15823_s14 + $0x880] sm:$0xff]  ;;  %2000 = vst [vmem:[%s15831_s15 + $0x218] sm:$0xff] %v1999_v3 }
  0x56   : > { %2002 = vst [vmem:[%s15831_s15 + $0x220] sm:$0xff] %v2001_v4  ;;  %v2003_v5 = vld [vmem:[%s15823_s14 + $0x8a0] sm:$0xff] }
  0x57   : > { %v2005_v6 = vld [vmem:[%s15823_s14 + $0x8c0] sm:$0xff]  ;;  %2004 = vst [vmem:[%s15831_s15 + $0x228] sm:$0xff] %v2003_v5 }
  0x58   : > { %v2007_v7 = vld [vmem:[%s15823_s14 + $0x8e0] sm:$0xff]  ;;  %2006 = vst [vmem:[%s15831_s15 + $0x230] sm:$0xff] %v2005_v6 }
  0x59   : > { %2008 = vst [vmem:[%s15831_s15 + $0x238] sm:$0xff] %v2007_v7  ;;  %v2009_v8 = vld [vmem:[%s15823_s14 + $0x900] sm:$0xff] }
  0x5a   : > { %v2011_v9 = vld [vmem:[%s15823_s14 + $0x920] sm:$0xff]  ;;  %2010 = vst [vmem:[%s15831_s15 + $0x240] sm:$0xff] %v2009_v8 }
  0x5b   : > { %v2013_v10 = vld [vmem:[%s15823_s14 + $0x940] sm:$0xff]  ;;  %2012 = vst [vmem:[%s15831_s15 + $0x248] sm:$0xff] %v2011_v9 }
  0x5c   : > { %2014 = vst [vmem:[%s15831_s15 + $0x250] sm:$0xff] %v2013_v10  ;;  %v2015_v11 = vld [vmem:[%s15823_s14 + $0x960] sm:$0xff] }
  0x5d   : > { %v2017_v12 = vld [vmem:[%s15823_s14 + $0x980] sm:$0xff]  ;;  %2016 = vst [vmem:[%s15831_s15 + $0x258] sm:$0xff] %v2015_v11 }
  0x5e   : > { %v2019_v13 = vld [vmem:[%s15823_s14 + $0x9a0] sm:$0xff]  ;;  %2018 = vst [vmem:[%s15831_s15 + $0x260] sm:$0xff] %v2017_v12 }
  0x5f   : > { %2020 = vst [vmem:[%s15831_s15 + $0x268] sm:$0xff] %v2019_v13  ;;  %v2021_v14 = vld [vmem:[%s15823_s14 + $0x9c0] sm:$0xff] }
  0x60   : > { %v2023_v15 = vld [vmem:[%s15823_s14 + $0x9e0] sm:$0xff]  ;;  %2022 = vst [vmem:[%s15831_s15 + $0x270] sm:$0xff] %v2021_v14 }
  0x61   : > { %v2025_v16 = vld [vmem:[%s15823_s14 + $0xa00] sm:$0xff]  ;;  %2024 = vst [vmem:[%s15831_s15 + $0x278] sm:$0xff] %v2023_v15 }
  0x62   : > { %2026 = vst [vmem:[%s15831_s15 + $0x280] sm:$0xff] %v2025_v16  ;;  %v2027_v17 = vld [vmem:[%s15823_s14 + $0xa20] sm:$0xff] }
  0x63   : > { %v2029_v18 = vld [vmem:[%s15823_s14 + $0xa40] sm:$0xff]  ;;  %2028 = vst [vmem:[%s15831_s15 + $0x288] sm:$0xff] %v2027_v17 }
  0x64   : > { %v2031_v19 = vld [vmem:[%s15823_s14 + $0xa60] sm:$0xff]  ;;  %2030 = vst [vmem:[%s15831_s15 + $0x290] sm:$0xff] %v2029_v18 }
  0x65   : > { %2032 = vst [vmem:[%s15831_s15 + $0x298] sm:$0xff] %v2031_v19  ;;  %v2033_v20 = vld [vmem:[%s15823_s14 + $0xa80] sm:$0xff] }
  0x66   : > { %v2035_v21 = vld [vmem:[%s15823_s14 + $0xaa0] sm:$0xff]  ;;  %2034 = vst [vmem:[%s15831_s15 + $0x2a0] sm:$0xff] %v2033_v20 }
  0x67   : > { %v2037_v22 = vld [vmem:[%s15823_s14 + $0xac0] sm:$0xff]  ;;  %2036 = vst [vmem:[%s15831_s15 + $0x2a8] sm:$0xff] %v2035_v21 }
  0x68   : > { %2038 = vst [vmem:[%s15831_s15 + $0x2b0] sm:$0xff] %v2037_v22  ;;  %v2039_v23 = vld [vmem:[%s15823_s14 + $0xae0] sm:$0xff] }
  0x69   : > { %v2041_v24 = vld [vmem:[%s15823_s14 + $0xb00] sm:$0xff]  ;;  %2040 = vst [vmem:[%s15831_s15 + $0x2b8] sm:$0xff] %v2039_v23 }
  0x6a   : > { %v2043_v25 = vld [vmem:[%s15823_s14 + $0xb20] sm:$0xff]  ;;  %2042 = vst [vmem:[%s15831_s15 + $0x2c0] sm:$0xff] %v2041_v24 }
  0x6b   : > { %2044 = vst [vmem:[%s15831_s15 + $0x2c8] sm:$0xff] %v2043_v25  ;;  %v2045_v26 = vld [vmem:[%s15823_s14 + $0xb40] sm:$0xff] }
  0x6c   : > { %v2047_v27 = vld [vmem:[%s15823_s14 + $0xb60] sm:$0xff]  ;;  %2046 = vst [vmem:[%s15831_s15 + $0x2d0] sm:$0xff] %v2045_v26 }
  0x6d   : > { %v2049_v28 = vld [vmem:[%s15823_s14 + $0xb80] sm:$0xff]  ;;  %2048 = vst [vmem:[%s15831_s15 + $0x2d8] sm:$0xff] %v2047_v27 }
  0x6e   : > { %2050 = vst [vmem:[%s15831_s15 + $0x2e0] sm:$0xff] %v2049_v28  ;;  %v2051_v29 = vld [vmem:[%s15823_s14 + $0xba0] sm:$0xff] }
  0x6f   : > { %v2053_v30 = vld [vmem:[%s15823_s14 + $0xbc0] sm:$0xff]  ;;  %2052 = vst [vmem:[%s15831_s15 + $0x2e8] sm:$0xff] %v2051_v29 }
  0x70   : > { %v2055_v31 = vld [vmem:[%s15823_s14 + $0xbe0] sm:$0xff]  ;;  %2054 = vst [vmem:[%s15831_s15 + $0x2f0] sm:$0xff] %v2053_v30 }
  0x71   : > { %2056 = vst [vmem:[%s15831_s15 + $0x2f8] sm:$0xff] %v2055_v31  ;;  %v2057_v32 = vld [vmem:[%s15823_s14 + $0xc00] sm:$0xff] }
  0x72   : > { %v2059_v33 = vld [vmem:[%s15823_s14 + $0xc20] sm:$0xff]  ;;  %2058 = vst [vmem:[%s15831_s15 + $0x300] sm:$0xff] %v2057_v32 }
  0x73   : > { %v2061_v34 = vld [vmem:[%s15823_s14 + $0xc40] sm:$0xff]  ;;  %2060 = vst [vmem:[%s15831_s15 + $0x308] sm:$0xff] %v2059_v33 }
  0x74   : > { %2062 = vst [vmem:[%s15831_s15 + $0x310] sm:$0xff] %v2061_v34  ;;  %v2063_v35 = vld [vmem:[%s15823_s14 + $0xc60] sm:$0xff] }
  0x75   : > { %v2065_v36 = vld [vmem:[%s15823_s14 + $0xc80] sm:$0xff]  ;;  %2064 = vst [vmem:[%s15831_s15 + $0x318] sm:$0xff] %v2063_v35 }
  0x76   : > { %v2067_v37 = vld [vmem:[%s15823_s14 + $0xca0] sm:$0xff]  ;;  %2066 = vst [vmem:[%s15831_s15 + $0x320] sm:$0xff] %v2065_v36 }
  0x77   : > { %2068 = vst [vmem:[%s15831_s15 + $0x328] sm:$0xff] %v2067_v37  ;;  %v2069_v38 = vld [vmem:[%s15823_s14 + $0xcc0] sm:$0xff] }
  0x78   : > { %v2071_v39 = vld [vmem:[%s15823_s14 + $0xce0] sm:$0xff]  ;;  %2070 = vst [vmem:[%s15831_s15 + $0x330] sm:$0xff] %v2069_v38 }
  0x79   : > { %v2073_v40 = vld [vmem:[%s15823_s14 + $0xd00] sm:$0xff]  ;;  %2072 = vst [vmem:[%s15831_s15 + $0x338] sm:$0xff] %v2071_v39 }
  0x7a   : > { %2074 = vst [vmem:[%s15831_s15 + $0x340] sm:$0xff] %v2073_v40  ;;  %v2075_v41 = vld [vmem:[%s15823_s14 + $0xd20] sm:$0xff] }
  0x7b   : > { %v2077_v42 = vld [vmem:[%s15823_s14 + $0xd40] sm:$0xff]  ;;  %2076 = vst [vmem:[%s15831_s15 + $0x348] sm:$0xff] %v2075_v41 }
  0x7c   : > { %v2079_v43 = vld [vmem:[%s15823_s14 + $0xd60] sm:$0xff]  ;;  %2078 = vst [vmem:[%s15831_s15 + $0x350] sm:$0xff] %v2077_v42 }
  0x7d   : > { %2080 = vst [vmem:[%s15831_s15 + $0x358] sm:$0xff] %v2079_v43  ;;  %v2081_v44 = vld [vmem:[%s15823_s14 + $0xd80] sm:$0xff] }
  0x7e   : > { %v2083_v45 = vld [vmem:[%s15823_s14 + $0xda0] sm:$0xff]  ;;  %2082 = vst [vmem:[%s15831_s15 + $0x360] sm:$0xff] %v2081_v44 }
  0x7f   : > { %v2085_v46 = vld [vmem:[%s15823_s14 + $0xdc0] sm:$0xff]  ;;  %2084 = vst [vmem:[%s15831_s15 + $0x368] sm:$0xff] %v2083_v45 }
  0x80   : > { %2086 = vst [vmem:[%s15831_s15 + $0x370] sm:$0xff] %v2085_v46  ;;  %v2087_v47 = vld [vmem:[%s15823_s14 + $0xde0] sm:$0xff] }
  0x81   : > { %v2089_v48 = vld [vmem:[%s15823_s14 + $0xe00] sm:$0xff]  ;;  %2088 = vst [vmem:[%s15831_s15 + $0x378] sm:$0xff] %v2087_v47 }
  0x82   : > { %v2091_v49 = vld [vmem:[%s15823_s14 + $0xe20] sm:$0xff]  ;;  %2090 = vst [vmem:[%s15831_s15 + $0x380] sm:$0xff] %v2089_v48 }
  0x83   : > { %2092 = vst [vmem:[%s15831_s15 + $0x388] sm:$0xff] %v2091_v49  ;;  %v2093_v50 = vld [vmem:[%s15823_s14 + $0xe40] sm:$0xff] }
  0x84   : > { %v2095_v51 = vld [vmem:[%s15823_s14 + $0xe60] sm:$0xff]  ;;  %2094 = vst [vmem:[%s15831_s15 + $0x390] sm:$0xff] %v2093_v50 }
  0x85   : > { %v2097_v52 = vld [vmem:[%s15823_s14 + $0xe80] sm:$0xff]  ;;  %2096 = vst [vmem:[%s15831_s15 + $0x398] sm:$0xff] %v2095_v51 }
  0x86   : > { %2098 = vst [vmem:[%s15831_s15 + $0x3a0] sm:$0xff] %v2097_v52  ;;  %v2099_v53 = vld [vmem:[%s15823_s14 + $0xea0] sm:$0xff] }
  0x87   : > { %v2101_v54 = vld [vmem:[%s15823_s14 + $0xec0] sm:$0xff]  ;;  %2100 = vst [vmem:[%s15831_s15 + $0x3a8] sm:$0xff] %v2099_v53 }
  0x88   : > { %v2103_v55 = vld [vmem:[%s15823_s14 + $0xee0] sm:$0xff]  ;;  %2102 = vst [vmem:[%s15831_s15 + $0x3b0] sm:$0xff] %v2101_v54 }
  0x89   : > { %2104 = vst [vmem:[%s15831_s15 + $0x3b8] sm:$0xff] %v2103_v55  ;;  %v2105_v56 = vld [vmem:[%s15823_s14 + $0xf00] sm:$0xff] }
  0x8a   : > { %v2107_v57 = vld [vmem:[%s15823_s14 + $0xf20] sm:$0xff]  ;;  %2106 = vst [vmem:[%s15831_s15 + $0x3c0] sm:$0xff] %v2105_v56 }
  0x8b   : > { %v2109_v58 = vld [vmem:[%s15823_s14 + $0xf40] sm:$0xff]  ;;  %2108 = vst [vmem:[%s15831_s15 + $0x3c8] sm:$0xff] %v2107_v57 }
  0x8c   : > { %2110 = vst [vmem:[%s15831_s15 + $0x3d0] sm:$0xff] %v2109_v58  ;;  %v2111_v59 = vld [vmem:[%s15823_s14 + $0xf60] sm:$0xff] }
  0x8d   : > { %v2113_v60 = vld [vmem:[%s15823_s14 + $0xf80] sm:$0xff]  ;;  %2112 = vst [vmem:[%s15831_s15 + $0x3d8] sm:$0xff] %v2111_v59 }
  0x8e   : > { %v2115_v61 = vld [vmem:[%s15823_s14 + $0xfa0] sm:$0xff]  ;;  %2114 = vst [vmem:[%s15831_s15 + $0x3e0] sm:$0xff] %v2113_v60 }
  0x8f   : > { %2116 = vst [vmem:[%s15831_s15 + $0x3e8] sm:$0xff] %v2115_v61  ;;  %v2117_v62 = vld [vmem:[%s15823_s14 + $0xfc0] sm:$0xff] }
  0x90   : > { %v2119_v63 = vld [vmem:[%s15823_s14 + $0xfe0] sm:$0xff]  ;;  %2118 = vst [vmem:[%s15831_s15 + $0x3f0] sm:$0xff] %v2117_v62 }
  0x91   : > { %v2121_v0 = vld [vmem:[%s15823_s14 + $0x1000] sm:$0xff]  ;;  %2120 = vst [vmem:[%s15831_s15 + $0x3f8] sm:$0xff] %v2119_v63 }
  0x92   : > { %2122 = vst [vmem:[%s15831_s15 + $0x400] sm:$0xff] %v2121_v0  ;;  %v2123_v1 = vld [vmem:[%s15823_s14 + $0x1020] sm:$0xff] }
  0x93   : > { %v2125_v2 = vld [vmem:[%s15823_s14 + $0x1040] sm:$0xff]  ;;  %2124 = vst [vmem:[%s15831_s15 + $0x408] sm:$0xff] %v2123_v1 }
  0x94   : > { %v2127_v3 = vld [vmem:[%s15823_s14 + $0x1060] sm:$0xff]  ;;  %2126 = vst [vmem:[%s15831_s15 + $0x410] sm:$0xff] %v2125_v2 }
  0x95   : > { %2128 = vst [vmem:[%s15831_s15 + $0x418] sm:$0xff] %v2127_v3  ;;  %v2129_v4 = vld [vmem:[%s15823_s14 + $0x1080] sm:$0xff] }
  0x96   : > { %v2131_v5 = vld [vmem:[%s15823_s14 + $0x10a0] sm:$0xff]  ;;  %2130 = vst [vmem:[%s15831_s15 + $0x420] sm:$0xff] %v2129_v4 }
  0x97   : > { %v2133_v6 = vld [vmem:[%s15823_s14 + $0x10c0] sm:$0xff]  ;;  %2132 = vst [vmem:[%s15831_s15 + $0x428] sm:$0xff] %v2131_v5 }
  0x98   : > { %2134 = vst [vmem:[%s15831_s15 + $0x430] sm:$0xff] %v2133_v6  ;;  %v2135_v7 = vld [vmem:[%s15823_s14 + $0x10e0] sm:$0xff] }
  0x99   : > { %v2137_v8 = vld [vmem:[%s15823_s14 + $0x1100] sm:$0xff]  ;;  %2136 = vst [vmem:[%s15831_s15 + $0x438] sm:$0xff] %v2135_v7 }
  0x9a   : > { %v2139_v9 = vld [vmem:[%s15823_s14 + $0x1120] sm:$0xff]  ;;  %2138 = vst [vmem:[%s15831_s15 + $0x440] sm:$0xff] %v2137_v8 }
  0x9b   : > { %2140 = vst [vmem:[%s15831_s15 + $0x448] sm:$0xff] %v2139_v9  ;;  %v2141_v10 = vld [vmem:[%s15823_s14 + $0x1140] sm:$0xff] }
  0x9c   : > { %v2143_v11 = vld [vmem:[%s15823_s14 + $0x1160] sm:$0xff]  ;;  %2142 = vst [vmem:[%s15831_s15 + $0x450] sm:$0xff] %v2141_v10 }
  0x9d   : > { %v2145_v12 = vld [vmem:[%s15823_s14 + $0x1180] sm:$0xff]  ;;  %2144 = vst [vmem:[%s15831_s15 + $0x458] sm:$0xff] %v2143_v11 }
  0x9e   : > { %2146 = vst [vmem:[%s15831_s15 + $0x460] sm:$0xff] %v2145_v12  ;;  %v2147_v13 = vld [vmem:[%s15823_s14 + $0x11a0] sm:$0xff] }
  0x9f   : > { %v2149_v14 = vld [vmem:[%s15823_s14 + $0x11c0] sm:$0xff]  ;;  %2148 = vst [vmem:[%s15831_s15 + $0x468] sm:$0xff] %v2147_v13 }
  0xa0   : > { %v2151_v15 = vld [vmem:[%s15823_s14 + $0x11e0] sm:$0xff]  ;;  %2150 = vst [vmem:[%s15831_s15 + $0x470] sm:$0xff] %v2149_v14 }
  0xa1   : > { %2152 = vst [vmem:[%s15831_s15 + $0x478] sm:$0xff] %v2151_v15  ;;  %v2153_v16 = vld [vmem:[%s15823_s14 + $0x1200] sm:$0xff] }
  0xa2   : > { %v2155_v17 = vld [vmem:[%s15823_s14 + $0x1220] sm:$0xff]  ;;  %2154 = vst [vmem:[%s15831_s15 + $0x480] sm:$0xff] %v2153_v16 }
  0xa3   : > { %v2157_v18 = vld [vmem:[%s15823_s14 + $0x1240] sm:$0xff]  ;;  %2156 = vst [vmem:[%s15831_s15 + $0x488] sm:$0xff] %v2155_v17 }
  0xa4   : > { %2158 = vst [vmem:[%s15831_s15 + $0x490] sm:$0xff] %v2157_v18  ;;  %v2159_v19 = vld [vmem:[%s15823_s14 + $0x1260] sm:$0xff] }
  0xa5   : > { %v2161_v20 = vld [vmem:[%s15823_s14 + $0x1280] sm:$0xff]  ;;  %2160 = vst [vmem:[%s15831_s15 + $0x498] sm:$0xff] %v2159_v19 }
  0xa6   : > { %v2163_v21 = vld [vmem:[%s15823_s14 + $0x12a0] sm:$0xff]  ;;  %2162 = vst [vmem:[%s15831_s15 + $0x4a0] sm:$0xff] %v2161_v20 }
  0xa7   : > { %2164 = vst [vmem:[%s15831_s15 + $0x4a8] sm:$0xff] %v2163_v21  ;;  %v2165_v22 = vld [vmem:[%s15823_s14 + $0x12c0] sm:$0xff] }
  0xa8   : > { %v2167_v23 = vld [vmem:[%s15823_s14 + $0x12e0] sm:$0xff]  ;;  %2166 = vst [vmem:[%s15831_s15 + $0x4b0] sm:$0xff] %v2165_v22 }
  0xa9   : > { %v2169_v24 = vld [vmem:[%s15823_s14 + $0x1300] sm:$0xff]  ;;  %2168 = vst [vmem:[%s15831_s15 + $0x4b8] sm:$0xff] %v2167_v23 }
  0xaa   : > { %2170 = vst [vmem:[%s15831_s15 + $0x4c0] sm:$0xff] %v2169_v24  ;;  %v2171_v25 = vld [vmem:[%s15823_s14 + $0x1320] sm:$0xff] }
  0xab   : > { %v2173_v26 = vld [vmem:[%s15823_s14 + $0x1340] sm:$0xff]  ;;  %2172 = vst [vmem:[%s15831_s15 + $0x4c8] sm:$0xff] %v2171_v25 }
  0xac   : > { %v2175_v27 = vld [vmem:[%s15823_s14 + $0x1360] sm:$0xff]  ;;  %2174 = vst [vmem:[%s15831_s15 + $0x4d0] sm:$0xff] %v2173_v26 }
  0xad   : > { %2176 = vst [vmem:[%s15831_s15 + $0x4d8] sm:$0xff] %v2175_v27  ;;  %v2177_v28 = vld [vmem:[%s15823_s14 + $0x1380] sm:$0xff] }
  0xae   : > { %v2179_v29 = vld [vmem:[%s15823_s14 + $0x13a0] sm:$0xff]  ;;  %2178 = vst [vmem:[%s15831_s15 + $0x4e0] sm:$0xff] %v2177_v28 }
  0xaf   : > { %v2181_v30 = vld [vmem:[%s15823_s14 + $0x13c0] sm:$0xff]  ;;  %2180 = vst [vmem:[%s15831_s15 + $0x4e8] sm:$0xff] %v2179_v29 }
  0xb0   : > { %2182 = vst [vmem:[%s15831_s15 + $0x4f0] sm:$0xff] %v2181_v30  ;;  %v2183_v31 = vld [vmem:[%s15823_s14 + $0x13e0] sm:$0xff] }
  0xb1   : > { %v2185_v32 = vld [vmem:[%s15823_s14 + $0x1400] sm:$0xff]  ;;  %2184 = vst [vmem:[%s15831_s15 + $0x4f8] sm:$0xff] %v2183_v31 }
  0xb2   : > { %v2187_v33 = vld [vmem:[%s15823_s14 + $0x1420] sm:$0xff]  ;;  %2186 = vst [vmem:[%s15831_s15 + $0x500] sm:$0xff] %v2185_v32 }
  0xb3   : > { %2188 = vst [vmem:[%s15831_s15 + $0x508] sm:$0xff] %v2187_v33  ;;  %v2189_v34 = vld [vmem:[%s15823_s14 + $0x1440] sm:$0xff] }
  0xb4   : > { %v2191_v35 = vld [vmem:[%s15823_s14 + $0x1460] sm:$0xff]  ;;  %2190 = vst [vmem:[%s15831_s15 + $0x510] sm:$0xff] %v2189_v34 }
  0xb5   : > { %v2193_v36 = vld [vmem:[%s15823_s14 + $0x1480] sm:$0xff]  ;;  %2192 = vst [vmem:[%s15831_s15 + $0x518] sm:$0xff] %v2191_v35 }
  0xb6   : > { %2194 = vst [vmem:[%s15831_s15 + $0x520] sm:$0xff] %v2193_v36  ;;  %v2195_v37 = vld [vmem:[%s15823_s14 + $0x14a0] sm:$0xff] }
  0xb7   : > { %v2197_v38 = vld [vmem:[%s15823_s14 + $0x14c0] sm:$0xff]  ;;  %2196 = vst [vmem:[%s15831_s15 + $0x528] sm:$0xff] %v2195_v37 }
  0xb8   : > { %v2199_v39 = vld [vmem:[%s15823_s14 + $0x14e0] sm:$0xff]  ;;  %2198 = vst [vmem:[%s15831_s15 + $0x530] sm:$0xff] %v2197_v38 }
  0xb9   : > { %2200 = vst [vmem:[%s15831_s15 + $0x538] sm:$0xff] %v2199_v39  ;;  %v2201_v40 = vld [vmem:[%s15823_s14 + $0x1500] sm:$0xff] }
  0xba   : > { %v2203_v41 = vld [vmem:[%s15823_s14 + $0x1520] sm:$0xff]  ;;  %2202 = vst [vmem:[%s15831_s15 + $0x540] sm:$0xff] %v2201_v40 }
  0xbb   : > { %v2205_v42 = vld [vmem:[%s15823_s14 + $0x1540] sm:$0xff]  ;;  %2204 = vst [vmem:[%s15831_s15 + $0x548] sm:$0xff] %v2203_v41 }
  0xbc   : > { %2206 = vst [vmem:[%s15831_s15 + $0x550] sm:$0xff] %v2205_v42  ;;  %v2207_v43 = vld [vmem:[%s15823_s14 + $0x1560] sm:$0xff] }
  0xbd   : > { %v2209_v44 = vld [vmem:[%s15823_s14 + $0x1580] sm:$0xff]  ;;  %2208 = vst [vmem:[%s15831_s15 + $0x558] sm:$0xff] %v2207_v43 }
  0xbe   : > { %v2211_v45 = vld [vmem:[%s15823_s14 + $0x15a0] sm:$0xff]  ;;  %2210 = vst [vmem:[%s15831_s15 + $0x560] sm:$0xff] %v2209_v44 }
  0xbf   : > { %2212 = vst [vmem:[%s15831_s15 + $0x568] sm:$0xff] %v2211_v45  ;;  %v2213_v46 = vld [vmem:[%s15823_s14 + $0x15c0] sm:$0xff] }
  0xc0   : > { %v2215_v47 = vld [vmem:[%s15823_s14 + $0x15e0] sm:$0xff]  ;;  %2214 = vst [vmem:[%s15831_s15 + $0x570] sm:$0xff] %v2213_v46 }
  0xc1   : > { %v2217_v48 = vld [vmem:[%s15823_s14 + $0x1600] sm:$0xff]  ;;  %2216 = vst [vmem:[%s15831_s15 + $0x578] sm:$0xff] %v2215_v47 }
  0xc2   : > { %2218 = vst [vmem:[%s15831_s15 + $0x580] sm:$0xff] %v2217_v48  ;;  %v2219_v49 = vld [vmem:[%s15823_s14 + $0x1620] sm:$0xff] }
  0xc3   : > { %v2221_v50 = vld [vmem:[%s15823_s14 + $0x1640] sm:$0xff]  ;;  %2220 = vst [vmem:[%s15831_s15 + $0x588] sm:$0xff] %v2219_v49 }
  0xc4   : > { %v2223_v51 = vld [vmem:[%s15823_s14 + $0x1660] sm:$0xff]  ;;  %2222 = vst [vmem:[%s15831_s15 + $0x590] sm:$0xff] %v2221_v50 }
  0xc5   : > { %2224 = vst [vmem:[%s15831_s15 + $0x598] sm:$0xff] %v2223_v51  ;;  %v2225_v52 = vld [vmem:[%s15823_s14 + $0x1680] sm:$0xff] }
  0xc6   : > { %v2227_v53 = vld [vmem:[%s15823_s14 + $0x16a0] sm:$0xff]  ;;  %2226 = vst [vmem:[%s15831_s15 + $0x5a0] sm:$0xff] %v2225_v52 }
  0xc7   : > { %v2229_v54 = vld [vmem:[%s15823_s14 + $0x16c0] sm:$0xff]  ;;  %2228 = vst [vmem:[%s15831_s15 + $0x5a8] sm:$0xff] %v2227_v53 }
  0xc8   : > { %2230 = vst [vmem:[%s15831_s15 + $0x5b0] sm:$0xff] %v2229_v54  ;;  %v2231_v55 = vld [vmem:[%s15823_s14 + $0x16e0] sm:$0xff] }
  0xc9   : > { %v2233_v56 = vld [vmem:[%s15823_s14 + $0x1700] sm:$0xff]  ;;  %2232 = vst [vmem:[%s15831_s15 + $0x5b8] sm:$0xff] %v2231_v55 }
  0xca   : > { %v2235_v57 = vld [vmem:[%s15823_s14 + $0x1720] sm:$0xff]  ;;  %2234 = vst [vmem:[%s15831_s15 + $0x5c0] sm:$0xff] %v2233_v56 }
  0xcb   : > { %2236 = vst [vmem:[%s15831_s15 + $0x5c8] sm:$0xff] %v2235_v57  ;;  %v2237_v58 = vld [vmem:[%s15823_s14 + $0x1740] sm:$0xff] }
  0xcc   : > { %v2239_v59 = vld [vmem:[%s15823_s14 + $0x1760] sm:$0xff]  ;;  %2238 = vst [vmem:[%s15831_s15 + $0x5d0] sm:$0xff] %v2237_v58 }
  0xcd   : > { %v2241_v60 = vld [vmem:[%s15823_s14 + $0x1780] sm:$0xff]  ;;  %2240 = vst [vmem:[%s15831_s15 + $0x5d8] sm:$0xff] %v2239_v59 }
  0xce   : > { %2242 = vst [vmem:[%s15831_s15 + $0x5e0] sm:$0xff] %v2241_v60  ;;  %v2243_v61 = vld [vmem:[%s15823_s14 + $0x17a0] sm:$0xff] }
  0xcf   : > { %v2245_v62 = vld [vmem:[%s15823_s14 + $0x17c0] sm:$0xff]  ;;  %2244 = vst [vmem:[%s15831_s15 + $0x5e8] sm:$0xff] %v2243_v61 }
  0xd0   : > { %v2247_v63 = vld [vmem:[%s15823_s14 + $0x17e0] sm:$0xff]  ;;  %2246 = vst [vmem:[%s15831_s15 + $0x5f0] sm:$0xff] %v2245_v62 }
  0xd1   : > { %2248 = vst [vmem:[%s15831_s15 + $0x5f8] sm:$0xff] %v2247_v63  ;;  %v2249_v0 = vld [vmem:[%s15823_s14 + $0x1800] sm:$0xff] }
  0xd2   : > { %v2251_v1 = vld [vmem:[%s15823_s14 + $0x1820] sm:$0xff]  ;;  %2250 = vst [vmem:[%s15831_s15 + $0x600] sm:$0xff] %v2249_v0 }
  0xd3   : > { %v2253_v2 = vld [vmem:[%s15823_s14 + $0x1840] sm:$0xff]  ;;  %2252 = vst [vmem:[%s15831_s15 + $0x608] sm:$0xff] %v2251_v1 }
  0xd4   : > { %2254 = vst [vmem:[%s15831_s15 + $0x610] sm:$0xff] %v2253_v2  ;;  %v2255_v3 = vld [vmem:[%s15823_s14 + $0x1860] sm:$0xff] }
  0xd5   : > { %v2257_v4 = vld [vmem:[%s15823_s14 + $0x1880] sm:$0xff]  ;;  %2256 = vst [vmem:[%s15831_s15 + $0x618] sm:$0xff] %v2255_v3 }
  0xd6   : > { %v2259_v5 = vld [vmem:[%s15823_s14 + $0x18a0] sm:$0xff]  ;;  %2258 = vst [vmem:[%s15831_s15 + $0x620] sm:$0xff] %v2257_v4 }
  0xd7   : > { %2260 = vst [vmem:[%s15831_s15 + $0x628] sm:$0xff] %v2259_v5  ;;  %v2261_v6 = vld [vmem:[%s15823_s14 + $0x18c0] sm:$0xff] }
  0xd8   : > { %v2263_v7 = vld [vmem:[%s15823_s14 + $0x18e0] sm:$0xff]  ;;  %2262 = vst [vmem:[%s15831_s15 + $0x630] sm:$0xff] %v2261_v6 }
  0xd9   : > { %v2265_v8 = vld [vmem:[%s15823_s14 + $0x1900] sm:$0xff]  ;;  %2264 = vst [vmem:[%s15831_s15 + $0x638] sm:$0xff] %v2263_v7 }
  0xda   : > { %2266 = vst [vmem:[%s15831_s15 + $0x640] sm:$0xff] %v2265_v8  ;;  %v2267_v9 = vld [vmem:[%s15823_s14 + $0x1920] sm:$0xff] }
  0xdb   : > { %v2269_v10 = vld [vmem:[%s15823_s14 + $0x1940] sm:$0xff]  ;;  %2268 = vst [vmem:[%s15831_s15 + $0x648] sm:$0xff] %v2267_v9 }
  0xdc   : > { %v2271_v11 = vld [vmem:[%s15823_s14 + $0x1960] sm:$0xff]  ;;  %2270 = vst [vmem:[%s15831_s15 + $0x650] sm:$0xff] %v2269_v10 }
  0xdd   : > { %2272 = vst [vmem:[%s15831_s15 + $0x658] sm:$0xff] %v2271_v11  ;;  %v2273_v12 = vld [vmem:[%s15823_s14 + $0x1980] sm:$0xff] }
  0xde   : > { %v2275_v13 = vld [vmem:[%s15823_s14 + $0x19a0] sm:$0xff]  ;;  %2274 = vst [vmem:[%s15831_s15 + $0x660] sm:$0xff] %v2273_v12 }
  0xdf   : > { %v2277_v14 = vld [vmem:[%s15823_s14 + $0x19c0] sm:$0xff]  ;;  %2276 = vst [vmem:[%s15831_s15 + $0x668] sm:$0xff] %v2275_v13 }
  0xe0   : > { %2278 = vst [vmem:[%s15831_s15 + $0x670] sm:$0xff] %v2277_v14  ;;  %v2279_v15 = vld [vmem:[%s15823_s14 + $0x19e0] sm:$0xff] }
  0xe1   : > { %v2281_v16 = vld [vmem:[%s15823_s14 + $0x1a00] sm:$0xff]  ;;  %2280 = vst [vmem:[%s15831_s15 + $0x678] sm:$0xff] %v2279_v15 }
  0xe2   : > { %v2283_v17 = vld [vmem:[%s15823_s14 + $0x1a20] sm:$0xff]  ;;  %2282 = vst [vmem:[%s15831_s15 + $0x680] sm:$0xff] %v2281_v16 }
  0xe3   : > { %2284 = vst [vmem:[%s15831_s15 + $0x688] sm:$0xff] %v2283_v17  ;;  %v2285_v18 = vld [vmem:[%s15823_s14 + $0x1a40] sm:$0xff] }
  0xe4   : > { %v2287_v19 = vld [vmem:[%s15823_s14 + $0x1a60] sm:$0xff]  ;;  %2286 = vst [vmem:[%s15831_s15 + $0x690] sm:$0xff] %v2285_v18 }
  0xe5   : > { %v2289_v20 = vld [vmem:[%s15823_s14 + $0x1a80] sm:$0xff]  ;;  %2288 = vst [vmem:[%s15831_s15 + $0x698] sm:$0xff] %v2287_v19 }
  0xe6   : > { %2290 = vst [vmem:[%s15831_s15 + $0x6a0] sm:$0xff] %v2289_v20  ;;  %v2291_v21 = vld [vmem:[%s15823_s14 + $0x1aa0] sm:$0xff] }
  0xe7   : > { %v2293_v22 = vld [vmem:[%s15823_s14 + $0x1ac0] sm:$0xff]  ;;  %2292 = vst [vmem:[%s15831_s15 + $0x6a8] sm:$0xff] %v2291_v21 }
  0xe8   : > { %v2295_v23 = vld [vmem:[%s15823_s14 + $0x1ae0] sm:$0xff]  ;;  %2294 = vst [vmem:[%s15831_s15 + $0x6b0] sm:$0xff] %v2293_v22 }
  0xe9   : > { %2296 = vst [vmem:[%s15831_s15 + $0x6b8] sm:$0xff] %v2295_v23  ;;  %v2297_v24 = vld [vmem:[%s15823_s14 + $0x1b00] sm:$0xff] }
  0xea   : > { %v2299_v25 = vld [vmem:[%s15823_s14 + $0x1b20] sm:$0xff]  ;;  %2298 = vst [vmem:[%s15831_s15 + $0x6c0] sm:$0xff] %v2297_v24 }
  0xeb   : > { %v2301_v26 = vld [vmem:[%s15823_s14 + $0x1b40] sm:$0xff]  ;;  %2300 = vst [vmem:[%s15831_s15 + $0x6c8] sm:$0xff] %v2299_v25 }
  0xec   : > { %2302 = vst [vmem:[%s15831_s15 + $0x6d0] sm:$0xff] %v2301_v26  ;;  %v2303_v27 = vld [vmem:[%s15823_s14 + $0x1b60] sm:$0xff] }
  0xed   : > { %v2305_v28 = vld [vmem:[%s15823_s14 + $0x1b80] sm:$0xff]  ;;  %2304 = vst [vmem:[%s15831_s15 + $0x6d8] sm:$0xff] %v2303_v27 }
  0xee   : > { %v2307_v29 = vld [vmem:[%s15823_s14 + $0x1ba0] sm:$0xff]  ;;  %2306 = vst [vmem:[%s15831_s15 + $0x6e0] sm:$0xff] %v2305_v28 }
  0xef   : > { %2308 = vst [vmem:[%s15831_s15 + $0x6e8] sm:$0xff] %v2307_v29  ;;  %v2309_v30 = vld [vmem:[%s15823_s14 + $0x1bc0] sm:$0xff] }
  0xf0   : > { %v2311_v31 = vld [vmem:[%s15823_s14 + $0x1be0] sm:$0xff]  ;;  %2310 = vst [vmem:[%s15831_s15 + $0x6f0] sm:$0xff] %v2309_v30 }
  0xf1   : > { %v2313_v32 = vld [vmem:[%s15823_s14 + $0x1c00] sm:$0xff]  ;;  %2312 = vst [vmem:[%s15831_s15 + $0x6f8] sm:$0xff] %v2311_v31 }
  0xf2   : > { %2314 = vst [vmem:[%s15831_s15 + $0x700] sm:$0xff] %v2313_v32  ;;  %v2315_v33 = vld [vmem:[%s15823_s14 + $0x1c20] sm:$0xff] }
  0xf3   : > { %v2317_v34 = vld [vmem:[%s15823_s14 + $0x1c40] sm:$0xff]  ;;  %2316 = vst [vmem:[%s15831_s15 + $0x708] sm:$0xff] %v2315_v33 }
  0xf4   : > { %v2319_v35 = vld [vmem:[%s15823_s14 + $0x1c60] sm:$0xff]  ;;  %2318 = vst [vmem:[%s15831_s15 + $0x710] sm:$0xff] %v2317_v34 }
  0xf5   : > { %2320 = vst [vmem:[%s15831_s15 + $0x718] sm:$0xff] %v2319_v35  ;;  %v2321_v36 = vld [vmem:[%s15823_s14 + $0x1c80] sm:$0xff] }
  0xf6   : > { %v2323_v37 = vld [vmem:[%s15823_s14 + $0x1ca0] sm:$0xff]  ;;  %2322 = vst [vmem:[%s15831_s15 + $0x720] sm:$0xff] %v2321_v36 }
  0xf7   : > { %v2325_v38 = vld [vmem:[%s15823_s14 + $0x1cc0] sm:$0xff]  ;;  %2324 = vst [vmem:[%s15831_s15 + $0x728] sm:$0xff] %v2323_v37 }
  0xf8   : > { %2326 = vst [vmem:[%s15831_s15 + $0x730] sm:$0xff] %v2325_v38  ;;  %v2327_v39 = vld [vmem:[%s15823_s14 + $0x1ce0] sm:$0xff] }
  0xf9   : > { %v2329_v40 = vld [vmem:[%s15823_s14 + $0x1d00] sm:$0xff]  ;;  %2328 = vst [vmem:[%s15831_s15 + $0x738] sm:$0xff] %v2327_v39 }
  0xfa   : > { %v2331_v41 = vld [vmem:[%s15823_s14 + $0x1d20] sm:$0xff]  ;;  %2330 = vst [vmem:[%s15831_s15 + $0x740] sm:$0xff] %v2329_v40 }
  0xfb   : > { %2332 = vst [vmem:[%s15831_s15 + $0x748] sm:$0xff] %v2331_v41  ;;  %v2333_v42 = vld [vmem:[%s15823_s14 + $0x1d40] sm:$0xff] }
  0xfc   : > { %v2335_v43 = vld [vmem:[%s15823_s14 + $0x1d60] sm:$0xff]  ;;  %2334 = vst [vmem:[%s15831_s15 + $0x750] sm:$0xff] %v2333_v42 }
  0xfd   : > { %v2337_v44 = vld [vmem:[%s15823_s14 + $0x1d80] sm:$0xff]  ;;  %2336 = vst [vmem:[%s15831_s15 + $0x758] sm:$0xff] %v2335_v43 }
  0xfe   : > { %2338 = vst [vmem:[%s15831_s15 + $0x760] sm:$0xff] %v2337_v44  ;;  %v2339_v45 = vld [vmem:[%s15823_s14 + $0x1da0] sm:$0xff] }
  0xff   : > { %v2341_v46 = vld [vmem:[%s15823_s14 + $0x1dc0] sm:$0xff]  ;;  %2340 = vst [vmem:[%s15831_s15 + $0x768] sm:$0xff] %v2339_v45 }
 0x100   : > { %v2343_v47 = vld [vmem:[%s15823_s14 + $0x1de0] sm:$0xff]  ;;  %2342 = vst [vmem:[%s15831_s15 + $0x770] sm:$0xff] %v2341_v46 }
 0x101   : > { %2344 = vst [vmem:[%s15831_s15 + $0x778] sm:$0xff] %v2343_v47  ;;  %v2345_v48 = vld [vmem:[%s15823_s14 + $0x1e00] sm:$0xff] }
 0x102   : > { %v2347_v49 = vld [vmem:[%s15823_s14 + $0x1e20] sm:$0xff]  ;;  %2346 = vst [vmem:[%s15831_s15 + $0x780] sm:$0xff] %v2345_v48 }
 0x103   : > { %v2349_v50 = vld [vmem:[%s15823_s14 + $0x1e40] sm:$0xff]  ;;  %2348 = vst [vmem:[%s15831_s15 + $0x788] sm:$0xff] %v2347_v49 }
 0x104   : > { %2350 = vst [vmem:[%s15831_s15 + $0x790] sm:$0xff] %v2349_v50  ;;  %v2351_v51 = vld [vmem:[%s15823_s14 + $0x1e60] sm:$0xff] }
 0x105   : > { %v2353_v52 = vld [vmem:[%s15823_s14 + $0x1e80] sm:$0xff]  ;;  %2352 = vst [vmem:[%s15831_s15 + $0x798] sm:$0xff] %v2351_v51 }
 0x106   : > { %v2355_v53 = vld [vmem:[%s15823_s14 + $0x1ea0] sm:$0xff]  ;;  %2354 = vst [vmem:[%s15831_s15 + $0x7a0] sm:$0xff] %v2353_v52 }
 0x107   : > { %2356 = vst [vmem:[%s15831_s15 + $0x7a8] sm:$0xff] %v2355_v53  ;;  %v2357_v54 = vld [vmem:[%s15823_s14 + $0x1ec0] sm:$0xff] }
 0x108   : > { %v2359_v55 = vld [vmem:[%s15823_s14 + $0x1ee0] sm:$0xff]  ;;  %2358 = vst [vmem:[%s15831_s15 + $0x7b0] sm:$0xff] %v2357_v54 }
 0x109   : > { %v2361_v56 = vld [vmem:[%s15823_s14 + $0x1f00] sm:$0xff]  ;;  %2360 = vst [vmem:[%s15831_s15 + $0x7b8] sm:$0xff] %v2359_v55 }
 0x10a   : > { %2362 = vst [vmem:[%s15831_s15 + $0x7c0] sm:$0xff] %v2361_v56  ;;  %v2363_v57 = vld [vmem:[%s15823_s14 + $0x1f20] sm:$0xff] }
 0x10b   : > { %v2365_v58 = vld [vmem:[%s15823_s14 + $0x1f40] sm:$0xff]  ;;  %2364 = vst [vmem:[%s15831_s15 + $0x7c8] sm:$0xff] %v2363_v57 }
 0x10c   : > { %v2367_v59 = vld [vmem:[%s15823_s14 + $0x1f60] sm:$0xff]  ;;  %2366 = vst [vmem:[%s15831_s15 + $0x7d0] sm:$0xff] %v2365_v58 }
 0x10d   : > { %2368 = vst [vmem:[%s15831_s15 + $0x7d8] sm:$0xff] %v2367_v59  ;;  %v2369_v60 = vld [vmem:[%s15823_s14 + $0x1f80] sm:$0xff] }
 0x10e   : > { %v2371_v61 = vld [vmem:[%s15823_s14 + $0x1fa0] sm:$0xff]  ;;  %2370 = vst [vmem:[%s15831_s15 + $0x7e0] sm:$0xff] %v2369_v60 }
 0x10f   : > { %v2373_v62 = vld [vmem:[%s15823_s14 + $0x1fc0] sm:$0xff]  ;;  %2372 = vst [vmem:[%s15831_s15 + $0x7e8] sm:$0xff] %v2371_v61 }
 0x110   : > { %2374 = vst [vmem:[%s15831_s15 + $0x7f0] sm:$0xff] %v2373_v62  ;;  %v2375_v63 = vld [vmem:[%s15823_s14 + $0x1fe0] sm:$0xff] }
 0x111   : > { %v2377_v0 = vld [vmem:[%s15823_s14 + $0x2000] sm:$0xff]  ;;  %2376 = vst [vmem:[%s15831_s15 + $0x7f8] sm:$0xff] %v2375_v63 }
 0x112   : > { %v2379_v1 = vld [vmem:[%s15823_s14 + $0x2020] sm:$0xff]  ;;  %2378 = vst [vmem:[%s15831_s15 + $0x800] sm:$0xff] %v2377_v0 }
 0x113   : > { %2380 = vst [vmem:[%s15831_s15 + $0x808] sm:$0xff] %v2379_v1  ;;  %v2381_v2 = vld [vmem:[%s15823_s14 + $0x2040] sm:$0xff] }
 0x114   : > { %v2383_v3 = vld [vmem:[%s15823_s14 + $0x2060] sm:$0xff]  ;;  %2382 = vst [vmem:[%s15831_s15 + $0x810] sm:$0xff] %v2381_v2 }
 0x115   : > { %v2385_v4 = vld [vmem:[%s15823_s14 + $0x2080] sm:$0xff]  ;;  %2384 = vst [vmem:[%s15831_s15 + $0x818] sm:$0xff] %v2383_v3 }
 0x116   : > { %2386 = vst [vmem:[%s15831_s15 + $0x820] sm:$0xff] %v2385_v4  ;;  %v2387_v5 = vld [vmem:[%s15823_s14 + $0x20a0] sm:$0xff] }
 0x117   : > { %v2389_v6 = vld [vmem:[%s15823_s14 + $0x20c0] sm:$0xff]  ;;  %2388 = vst [vmem:[%s15831_s15 + $0x828] sm:$0xff] %v2387_v5 }
 0x118   : > { %v2391_v7 = vld [vmem:[%s15823_s14 + $0x20e0] sm:$0xff]  ;;  %2390 = vst [vmem:[%s15831_s15 + $0x830] sm:$0xff] %v2389_v6 }
 0x119   : > { %2392 = vst [vmem:[%s15831_s15 + $0x838] sm:$0xff] %v2391_v7  ;;  %v2393_v8 = vld [vmem:[%s15823_s14 + $0x2100] sm:$0xff] }
 0x11a   : > { %v2395_v9 = vld [vmem:[%s15823_s14 + $0x2120] sm:$0xff]  ;;  %2394 = vst [vmem:[%s15831_s15 + $0x840] sm:$0xff] %v2393_v8 }
 0x11b   : > { %v2397_v10 = vld [vmem:[%s15823_s14 + $0x2140] sm:$0xff]  ;;  %2396 = vst [vmem:[%s15831_s15 + $0x848] sm:$0xff] %v2395_v9 }
 0x11c   : > { %2398 = vst [vmem:[%s15831_s15 + $0x850] sm:$0xff] %v2397_v10  ;;  %v2399_v11 = vld [vmem:[%s15823_s14 + $0x2160] sm:$0xff] }
 0x11d   : > { %v2401_v12 = vld [vmem:[%s15823_s14 + $0x2180] sm:$0xff]  ;;  %2400 = vst [vmem:[%s15831_s15 + $0x858] sm:$0xff] %v2399_v11 }
 0x11e   : > { %v2403_v13 = vld [vmem:[%s15823_s14 + $0x21a0] sm:$0xff]  ;;  %2402 = vst [vmem:[%s15831_s15 + $0x860] sm:$0xff] %v2401_v12 }
 0x11f   : > { %2404 = vst [vmem:[%s15831_s15 + $0x868] sm:$0xff] %v2403_v13  ;;  %v2405_v14 = vld [vmem:[%s15823_s14 + $0x21c0] sm:$0xff] }
 0x120   : > { %v2407_v15 = vld [vmem:[%s15823_s14 + $0x21e0] sm:$0xff]  ;;  %2406 = vst [vmem:[%s15831_s15 + $0x870] sm:$0xff] %v2405_v14 }
 0x121   : > { %v2409_v16 = vld [vmem:[%s15823_s14 + $0x2200] sm:$0xff]  ;;  %2408 = vst [vmem:[%s15831_s15 + $0x878] sm:$0xff] %v2407_v15 }
 0x122   : > { %2410 = vst [vmem:[%s15831_s15 + $0x880] sm:$0xff] %v2409_v16  ;;  %v2411_v17 = vld [vmem:[%s15823_s14 + $0x2220] sm:$0xff] }
 0x123   : > { %v2413_v18 = vld [vmem:[%s15823_s14 + $0x2240] sm:$0xff]  ;;  %2412 = vst [vmem:[%s15831_s15 + $0x888] sm:$0xff] %v2411_v17 }
 0x124   : > { %v2415_v19 = vld [vmem:[%s15823_s14 + $0x2260] sm:$0xff]  ;;  %2414 = vst [vmem:[%s15831_s15 + $0x890] sm:$0xff] %v2413_v18 }
 0x125   : > { %2416 = vst [vmem:[%s15831_s15 + $0x898] sm:$0xff] %v2415_v19  ;;  %v2417_v20 = vld [vmem:[%s15823_s14 + $0x2280] sm:$0xff] }
 0x126   : > { %v2419_v21 = vld [vmem:[%s15823_s14 + $0x22a0] sm:$0xff]  ;;  %2418 = vst [vmem:[%s15831_s15 + $0x8a0] sm:$0xff] %v2417_v20 }
 0x127   : > { %v2421_v22 = vld [vmem:[%s15823_s14 + $0x22c0] sm:$0xff]  ;;  %2420 = vst [vmem:[%s15831_s15 + $0x8a8] sm:$0xff] %v2419_v21 }
 0x128   : > { %2422 = vst [vmem:[%s15831_s15 + $0x8b0] sm:$0xff] %v2421_v22  ;;  %v2423_v23 = vld [vmem:[%s15823_s14 + $0x22e0] sm:$0xff] }
 0x129   : > { %v2425_v24 = vld [vmem:[%s15823_s14 + $0x2300] sm:$0xff]  ;;  %2424 = vst [vmem:[%s15831_s15 + $0x8b8] sm:$0xff] %v2423_v23 }
 0x12a   : > { %v2427_v25 = vld [vmem:[%s15823_s14 + $0x2320] sm:$0xff]  ;;  %2426 = vst [vmem:[%s15831_s15 + $0x8c0] sm:$0xff] %v2425_v24 }
 0x12b   : > { %2428 = vst [vmem:[%s15831_s15 + $0x8c8] sm:$0xff] %v2427_v25  ;;  %v2429_v26 = vld [vmem:[%s15823_s14 + $0x2340] sm:$0xff] }
 0x12c   : > { %v2431_v27 = vld [vmem:[%s15823_s14 + $0x2360] sm:$0xff]  ;;  %2430 = vst [vmem:[%s15831_s15 + $0x8d0] sm:$0xff] %v2429_v26 }
 0x12d   : > { %v2433_v28 = vld [vmem:[%s15823_s14 + $0x2380] sm:$0xff]  ;;  %2432 = vst [vmem:[%s15831_s15 + $0x8d8] sm:$0xff] %v2431_v27 }
 0x12e   : > { %2434 = vst [vmem:[%s15831_s15 + $0x8e0] sm:$0xff] %v2433_v28  ;;  %v2435_v29 = vld [vmem:[%s15823_s14 + $0x23a0] sm:$0xff] }
 0x12f   : > { %v2437_v30 = vld [vmem:[%s15823_s14 + $0x23c0] sm:$0xff]  ;;  %2436 = vst [vmem:[%s15831_s15 + $0x8e8] sm:$0xff] %v2435_v29 }
 0x130   : > { %v2439_v31 = vld [vmem:[%s15823_s14 + $0x23e0] sm:$0xff]  ;;  %2438 = vst [vmem:[%s15831_s15 + $0x8f0] sm:$0xff] %v2437_v30 }
 0x131   : > { %2440 = vst [vmem:[%s15831_s15 + $0x8f8] sm:$0xff] %v2439_v31  ;;  %v2441_v32 = vld [vmem:[%s15823_s14 + $0x2400] sm:$0xff] }
 0x132   : > { %v2443_v33 = vld [vmem:[%s15823_s14 + $0x2420] sm:$0xff]  ;;  %2442 = vst [vmem:[%s15831_s15 + $0x900] sm:$0xff] %v2441_v32 }
 0x133   : > { %v2445_v34 = vld [vmem:[%s15823_s14 + $0x2440] sm:$0xff]  ;;  %2444 = vst [vmem:[%s15831_s15 + $0x908] sm:$0xff] %v2443_v33 }
 0x134   : > { %2446 = vst [vmem:[%s15831_s15 + $0x910] sm:$0xff] %v2445_v34  ;;  %v2447_v35 = vld [vmem:[%s15823_s14 + $0x2460] sm:$0xff] }
 0x135   : > { %v2449_v36 = vld [vmem:[%s15823_s14 + $0x2480] sm:$0xff]  ;;  %2448 = vst [vmem:[%s15831_s15 + $0x918] sm:$0xff] %v2447_v35 }
 0x136   : > { %v2451_v37 = vld [vmem:[%s15823_s14 + $0x24a0] sm:$0xff]  ;;  %2450 = vst [vmem:[%s15831_s15 + $0x920] sm:$0xff] %v2449_v36 }
 0x137   : > { %2452 = vst [vmem:[%s15831_s15 + $0x928] sm:$0xff] %v2451_v37  ;;  %v2453_v38 = vld [vmem:[%s15823_s14 + $0x24c0] sm:$0xff] }
 0x138   : > { %v2455_v39 = vld [vmem:[%s15823_s14 + $0x24e0] sm:$0xff]  ;;  %2454 = vst [vmem:[%s15831_s15 + $0x930] sm:$0xff] %v2453_v38 }
 0x139   : > { %v2457_v40 = vld [vmem:[%s15823_s14 + $0x2500] sm:$0xff]  ;;  %2456 = vst [vmem:[%s15831_s15 + $0x938] sm:$0xff] %v2455_v39 }
 0x13a   : > { %2458 = vst [vmem:[%s15831_s15 + $0x940] sm:$0xff] %v2457_v40  ;;  %v2459_v41 = vld [vmem:[%s15823_s14 + $0x2520] sm:$0xff] }
 0x13b   : > { %v2461_v42 = vld [vmem:[%s15823_s14 + $0x2540] sm:$0xff]  ;;  %2460 = vst [vmem:[%s15831_s15 + $0x948] sm:$0xff] %v2459_v41 }
 0x13c   : > { %v2463_v43 = vld [vmem:[%s15823_s14 + $0x2560] sm:$0xff]  ;;  %2462 = vst [vmem:[%s15831_s15 + $0x950] sm:$0xff] %v2461_v42 }
 0x13d   : > { %2464 = vst [vmem:[%s15831_s15 + $0x958] sm:$0xff] %v2463_v43  ;;  %v2465_v44 = vld [vmem:[%s15823_s14 + $0x2580] sm:$0xff] }
 0x13e   : > { %v2467_v45 = vld [vmem:[%s15823_s14 + $0x25a0] sm:$0xff]  ;;  %2466 = vst [vmem:[%s15831_s15 + $0x960] sm:$0xff] %v2465_v44 }
 0x13f   : > { %v2469_v46 = vld [vmem:[%s15823_s14 + $0x25c0] sm:$0xff]  ;;  %2468 = vst [vmem:[%s15831_s15 + $0x968] sm:$0xff] %v2467_v45 }
 0x140   : > { %2470 = vst [vmem:[%s15831_s15 + $0x970] sm:$0xff] %v2469_v46  ;;  %v2471_v47 = vld [vmem:[%s15823_s14 + $0x25e0] sm:$0xff] }
 0x141   : > { %v2473_v48 = vld [vmem:[%s15823_s14 + $0x2600] sm:$0xff]  ;;  %2472 = vst [vmem:[%s15831_s15 + $0x978] sm:$0xff] %v2471_v47 }
 0x142   : > { %v2475_v49 = vld [vmem:[%s15823_s14 + $0x2620] sm:$0xff]  ;;  %2474 = vst [vmem:[%s15831_s15 + $0x980] sm:$0xff] %v2473_v48 }
 0x143   : > { %2476 = vst [vmem:[%s15831_s15 + $0x988] sm:$0xff] %v2475_v49  ;;  %v2477_v50 = vld [vmem:[%s15823_s14 + $0x2640] sm:$0xff] }
 0x144   : > { %v2479_v51 = vld [vmem:[%s15823_s14 + $0x2660] sm:$0xff]  ;;  %2478 = vst [vmem:[%s15831_s15 + $0x990] sm:$0xff] %v2477_v50 }
 0x145   : > { %v2481_v52 = vld [vmem:[%s15823_s14 + $0x2680] sm:$0xff]  ;;  %2480 = vst [vmem:[%s15831_s15 + $0x998] sm:$0xff] %v2479_v51 }
 0x146   : > { %2482 = vst [vmem:[%s15831_s15 + $0x9a0] sm:$0xff] %v2481_v52  ;;  %v2483_v53 = vld [vmem:[%s15823_s14 + $0x26a0] sm:$0xff] }
 0x147   : > { %v2485_v54 = vld [vmem:[%s15823_s14 + $0x26c0] sm:$0xff]  ;;  %2484 = vst [vmem:[%s15831_s15 + $0x9a8] sm:$0xff] %v2483_v53 }
 0x148   : > { %v2487_v55 = vld [vmem:[%s15823_s14 + $0x26e0] sm:$0xff]  ;;  %2486 = vst [vmem:[%s15831_s15 + $0x9b0] sm:$0xff] %v2485_v54 }
 0x149   : > { %2488 = vst [vmem:[%s15831_s15 + $0x9b8] sm:$0xff] %v2487_v55  ;;  %v2489_v56 = vld [vmem:[%s15823_s14 + $0x2700] sm:$0xff] }
 0x14a   : > { %v2491_v57 = vld [vmem:[%s15823_s14 + $0x2720] sm:$0xff]  ;;  %2490 = vst [vmem:[%s15831_s15 + $0x9c0] sm:$0xff] %v2489_v56 }
 0x14b   : > { %v2493_v58 = vld [vmem:[%s15823_s14 + $0x2740] sm:$0xff]  ;;  %2492 = vst [vmem:[%s15831_s15 + $0x9c8] sm:$0xff] %v2491_v57 }
 0x14c   : > { %2494 = vst [vmem:[%s15831_s15 + $0x9d0] sm:$0xff] %v2493_v58  ;;  %v2495_v59 = vld [vmem:[%s15823_s14 + $0x2760] sm:$0xff] }
 0x14d   : > { %v2497_v60 = vld [vmem:[%s15823_s14 + $0x2780] sm:$0xff]  ;;  %2496 = vst [vmem:[%s15831_s15 + $0x9d8] sm:$0xff] %v2495_v59 }
 0x14e   : > { %v2499_v61 = vld [vmem:[%s15823_s14 + $0x27a0] sm:$0xff]  ;;  %2498 = vst [vmem:[%s15831_s15 + $0x9e0] sm:$0xff] %v2497_v60 }
 0x14f   : > { %2500 = vst [vmem:[%s15831_s15 + $0x9e8] sm:$0xff] %v2499_v61  ;;  %v2501_v62 = vld [vmem:[%s15823_s14 + $0x27c0] sm:$0xff] }
 0x150   : > { %v2503_v63 = vld [vmem:[%s15823_s14 + $0x27e0] sm:$0xff]  ;;  %2502 = vst [vmem:[%s15831_s15 + $0x9f0] sm:$0xff] %v2501_v62 }
 0x151   : > { %v2505_v0 = vld [vmem:[%s15823_s14 + $0x2800] sm:$0xff]  ;;  %2504 = vst [vmem:[%s15831_s15 + $0x9f8] sm:$0xff] %v2503_v63 }
 0x152   : > { %2506 = vst [vmem:[%s15831_s15 + $0xa00] sm:$0xff] %v2505_v0  ;;  %v2507_v1 = vld [vmem:[%s15823_s14 + $0x2820] sm:$0xff] }
 0x153   : > { %v2509_v2 = vld [vmem:[%s15823_s14 + $0x2840] sm:$0xff]  ;;  %2508 = vst [vmem:[%s15831_s15 + $0xa08] sm:$0xff] %v2507_v1 }
 0x154   : > { %v2511_v3 = vld [vmem:[%s15823_s14 + $0x2860] sm:$0xff]  ;;  %2510 = vst [vmem:[%s15831_s15 + $0xa10] sm:$0xff] %v2509_v2 }
 0x155   : > { %2512 = vst [vmem:[%s15831_s15 + $0xa18] sm:$0xff] %v2511_v3  ;;  %v2513_v4 = vld [vmem:[%s15823_s14 + $0x2880] sm:$0xff] }
 0x156   : > { %v2515_v5 = vld [vmem:[%s15823_s14 + $0x28a0] sm:$0xff]  ;;  %2514 = vst [vmem:[%s15831_s15 + $0xa20] sm:$0xff] %v2513_v4 }
 0x157   : > { %v2517_v6 = vld [vmem:[%s15823_s14 + $0x28c0] sm:$0xff]  ;;  %2516 = vst [vmem:[%s15831_s15 + $0xa28] sm:$0xff] %v2515_v5 }
 0x158   : > { %2518 = vst [vmem:[%s15831_s15 + $0xa30] sm:$0xff] %v2517_v6  ;;  %v2519_v7 = vld [vmem:[%s15823_s14 + $0x28e0] sm:$0xff] }
 0x159   : > { %v2521_v8 = vld [vmem:[%s15823_s14 + $0x2900] sm:$0xff]  ;;  %2520 = vst [vmem:[%s15831_s15 + $0xa38] sm:$0xff] %v2519_v7 }
 0x15a   : > { %v2523_v9 = vld [vmem:[%s15823_s14 + $0x2920] sm:$0xff]  ;;  %2522 = vst [vmem:[%s15831_s15 + $0xa40] sm:$0xff] %v2521_v8 }
 0x15b   : > { %2524 = vst [vmem:[%s15831_s15 + $0xa48] sm:$0xff] %v2523_v9  ;;  %v2525_v10 = vld [vmem:[%s15823_s14 + $0x2940] sm:$0xff] }
 0x15c   : > { %v2527_v11 = vld [vmem:[%s15823_s14 + $0x2960] sm:$0xff]  ;;  %2526 = vst [vmem:[%s15831_s15 + $0xa50] sm:$0xff] %v2525_v10 }
 0x15d   : > { %v2529_v12 = vld [vmem:[%s15823_s14 + $0x2980] sm:$0xff]  ;;  %2528 = vst [vmem:[%s15831_s15 + $0xa58] sm:$0xff] %v2527_v11 }
 0x15e   : > { %2530 = vst [vmem:[%s15831_s15 + $0xa60] sm:$0xff] %v2529_v12  ;;  %v2531_v13 = vld [vmem:[%s15823_s14 + $0x29a0] sm:$0xff] }
 0x15f   : > { %v2533_v14 = vld [vmem:[%s15823_s14 + $0x29c0] sm:$0xff]  ;;  %2532 = vst [vmem:[%s15831_s15 + $0xa68] sm:$0xff] %v2531_v13 }
 0x160   : > { %v2535_v15 = vld [vmem:[%s15823_s14 + $0x29e0] sm:$0xff]  ;;  %2534 = vst [vmem:[%s15831_s15 + $0xa70] sm:$0xff] %v2533_v14 }
 0x161   : > { %2536 = vst [vmem:[%s15831_s15 + $0xa78] sm:$0xff] %v2535_v15  ;;  %v2537_v16 = vld [vmem:[%s15823_s14 + $0x2a00] sm:$0xff] }
 0x162   : > { %v2539_v17 = vld [vmem:[%s15823_s14 + $0x2a20] sm:$0xff]  ;;  %2538 = vst [vmem:[%s15831_s15 + $0xa80] sm:$0xff] %v2537_v16 }
 0x163   : > { %v2541_v18 = vld [vmem:[%s15823_s14 + $0x2a40] sm:$0xff]  ;;  %2540 = vst [vmem:[%s15831_s15 + $0xa88] sm:$0xff] %v2539_v17 }
 0x164   : > { %2542 = vst [vmem:[%s15831_s15 + $0xa90] sm:$0xff] %v2541_v18  ;;  %v2543_v19 = vld [vmem:[%s15823_s14 + $0x2a60] sm:$0xff] }
 0x165   : > { %v2545_v20 = vld [vmem:[%s15823_s14 + $0x2a80] sm:$0xff]  ;;  %2544 = vst [vmem:[%s15831_s15 + $0xa98] sm:$0xff] %v2543_v19 }
 0x166   : > { %v2547_v21 = vld [vmem:[%s15823_s14 + $0x2aa0] sm:$0xff]  ;;  %2546 = vst [vmem:[%s15831_s15 + $0xaa0] sm:$0xff] %v2545_v20 }
 0x167   : > { %2548 = vst [vmem:[%s15831_s15 + $0xaa8] sm:$0xff] %v2547_v21  ;;  %v2549_v22 = vld [vmem:[%s15823_s14 + $0x2ac0] sm:$0xff] }
 0x168   : > { %v2551_v23 = vld [vmem:[%s15823_s14 + $0x2ae0] sm:$0xff]  ;;  %2550 = vst [vmem:[%s15831_s15 + $0xab0] sm:$0xff] %v2549_v22 }
 0x169   : > { %v2553_v24 = vld [vmem:[%s15823_s14 + $0x2b00] sm:$0xff]  ;;  %2552 = vst [vmem:[%s15831_s15 + $0xab8] sm:$0xff] %v2551_v23 }
 0x16a   : > { %2554 = vst [vmem:[%s15831_s15 + $0xac0] sm:$0xff] %v2553_v24  ;;  %v2555_v25 = vld [vmem:[%s15823_s14 + $0x2b20] sm:$0xff] }
 0x16b   : > { %v2557_v26 = vld [vmem:[%s15823_s14 + $0x2b40] sm:$0xff]  ;;  %2556 = vst [vmem:[%s15831_s15 + $0xac8] sm:$0xff] %v2555_v25 }
 0x16c   : > { %v2559_v27 = vld [vmem:[%s15823_s14 + $0x2b60] sm:$0xff]  ;;  %2558 = vst [vmem:[%s15831_s15 + $0xad0] sm:$0xff] %v2557_v26 }
 0x16d   : > { %2560 = vst [vmem:[%s15831_s15 + $0xad8] sm:$0xff] %v2559_v27  ;;  %v2561_v28 = vld [vmem:[%s15823_s14 + $0x2b80] sm:$0xff] }
 0x16e   : > { %v2563_v29 = vld [vmem:[%s15823_s14 + $0x2ba0] sm:$0xff]  ;;  %2562 = vst [vmem:[%s15831_s15 + $0xae0] sm:$0xff] %v2561_v28 }
 0x16f   : > { %v2565_v30 = vld [vmem:[%s15823_s14 + $0x2bc0] sm:$0xff]  ;;  %2564 = vst [vmem:[%s15831_s15 + $0xae8] sm:$0xff] %v2563_v29 }
 0x170   : > { %2566 = vst [vmem:[%s15831_s15 + $0xaf0] sm:$0xff] %v2565_v30  ;;  %v2567_v31 = vld [vmem:[%s15823_s14 + $0x2be0] sm:$0xff] }
 0x171   : > { %v2569_v32 = vld [vmem:[%s15823_s14 + $0x2c00] sm:$0xff]  ;;  %2568 = vst [vmem:[%s15831_s15 + $0xaf8] sm:$0xff] %v2567_v31 }
 0x172   : > { %v2571_v33 = vld [vmem:[%s15823_s14 + $0x2c20] sm:$0xff]  ;;  %2570 = vst [vmem:[%s15831_s15 + $0xb00] sm:$0xff] %v2569_v32 }
 0x173   : > { %2572 = vst [vmem:[%s15831_s15 + $0xb08] sm:$0xff] %v2571_v33  ;;  %v2573_v34 = vld [vmem:[%s15823_s14 + $0x2c40] sm:$0xff] }
 0x174   : > { %v2575_v35 = vld [vmem:[%s15823_s14 + $0x2c60] sm:$0xff]  ;;  %2574 = vst [vmem:[%s15831_s15 + $0xb10] sm:$0xff] %v2573_v34 }
 0x175   : > { %v2577_v36 = vld [vmem:[%s15823_s14 + $0x2c80] sm:$0xff]  ;;  %2576 = vst [vmem:[%s15831_s15 + $0xb18] sm:$0xff] %v2575_v35 }
 0x176   : > { %2578 = vst [vmem:[%s15831_s15 + $0xb20] sm:$0xff] %v2577_v36  ;;  %v2579_v37 = vld [vmem:[%s15823_s14 + $0x2ca0] sm:$0xff] }
 0x177   : > { %v2581_v38 = vld [vmem:[%s15823_s14 + $0x2cc0] sm:$0xff]  ;;  %2580 = vst [vmem:[%s15831_s15 + $0xb28] sm:$0xff] %v2579_v37 }
 0x178   : > { %v2583_v39 = vld [vmem:[%s15823_s14 + $0x2ce0] sm:$0xff]  ;;  %2582 = vst [vmem:[%s15831_s15 + $0xb30] sm:$0xff] %v2581_v38 }
 0x179   : > { %2584 = vst [vmem:[%s15831_s15 + $0xb38] sm:$0xff] %v2583_v39  ;;  %v2585_v40 = vld [vmem:[%s15823_s14 + $0x2d00] sm:$0xff] }
 0x17a   : > { %v2587_v41 = vld [vmem:[%s15823_s14 + $0x2d20] sm:$0xff]  ;;  %2586 = vst [vmem:[%s15831_s15 + $0xb40] sm:$0xff] %v2585_v40 }
 0x17b   : > { %v2589_v42 = vld [vmem:[%s15823_s14 + $0x2d40] sm:$0xff]  ;;  %2588 = vst [vmem:[%s15831_s15 + $0xb48] sm:$0xff] %v2587_v41 }
 0x17c   : > { %2590 = vst [vmem:[%s15831_s15 + $0xb50] sm:$0xff] %v2589_v42  ;;  %v2591_v43 = vld [vmem:[%s15823_s14 + $0x2d60] sm:$0xff] }
 0x17d   : > { %v2593_v44 = vld [vmem:[%s15823_s14 + $0x2d80] sm:$0xff]  ;;  %2592 = vst [vmem:[%s15831_s15 + $0xb58] sm:$0xff] %v2591_v43 }
 0x17e   : > { %v2595_v45 = vld [vmem:[%s15823_s14 + $0x2da0] sm:$0xff]  ;;  %2594 = vst [vmem:[%s15831_s15 + $0xb60] sm:$0xff] %v2593_v44 }
 0x17f   : > { %2596 = vst [vmem:[%s15831_s15 + $0xb68] sm:$0xff] %v2595_v45  ;;  %v2597_v46 = vld [vmem:[%s15823_s14 + $0x2dc0] sm:$0xff] }
 0x180   : > { %v2599_v47 = vld [vmem:[%s15823_s14 + $0x2de0] sm:$0xff]  ;;  %2598 = vst [vmem:[%s15831_s15 + $0xb70] sm:$0xff] %v2597_v46 }
 0x181   : > { %v2601_v48 = vld [vmem:[%s15823_s14 + $0x2e00] sm:$0xff]  ;;  %2600 = vst [vmem:[%s15831_s15 + $0xb78] sm:$0xff] %v2599_v47 }
 0x182   : > { %2602 = vst [vmem:[%s15831_s15 + $0xb80] sm:$0xff] %v2601_v48  ;;  %v2603_v49 = vld [vmem:[%s15823_s14 + $0x2e20] sm:$0xff] }
 0x183   : > { %v2605_v50 = vld [vmem:[%s15823_s14 + $0x2e40] sm:$0xff]  ;;  %2604 = vst [vmem:[%s15831_s15 + $0xb88] sm:$0xff] %v2603_v49 }
 0x184   : > { %v2607_v51 = vld [vmem:[%s15823_s14 + $0x2e60] sm:$0xff]  ;;  %2606 = vst [vmem:[%s15831_s15 + $0xb90] sm:$0xff] %v2605_v50 }
 0x185   : > { %2608 = vst [vmem:[%s15831_s15 + $0xb98] sm:$0xff] %v2607_v51  ;;  %v2609_v52 = vld [vmem:[%s15823_s14 + $0x2e80] sm:$0xff] }
 0x186   : > { %v2611_v53 = vld [vmem:[%s15823_s14 + $0x2ea0] sm:$0xff]  ;;  %2610 = vst [vmem:[%s15831_s15 + $0xba0] sm:$0xff] %v2609_v52 }
 0x187   : > { %v2613_v54 = vld [vmem:[%s15823_s14 + $0x2ec0] sm:$0xff]  ;;  %2612 = vst [vmem:[%s15831_s15 + $0xba8] sm:$0xff] %v2611_v53 }
 0x188   : > { %2614 = vst [vmem:[%s15831_s15 + $0xbb0] sm:$0xff] %v2613_v54  ;;  %v2615_v55 = vld [vmem:[%s15823_s14 + $0x2ee0] sm:$0xff] }
 0x189   : > { %v2617_v56 = vld [vmem:[%s15823_s14 + $0x2f00] sm:$0xff]  ;;  %2616 = vst [vmem:[%s15831_s15 + $0xbb8] sm:$0xff] %v2615_v55 }
 0x18a   : > { %v2619_v57 = vld [vmem:[%s15823_s14 + $0x2f20] sm:$0xff]  ;;  %2618 = vst [vmem:[%s15831_s15 + $0xbc0] sm:$0xff] %v2617_v56 }
 0x18b   : > { %2620 = vst [vmem:[%s15831_s15 + $0xbc8] sm:$0xff] %v2619_v57  ;;  %v2621_v58 = vld [vmem:[%s15823_s14 + $0x2f40] sm:$0xff] }
 0x18c   : > { %v2623_v59 = vld [vmem:[%s15823_s14 + $0x2f60] sm:$0xff]  ;;  %2622 = vst [vmem:[%s15831_s15 + $0xbd0] sm:$0xff] %v2621_v58 }
 0x18d   : > { %v2625_v60 = vld [vmem:[%s15823_s14 + $0x2f80] sm:$0xff]  ;;  %2624 = vst [vmem:[%s15831_s15 + $0xbd8] sm:$0xff] %v2623_v59 }
 0x18e   : > { %2626 = vst [vmem:[%s15831_s15 + $0xbe0] sm:$0xff] %v2625_v60  ;;  %v2627_v61 = vld [vmem:[%s15823_s14 + $0x2fa0] sm:$0xff] }
 0x18f   : > { %v2629_v62 = vld [vmem:[%s15823_s14 + $0x2fc0] sm:$0xff]  ;;  %2628 = vst [vmem:[%s15831_s15 + $0xbe8] sm:$0xff] %v2627_v61 }
 0x190   : > { %v2631_v63 = vld [vmem:[%s15823_s14 + $0x2fe0] sm:$0xff]  ;;  %2630 = vst [vmem:[%s15831_s15 + $0xbf0] sm:$0xff] %v2629_v62 }
 0x191   : > { %2632 = vst [vmem:[%s15831_s15 + $0xbf8] sm:$0xff] %v2631_v63  ;;  %v2633_v0 = vld [vmem:[%s15823_s14 + $0x3000] sm:$0xff] }
 0x192   : > { %v2635_v1 = vld [vmem:[%s15823_s14 + $0x3020] sm:$0xff]  ;;  %2634 = vst [vmem:[%s15831_s15 + $0xc00] sm:$0xff] %v2633_v0 }
 0x193   : > { %v2637_v2 = vld [vmem:[%s15823_s14 + $0x3040] sm:$0xff]  ;;  %2636 = vst [vmem:[%s15831_s15 + $0xc08] sm:$0xff] %v2635_v1 }
 0x194   : > { %2638 = vst [vmem:[%s15831_s15 + $0xc10] sm:$0xff] %v2637_v2  ;;  %v2639_v3 = vld [vmem:[%s15823_s14 + $0x3060] sm:$0xff] }
 0x195   : > { %v2641_v4 = vld [vmem:[%s15823_s14 + $0x3080] sm:$0xff]  ;;  %2640 = vst [vmem:[%s15831_s15 + $0xc18] sm:$0xff] %v2639_v3 }
 0x196   : > { %v2643_v5 = vld [vmem:[%s15823_s14 + $0x30a0] sm:$0xff]  ;;  %2642 = vst [vmem:[%s15831_s15 + $0xc20] sm:$0xff] %v2641_v4 }
 0x197   : > { %2644 = vst [vmem:[%s15831_s15 + $0xc28] sm:$0xff] %v2643_v5  ;;  %v2645_v6 = vld [vmem:[%s15823_s14 + $0x30c0] sm:$0xff] }
 0x198   : > { %v2647_v7 = vld [vmem:[%s15823_s14 + $0x30e0] sm:$0xff]  ;;  %2646 = vst [vmem:[%s15831_s15 + $0xc30] sm:$0xff] %v2645_v6 }
 0x199   : > { %v2649_v8 = vld [vmem:[%s15823_s14 + $0x3100] sm:$0xff]  ;;  %2648 = vst [vmem:[%s15831_s15 + $0xc38] sm:$0xff] %v2647_v7 }
 0x19a   : > { %2650 = vst [vmem:[%s15831_s15 + $0xc40] sm:$0xff] %v2649_v8  ;;  %v2651_v9 = vld [vmem:[%s15823_s14 + $0x3120] sm:$0xff] }
 0x19b   : > { %v2653_v10 = vld [vmem:[%s15823_s14 + $0x3140] sm:$0xff]  ;;  %2652 = vst [vmem:[%s15831_s15 + $0xc48] sm:$0xff] %v2651_v9 }
 0x19c   : > { %v2655_v11 = vld [vmem:[%s15823_s14 + $0x3160] sm:$0xff]  ;;  %2654 = vst [vmem:[%s15831_s15 + $0xc50] sm:$0xff] %v2653_v10 }
 0x19d   : > { %2656 = vst [vmem:[%s15831_s15 + $0xc58] sm:$0xff] %v2655_v11  ;;  %v2657_v12 = vld [vmem:[%s15823_s14 + $0x3180] sm:$0xff] }
 0x19e   : > { %v2659_v13 = vld [vmem:[%s15823_s14 + $0x31a0] sm:$0xff]  ;;  %2658 = vst [vmem:[%s15831_s15 + $0xc60] sm:$0xff] %v2657_v12 }
 0x19f   : > { %v2661_v14 = vld [vmem:[%s15823_s14 + $0x31c0] sm:$0xff]  ;;  %2660 = vst [vmem:[%s15831_s15 + $0xc68] sm:$0xff] %v2659_v13 }
 0x1a0   : > { %2662 = vst [vmem:[%s15831_s15 + $0xc70] sm:$0xff] %v2661_v14  ;;  %v2663_v15 = vld [vmem:[%s15823_s14 + $0x31e0] sm:$0xff] }
 0x1a1   : > { %v2665_v16 = vld [vmem:[%s15823_s14 + $0x3200] sm:$0xff]  ;;  %2664 = vst [vmem:[%s15831_s15 + $0xc78] sm:$0xff] %v2663_v15 }
 0x1a2   : > { %v2667_v17 = vld [vmem:[%s15823_s14 + $0x3220] sm:$0xff]  ;;  %2666 = vst [vmem:[%s15831_s15 + $0xc80] sm:$0xff] %v2665_v16 }
 0x1a3   : > { %2668 = vst [vmem:[%s15831_s15 + $0xc88] sm:$0xff] %v2667_v17  ;;  %v2669_v18 = vld [vmem:[%s15823_s14 + $0x3240] sm:$0xff] }
 0x1a4   : > { %v2671_v19 = vld [vmem:[%s15823_s14 + $0x3260] sm:$0xff]  ;;  %2670 = vst [vmem:[%s15831_s15 + $0xc90] sm:$0xff] %v2669_v18 }
 0x1a5   : > { %v2673_v20 = vld [vmem:[%s15823_s14 + $0x3280] sm:$0xff]  ;;  %2672 = vst [vmem:[%s15831_s15 + $0xc98] sm:$0xff] %v2671_v19 }
 0x1a6   : > { %2674 = vst [vmem:[%s15831_s15 + $0xca0] sm:$0xff] %v2673_v20  ;;  %v2675_v21 = vld [vmem:[%s15823_s14 + $0x32a0] sm:$0xff] }
 0x1a7   : > { %v2677_v22 = vld [vmem:[%s15823_s14 + $0x32c0] sm:$0xff]  ;;  %2676 = vst [vmem:[%s15831_s15 + $0xca8] sm:$0xff] %v2675_v21 }
 0x1a8   : > { %v2679_v23 = vld [vmem:[%s15823_s14 + $0x32e0] sm:$0xff]  ;;  %2678 = vst [vmem:[%s15831_s15 + $0xcb0] sm:$0xff] %v2677_v22 }
 0x1a9   : > { %2680 = vst [vmem:[%s15831_s15 + $0xcb8] sm:$0xff] %v2679_v23  ;;  %v2681_v24 = vld [vmem:[%s15823_s14 + $0x3300] sm:$0xff] }
 0x1aa   : > { %v2683_v25 = vld [vmem:[%s15823_s14 + $0x3320] sm:$0xff]  ;;  %2682 = vst [vmem:[%s15831_s15 + $0xcc0] sm:$0xff] %v2681_v24 }
 0x1ab   : > { %v2685_v26 = vld [vmem:[%s15823_s14 + $0x3340] sm:$0xff]  ;;  %2684 = vst [vmem:[%s15831_s15 + $0xcc8] sm:$0xff] %v2683_v25 }
 0x1ac   : > { %2686 = vst [vmem:[%s15831_s15 + $0xcd0] sm:$0xff] %v2685_v26  ;;  %v2687_v27 = vld [vmem:[%s15823_s14 + $0x3360] sm:$0xff] }
 0x1ad   : > { %v2689_v28 = vld [vmem:[%s15823_s14 + $0x3380] sm:$0xff]  ;;  %2688 = vst [vmem:[%s15831_s15 + $0xcd8] sm:$0xff] %v2687_v27 }
 0x1ae   : > { %v2691_v29 = vld [vmem:[%s15823_s14 + $0x33a0] sm:$0xff]  ;;  %2690 = vst [vmem:[%s15831_s15 + $0xce0] sm:$0xff] %v2689_v28 }
 0x1af   : > { %2692 = vst [vmem:[%s15831_s15 + $0xce8] sm:$0xff] %v2691_v29  ;;  %v2693_v30 = vld [vmem:[%s15823_s14 + $0x33c0] sm:$0xff] }
 0x1b0   : > { %v2695_v31 = vld [vmem:[%s15823_s14 + $0x33e0] sm:$0xff]  ;;  %2694 = vst [vmem:[%s15831_s15 + $0xcf0] sm:$0xff] %v2693_v30 }
 0x1b1   : > { %v2697_v32 = vld [vmem:[%s15823_s14 + $0x3400] sm:$0xff]  ;;  %2696 = vst [vmem:[%s15831_s15 + $0xcf8] sm:$0xff] %v2695_v31 }
 0x1b2   : > { %2698 = vst [vmem:[%s15831_s15 + $0xd00] sm:$0xff] %v2697_v32  ;;  %v2699_v33 = vld [vmem:[%s15823_s14 + $0x3420] sm:$0xff] }
 0x1b3   : > { %v2701_v34 = vld [vmem:[%s15823_s14 + $0x3440] sm:$0xff]  ;;  %2700 = vst [vmem:[%s15831_s15 + $0xd08] sm:$0xff] %v2699_v33 }
 0x1b4   : > { %v2703_v35 = vld [vmem:[%s15823_s14 + $0x3460] sm:$0xff]  ;;  %2702 = vst [vmem:[%s15831_s15 + $0xd10] sm:$0xff] %v2701_v34 }
 0x1b5   : > { %2704 = vst [vmem:[%s15831_s15 + $0xd18] sm:$0xff] %v2703_v35  ;;  %v2705_v36 = vld [vmem:[%s15823_s14 + $0x3480] sm:$0xff] }
 0x1b6   : > { %v2707_v37 = vld [vmem:[%s15823_s14 + $0x34a0] sm:$0xff]  ;;  %2706 = vst [vmem:[%s15831_s15 + $0xd20] sm:$0xff] %v2705_v36 }
 0x1b7   : > { %v2709_v38 = vld [vmem:[%s15823_s14 + $0x34c0] sm:$0xff]  ;;  %2708 = vst [vmem:[%s15831_s15 + $0xd28] sm:$0xff] %v2707_v37 }
 0x1b8   : > { %2710 = vst [vmem:[%s15831_s15 + $0xd30] sm:$0xff] %v2709_v38  ;;  %v2711_v39 = vld [vmem:[%s15823_s14 + $0x34e0] sm:$0xff] }
 0x1b9   : > { %v2713_v40 = vld [vmem:[%s15823_s14 + $0x3500] sm:$0xff]  ;;  %2712 = vst [vmem:[%s15831_s15 + $0xd38] sm:$0xff] %v2711_v39 }
 0x1ba   : > { %v2715_v41 = vld [vmem:[%s15823_s14 + $0x3520] sm:$0xff]  ;;  %2714 = vst [vmem:[%s15831_s15 + $0xd40] sm:$0xff] %v2713_v40 }
 0x1bb   : > { %2716 = vst [vmem:[%s15831_s15 + $0xd48] sm:$0xff] %v2715_v41  ;;  %v2717_v42 = vld [vmem:[%s15823_s14 + $0x3540] sm:$0xff] }
 0x1bc   : > { %v2719_v43 = vld [vmem:[%s15823_s14 + $0x3560] sm:$0xff]  ;;  %2718 = vst [vmem:[%s15831_s15 + $0xd50] sm:$0xff] %v2717_v42 }
 0x1bd   : > { %v2721_v44 = vld [vmem:[%s15823_s14 + $0x3580] sm:$0xff]  ;;  %2720 = vst [vmem:[%s15831_s15 + $0xd58] sm:$0xff] %v2719_v43 }
 0x1be   : > { %2722 = vst [vmem:[%s15831_s15 + $0xd60] sm:$0xff] %v2721_v44  ;;  %v2723_v45 = vld [vmem:[%s15823_s14 + $0x35a0] sm:$0xff] }
 0x1bf   : > { %v2725_v46 = vld [vmem:[%s15823_s14 + $0x35c0] sm:$0xff]  ;;  %2724 = vst [vmem:[%s15831_s15 + $0xd68] sm:$0xff] %v2723_v45 }
 0x1c0   : > { %v2727_v47 = vld [vmem:[%s15823_s14 + $0x35e0] sm:$0xff]  ;;  %2726 = vst [vmem:[%s15831_s15 + $0xd70] sm:$0xff] %v2725_v46 }
 0x1c1   : > { %2728 = vst [vmem:[%s15831_s15 + $0xd78] sm:$0xff] %v2727_v47  ;;  %v2729_v48 = vld [vmem:[%s15823_s14 + $0x3600] sm:$0xff] }
 0x1c2   : > { %v2731_v49 = vld [vmem:[%s15823_s14 + $0x3620] sm:$0xff]  ;;  %2730 = vst [vmem:[%s15831_s15 + $0xd80] sm:$0xff] %v2729_v48 }
 0x1c3   : > { %v2733_v50 = vld [vmem:[%s15823_s14 + $0x3640] sm:$0xff]  ;;  %2732 = vst [vmem:[%s15831_s15 + $0xd88] sm:$0xff] %v2731_v49 }
 0x1c4   : > { %2734 = vst [vmem:[%s15831_s15 + $0xd90] sm:$0xff] %v2733_v50  ;;  %v2735_v51 = vld [vmem:[%s15823_s14 + $0x3660] sm:$0xff] }
 0x1c5   : > { %v2737_v52 = vld [vmem:[%s15823_s14 + $0x3680] sm:$0xff]  ;;  %2736 = vst [vmem:[%s15831_s15 + $0xd98] sm:$0xff] %v2735_v51 }
 0x1c6   : > { %v2739_v53 = vld [vmem:[%s15823_s14 + $0x36a0] sm:$0xff]  ;;  %2738 = vst [vmem:[%s15831_s15 + $0xda0] sm:$0xff] %v2737_v52 }
 0x1c7   : > { %2740 = vst [vmem:[%s15831_s15 + $0xda8] sm:$0xff] %v2739_v53  ;;  %v2741_v54 = vld [vmem:[%s15823_s14 + $0x36c0] sm:$0xff] }
 0x1c8   : > { %v2743_v55 = vld [vmem:[%s15823_s14 + $0x36e0] sm:$0xff]  ;;  %2742 = vst [vmem:[%s15831_s15 + $0xdb0] sm:$0xff] %v2741_v54 }
 0x1c9   : > { %v2745_v56 = vld [vmem:[%s15823_s14 + $0x3700] sm:$0xff]  ;;  %2744 = vst [vmem:[%s15831_s15 + $0xdb8] sm:$0xff] %v2743_v55 }
 0x1ca   : > { %2746 = vst [vmem:[%s15831_s15 + $0xdc0] sm:$0xff] %v2745_v56  ;;  %v2747_v57 = vld [vmem:[%s15823_s14 + $0x3720] sm:$0xff] }
 0x1cb   : > { %v2749_v58 = vld [vmem:[%s15823_s14 + $0x3740] sm:$0xff]  ;;  %2748 = vst [vmem:[%s15831_s15 + $0xdc8] sm:$0xff] %v2747_v57 }
 0x1cc   : > { %v2751_v59 = vld [vmem:[%s15823_s14 + $0x3760] sm:$0xff]  ;;  %2750 = vst [vmem:[%s15831_s15 + $0xdd0] sm:$0xff] %v2749_v58 }
 0x1cd   : > { %2752 = vst [vmem:[%s15831_s15 + $0xdd8] sm:$0xff] %v2751_v59  ;;  %v2753_v60 = vld [vmem:[%s15823_s14 + $0x3780] sm:$0xff] }
 0x1ce   : > { %v2755_v61 = vld [vmem:[%s15823_s14 + $0x37a0] sm:$0xff]  ;;  %2754 = vst [vmem:[%s15831_s15 + $0xde0] sm:$0xff] %v2753_v60 }
 0x1cf   : > { %v2757_v62 = vld [vmem:[%s15823_s14 + $0x37c0] sm:$0xff]  ;;  %2756 = vst [vmem:[%s15831_s15 + $0xde8] sm:$0xff] %v2755_v61 }
 0x1d0   : > { %2758 = vst [vmem:[%s15831_s15 + $0xdf0] sm:$0xff] %v2757_v62  ;;  %v2759_v63 = vld [vmem:[%s15823_s14 + $0x37e0] sm:$0xff] }
 0x1d1   : > { %v2761_v0 = vld [vmem:[%s15823_s14 + $0x3800] sm:$0xff]  ;;  %2760 = vst [vmem:[%s15831_s15 + $0xdf8] sm:$0xff] %v2759_v63 }
 0x1d2   : > { %v2763_v1 = vld [vmem:[%s15823_s14 + $0x3820] sm:$0xff]  ;;  %2762 = vst [vmem:[%s15831_s15 + $0xe00] sm:$0xff] %v2761_v0 }
 0x1d3   : > { %2764 = vst [vmem:[%s15831_s15 + $0xe08] sm:$0xff] %v2763_v1  ;;  %v2765_v2 = vld [vmem:[%s15823_s14 + $0x3840] sm:$0xff] }
 0x1d4   : > { %v2767_v3 = vld [vmem:[%s15823_s14 + $0x3860] sm:$0xff]  ;;  %2766 = vst [vmem:[%s15831_s15 + $0xe10] sm:$0xff] %v2765_v2 }
 0x1d5   : > { %v2769_v4 = vld [vmem:[%s15823_s14 + $0x3880] sm:$0xff]  ;;  %2768 = vst [vmem:[%s15831_s15 + $0xe18] sm:$0xff] %v2767_v3 }
 0x1d6   : > { %2770 = vst [vmem:[%s15831_s15 + $0xe20] sm:$0xff] %v2769_v4  ;;  %v2771_v5 = vld [vmem:[%s15823_s14 + $0x38a0] sm:$0xff] }
 0x1d7   : > { %v2773_v6 = vld [vmem:[%s15823_s14 + $0x38c0] sm:$0xff]  ;;  %2772 = vst [vmem:[%s15831_s15 + $0xe28] sm:$0xff] %v2771_v5 }
 0x1d8   : > { %v2775_v7 = vld [vmem:[%s15823_s14 + $0x38e0] sm:$0xff]  ;;  %2774 = vst [vmem:[%s15831_s15 + $0xe30] sm:$0xff] %v2773_v6 }
 0x1d9   : > { %2776 = vst [vmem:[%s15831_s15 + $0xe38] sm:$0xff] %v2775_v7  ;;  %v2777_v8 = vld [vmem:[%s15823_s14 + $0x3900] sm:$0xff] }
 0x1da   : > { %v2779_v9 = vld [vmem:[%s15823_s14 + $0x3920] sm:$0xff]  ;;  %2778 = vst [vmem:[%s15831_s15 + $0xe40] sm:$0xff] %v2777_v8 }
 0x1db   : > { %v2781_v10 = vld [vmem:[%s15823_s14 + $0x3940] sm:$0xff]  ;;  %2780 = vst [vmem:[%s15831_s15 + $0xe48] sm:$0xff] %v2779_v9 }
 0x1dc   : > { %2782 = vst [vmem:[%s15831_s15 + $0xe50] sm:$0xff] %v2781_v10  ;;  %v2783_v11 = vld [vmem:[%s15823_s14 + $0x3960] sm:$0xff] }
 0x1dd   : > { %v2785_v12 = vld [vmem:[%s15823_s14 + $0x3980] sm:$0xff]  ;;  %2784 = vst [vmem:[%s15831_s15 + $0xe58] sm:$0xff] %v2783_v11 }
 0x1de   : > { %v2787_v13 = vld [vmem:[%s15823_s14 + $0x39a0] sm:$0xff]  ;;  %2786 = vst [vmem:[%s15831_s15 + $0xe60] sm:$0xff] %v2785_v12 }
 0x1df   : > { %2788 = vst [vmem:[%s15831_s15 + $0xe68] sm:$0xff] %v2787_v13  ;;  %v2789_v14 = vld [vmem:[%s15823_s14 + $0x39c0] sm:$0xff] }
 0x1e0   : > { %v2791_v15 = vld [vmem:[%s15823_s14 + $0x39e0] sm:$0xff]  ;;  %2790 = vst [vmem:[%s15831_s15 + $0xe70] sm:$0xff] %v2789_v14 }
 0x1e1   : > { %v2793_v16 = vld [vmem:[%s15823_s14 + $0x3a00] sm:$0xff]  ;;  %2792 = vst [vmem:[%s15831_s15 + $0xe78] sm:$0xff] %v2791_v15 }
 0x1e2   : > { %2794 = vst [vmem:[%s15831_s15 + $0xe80] sm:$0xff] %v2793_v16  ;;  %v2795_v17 = vld [vmem:[%s15823_s14 + $0x3a20] sm:$0xff] }
 0x1e3   : > { %v2797_v18 = vld [vmem:[%s15823_s14 + $0x3a40] sm:$0xff]  ;;  %2796 = vst [vmem:[%s15831_s15 + $0xe88] sm:$0xff] %v2795_v17 }
 0x1e4   : > { %v2799_v19 = vld [vmem:[%s15823_s14 + $0x3a60] sm:$0xff]  ;;  %2798 = vst [vmem:[%s15831_s15 + $0xe90] sm:$0xff] %v2797_v18 }
 0x1e5   : > { %2800 = vst [vmem:[%s15831_s15 + $0xe98] sm:$0xff] %v2799_v19  ;;  %v2801_v20 = vld [vmem:[%s15823_s14 + $0x3a80] sm:$0xff] }
 0x1e6   : > { %v2803_v21 = vld [vmem:[%s15823_s14 + $0x3aa0] sm:$0xff]  ;;  %2802 = vst [vmem:[%s15831_s15 + $0xea0] sm:$0xff] %v2801_v20 }
 0x1e7   : > { %v2805_v22 = vld [vmem:[%s15823_s14 + $0x3ac0] sm:$0xff]  ;;  %2804 = vst [vmem:[%s15831_s15 + $0xea8] sm:$0xff] %v2803_v21 }
 0x1e8   : > { %2806 = vst [vmem:[%s15831_s15 + $0xeb0] sm:$0xff] %v2805_v22  ;;  %v2807_v23 = vld [vmem:[%s15823_s14 + $0x3ae0] sm:$0xff] }
 0x1e9   : > { %v2809_v24 = vld [vmem:[%s15823_s14 + $0x3b00] sm:$0xff]  ;;  %2808 = vst [vmem:[%s15831_s15 + $0xeb8] sm:$0xff] %v2807_v23 }
 0x1ea   : > { %v2811_v25 = vld [vmem:[%s15823_s14 + $0x3b20] sm:$0xff]  ;;  %2810 = vst [vmem:[%s15831_s15 + $0xec0] sm:$0xff] %v2809_v24 }
 0x1eb   : > { %2812 = vst [vmem:[%s15831_s15 + $0xec8] sm:$0xff] %v2811_v25  ;;  %v2813_v26 = vld [vmem:[%s15823_s14 + $0x3b40] sm:$0xff] }
 0x1ec   : > { %v2815_v27 = vld [vmem:[%s15823_s14 + $0x3b60] sm:$0xff]  ;;  %2814 = vst [vmem:[%s15831_s15 + $0xed0] sm:$0xff] %v2813_v26 }
 0x1ed   : > { %v2817_v28 = vld [vmem:[%s15823_s14 + $0x3b80] sm:$0xff]  ;;  %2816 = vst [vmem:[%s15831_s15 + $0xed8] sm:$0xff] %v2815_v27 }
 0x1ee   : > { %2818 = vst [vmem:[%s15831_s15 + $0xee0] sm:$0xff] %v2817_v28  ;;  %v2819_v29 = vld [vmem:[%s15823_s14 + $0x3ba0] sm:$0xff] }
 0x1ef   : > { %v2821_v30 = vld [vmem:[%s15823_s14 + $0x3bc0] sm:$0xff]  ;;  %2820 = vst [vmem:[%s15831_s15 + $0xee8] sm:$0xff] %v2819_v29 }
 0x1f0   : > { %v2823_v31 = vld [vmem:[%s15823_s14 + $0x3be0] sm:$0xff]  ;;  %2822 = vst [vmem:[%s15831_s15 + $0xef0] sm:$0xff] %v2821_v30 }
 0x1f1   : > { %2824 = vst [vmem:[%s15831_s15 + $0xef8] sm:$0xff] %v2823_v31  ;;  %v2825_v32 = vld [vmem:[%s15823_s14 + $0x3c00] sm:$0xff] }
 0x1f2   : > { %v2827_v33 = vld [vmem:[%s15823_s14 + $0x3c20] sm:$0xff]  ;;  %2826 = vst [vmem:[%s15831_s15 + $0xf00] sm:$0xff] %v2825_v32 }
 0x1f3   : > { %v2829_v34 = vld [vmem:[%s15823_s14 + $0x3c40] sm:$0xff]  ;;  %2828 = vst [vmem:[%s15831_s15 + $0xf08] sm:$0xff] %v2827_v33 }
 0x1f4   : > { %2830 = vst [vmem:[%s15831_s15 + $0xf10] sm:$0xff] %v2829_v34  ;;  %v2831_v35 = vld [vmem:[%s15823_s14 + $0x3c60] sm:$0xff] }
 0x1f5   : > { %v2833_v36 = vld [vmem:[%s15823_s14 + $0x3c80] sm:$0xff]  ;;  %2832 = vst [vmem:[%s15831_s15 + $0xf18] sm:$0xff] %v2831_v35 }
 0x1f6   : > { %v2835_v37 = vld [vmem:[%s15823_s14 + $0x3ca0] sm:$0xff]  ;;  %2834 = vst [vmem:[%s15831_s15 + $0xf20] sm:$0xff] %v2833_v36 }
 0x1f7   : > { %2836 = vst [vmem:[%s15831_s15 + $0xf28] sm:$0xff] %v2835_v37  ;;  %v2837_v38 = vld [vmem:[%s15823_s14 + $0x3cc0] sm:$0xff] }
 0x1f8   : > { %v2839_v39 = vld [vmem:[%s15823_s14 + $0x3ce0] sm:$0xff]  ;;  %2838 = vst [vmem:[%s15831_s15 + $0xf30] sm:$0xff] %v2837_v38 }
 0x1f9   : > { %v2841_v40 = vld [vmem:[%s15823_s14 + $0x3d00] sm:$0xff]  ;;  %2840 = vst [vmem:[%s15831_s15 + $0xf38] sm:$0xff] %v2839_v39 }
 0x1fa   : > { %2842 = vst [vmem:[%s15831_s15 + $0xf40] sm:$0xff] %v2841_v40  ;;  %v2843_v41 = vld [vmem:[%s15823_s14 + $0x3d20] sm:$0xff] }
 0x1fb   : > { %v2845_v42 = vld [vmem:[%s15823_s14 + $0x3d40] sm:$0xff]  ;;  %2844 = vst [vmem:[%s15831_s15 + $0xf48] sm:$0xff] %v2843_v41 }
 0x1fc   : > { %v2847_v43 = vld [vmem:[%s15823_s14 + $0x3d60] sm:$0xff]  ;;  %2846 = vst [vmem:[%s15831_s15 + $0xf50] sm:$0xff] %v2845_v42 }
 0x1fd   : > { %2848 = vst [vmem:[%s15831_s15 + $0xf58] sm:$0xff] %v2847_v43  ;;  %v2849_v44 = vld [vmem:[%s15823_s14 + $0x3d80] sm:$0xff] }
 0x1fe   : > { %v2851_v45 = vld [vmem:[%s15823_s14 + $0x3da0] sm:$0xff]  ;;  %2850 = vst [vmem:[%s15831_s15 + $0xf60] sm:$0xff] %v2849_v44 }
 0x1ff   : > { %v2853_v46 = vld [vmem:[%s15823_s14 + $0x3dc0] sm:$0xff]  ;;  %2852 = vst [vmem:[%s15831_s15 + $0xf68] sm:$0xff] %v2851_v45 }
 0x200   : > { %2854 = vst [vmem:[%s15831_s15 + $0xf70] sm:$0xff] %v2853_v46  ;;  %v2855_v47 = vld [vmem:[%s15823_s14 + $0x3de0] sm:$0xff] }
 0x201   : > { %v2857_v48 = vld [vmem:[%s15823_s14 + $0x3e00] sm:$0xff]  ;;  %2856 = vst [vmem:[%s15831_s15 + $0xf78] sm:$0xff] %v2855_v47 }
 0x202   : > { %v2859_v49 = vld [vmem:[%s15823_s14 + $0x3e20] sm:$0xff]  ;;  %2858 = vst [vmem:[%s15831_s15 + $0xf80] sm:$0xff] %v2857_v48 }
 0x203   : > { %2860 = vst [vmem:[%s15831_s15 + $0xf88] sm:$0xff] %v2859_v49  ;;  %v2861_v50 = vld [vmem:[%s15823_s14 + $0x3e40] sm:$0xff] }
 0x204   : > { %v2863_v51 = vld [vmem:[%s15823_s14 + $0x3e60] sm:$0xff]  ;;  %2862 = vst [vmem:[%s15831_s15 + $0xf90] sm:$0xff] %v2861_v50 }
 0x205   : > { %v2865_v52 = vld [vmem:[%s15823_s14 + $0x3e80] sm:$0xff]  ;;  %2864 = vst [vmem:[%s15831_s15 + $0xf98] sm:$0xff] %v2863_v51 }
 0x206   : > { %2866 = vst [vmem:[%s15831_s15 + $0xfa0] sm:$0xff] %v2865_v52  ;;  %v2867_v53 = vld [vmem:[%s15823_s14 + $0x3ea0] sm:$0xff] }
 0x207   : > { %v2869_v54 = vld [vmem:[%s15823_s14 + $0x3ec0] sm:$0xff]  ;;  %2868 = vst [vmem:[%s15831_s15 + $0xfa8] sm:$0xff] %v2867_v53 }
 0x208   : > { %v2871_v55 = vld [vmem:[%s15823_s14 + $0x3ee0] sm:$0xff]  ;;  %2870 = vst [vmem:[%s15831_s15 + $0xfb0] sm:$0xff] %v2869_v54 }
 0x209   : > { %2872 = vst [vmem:[%s15831_s15 + $0xfb8] sm:$0xff] %v2871_v55  ;;  %v2873_v56 = vld [vmem:[%s15823_s14 + $0x3f00] sm:$0xff] }
 0x20a   : > { %v2875_v57 = vld [vmem:[%s15823_s14 + $0x3f20] sm:$0xff]  ;;  %2874 = vst [vmem:[%s15831_s15 + $0xfc0] sm:$0xff] %v2873_v56 }
 0x20b   : > { %v2877_v58 = vld [vmem:[%s15823_s14 + $0x3f40] sm:$0xff]  ;;  %2876 = vst [vmem:[%s15831_s15 + $0xfc8] sm:$0xff] %v2875_v57 }
 0x20c   : > { %2878 = vst [vmem:[%s15831_s15 + $0xfd0] sm:$0xff] %v2877_v58  ;;  %v2879_v59 = vld [vmem:[%s15823_s14 + $0x3f60] sm:$0xff] }
 0x20d   : > { %v2881_v60 = vld [vmem:[%s15823_s14 + $0x3f80] sm:$0xff]  ;;  %2880 = vst [vmem:[%s15831_s15 + $0xfd8] sm:$0xff] %v2879_v59 }
 0x20e   : > { %v2883_v61 = vld [vmem:[%s15823_s14 + $0x3fa0] sm:$0xff]  ;;  %2882 = vst [vmem:[%s15831_s15 + $0xfe0] sm:$0xff] %v2881_v60 }
 0x20f   : > { %2884 = vst [vmem:[%s15831_s15 + $0xfe8] sm:$0xff] %v2883_v61  ;;  %v2885_v62 = vld [vmem:[%s15823_s14 + $0x3fc0] sm:$0xff] }
 0x210   : > { %v2887_v63 = vld [vmem:[%s15823_s14 + $0x3fe0] sm:$0xff]  ;;  %2886 = vst [vmem:[%s15831_s15 + $0xff0] sm:$0xff] %v2885_v62 }
 0x211   : > { %v2889_v0 = vld [vmem:[%s15823_s14 + $0x4000] sm:$0xff]  ;;  %2888 = vst [vmem:[%s15831_s15 + $0xff8] sm:$0xff] %v2887_v63 }
 0x212   : > { %2890 = vst [vmem:[%s15831_s15 + $0x1000] sm:$0xff] %v2889_v0  ;;  %v2891_v1 = vld [vmem:[%s15823_s14 + $0x4020] sm:$0xff] }
 0x213   : > { %v2893_v2 = vld [vmem:[%s15823_s14 + $0x4040] sm:$0xff]  ;;  %2892 = vst [vmem:[%s15831_s15 + $0x1008] sm:$0xff] %v2891_v1 }
 0x214   : > { %v2895_v3 = vld [vmem:[%s15823_s14 + $0x4060] sm:$0xff]  ;;  %2894 = vst [vmem:[%s15831_s15 + $0x1010] sm:$0xff] %v2893_v2 }
 0x215   : > { %2896 = vst [vmem:[%s15831_s15 + $0x1018] sm:$0xff] %v2895_v3  ;;  %v2897_v4 = vld [vmem:[%s15823_s14 + $0x4080] sm:$0xff] }
 0x216   : > { %v2899_v5 = vld [vmem:[%s15823_s14 + $0x40a0] sm:$0xff]  ;;  %2898 = vst [vmem:[%s15831_s15 + $0x1020] sm:$0xff] %v2897_v4 }
 0x217   : > { %v2901_v6 = vld [vmem:[%s15823_s14 + $0x40c0] sm:$0xff]  ;;  %2900 = vst [vmem:[%s15831_s15 + $0x1028] sm:$0xff] %v2899_v5 }
 0x218   : > { %2902 = vst [vmem:[%s15831_s15 + $0x1030] sm:$0xff] %v2901_v6  ;;  %v2903_v7 = vld [vmem:[%s15823_s14 + $0x40e0] sm:$0xff] }
 0x219   : > { %v2905_v8 = vld [vmem:[%s15823_s14 + $0x4100] sm:$0xff]  ;;  %2904 = vst [vmem:[%s15831_s15 + $0x1038] sm:$0xff] %v2903_v7 }
 0x21a   : > { %v2907_v9 = vld [vmem:[%s15823_s14 + $0x4120] sm:$0xff]  ;;  %2906 = vst [vmem:[%s15831_s15 + $0x1040] sm:$0xff] %v2905_v8 }
 0x21b   : > { %2908 = vst [vmem:[%s15831_s15 + $0x1048] sm:$0xff] %v2907_v9  ;;  %v2909_v10 = vld [vmem:[%s15823_s14 + $0x4140] sm:$0xff] }
 0x21c   : > { %v2911_v11 = vld [vmem:[%s15823_s14 + $0x4160] sm:$0xff]  ;;  %2910 = vst [vmem:[%s15831_s15 + $0x1050] sm:$0xff] %v2909_v10 }
 0x21d   : > { %v2913_v12 = vld [vmem:[%s15823_s14 + $0x4180] sm:$0xff]  ;;  %2912 = vst [vmem:[%s15831_s15 + $0x1058] sm:$0xff] %v2911_v11 }
 0x21e   : > { %2914 = vst [vmem:[%s15831_s15 + $0x1060] sm:$0xff] %v2913_v12  ;;  %v2915_v13 = vld [vmem:[%s15823_s14 + $0x41a0] sm:$0xff] }
 0x21f   : > { %v2917_v14 = vld [vmem:[%s15823_s14 + $0x41c0] sm:$0xff]  ;;  %2916 = vst [vmem:[%s15831_s15 + $0x1068] sm:$0xff] %v2915_v13 }
 0x220   : > { %v2919_v15 = vld [vmem:[%s15823_s14 + $0x41e0] sm:$0xff]  ;;  %2918 = vst [vmem:[%s15831_s15 + $0x1070] sm:$0xff] %v2917_v14 }
 0x221   : > { %2920 = vst [vmem:[%s15831_s15 + $0x1078] sm:$0xff] %v2919_v15  ;;  %v2921_v16 = vld [vmem:[%s15823_s14 + $0x4200] sm:$0xff] }
 0x222   : > { %v2923_v17 = vld [vmem:[%s15823_s14 + $0x4220] sm:$0xff]  ;;  %2922 = vst [vmem:[%s15831_s15 + $0x1080] sm:$0xff] %v2921_v16 }
 0x223   : > { %v2925_v18 = vld [vmem:[%s15823_s14 + $0x4240] sm:$0xff]  ;;  %2924 = vst [vmem:[%s15831_s15 + $0x1088] sm:$0xff] %v2923_v17 }
 0x224   : > { %2926 = vst [vmem:[%s15831_s15 + $0x1090] sm:$0xff] %v2925_v18  ;;  %v2927_v19 = vld [vmem:[%s15823_s14 + $0x4260] sm:$0xff] }
 0x225   : > { %v2929_v20 = vld [vmem:[%s15823_s14 + $0x4280] sm:$0xff]  ;;  %2928 = vst [vmem:[%s15831_s15 + $0x1098] sm:$0xff] %v2927_v19 }
 0x226   : > { %v2931_v21 = vld [vmem:[%s15823_s14 + $0x42a0] sm:$0xff]  ;;  %2930 = vst [vmem:[%s15831_s15 + $0x10a0] sm:$0xff] %v2929_v20 }
 0x227   : > { %2932 = vst [vmem:[%s15831_s15 + $0x10a8] sm:$0xff] %v2931_v21  ;;  %v2933_v22 = vld [vmem:[%s15823_s14 + $0x42c0] sm:$0xff] }
 0x228   : > { %v2935_v23 = vld [vmem:[%s15823_s14 + $0x42e0] sm:$0xff]  ;;  %2934 = vst [vmem:[%s15831_s15 + $0x10b0] sm:$0xff] %v2933_v22 }
 0x229   : > { %v2937_v24 = vld [vmem:[%s15823_s14 + $0x4300] sm:$0xff]  ;;  %2936 = vst [vmem:[%s15831_s15 + $0x10b8] sm:$0xff] %v2935_v23 }
 0x22a   : > { %2938 = vst [vmem:[%s15831_s15 + $0x10c0] sm:$0xff] %v2937_v24  ;;  %v2939_v25 = vld [vmem:[%s15823_s14 + $0x4320] sm:$0xff] }
 0x22b   : > { %v2941_v26 = vld [vmem:[%s15823_s14 + $0x4340] sm:$0xff]  ;;  %2940 = vst [vmem:[%s15831_s15 + $0x10c8] sm:$0xff] %v2939_v25 }
 0x22c   : > { %v2943_v27 = vld [vmem:[%s15823_s14 + $0x4360] sm:$0xff]  ;;  %2942 = vst [vmem:[%s15831_s15 + $0x10d0] sm:$0xff] %v2941_v26 }
 0x22d   : > { %2944 = vst [vmem:[%s15831_s15 + $0x10d8] sm:$0xff] %v2943_v27  ;;  %v2945_v28 = vld [vmem:[%s15823_s14 + $0x4380] sm:$0xff] }
 0x22e   : > { %v2947_v29 = vld [vmem:[%s15823_s14 + $0x43a0] sm:$0xff]  ;;  %2946 = vst [vmem:[%s15831_s15 + $0x10e0] sm:$0xff] %v2945_v28 }
 0x22f   : > { %v2949_v30 = vld [vmem:[%s15823_s14 + $0x43c0] sm:$0xff]  ;;  %2948 = vst [vmem:[%s15831_s15 + $0x10e8] sm:$0xff] %v2947_v29 }
 0x230   : > { %2950 = vst [vmem:[%s15831_s15 + $0x10f0] sm:$0xff] %v2949_v30  ;;  %v2951_v31 = vld [vmem:[%s15823_s14 + $0x43e0] sm:$0xff] }
 0x231   : > { %v2953_v32 = vld [vmem:[%s15823_s14 + $0x4400] sm:$0xff]  ;;  %2952 = vst [vmem:[%s15831_s15 + $0x10f8] sm:$0xff] %v2951_v31 }
 0x232   : > { %v2955_v33 = vld [vmem:[%s15823_s14 + $0x4420] sm:$0xff]  ;;  %2954 = vst [vmem:[%s15831_s15 + $0x1100] sm:$0xff] %v2953_v32 }
 0x233   : > { %2956 = vst [vmem:[%s15831_s15 + $0x1108] sm:$0xff] %v2955_v33  ;;  %v2957_v34 = vld [vmem:[%s15823_s14 + $0x4440] sm:$0xff] }
 0x234   : > { %v2959_v35 = vld [vmem:[%s15823_s14 + $0x4460] sm:$0xff]  ;;  %2958 = vst [vmem:[%s15831_s15 + $0x1110] sm:$0xff] %v2957_v34 }
 0x235   : > { %v2961_v36 = vld [vmem:[%s15823_s14 + $0x4480] sm:$0xff]  ;;  %2960 = vst [vmem:[%s15831_s15 + $0x1118] sm:$0xff] %v2959_v35 }
 0x236   : > { %2962 = vst [vmem:[%s15831_s15 + $0x1120] sm:$0xff] %v2961_v36  ;;  %v2963_v37 = vld [vmem:[%s15823_s14 + $0x44a0] sm:$0xff] }
 0x237   : > { %v2965_v38 = vld [vmem:[%s15823_s14 + $0x44c0] sm:$0xff]  ;;  %2964 = vst [vmem:[%s15831_s15 + $0x1128] sm:$0xff] %v2963_v37 }
 0x238   : > { %v2967_v39 = vld [vmem:[%s15823_s14 + $0x44e0] sm:$0xff]  ;;  %2966 = vst [vmem:[%s15831_s15 + $0x1130] sm:$0xff] %v2965_v38 }
 0x239   : > { %2968 = vst [vmem:[%s15831_s15 + $0x1138] sm:$0xff] %v2967_v39  ;;  %v2969_v40 = vld [vmem:[%s15823_s14 + $0x4500] sm:$0xff] }
 0x23a   : > { %v2971_v41 = vld [vmem:[%s15823_s14 + $0x4520] sm:$0xff]  ;;  %2970 = vst [vmem:[%s15831_s15 + $0x1140] sm:$0xff] %v2969_v40 }
 0x23b   : > { %v2973_v42 = vld [vmem:[%s15823_s14 + $0x4540] sm:$0xff]  ;;  %2972 = vst [vmem:[%s15831_s15 + $0x1148] sm:$0xff] %v2971_v41 }
 0x23c   : > { %2974 = vst [vmem:[%s15831_s15 + $0x1150] sm:$0xff] %v2973_v42  ;;  %v2975_v43 = vld [vmem:[%s15823_s14 + $0x4560] sm:$0xff] }
 0x23d   : > { %v2977_v44 = vld [vmem:[%s15823_s14 + $0x4580] sm:$0xff]  ;;  %2976 = vst [vmem:[%s15831_s15 + $0x1158] sm:$0xff] %v2975_v43 }
 0x23e   : > { %v2979_v45 = vld [vmem:[%s15823_s14 + $0x45a0] sm:$0xff]  ;;  %2978 = vst [vmem:[%s15831_s15 + $0x1160] sm:$0xff] %v2977_v44 }
 0x23f   : > { %2980 = vst [vmem:[%s15831_s15 + $0x1168] sm:$0xff] %v2979_v45  ;;  %v2981_v46 = vld [vmem:[%s15823_s14 + $0x45c0] sm:$0xff] }
 0x240   : > { %v2983_v47 = vld [vmem:[%s15823_s14 + $0x45e0] sm:$0xff]  ;;  %2982 = vst [vmem:[%s15831_s15 + $0x1170] sm:$0xff] %v2981_v46 }
 0x241   : > { %v2985_v48 = vld [vmem:[%s15823_s14 + $0x4600] sm:$0xff]  ;;  %2984 = vst [vmem:[%s15831_s15 + $0x1178] sm:$0xff] %v2983_v47 }
 0x242   : > { %2986 = vst [vmem:[%s15831_s15 + $0x1180] sm:$0xff] %v2985_v48  ;;  %v2987_v49 = vld [vmem:[%s15823_s14 + $0x4620] sm:$0xff] }
 0x243   : > { %v2989_v50 = vld [vmem:[%s15823_s14 + $0x4640] sm:$0xff]  ;;  %2988 = vst [vmem:[%s15831_s15 + $0x1188] sm:$0xff] %v2987_v49 }
 0x244   : > { %v2991_v51 = vld [vmem:[%s15823_s14 + $0x4660] sm:$0xff]  ;;  %2990 = vst [vmem:[%s15831_s15 + $0x1190] sm:$0xff] %v2989_v50 }
 0x245   : > { %2992 = vst [vmem:[%s15831_s15 + $0x1198] sm:$0xff] %v2991_v51  ;;  %v2993_v52 = vld [vmem:[%s15823_s14 + $0x4680] sm:$0xff] }
 0x246   : > { %v2995_v53 = vld [vmem:[%s15823_s14 + $0x46a0] sm:$0xff]  ;;  %2994 = vst [vmem:[%s15831_s15 + $0x11a0] sm:$0xff] %v2993_v52 }
 0x247   : > { %v2997_v54 = vld [vmem:[%s15823_s14 + $0x46c0] sm:$0xff]  ;;  %2996 = vst [vmem:[%s15831_s15 + $0x11a8] sm:$0xff] %v2995_v53 }
 0x248   : > { %2998 = vst [vmem:[%s15831_s15 + $0x11b0] sm:$0xff] %v2997_v54  ;;  %v2999_v55 = vld [vmem:[%s15823_s14 + $0x46e0] sm:$0xff] }
 0x249   : > { %v3001_v56 = vld [vmem:[%s15823_s14 + $0x4700] sm:$0xff]  ;;  %3000 = vst [vmem:[%s15831_s15 + $0x11b8] sm:$0xff] %v2999_v55 }
 0x24a   : > { %v3003_v57 = vld [vmem:[%s15823_s14 + $0x4720] sm:$0xff]  ;;  %3002 = vst [vmem:[%s15831_s15 + $0x11c0] sm:$0xff] %v3001_v56 }
 0x24b   : > { %3004 = vst [vmem:[%s15831_s15 + $0x11c8] sm:$0xff] %v3003_v57  ;;  %v3005_v58 = vld [vmem:[%s15823_s14 + $0x4740] sm:$0xff] }
 0x24c   : > { %v3007_v59 = vld [vmem:[%s15823_s14 + $0x4760] sm:$0xff]  ;;  %3006 = vst [vmem:[%s15831_s15 + $0x11d0] sm:$0xff] %v3005_v58 }
 0x24d   : > { %v3009_v60 = vld [vmem:[%s15823_s14 + $0x4780] sm:$0xff]  ;;  %3008 = vst [vmem:[%s15831_s15 + $0x11d8] sm:$0xff] %v3007_v59 }
 0x24e   : > { %3010 = vst [vmem:[%s15831_s15 + $0x11e0] sm:$0xff] %v3009_v60  ;;  %v3011_v61 = vld [vmem:[%s15823_s14 + $0x47a0] sm:$0xff] }
 0x24f   : > { %v3013_v62 = vld [vmem:[%s15823_s14 + $0x47c0] sm:$0xff]  ;;  %3012 = vst [vmem:[%s15831_s15 + $0x11e8] sm:$0xff] %v3011_v61 }
 0x250   : > { %v3015_v63 = vld [vmem:[%s15823_s14 + $0x47e0] sm:$0xff]  ;;  %3014 = vst [vmem:[%s15831_s15 + $0x11f0] sm:$0xff] %v3013_v62 }
 0x251   : > { %3016 = vst [vmem:[%s15831_s15 + $0x11f8] sm:$0xff] %v3015_v63  ;;  %v3017_v0 = vld [vmem:[%s15823_s14 + $0x4800] sm:$0xff] }
 0x252   : > { %v3019_v1 = vld [vmem:[%s15823_s14 + $0x4820] sm:$0xff]  ;;  %3018 = vst [vmem:[%s15831_s15 + $0x1200] sm:$0xff] %v3017_v0 }
 0x253   : > { %v3021_v2 = vld [vmem:[%s15823_s14 + $0x4840] sm:$0xff]  ;;  %3020 = vst [vmem:[%s15831_s15 + $0x1208] sm:$0xff] %v3019_v1 }
 0x254   : > { %3022 = vst [vmem:[%s15831_s15 + $0x1210] sm:$0xff] %v3021_v2  ;;  %v3023_v3 = vld [vmem:[%s15823_s14 + $0x4860] sm:$0xff] }
 0x255   : > { %v3025_v4 = vld [vmem:[%s15823_s14 + $0x4880] sm:$0xff]  ;;  %3024 = vst [vmem:[%s15831_s15 + $0x1218] sm:$0xff] %v3023_v3 }
 0x256   : > { %v3027_v5 = vld [vmem:[%s15823_s14 + $0x48a0] sm:$0xff]  ;;  %3026 = vst [vmem:[%s15831_s15 + $0x1220] sm:$0xff] %v3025_v4 }
 0x257   : > { %3028 = vst [vmem:[%s15831_s15 + $0x1228] sm:$0xff] %v3027_v5  ;;  %v3029_v6 = vld [vmem:[%s15823_s14 + $0x48c0] sm:$0xff] }
 0x258   : > { %v3031_v7 = vld [vmem:[%s15823_s14 + $0x48e0] sm:$0xff]  ;;  %3030 = vst [vmem:[%s15831_s15 + $0x1230] sm:$0xff] %v3029_v6 }
 0x259   : > { %v3033_v8 = vld [vmem:[%s15823_s14 + $0x4900] sm:$0xff]  ;;  %3032 = vst [vmem:[%s15831_s15 + $0x1238] sm:$0xff] %v3031_v7 }
 0x25a   : > { %3034 = vst [vmem:[%s15831_s15 + $0x1240] sm:$0xff] %v3033_v8  ;;  %v3035_v9 = vld [vmem:[%s15823_s14 + $0x4920] sm:$0xff] }
 0x25b   : > { %v3037_v10 = vld [vmem:[%s15823_s14 + $0x4940] sm:$0xff]  ;;  %3036 = vst [vmem:[%s15831_s15 + $0x1248] sm:$0xff] %v3035_v9 }
 0x25c   : > { %v3039_v11 = vld [vmem:[%s15823_s14 + $0x4960] sm:$0xff]  ;;  %3038 = vst [vmem:[%s15831_s15 + $0x1250] sm:$0xff] %v3037_v10 }
 0x25d   : > { %3040 = vst [vmem:[%s15831_s15 + $0x1258] sm:$0xff] %v3039_v11  ;;  %v3041_v12 = vld [vmem:[%s15823_s14 + $0x4980] sm:$0xff] }
 0x25e   : > { %v3043_v13 = vld [vmem:[%s15823_s14 + $0x49a0] sm:$0xff]  ;;  %3042 = vst [vmem:[%s15831_s15 + $0x1260] sm:$0xff] %v3041_v12 }
 0x25f   : > { %v3045_v14 = vld [vmem:[%s15823_s14 + $0x49c0] sm:$0xff]  ;;  %3044 = vst [vmem:[%s15831_s15 + $0x1268] sm:$0xff] %v3043_v13 }
 0x260   : > { %3046 = vst [vmem:[%s15831_s15 + $0x1270] sm:$0xff] %v3045_v14  ;;  %v3047_v15 = vld [vmem:[%s15823_s14 + $0x49e0] sm:$0xff] }
 0x261   : > { %v3049_v16 = vld [vmem:[%s15823_s14 + $0x4a00] sm:$0xff]  ;;  %3048 = vst [vmem:[%s15831_s15 + $0x1278] sm:$0xff] %v3047_v15 }
 0x262   : > { %v3051_v17 = vld [vmem:[%s15823_s14 + $0x4a20] sm:$0xff]  ;;  %3050 = vst [vmem:[%s15831_s15 + $0x1280] sm:$0xff] %v3049_v16 }
 0x263   : > { %3052 = vst [vmem:[%s15831_s15 + $0x1288] sm:$0xff] %v3051_v17  ;;  %v3053_v18 = vld [vmem:[%s15823_s14 + $0x4a40] sm:$0xff] }
 0x264   : > { %v3055_v19 = vld [vmem:[%s15823_s14 + $0x4a60] sm:$0xff]  ;;  %3054 = vst [vmem:[%s15831_s15 + $0x1290] sm:$0xff] %v3053_v18 }
 0x265   : > { %v3057_v20 = vld [vmem:[%s15823_s14 + $0x4a80] sm:$0xff]  ;;  %3056 = vst [vmem:[%s15831_s15 + $0x1298] sm:$0xff] %v3055_v19 }
 0x266   : > { %3058 = vst [vmem:[%s15831_s15 + $0x12a0] sm:$0xff] %v3057_v20  ;;  %v3059_v21 = vld [vmem:[%s15823_s14 + $0x4aa0] sm:$0xff] }
 0x267   : > { %v3061_v22 = vld [vmem:[%s15823_s14 + $0x4ac0] sm:$0xff]  ;;  %3060 = vst [vmem:[%s15831_s15 + $0x12a8] sm:$0xff] %v3059_v21 }
 0x268   : > { %v3063_v23 = vld [vmem:[%s15823_s14 + $0x4ae0] sm:$0xff]  ;;  %3062 = vst [vmem:[%s15831_s15 + $0x12b0] sm:$0xff] %v3061_v22 }
 0x269   : > { %3064 = vst [vmem:[%s15831_s15 + $0x12b8] sm:$0xff] %v3063_v23  ;;  %v3065_v24 = vld [vmem:[%s15823_s14 + $0x4b00] sm:$0xff] }
 0x26a   : > { %v3067_v25 = vld [vmem:[%s15823_s14 + $0x4b20] sm:$0xff]  ;;  %3066 = vst [vmem:[%s15831_s15 + $0x12c0] sm:$0xff] %v3065_v24 }
 0x26b   : > { %v3069_v26 = vld [vmem:[%s15823_s14 + $0x4b40] sm:$0xff]  ;;  %3068 = vst [vmem:[%s15831_s15 + $0x12c8] sm:$0xff] %v3067_v25 }
 0x26c   : > { %3070 = vst [vmem:[%s15831_s15 + $0x12d0] sm:$0xff] %v3069_v26  ;;  %v3071_v27 = vld [vmem:[%s15823_s14 + $0x4b60] sm:$0xff] }
 0x26d   : > { %v3073_v28 = vld [vmem:[%s15823_s14 + $0x4b80] sm:$0xff]  ;;  %3072 = vst [vmem:[%s15831_s15 + $0x12d8] sm:$0xff] %v3071_v27 }
 0x26e   : > { %v3075_v29 = vld [vmem:[%s15823_s14 + $0x4ba0] sm:$0xff]  ;;  %3074 = vst [vmem:[%s15831_s15 + $0x12e0] sm:$0xff] %v3073_v28 }
 0x26f   : > { %3076 = vst [vmem:[%s15831_s15 + $0x12e8] sm:$0xff] %v3075_v29  ;;  %v3077_v30 = vld [vmem:[%s15823_s14 + $0x4bc0] sm:$0xff] }
 0x270   : > { %v3079_v31 = vld [vmem:[%s15823_s14 + $0x4be0] sm:$0xff]  ;;  %3078 = vst [vmem:[%s15831_s15 + $0x12f0] sm:$0xff] %v3077_v30 }
 0x271   : > { %v3081_v32 = vld [vmem:[%s15823_s14 + $0x4c00] sm:$0xff]  ;;  %3080 = vst [vmem:[%s15831_s15 + $0x12f8] sm:$0xff] %v3079_v31 }
 0x272   : > { %3082 = vst [vmem:[%s15831_s15 + $0x1300] sm:$0xff] %v3081_v32  ;;  %v3083_v33 = vld [vmem:[%s15823_s14 + $0x4c20] sm:$0xff] }
 0x273   : > { %v3085_v34 = vld [vmem:[%s15823_s14 + $0x4c40] sm:$0xff]  ;;  %3084 = vst [vmem:[%s15831_s15 + $0x1308] sm:$0xff] %v3083_v33 }
 0x274   : > { %v3087_v35 = vld [vmem:[%s15823_s14 + $0x4c60] sm:$0xff]  ;;  %3086 = vst [vmem:[%s15831_s15 + $0x1310] sm:$0xff] %v3085_v34 }
 0x275   : > { %3088 = vst [vmem:[%s15831_s15 + $0x1318] sm:$0xff] %v3087_v35  ;;  %v3089_v36 = vld [vmem:[%s15823_s14 + $0x4c80] sm:$0xff] }
 0x276   : > { %v3091_v37 = vld [vmem:[%s15823_s14 + $0x4ca0] sm:$0xff]  ;;  %3090 = vst [vmem:[%s15831_s15 + $0x1320] sm:$0xff] %v3089_v36 }
 0x277   : > { %v3093_v38 = vld [vmem:[%s15823_s14 + $0x4cc0] sm:$0xff]  ;;  %3092 = vst [vmem:[%s15831_s15 + $0x1328] sm:$0xff] %v3091_v37 }
 0x278   : > { %3094 = vst [vmem:[%s15831_s15 + $0x1330] sm:$0xff] %v3093_v38  ;;  %v3095_v39 = vld [vmem:[%s15823_s14 + $0x4ce0] sm:$0xff] }
 0x279   : > { %v3097_v40 = vld [vmem:[%s15823_s14 + $0x4d00] sm:$0xff]  ;;  %3096 = vst [vmem:[%s15831_s15 + $0x1338] sm:$0xff] %v3095_v39 }
 0x27a   : > { %v3099_v41 = vld [vmem:[%s15823_s14 + $0x4d20] sm:$0xff]  ;;  %3098 = vst [vmem:[%s15831_s15 + $0x1340] sm:$0xff] %v3097_v40 }
 0x27b   : > { %3100 = vst [vmem:[%s15831_s15 + $0x1348] sm:$0xff] %v3099_v41  ;;  %v3101_v42 = vld [vmem:[%s15823_s14 + $0x4d40] sm:$0xff] }
 0x27c   : > { %v3103_v43 = vld [vmem:[%s15823_s14 + $0x4d60] sm:$0xff]  ;;  %3102 = vst [vmem:[%s15831_s15 + $0x1350] sm:$0xff] %v3101_v42 }
 0x27d   : > { %v3105_v44 = vld [vmem:[%s15823_s14 + $0x4d80] sm:$0xff]  ;;  %3104 = vst [vmem:[%s15831_s15 + $0x1358] sm:$0xff] %v3103_v43 }
 0x27e   : > { %3106 = vst [vmem:[%s15831_s15 + $0x1360] sm:$0xff] %v3105_v44  ;;  %v3107_v45 = vld [vmem:[%s15823_s14 + $0x4da0] sm:$0xff] }
 0x27f   : > { %v3109_v46 = vld [vmem:[%s15823_s14 + $0x4dc0] sm:$0xff]  ;;  %3108 = vst [vmem:[%s15831_s15 + $0x1368] sm:$0xff] %v3107_v45 }
 0x280   : > { %v3111_v47 = vld [vmem:[%s15823_s14 + $0x4de0] sm:$0xff]  ;;  %3110 = vst [vmem:[%s15831_s15 + $0x1370] sm:$0xff] %v3109_v46 }
 0x281   : > { %3112 = vst [vmem:[%s15831_s15 + $0x1378] sm:$0xff] %v3111_v47  ;;  %v3113_v48 = vld [vmem:[%s15823_s14 + $0x4e00] sm:$0xff] }
 0x282   : > { %v3115_v49 = vld [vmem:[%s15823_s14 + $0x4e20] sm:$0xff]  ;;  %3114 = vst [vmem:[%s15831_s15 + $0x1380] sm:$0xff] %v3113_v48 }
 0x283   : > { %v3117_v50 = vld [vmem:[%s15823_s14 + $0x4e40] sm:$0xff]  ;;  %3116 = vst [vmem:[%s15831_s15 + $0x1388] sm:$0xff] %v3115_v49 }
 0x284   : > { %3118 = vst [vmem:[%s15831_s15 + $0x1390] sm:$0xff] %v3117_v50  ;;  %v3119_v51 = vld [vmem:[%s15823_s14 + $0x4e60] sm:$0xff] }
 0x285   : > { %v3121_v52 = vld [vmem:[%s15823_s14 + $0x4e80] sm:$0xff]  ;;  %3120 = vst [vmem:[%s15831_s15 + $0x1398] sm:$0xff] %v3119_v51 }
 0x286   : > { %v3123_v53 = vld [vmem:[%s15823_s14 + $0x4ea0] sm:$0xff]  ;;  %3122 = vst [vmem:[%s15831_s15 + $0x13a0] sm:$0xff] %v3121_v52 }
 0x287   : > { %3124 = vst [vmem:[%s15831_s15 + $0x13a8] sm:$0xff] %v3123_v53  ;;  %v3125_v54 = vld [vmem:[%s15823_s14 + $0x4ec0] sm:$0xff] }
 0x288   : > { %v3127_v55 = vld [vmem:[%s15823_s14 + $0x4ee0] sm:$0xff]  ;;  %3126 = vst [vmem:[%s15831_s15 + $0x13b0] sm:$0xff] %v3125_v54 }
 0x289   : > { %v3129_v56 = vld [vmem:[%s15823_s14 + $0x4f00] sm:$0xff]  ;;  %3128 = vst [vmem:[%s15831_s15 + $0x13b8] sm:$0xff] %v3127_v55 }
 0x28a   : > { %3130 = vst [vmem:[%s15831_s15 + $0x13c0] sm:$0xff] %v3129_v56  ;;  %v3131_v57 = vld [vmem:[%s15823_s14 + $0x4f20] sm:$0xff] }
 0x28b   : > { %v3133_v58 = vld [vmem:[%s15823_s14 + $0x4f40] sm:$0xff]  ;;  %3132 = vst [vmem:[%s15831_s15 + $0x13c8] sm:$0xff] %v3131_v57 }
 0x28c   : > { %v3135_v59 = vld [vmem:[%s15823_s14 + $0x4f60] sm:$0xff]  ;;  %3134 = vst [vmem:[%s15831_s15 + $0x13d0] sm:$0xff] %v3133_v58 }
 0x28d   : > { %3136 = vst [vmem:[%s15831_s15 + $0x13d8] sm:$0xff] %v3135_v59  ;;  %v3137_v60 = vld [vmem:[%s15823_s14 + $0x4f80] sm:$0xff] }
 0x28e   : > { %v3139_v61 = vld [vmem:[%s15823_s14 + $0x4fa0] sm:$0xff]  ;;  %3138 = vst [vmem:[%s15831_s15 + $0x13e0] sm:$0xff] %v3137_v60 }
 0x28f   : > { %v3141_v62 = vld [vmem:[%s15823_s14 + $0x4fc0] sm:$0xff]  ;;  %3140 = vst [vmem:[%s15831_s15 + $0x13e8] sm:$0xff] %v3139_v61 }
 0x290   : > { %3142 = vst [vmem:[%s15831_s15 + $0x13f0] sm:$0xff] %v3141_v62  ;;  %v3143_v63 = vld [vmem:[%s15823_s14 + $0x4fe0] sm:$0xff] }
 0x291   : > { %v3145_v0 = vld [vmem:[%s15823_s14 + $0x5000] sm:$0xff]  ;;  %3144 = vst [vmem:[%s15831_s15 + $0x13f8] sm:$0xff] %v3143_v63 }
 0x292   : > { %v3147_v1 = vld [vmem:[%s15823_s14 + $0x5020] sm:$0xff]  ;;  %3146 = vst [vmem:[%s15831_s15 + $0x1400] sm:$0xff] %v3145_v0 }
 0x293   : > { %3148 = vst [vmem:[%s15831_s15 + $0x1408] sm:$0xff] %v3147_v1  ;;  %v3149_v2 = vld [vmem:[%s15823_s14 + $0x5040] sm:$0xff] }
 0x294   : > { %v3151_v3 = vld [vmem:[%s15823_s14 + $0x5060] sm:$0xff]  ;;  %3150 = vst [vmem:[%s15831_s15 + $0x1410] sm:$0xff] %v3149_v2 }
 0x295   : > { %v3153_v4 = vld [vmem:[%s15823_s14 + $0x5080] sm:$0xff]  ;;  %3152 = vst [vmem:[%s15831_s15 + $0x1418] sm:$0xff] %v3151_v3 }
 0x296   : > { %3154 = vst [vmem:[%s15831_s15 + $0x1420] sm:$0xff] %v3153_v4  ;;  %v3155_v5 = vld [vmem:[%s15823_s14 + $0x50a0] sm:$0xff] }
 0x297   : > { %v3157_v6 = vld [vmem:[%s15823_s14 + $0x50c0] sm:$0xff]  ;;  %3156 = vst [vmem:[%s15831_s15 + $0x1428] sm:$0xff] %v3155_v5 }
 0x298   : > { %v3159_v7 = vld [vmem:[%s15823_s14 + $0x50e0] sm:$0xff]  ;;  %3158 = vst [vmem:[%s15831_s15 + $0x1430] sm:$0xff] %v3157_v6 }
 0x299   : > { %3160 = vst [vmem:[%s15831_s15 + $0x1438] sm:$0xff] %v3159_v7  ;;  %v3161_v8 = vld [vmem:[%s15823_s14 + $0x5100] sm:$0xff] }
 0x29a   : > { %v3163_v9 = vld [vmem:[%s15823_s14 + $0x5120] sm:$0xff]  ;;  %3162 = vst [vmem:[%s15831_s15 + $0x1440] sm:$0xff] %v3161_v8 }
 0x29b   : > { %v3165_v10 = vld [vmem:[%s15823_s14 + $0x5140] sm:$0xff]  ;;  %3164 = vst [vmem:[%s15831_s15 + $0x1448] sm:$0xff] %v3163_v9 }
 0x29c   : > { %3166 = vst [vmem:[%s15831_s15 + $0x1450] sm:$0xff] %v3165_v10  ;;  %v3167_v11 = vld [vmem:[%s15823_s14 + $0x5160] sm:$0xff] }
 0x29d   : > { %v3169_v12 = vld [vmem:[%s15823_s14 + $0x5180] sm:$0xff]  ;;  %3168 = vst [vmem:[%s15831_s15 + $0x1458] sm:$0xff] %v3167_v11 }
 0x29e   : > { %v3171_v13 = vld [vmem:[%s15823_s14 + $0x51a0] sm:$0xff]  ;;  %3170 = vst [vmem:[%s15831_s15 + $0x1460] sm:$0xff] %v3169_v12 }
 0x29f   : > { %3172 = vst [vmem:[%s15831_s15 + $0x1468] sm:$0xff] %v3171_v13  ;;  %v3173_v14 = vld [vmem:[%s15823_s14 + $0x51c0] sm:$0xff] }
 0x2a0   : > { %v3175_v15 = vld [vmem:[%s15823_s14 + $0x51e0] sm:$0xff]  ;;  %3174 = vst [vmem:[%s15831_s15 + $0x1470] sm:$0xff] %v3173_v14 }
 0x2a1   : > { %v3177_v16 = vld [vmem:[%s15823_s14 + $0x5200] sm:$0xff]  ;;  %3176 = vst [vmem:[%s15831_s15 + $0x1478] sm:$0xff] %v3175_v15 }
 0x2a2   : > { %3178 = vst [vmem:[%s15831_s15 + $0x1480] sm:$0xff] %v3177_v16  ;;  %v3179_v17 = vld [vmem:[%s15823_s14 + $0x5220] sm:$0xff] }
 0x2a3   : > { %v3181_v18 = vld [vmem:[%s15823_s14 + $0x5240] sm:$0xff]  ;;  %3180 = vst [vmem:[%s15831_s15 + $0x1488] sm:$0xff] %v3179_v17 }
 0x2a4   : > { %v3183_v19 = vld [vmem:[%s15823_s14 + $0x5260] sm:$0xff]  ;;  %3182 = vst [vmem:[%s15831_s15 + $0x1490] sm:$0xff] %v3181_v18 }
 0x2a5   : > { %3184 = vst [vmem:[%s15831_s15 + $0x1498] sm:$0xff] %v3183_v19  ;;  %v3185_v20 = vld [vmem:[%s15823_s14 + $0x5280] sm:$0xff] }
 0x2a6   : > { %v3187_v21 = vld [vmem:[%s15823_s14 + $0x52a0] sm:$0xff]  ;;  %3186 = vst [vmem:[%s15831_s15 + $0x14a0] sm:$0xff] %v3185_v20 }
 0x2a7   : > { %v3189_v22 = vld [vmem:[%s15823_s14 + $0x52c0] sm:$0xff]  ;;  %3188 = vst [vmem:[%s15831_s15 + $0x14a8] sm:$0xff] %v3187_v21 }
 0x2a8   : > { %3190 = vst [vmem:[%s15831_s15 + $0x14b0] sm:$0xff] %v3189_v22  ;;  %v3191_v23 = vld [vmem:[%s15823_s14 + $0x52e0] sm:$0xff] }
 0x2a9   : > { %v3193_v24 = vld [vmem:[%s15823_s14 + $0x5300] sm:$0xff]  ;;  %3192 = vst [vmem:[%s15831_s15 + $0x14b8] sm:$0xff] %v3191_v23 }
 0x2aa   : > { %v3195_v25 = vld [vmem:[%s15823_s14 + $0x5320] sm:$0xff]  ;;  %3194 = vst [vmem:[%s15831_s15 + $0x14c0] sm:$0xff] %v3193_v24 }
 0x2ab   : > { %3196 = vst [vmem:[%s15831_s15 + $0x14c8] sm:$0xff] %v3195_v25  ;;  %v3197_v26 = vld [vmem:[%s15823_s14 + $0x5340] sm:$0xff] }
 0x2ac   : > { %v3199_v27 = vld [vmem:[%s15823_s14 + $0x5360] sm:$0xff]  ;;  %3198 = vst [vmem:[%s15831_s15 + $0x14d0] sm:$0xff] %v3197_v26 }
 0x2ad   : > { %v3201_v28 = vld [vmem:[%s15823_s14 + $0x5380] sm:$0xff]  ;;  %3200 = vst [vmem:[%s15831_s15 + $0x14d8] sm:$0xff] %v3199_v27 }
 0x2ae   : > { %3202 = vst [vmem:[%s15831_s15 + $0x14e0] sm:$0xff] %v3201_v28  ;;  %v3203_v29 = vld [vmem:[%s15823_s14 + $0x53a0] sm:$0xff] }
 0x2af   : > { %v3205_v30 = vld [vmem:[%s15823_s14 + $0x53c0] sm:$0xff]  ;;  %3204 = vst [vmem:[%s15831_s15 + $0x14e8] sm:$0xff] %v3203_v29 }
 0x2b0   : > { %v3207_v31 = vld [vmem:[%s15823_s14 + $0x53e0] sm:$0xff]  ;;  %3206 = vst [vmem:[%s15831_s15 + $0x14f0] sm:$0xff] %v3205_v30 }
 0x2b1   : > { %3208 = vst [vmem:[%s15831_s15 + $0x14f8] sm:$0xff] %v3207_v31  ;;  %v3209_v32 = vld [vmem:[%s15823_s14 + $0x5400] sm:$0xff] }
 0x2b2   : > { %v3211_v33 = vld [vmem:[%s15823_s14 + $0x5420] sm:$0xff]  ;;  %3210 = vst [vmem:[%s15831_s15 + $0x1500] sm:$0xff] %v3209_v32 }
 0x2b3   : > { %v3213_v34 = vld [vmem:[%s15823_s14 + $0x5440] sm:$0xff]  ;;  %3212 = vst [vmem:[%s15831_s15 + $0x1508] sm:$0xff] %v3211_v33 }
 0x2b4   : > { %3214 = vst [vmem:[%s15831_s15 + $0x1510] sm:$0xff] %v3213_v34  ;;  %v3215_v35 = vld [vmem:[%s15823_s14 + $0x5460] sm:$0xff] }
 0x2b5   : > { %v3217_v36 = vld [vmem:[%s15823_s14 + $0x5480] sm:$0xff]  ;;  %3216 = vst [vmem:[%s15831_s15 + $0x1518] sm:$0xff] %v3215_v35 }
 0x2b6   : > { %v3219_v37 = vld [vmem:[%s15823_s14 + $0x54a0] sm:$0xff]  ;;  %3218 = vst [vmem:[%s15831_s15 + $0x1520] sm:$0xff] %v3217_v36 }
 0x2b7   : > { %3220 = vst [vmem:[%s15831_s15 + $0x1528] sm:$0xff] %v3219_v37  ;;  %v3221_v38 = vld [vmem:[%s15823_s14 + $0x54c0] sm:$0xff] }
 0x2b8   : > { %v3223_v39 = vld [vmem:[%s15823_s14 + $0x54e0] sm:$0xff]  ;;  %3222 = vst [vmem:[%s15831_s15 + $0x1530] sm:$0xff] %v3221_v38 }
 0x2b9   : > { %v3225_v40 = vld [vmem:[%s15823_s14 + $0x5500] sm:$0xff]  ;;  %3224 = vst [vmem:[%s15831_s15 + $0x1538] sm:$0xff] %v3223_v39 }
 0x2ba   : > { %3226 = vst [vmem:[%s15831_s15 + $0x1540] sm:$0xff] %v3225_v40  ;;  %v3227_v41 = vld [vmem:[%s15823_s14 + $0x5520] sm:$0xff] }
 0x2bb   : > { %v3229_v42 = vld [vmem:[%s15823_s14 + $0x5540] sm:$0xff]  ;;  %3228 = vst [vmem:[%s15831_s15 + $0x1548] sm:$0xff] %v3227_v41 }
 0x2bc   : > { %v3231_v43 = vld [vmem:[%s15823_s14 + $0x5560] sm:$0xff]  ;;  %3230 = vst [vmem:[%s15831_s15 + $0x1550] sm:$0xff] %v3229_v42 }
 0x2bd   : > { %3232 = vst [vmem:[%s15831_s15 + $0x1558] sm:$0xff] %v3231_v43  ;;  %v3233_v44 = vld [vmem:[%s15823_s14 + $0x5580] sm:$0xff] }
 0x2be   : > { %v3235_v45 = vld [vmem:[%s15823_s14 + $0x55a0] sm:$0xff]  ;;  %3234 = vst [vmem:[%s15831_s15 + $0x1560] sm:$0xff] %v3233_v44 }
 0x2bf   : > { %v3237_v46 = vld [vmem:[%s15823_s14 + $0x55c0] sm:$0xff]  ;;  %3236 = vst [vmem:[%s15831_s15 + $0x1568] sm:$0xff] %v3235_v45 }
 0x2c0   : > { %3238 = vst [vmem:[%s15831_s15 + $0x1570] sm:$0xff] %v3237_v46  ;;  %v3239_v47 = vld [vmem:[%s15823_s14 + $0x55e0] sm:$0xff] }
 0x2c1   : > { %v3241_v48 = vld [vmem:[%s15823_s14 + $0x5600] sm:$0xff]  ;;  %3240 = vst [vmem:[%s15831_s15 + $0x1578] sm:$0xff] %v3239_v47 }
 0x2c2   : > { %v3243_v49 = vld [vmem:[%s15823_s14 + $0x5620] sm:$0xff]  ;;  %3242 = vst [vmem:[%s15831_s15 + $0x1580] sm:$0xff] %v3241_v48 }
 0x2c3   : > { %3244 = vst [vmem:[%s15831_s15 + $0x1588] sm:$0xff] %v3243_v49  ;;  %v3245_v50 = vld [vmem:[%s15823_s14 + $0x5640] sm:$0xff] }
 0x2c4   : > { %v3247_v51 = vld [vmem:[%s15823_s14 + $0x5660] sm:$0xff]  ;;  %3246 = vst [vmem:[%s15831_s15 + $0x1590] sm:$0xff] %v3245_v50 }
 0x2c5   : > { %v3249_v52 = vld [vmem:[%s15823_s14 + $0x5680] sm:$0xff]  ;;  %3248 = vst [vmem:[%s15831_s15 + $0x1598] sm:$0xff] %v3247_v51 }
 0x2c6   : > { %3250 = vst [vmem:[%s15831_s15 + $0x15a0] sm:$0xff] %v3249_v52  ;;  %v3251_v53 = vld [vmem:[%s15823_s14 + $0x56a0] sm:$0xff] }
 0x2c7   : > { %v3253_v54 = vld [vmem:[%s15823_s14 + $0x56c0] sm:$0xff]  ;;  %3252 = vst [vmem:[%s15831_s15 + $0x15a8] sm:$0xff] %v3251_v53 }
 0x2c8   : > { %v3255_v55 = vld [vmem:[%s15823_s14 + $0x56e0] sm:$0xff]  ;;  %3254 = vst [vmem:[%s15831_s15 + $0x15b0] sm:$0xff] %v3253_v54 }
 0x2c9   : > { %3256 = vst [vmem:[%s15831_s15 + $0x15b8] sm:$0xff] %v3255_v55  ;;  %v3257_v56 = vld [vmem:[%s15823_s14 + $0x5700] sm:$0xff] }
 0x2ca   : > { %v3259_v57 = vld [vmem:[%s15823_s14 + $0x5720] sm:$0xff]  ;;  %3258 = vst [vmem:[%s15831_s15 + $0x15c0] sm:$0xff] %v3257_v56 }
 0x2cb   : > { %v3261_v58 = vld [vmem:[%s15823_s14 + $0x5740] sm:$0xff]  ;;  %3260 = vst [vmem:[%s15831_s15 + $0x15c8] sm:$0xff] %v3259_v57 }
 0x2cc   : > { %3262 = vst [vmem:[%s15831_s15 + $0x15d0] sm:$0xff] %v3261_v58  ;;  %v3263_v59 = vld [vmem:[%s15823_s14 + $0x5760] sm:$0xff] }
 0x2cd   : > { %v3265_v60 = vld [vmem:[%s15823_s14 + $0x5780] sm:$0xff]  ;;  %3264 = vst [vmem:[%s15831_s15 + $0x15d8] sm:$0xff] %v3263_v59 }
 0x2ce   : > { %v3267_v61 = vld [vmem:[%s15823_s14 + $0x57a0] sm:$0xff]  ;;  %3266 = vst [vmem:[%s15831_s15 + $0x15e0] sm:$0xff] %v3265_v60 }
 0x2cf   : > { %3268 = vst [vmem:[%s15831_s15 + $0x15e8] sm:$0xff] %v3267_v61  ;;  %v3269_v62 = vld [vmem:[%s15823_s14 + $0x57c0] sm:$0xff] }
 0x2d0   : > { %v3271_v63 = vld [vmem:[%s15823_s14 + $0x57e0] sm:$0xff]  ;;  %3270 = vst [vmem:[%s15831_s15 + $0x15f0] sm:$0xff] %v3269_v62 }
 0x2d1   : > { %v3273_v0 = vld [vmem:[%s15823_s14 + $0x5800] sm:$0xff]  ;;  %3272 = vst [vmem:[%s15831_s15 + $0x15f8] sm:$0xff] %v3271_v63 }
 0x2d2   : > { %3274 = vst [vmem:[%s15831_s15 + $0x1600] sm:$0xff] %v3273_v0  ;;  %v3275_v1 = vld [vmem:[%s15823_s14 + $0x5820] sm:$0xff] }
 0x2d3   : > { %v3277_v2 = vld [vmem:[%s15823_s14 + $0x5840] sm:$0xff]  ;;  %3276 = vst [vmem:[%s15831_s15 + $0x1608] sm:$0xff] %v3275_v1 }
 0x2d4   : > { %v3279_v3 = vld [vmem:[%s15823_s14 + $0x5860] sm:$0xff]  ;;  %3278 = vst [vmem:[%s15831_s15 + $0x1610] sm:$0xff] %v3277_v2 }
 0x2d5   : > { %3280 = vst [vmem:[%s15831_s15 + $0x1618] sm:$0xff] %v3279_v3  ;;  %v3281_v4 = vld [vmem:[%s15823_s14 + $0x5880] sm:$0xff] }
 0x2d6   : > { %v3283_v5 = vld [vmem:[%s15823_s14 + $0x58a0] sm:$0xff]  ;;  %3282 = vst [vmem:[%s15831_s15 + $0x1620] sm:$0xff] %v3281_v4 }
 0x2d7   : > { %v3285_v6 = vld [vmem:[%s15823_s14 + $0x58c0] sm:$0xff]  ;;  %3284 = vst [vmem:[%s15831_s15 + $0x1628] sm:$0xff] %v3283_v5 }
 0x2d8   : > { %3286 = vst [vmem:[%s15831_s15 + $0x1630] sm:$0xff] %v3285_v6  ;;  %v3287_v7 = vld [vmem:[%s15823_s14 + $0x58e0] sm:$0xff] }
 0x2d9   : > { %v3289_v8 = vld [vmem:[%s15823_s14 + $0x5900] sm:$0xff]  ;;  %3288 = vst [vmem:[%s15831_s15 + $0x1638] sm:$0xff] %v3287_v7 }
 0x2da   : > { %v3291_v9 = vld [vmem:[%s15823_s14 + $0x5920] sm:$0xff]  ;;  %3290 = vst [vmem:[%s15831_s15 + $0x1640] sm:$0xff] %v3289_v8 }
 0x2db   : > { %3292 = vst [vmem:[%s15831_s15 + $0x1648] sm:$0xff] %v3291_v9  ;;  %v3293_v10 = vld [vmem:[%s15823_s14 + $0x5940] sm:$0xff] }
 0x2dc   : > { %v3295_v11 = vld [vmem:[%s15823_s14 + $0x5960] sm:$0xff]  ;;  %3294 = vst [vmem:[%s15831_s15 + $0x1650] sm:$0xff] %v3293_v10 }
 0x2dd   : > { %v3297_v12 = vld [vmem:[%s15823_s14 + $0x5980] sm:$0xff]  ;;  %3296 = vst [vmem:[%s15831_s15 + $0x1658] sm:$0xff] %v3295_v11 }
 0x2de   : > { %3298 = vst [vmem:[%s15831_s15 + $0x1660] sm:$0xff] %v3297_v12  ;;  %v3299_v13 = vld [vmem:[%s15823_s14 + $0x59a0] sm:$0xff] }
 0x2df   : > { %v3301_v14 = vld [vmem:[%s15823_s14 + $0x59c0] sm:$0xff]  ;;  %3300 = vst [vmem:[%s15831_s15 + $0x1668] sm:$0xff] %v3299_v13 }
 0x2e0   : > { %v3303_v15 = vld [vmem:[%s15823_s14 + $0x59e0] sm:$0xff]  ;;  %3302 = vst [vmem:[%s15831_s15 + $0x1670] sm:$0xff] %v3301_v14 }
 0x2e1   : > { %3304 = vst [vmem:[%s15831_s15 + $0x1678] sm:$0xff] %v3303_v15  ;;  %v3305_v16 = vld [vmem:[%s15823_s14 + $0x5a00] sm:$0xff] }
 0x2e2   : > { %v3307_v17 = vld [vmem:[%s15823_s14 + $0x5a20] sm:$0xff]  ;;  %3306 = vst [vmem:[%s15831_s15 + $0x1680] sm:$0xff] %v3305_v16 }
 0x2e3   : > { %v3309_v18 = vld [vmem:[%s15823_s14 + $0x5a40] sm:$0xff]  ;;  %3308 = vst [vmem:[%s15831_s15 + $0x1688] sm:$0xff] %v3307_v17 }
 0x2e4   : > { %3310 = vst [vmem:[%s15831_s15 + $0x1690] sm:$0xff] %v3309_v18  ;;  %v3311_v19 = vld [vmem:[%s15823_s14 + $0x5a60] sm:$0xff] }
 0x2e5   : > { %v3313_v20 = vld [vmem:[%s15823_s14 + $0x5a80] sm:$0xff]  ;;  %3312 = vst [vmem:[%s15831_s15 + $0x1698] sm:$0xff] %v3311_v19 }
 0x2e6   : > { %v3315_v21 = vld [vmem:[%s15823_s14 + $0x5aa0] sm:$0xff]  ;;  %3314 = vst [vmem:[%s15831_s15 + $0x16a0] sm:$0xff] %v3313_v20 }
 0x2e7   : > { %3316 = vst [vmem:[%s15831_s15 + $0x16a8] sm:$0xff] %v3315_v21  ;;  %v3317_v22 = vld [vmem:[%s15823_s14 + $0x5ac0] sm:$0xff] }
 0x2e8   : > { %v3319_v23 = vld [vmem:[%s15823_s14 + $0x5ae0] sm:$0xff]  ;;  %3318 = vst [vmem:[%s15831_s15 + $0x16b0] sm:$0xff] %v3317_v22 }
 0x2e9   : > { %v3321_v24 = vld [vmem:[%s15823_s14 + $0x5b00] sm:$0xff]  ;;  %3320 = vst [vmem:[%s15831_s15 + $0x16b8] sm:$0xff] %v3319_v23 }
 0x2ea   : > { %3322 = vst [vmem:[%s15831_s15 + $0x16c0] sm:$0xff] %v3321_v24  ;;  %v3323_v25 = vld [vmem:[%s15823_s14 + $0x5b20] sm:$0xff] }
 0x2eb   : > { %v3325_v26 = vld [vmem:[%s15823_s14 + $0x5b40] sm:$0xff]  ;;  %3324 = vst [vmem:[%s15831_s15 + $0x16c8] sm:$0xff] %v3323_v25 }
 0x2ec   : > { %v3327_v27 = vld [vmem:[%s15823_s14 + $0x5b60] sm:$0xff]  ;;  %3326 = vst [vmem:[%s15831_s15 + $0x16d0] sm:$0xff] %v3325_v26 }
 0x2ed   : > { %3328 = vst [vmem:[%s15831_s15 + $0x16d8] sm:$0xff] %v3327_v27  ;;  %v3329_v28 = vld [vmem:[%s15823_s14 + $0x5b80] sm:$0xff] }
 0x2ee   : > { %v3331_v29 = vld [vmem:[%s15823_s14 + $0x5ba0] sm:$0xff]  ;;  %3330 = vst [vmem:[%s15831_s15 + $0x16e0] sm:$0xff] %v3329_v28 }
 0x2ef   : > { %v3333_v30 = vld [vmem:[%s15823_s14 + $0x5bc0] sm:$0xff]  ;;  %3332 = vst [vmem:[%s15831_s15 + $0x16e8] sm:$0xff] %v3331_v29 }
 0x2f0   : > { %3334 = vst [vmem:[%s15831_s15 + $0x16f0] sm:$0xff] %v3333_v30  ;;  %v3335_v31 = vld [vmem:[%s15823_s14 + $0x5be0] sm:$0xff] }
 0x2f1   : > { %v3337_v32 = vld [vmem:[%s15823_s14 + $0x5c00] sm:$0xff]  ;;  %3336 = vst [vmem:[%s15831_s15 + $0x16f8] sm:$0xff] %v3335_v31 }
 0x2f2   : > { %v3339_v33 = vld [vmem:[%s15823_s14 + $0x5c20] sm:$0xff]  ;;  %3338 = vst [vmem:[%s15831_s15 + $0x1700] sm:$0xff] %v3337_v32 }
 0x2f3   : > { %3340 = vst [vmem:[%s15831_s15 + $0x1708] sm:$0xff] %v3339_v33  ;;  %v3341_v34 = vld [vmem:[%s15823_s14 + $0x5c40] sm:$0xff] }
 0x2f4   : > { %v3343_v35 = vld [vmem:[%s15823_s14 + $0x5c60] sm:$0xff]  ;;  %3342 = vst [vmem:[%s15831_s15 + $0x1710] sm:$0xff] %v3341_v34 }
 0x2f5   : > { %v3345_v36 = vld [vmem:[%s15823_s14 + $0x5c80] sm:$0xff]  ;;  %3344 = vst [vmem:[%s15831_s15 + $0x1718] sm:$0xff] %v3343_v35 }
 0x2f6   : > { %3346 = vst [vmem:[%s15831_s15 + $0x1720] sm:$0xff] %v3345_v36  ;;  %v3347_v37 = vld [vmem:[%s15823_s14 + $0x5ca0] sm:$0xff] }
 0x2f7   : > { %v3349_v38 = vld [vmem:[%s15823_s14 + $0x5cc0] sm:$0xff]  ;;  %3348 = vst [vmem:[%s15831_s15 + $0x1728] sm:$0xff] %v3347_v37 }
 0x2f8   : > { %v3351_v39 = vld [vmem:[%s15823_s14 + $0x5ce0] sm:$0xff]  ;;  %3350 = vst [vmem:[%s15831_s15 + $0x1730] sm:$0xff] %v3349_v38 }
 0x2f9   : > { %3352 = vst [vmem:[%s15831_s15 + $0x1738] sm:$0xff] %v3351_v39  ;;  %v3353_v40 = vld [vmem:[%s15823_s14 + $0x5d00] sm:$0xff] }
 0x2fa   : > { %v3355_v41 = vld [vmem:[%s15823_s14 + $0x5d20] sm:$0xff]  ;;  %3354 = vst [vmem:[%s15831_s15 + $0x1740] sm:$0xff] %v3353_v40 }
 0x2fb   : > { %v3357_v42 = vld [vmem:[%s15823_s14 + $0x5d40] sm:$0xff]  ;;  %3356 = vst [vmem:[%s15831_s15 + $0x1748] sm:$0xff] %v3355_v41 }
 0x2fc   : > { %3358 = vst [vmem:[%s15831_s15 + $0x1750] sm:$0xff] %v3357_v42  ;;  %v3359_v43 = vld [vmem:[%s15823_s14 + $0x5d60] sm:$0xff] }
 0x2fd   : > { %v3361_v44 = vld [vmem:[%s15823_s14 + $0x5d80] sm:$0xff]  ;;  %3360 = vst [vmem:[%s15831_s15 + $0x1758] sm:$0xff] %v3359_v43 }
 0x2fe   : > { %v3363_v45 = vld [vmem:[%s15823_s14 + $0x5da0] sm:$0xff]  ;;  %3362 = vst [vmem:[%s15831_s15 + $0x1760] sm:$0xff] %v3361_v44 }
 0x2ff   : > { %3364 = vst [vmem:[%s15831_s15 + $0x1768] sm:$0xff] %v3363_v45  ;;  %v3365_v46 = vld [vmem:[%s15823_s14 + $0x5dc0] sm:$0xff] }
 0x300   : > { %v3367_v47 = vld [vmem:[%s15823_s14 + $0x5de0] sm:$0xff]  ;;  %3366 = vst [vmem:[%s15831_s15 + $0x1770] sm:$0xff] %v3365_v46 }
 0x301   : > { %v3369_v48 = vld [vmem:[%s15823_s14 + $0x5e00] sm:$0xff]  ;;  %3368 = vst [vmem:[%s15831_s15 + $0x1778] sm:$0xff] %v3367_v47 }
 0x302   : > { %3370 = vst [vmem:[%s15831_s15 + $0x1780] sm:$0xff] %v3369_v48  ;;  %v3371_v49 = vld [vmem:[%s15823_s14 + $0x5e20] sm:$0xff] }
 0x303   : > { %v3373_v50 = vld [vmem:[%s15823_s14 + $0x5e40] sm:$0xff]  ;;  %3372 = vst [vmem:[%s15831_s15 + $0x1788] sm:$0xff] %v3371_v49 }
 0x304   : > { %v3375_v51 = vld [vmem:[%s15823_s14 + $0x5e60] sm:$0xff]  ;;  %3374 = vst [vmem:[%s15831_s15 + $0x1790] sm:$0xff] %v3373_v50 }
 0x305   : > { %3376 = vst [vmem:[%s15831_s15 + $0x1798] sm:$0xff] %v3375_v51  ;;  %v3377_v52 = vld [vmem:[%s15823_s14 + $0x5e80] sm:$0xff] }
 0x306   : > { %v3379_v53 = vld [vmem:[%s15823_s14 + $0x5ea0] sm:$0xff]  ;;  %3378 = vst [vmem:[%s15831_s15 + $0x17a0] sm:$0xff] %v3377_v52 }
 0x307   : > { %v3381_v54 = vld [vmem:[%s15823_s14 + $0x5ec0] sm:$0xff]  ;;  %3380 = vst [vmem:[%s15831_s15 + $0x17a8] sm:$0xff] %v3379_v53 }
 0x308   : > { %3382 = vst [vmem:[%s15831_s15 + $0x17b0] sm:$0xff] %v3381_v54  ;;  %v3383_v55 = vld [vmem:[%s15823_s14 + $0x5ee0] sm:$0xff] }
 0x309   : > { %v3385_v56 = vld [vmem:[%s15823_s14 + $0x5f00] sm:$0xff]  ;;  %3384 = vst [vmem:[%s15831_s15 + $0x17b8] sm:$0xff] %v3383_v55 }
 0x30a   : > { %v3387_v57 = vld [vmem:[%s15823_s14 + $0x5f20] sm:$0xff]  ;;  %3386 = vst [vmem:[%s15831_s15 + $0x17c0] sm:$0xff] %v3385_v56 }
 0x30b   : > { %3388 = vst [vmem:[%s15831_s15 + $0x17c8] sm:$0xff] %v3387_v57  ;;  %v3389_v58 = vld [vmem:[%s15823_s14 + $0x5f40] sm:$0xff] }
 0x30c   : > { %v3391_v59 = vld [vmem:[%s15823_s14 + $0x5f60] sm:$0xff]  ;;  %3390 = vst [vmem:[%s15831_s15 + $0x17d0] sm:$0xff] %v3389_v58 }
 0x30d   : > { %v3393_v60 = vld [vmem:[%s15823_s14 + $0x5f80] sm:$0xff]  ;;  %3392 = vst [vmem:[%s15831_s15 + $0x17d8] sm:$0xff] %v3391_v59 }
 0x30e   : > { %3394 = vst [vmem:[%s15831_s15 + $0x17e0] sm:$0xff] %v3393_v60  ;;  %v3395_v61 = vld [vmem:[%s15823_s14 + $0x5fa0] sm:$0xff] }
 0x30f   : > { %v3397_v62 = vld [vmem:[%s15823_s14 + $0x5fc0] sm:$0xff]  ;;  %3396 = vst [vmem:[%s15831_s15 + $0x17e8] sm:$0xff] %v3395_v61 }
 0x310   : > { %v3399_v63 = vld [vmem:[%s15823_s14 + $0x5fe0] sm:$0xff]  ;;  %3398 = vst [vmem:[%s15831_s15 + $0x17f0] sm:$0xff] %v3397_v62 }
 0x311   : > { %3400 = vst [vmem:[%s15831_s15 + $0x17f8] sm:$0xff] %v3399_v63  ;;  %v3401_v0 = vld [vmem:[%s15823_s14 + $0x6000] sm:$0xff] }
 0x312   : > { %v3403_v1 = vld [vmem:[%s15823_s14 + $0x6020] sm:$0xff]  ;;  %3402 = vst [vmem:[%s15831_s15 + $0x1800] sm:$0xff] %v3401_v0 }
 0x313   : > { %v3405_v2 = vld [vmem:[%s15823_s14 + $0x6040] sm:$0xff]  ;;  %3404 = vst [vmem:[%s15831_s15 + $0x1808] sm:$0xff] %v3403_v1 }
 0x314   : > { %3406 = vst [vmem:[%s15831_s15 + $0x1810] sm:$0xff] %v3405_v2  ;;  %v3407_v3 = vld [vmem:[%s15823_s14 + $0x6060] sm:$0xff] }
 0x315   : > { %v3409_v4 = vld [vmem:[%s15823_s14 + $0x6080] sm:$0xff]  ;;  %3408 = vst [vmem:[%s15831_s15 + $0x1818] sm:$0xff] %v3407_v3 }
 0x316   : > { %v3411_v5 = vld [vmem:[%s15823_s14 + $0x60a0] sm:$0xff]  ;;  %3410 = vst [vmem:[%s15831_s15 + $0x1820] sm:$0xff] %v3409_v4 }
 0x317   : > { %3412 = vst [vmem:[%s15831_s15 + $0x1828] sm:$0xff] %v3411_v5  ;;  %v3413_v6 = vld [vmem:[%s15823_s14 + $0x60c0] sm:$0xff] }
 0x318   : > { %v3415_v7 = vld [vmem:[%s15823_s14 + $0x60e0] sm:$0xff]  ;;  %3414 = vst [vmem:[%s15831_s15 + $0x1830] sm:$0xff] %v3413_v6 }
 0x319   : > { %v3417_v8 = vld [vmem:[%s15823_s14 + $0x6100] sm:$0xff]  ;;  %3416 = vst [vmem:[%s15831_s15 + $0x1838] sm:$0xff] %v3415_v7 }
 0x31a   : > { %3418 = vst [vmem:[%s15831_s15 + $0x1840] sm:$0xff] %v3417_v8  ;;  %v3419_v9 = vld [vmem:[%s15823_s14 + $0x6120] sm:$0xff] }
 0x31b   : > { %v3421_v10 = vld [vmem:[%s15823_s14 + $0x6140] sm:$0xff]  ;;  %3420 = vst [vmem:[%s15831_s15 + $0x1848] sm:$0xff] %v3419_v9 }
 0x31c   : > { %v3423_v11 = vld [vmem:[%s15823_s14 + $0x6160] sm:$0xff]  ;;  %3422 = vst [vmem:[%s15831_s15 + $0x1850] sm:$0xff] %v3421_v10 }
 0x31d   : > { %3424 = vst [vmem:[%s15831_s15 + $0x1858] sm:$0xff] %v3423_v11  ;;  %v3425_v12 = vld [vmem:[%s15823_s14 + $0x6180] sm:$0xff] }
 0x31e   : > { %v3427_v13 = vld [vmem:[%s15823_s14 + $0x61a0] sm:$0xff]  ;;  %3426 = vst [vmem:[%s15831_s15 + $0x1860] sm:$0xff] %v3425_v12 }
 0x31f   : > { %v3429_v14 = vld [vmem:[%s15823_s14 + $0x61c0] sm:$0xff]  ;;  %3428 = vst [vmem:[%s15831_s15 + $0x1868] sm:$0xff] %v3427_v13 }
 0x320   : > { %3430 = vst [vmem:[%s15831_s15 + $0x1870] sm:$0xff] %v3429_v14  ;;  %v3431_v15 = vld [vmem:[%s15823_s14 + $0x61e0] sm:$0xff] }
 0x321   : > { %v3433_v16 = vld [vmem:[%s15823_s14 + $0x6200] sm:$0xff]  ;;  %3432 = vst [vmem:[%s15831_s15 + $0x1878] sm:$0xff] %v3431_v15 }
 0x322   : > { %v3435_v17 = vld [vmem:[%s15823_s14 + $0x6220] sm:$0xff]  ;;  %3434 = vst [vmem:[%s15831_s15 + $0x1880] sm:$0xff] %v3433_v16 }
 0x323   : > { %3436 = vst [vmem:[%s15831_s15 + $0x1888] sm:$0xff] %v3435_v17  ;;  %v3437_v18 = vld [vmem:[%s15823_s14 + $0x6240] sm:$0xff] }
 0x324   : > { %v3439_v19 = vld [vmem:[%s15823_s14 + $0x6260] sm:$0xff]  ;;  %3438 = vst [vmem:[%s15831_s15 + $0x1890] sm:$0xff] %v3437_v18 }
 0x325   : > { %v3441_v20 = vld [vmem:[%s15823_s14 + $0x6280] sm:$0xff]  ;;  %3440 = vst [vmem:[%s15831_s15 + $0x1898] sm:$0xff] %v3439_v19 }
 0x326   : > { %3442 = vst [vmem:[%s15831_s15 + $0x18a0] sm:$0xff] %v3441_v20  ;;  %v3443_v21 = vld [vmem:[%s15823_s14 + $0x62a0] sm:$0xff] }
 0x327   : > { %v3445_v22 = vld [vmem:[%s15823_s14 + $0x62c0] sm:$0xff]  ;;  %3444 = vst [vmem:[%s15831_s15 + $0x18a8] sm:$0xff] %v3443_v21 }
 0x328   : > { %v3447_v23 = vld [vmem:[%s15823_s14 + $0x62e0] sm:$0xff]  ;;  %3446 = vst [vmem:[%s15831_s15 + $0x18b0] sm:$0xff] %v3445_v22 }
 0x329   : > { %3448 = vst [vmem:[%s15831_s15 + $0x18b8] sm:$0xff] %v3447_v23  ;;  %v3449_v24 = vld [vmem:[%s15823_s14 + $0x6300] sm:$0xff] }
 0x32a   : > { %v3451_v25 = vld [vmem:[%s15823_s14 + $0x6320] sm:$0xff]  ;;  %3450 = vst [vmem:[%s15831_s15 + $0x18c0] sm:$0xff] %v3449_v24 }
 0x32b   : > { %v3453_v26 = vld [vmem:[%s15823_s14 + $0x6340] sm:$0xff]  ;;  %3452 = vst [vmem:[%s15831_s15 + $0x18c8] sm:$0xff] %v3451_v25 }
 0x32c   : > { %3454 = vst [vmem:[%s15831_s15 + $0x18d0] sm:$0xff] %v3453_v26  ;;  %v3455_v27 = vld [vmem:[%s15823_s14 + $0x6360] sm:$0xff] }
 0x32d   : > { %v3457_v28 = vld [vmem:[%s15823_s14 + $0x6380] sm:$0xff]  ;;  %3456 = vst [vmem:[%s15831_s15 + $0x18d8] sm:$0xff] %v3455_v27 }
 0x32e   : > { %v3459_v29 = vld [vmem:[%s15823_s14 + $0x63a0] sm:$0xff]  ;;  %3458 = vst [vmem:[%s15831_s15 + $0x18e0] sm:$0xff] %v3457_v28 }
 0x32f   : > { %3460 = vst [vmem:[%s15831_s15 + $0x18e8] sm:$0xff] %v3459_v29  ;;  %v3461_v30 = vld [vmem:[%s15823_s14 + $0x63c0] sm:$0xff] }
 0x330   : > { %v3463_v31 = vld [vmem:[%s15823_s14 + $0x63e0] sm:$0xff]  ;;  %3462 = vst [vmem:[%s15831_s15 + $0x18f0] sm:$0xff] %v3461_v30 }
 0x331   : > { %3464 = vst [vmem:[%s15831_s15 + $0x18f8] sm:$0xff] %v3463_v31 }
 0x332 PF: > { %p13352_p5 = scmp.ge.s32.totalorder %s15742_s26, 1  ;;  %p6722_p6 = scmp.lt.s32.totalorder %s15742_s26, 5 }
 0x334   : > { %p6723_p7 = pnand %p13352_p5, %p6722_p6 }
 0x335   : > { %s6729_s16 = sand.u32 (!%p6723_p7), 1, %s15734_s24   ;;  %s13353_s17 = sshll.u32 (!%p6723_p7), %s15803_s27, 1 }
 0x336   : > { %6726 = sbr.rel (%p6723_p7) target bundleno = 2353 (0x931), region = 96  ;;  %p6766_p8 = scmp.lt.s32.totalorder (!%p6723_p7), %s13353_s17, 7 }
 0x337   : > { %s14389_s18 = smul.u32 (!%p6723_p7), 6400, %s6729_s16  ;;  %s13354_s19 = sshll.u32 (!%p6723_p7), %s15803_s27, 5 }
 0x338   : > { %p6771_p9 = scmp.lt.s32.totalorder (!%p6723_p7), %s13354_s19, 127  ;;  %p13356_p10 = scmp.ne.s32.totalorder (!%p6723_p7), %s15803_s27, 0 }
 0x339   : > { %s17443_s24 = scalar_lea.vmem (!%p6723_p7), [#allocation3], %s14389_s18 }
 0x33d   : > { %s18476_s17 = smov (!%p6766_p8, %s13353_s17), 7  ;;  %s18478_s19 = smov (!%p6771_p9, %s13354_s19), 127 }
 0x33e   : > { %s6768_s22 = scalar_lea.vmem %s18466_s2, %s18476_s17  ;;  %s13355_s23 = sshll.u32 %s18478_s19, 2  ;;  %v15744_v32 = vmov (!%p13356_p10), 0.0  }
 0x33f   : > { %s17441_s30 = scalar_lea.vmem %s18467_s3, %s13355_s23  ;;  %6780 = sbr.rel (%p13356_p10) target bundleno = 838 (0x346), region = 104  ;;  %6781 = vst [vmem:[#allocation2] sm:$0xff] (!%p13356_p10), %v15744_v32  ;;  %6782 = vst [vmem:[#allocation2 + $0x8] sm:$0xff] (!%p13356_p10), %v15744_v32 }
 0x346 PF: > { %v14417_v33 = vld [vmem:[%s17443_s24 + $0x4] ss:$8 sps:$4 sm:$0xff]   ;;  %v14421_v35 = vld [vmem:[%s17443_s24] ss:$8 sps:$4 sm:$0xff]   ;;  %v14423_v37 = vld [vmem:[%s17443_s24 + $0x14] ss:$8 sps:$4 sm:$0xff]  }
 0x347   : > { %v14419_v34 = vld [vmem:[%s17443_s24 + $0xc04] ss:$8 sps:$4 sm:$0xff]   ;;  %11895 = vmatprep.subr.bf16.mxu1 %v14417_v33  ;;  %v14422_v36 = vld [vmem:[%s17443_s24 + $0xc00] ss:$8 sps:$4 sm:$0xff]   ;;  %v14425_v38 = vld [vmem:[%s17443_s24 + $0xc14] ss:$8 sps:$4 sm:$0xff]  }
 0x348   : > { %12411 = vmatprep.subr.bf16.mxu0 %v14419_v34  ;;  %11896 = vmatpush1.bf16.msra.mxu1 %v14421_v35  ;;  %v14427_v39 = vld [vmem:[%s17443_s24 + $0x10] ss:$8 sps:$4 sm:$0xff]   ;;  %v14429_v41 = vld [vmem:[%s17443_s24 + $0x24] ss:$8 sps:$4 sm:$0xff]   ;;  %v14433_v43 = vld [vmem:[%s17443_s24 + $0x20] ss:$8 sps:$4 sm:$0xff]  }
 0x349   : > { %12412 = vmatpush1.bf16.msra.mxu0 %v14422_v36  ;;  %11897 = vmatprep.subr.bf16.mxu1 %v14423_v37  ;;  %v14428_v40 = vld [vmem:[%s17443_s24 + $0xc10] ss:$8 sps:$4 sm:$0xff]   ;;  %v14431_v42 = vld [vmem:[%s17443_s24 + $0xc24] ss:$8 sps:$4 sm:$0xff]   ;;  %v14434_v44 = vld [vmem:[%s17443_s24 + $0xc20] ss:$8 sps:$4 sm:$0xff]  }
 0x34a   : > { %12413 = vmatprep.subr.bf16.mxu0 %v14425_v38  ;;  %v14435_v45 = vld [vmem:[%s17443_s24 + $0x34] ss:$8 sps:$4 sm:$0xff]   ;;  %v14439_v47 = vld [vmem:[%s17443_s24 + $0x30] ss:$8 sps:$4 sm:$0xff]   ;;  %v14441_v49 = vld [vmem:[%s17443_s24 + $0x44] ss:$8 sps:$4 sm:$0xff]  }
 0x34b   : > { %v14437_v46 = vld [vmem:[%s17443_s24 + $0xc34] ss:$8 sps:$4 sm:$0xff]   ;;  %v14440_v48 = vld [vmem:[%s17443_s24 + $0xc30] ss:$8 sps:$4 sm:$0xff]   ;;  %v14443_v50 = vld [vmem:[%s17443_s24 + $0xc44] ss:$8 sps:$4 sm:$0xff]  }
 0x34c   : > { %11898 = vmatpush1.bf16.msra.mxu1 %v14427_v39  ;;  %v14445_v51 = vld [vmem:[%s17443_s24 + $0x40] ss:$8 sps:$4 sm:$0xff]   ;;  %v14447_v53 = vld [vmem:[%s17443_s24 + $0x54] ss:$8 sps:$4 sm:$0xff]   ;;  %v14451_v55 = vld [vmem:[%s17443_s24 + $0x50] ss:$8 sps:$4 sm:$0xff]  }
 0x34d   : > { %12414 = vmatpush1.bf16.msra.mxu0 %v14428_v40  ;;  %11899 = vmatprep.subr.bf16.mxu1 %v14429_v41  ;;  %v14446_v52 = vld [vmem:[%s17443_s24 + $0xc40] ss:$8 sps:$4 sm:$0xff]   ;;  %v14449_v54 = vld [vmem:[%s17443_s24 + $0xc54] ss:$8 sps:$4 sm:$0xff]   ;;  %v14452_v56 = vld [vmem:[%s17443_s24 + $0xc50] ss:$8 sps:$4 sm:$0xff]  }
 0x34e   : > { %12415 = vmatprep.subr.bf16.mxu0 %v14431_v42  ;;  %v14453_v57 = vld [vmem:[%s17443_s24 + $0x64] ss:$8 sps:$4 sm:$0xff]   ;;  %v14457_v59 = vld [vmem:[%s17443_s24 + $0x60] ss:$8 sps:$4 sm:$0xff]   ;;  %v14459_v61 = vld [vmem:[%s17443_s24 + $0x74] ss:$8 sps:$4 sm:$0xff]  }
 0x34f   : > { %v14455_v58 = vld [vmem:[%s17443_s24 + $0xc64] ss:$8 sps:$4 sm:$0xff]   ;;  %v14458_v60 = vld [vmem:[%s17443_s24 + $0xc60] ss:$8 sps:$4 sm:$0xff]   ;;  %v14461_v62 = vld [vmem:[%s17443_s24 + $0xc74] ss:$8 sps:$4 sm:$0xff]  }
 0x350   : > { %11900 = vmatpush1.bf16.msra.mxu1 %v14433_v43  ;;  %v14463_v63 = vld [vmem:[%s17443_s24 + $0x70] ss:$8 sps:$4 sm:$0xff]   ;;  %v14465_v1 = vld [vmem:[%s17443_s24 + $0x84] ss:$8 sps:$4 sm:$0xff]   ;;  %v14469_v3 = vld [vmem:[%s17443_s24 + $0x80] ss:$8 sps:$4 sm:$0xff]  }
 0x351   : > { %12416 = vmatpush1.bf16.msra.mxu0 %v14434_v44  ;;  %11901 = vmatprep.subr.bf16.mxu1 %v14435_v45  ;;  %v14464_v0 = vld [vmem:[%s17443_s24 + $0xc70] ss:$8 sps:$4 sm:$0xff]   ;;  %v14467_v2 = vld [vmem:[%s17443_s24 + $0xc84] ss:$8 sps:$4 sm:$0xff]   ;;  %v14470_v4 = vld [vmem:[%s17443_s24 + $0xc80] ss:$8 sps:$4 sm:$0xff]  }
 0x352   : > { %12417 = vmatprep.subr.bf16.mxu0 %v14437_v46  ;;  %v14471_v5 = vld [vmem:[%s17443_s24 + $0x94] ss:$8 sps:$4 sm:$0xff]   ;;  %v14475_v7 = vld [vmem:[%s17443_s24 + $0x90] ss:$8 sps:$4 sm:$0xff]   ;;  %v14477_v9 = vld [vmem:[%s17443_s24 + $0xa4] ss:$8 sps:$4 sm:$0xff]  }
 0x353   : > { %v14473_v6 = vld [vmem:[%s17443_s24 + $0xc94] ss:$8 sps:$4 sm:$0xff]   ;;  %v14476_v8 = vld [vmem:[%s17443_s24 + $0xc90] ss:$8 sps:$4 sm:$0xff]   ;;  %v14479_v10 = vld [vmem:[%s17443_s24 + $0xca4] ss:$8 sps:$4 sm:$0xff]  }
 0x354   : > { %11902 = vmatpush1.bf16.msra.mxu1 %v14439_v47  ;;  %v14481_v11 = vld [vmem:[%s17443_s24 + $0xa0] ss:$8 sps:$4 sm:$0xff]   ;;  %v14483_v13 = vld [vmem:[%s17443_s24 + $0xb4] ss:$8 sps:$4 sm:$0xff]   ;;  %v14487_v15 = vld [vmem:[%s17443_s24 + $0xb0] ss:$8 sps:$4 sm:$0xff]  }
 0x355   : > { %12418 = vmatpush1.bf16.msra.mxu0 %v14440_v48  ;;  %11903 = vmatprep.subr.bf16.mxu1 %v14441_v49  ;;  %v14482_v12 = vld [vmem:[%s17443_s24 + $0xca0] ss:$8 sps:$4 sm:$0xff]   ;;  %v14485_v14 = vld [vmem:[%s17443_s24 + $0xcb4] ss:$8 sps:$4 sm:$0xff]   ;;  %v14488_v16 = vld [vmem:[%s17443_s24 + $0xcb0] ss:$8 sps:$4 sm:$0xff]  }
 0x356   : > { %12419 = vmatprep.subr.bf16.mxu0 %v14443_v50  ;;  %v14515_v17 = vld [vmem:[%s18464_s0 + $0x4] ss:$200 sps:$4 sm:$0xff]   ;;  %v14489_v18 = vld [vmem:[%s17443_s24 + $0xc4] ss:$8 sps:$4 sm:$0xff]   ;;  %v14493_v21 = vld [vmem:[%s17443_s24 + $0xc0] ss:$8 sps:$4 sm:$0xff]  }
 0x357   : > { %v14491_v19 = vld [vmem:[%s17443_s24 + $0xcc4] ss:$8 sps:$4 sm:$0xff]   ;;  %11927 = vmatprep.mubr.bf16.mxu1 %v14515_v17  ;;  %v14521_v20 = vld [vmem:[%s18464_s0 + $0x64] ss:$200 sps:$4 sm:$0xff]   ;;  %v14494_v22 = vld [vmem:[%s17443_s24 + $0xcc0] ss:$8 sps:$4 sm:$0xff]  }
 0x358   : > { %11904 = vmatpush1.bf16.msra.mxu1 %v14445_v51  ;;  %v14495_v23 = vld [vmem:[%s17443_s24 + $0xd4] ss:$8 sps:$4 sm:$0xff]   ;;  %12443 = vmatprep.mubr.bf16.mxu0 %v14521_v20  ;;  %v14499_v25 = vld [vmem:[%s17443_s24 + $0xd0] ss:$8 sps:$4 sm:$0xff]   ;;  %v14501_v27 = vld [vmem:[%s17443_s24 + $0xe4] ss:$8 sps:$4 sm:$0xff]  }
 0x359   : > { %12420 = vmatpush1.bf16.msra.mxu0 %v14446_v52  ;;  %11905 = vmatprep.subr.bf16.mxu1 %v14447_v53  ;;  %v14497_v24 = vld [vmem:[%s17443_s24 + $0xcd4] ss:$8 sps:$4 sm:$0xff]   ;;  %v14500_v26 = vld [vmem:[%s17443_s24 + $0xcd0] ss:$8 sps:$4 sm:$0xff]   ;;  %v14503_v28 = vld [vmem:[%s17443_s24 + $0xce4] ss:$8 sps:$4 sm:$0xff]  }
 0x35a   : > { %12421 = vmatprep.subr.bf16.mxu0 %v14449_v54  ;;  %v14505_v29 = vld [vmem:[%s17443_s24 + $0xe0] ss:$8 sps:$4 sm:$0xff]   ;;  %v14507_v31 = vld [vmem:[%s17443_s24 + $0xf4] ss:$8 sps:$4 sm:$0xff]   ;;  %v14511_v33 = vld [vmem:[%s17443_s24 + $0xf0] ss:$8 sps:$4 sm:$0xff]  }
 0x35b   : > { %v14506_v30 = vld [vmem:[%s17443_s24 + $0xce0] ss:$8 sps:$4 sm:$0xff]   ;;  %v14509_v32 = vld [vmem:[%s17443_s24 + $0xcf4] ss:$8 sps:$4 sm:$0xff]   ;;  %v14512_v34 = vld [vmem:[%s17443_s24 + $0xcf0] ss:$8 sps:$4 sm:$0xff]  }
 0x35c   : > { %11906 = vmatpush1.bf16.msra.mxu1 %v14451_v55  ;;  %v14518_v35 = vld [vmem:[%s17443_s24 + $0x104] ss:$8 sps:$4 sm:$0xff]   ;;  %v14513_v37 = vld [vmem:[%s18464_s0] ss:$200 sps:$4 sm:$0xff]   ;;  %v14516_v38 = vld [vmem:[%s17443_s24 + $0x100] ss:$8 sps:$4 sm:$0xff]  }
 0x35d   : > { %12422 = vmatpush1.bf16.msra.mxu0 %v14452_v56  ;;  %11907 = vmatprep.subr.bf16.mxu1 %v14453_v57  ;;  %v14524_v36 = vld [vmem:[%s17443_s24 + $0xd04] ss:$8 sps:$4 sm:$0xff]   ;;  %v14519_v39 = vld [vmem:[%s18464_s0 + $0x60] ss:$200 sps:$4 sm:$0xff]   ;;  %v14522_v40 = vld [vmem:[%s17443_s24 + $0xd00] ss:$8 sps:$4 sm:$0xff]  }
 0x35e   : > { %12423 = vmatprep.subr.bf16.mxu0 %v14455_v58  ;;  %v14527_v41 = vld [vmem:[%s17443_s24 + $0x114] ss:$8 sps:$4 sm:$0xff]   ;;  %v14525_v43 = vld [vmem:[%s17443_s24 + $0x110] ss:$8 sps:$4 sm:$0xff]   ;;  %v14533_v45 = vld [vmem:[%s17443_s24 + $0x124] ss:$8 sps:$4 sm:$0xff]  }
 0x35f   : > { %v14530_v42 = vld [vmem:[%s17443_s24 + $0xd14] ss:$8 sps:$4 sm:$0xff]   ;;  %v14528_v44 = vld [vmem:[%s17443_s24 + $0xd10] ss:$8 sps:$4 sm:$0xff]   ;;  %v14536_v46 = vld [vmem:[%s17443_s24 + $0xd24] ss:$8 sps:$4 sm:$0xff]  }
 0x360   : > { %11908 = vmatpush1.bf16.msra.mxu1 %v14457_v59  ;;  %v14531_v47 = vld [vmem:[%s17443_s24 + $0x120] ss:$8 sps:$4 sm:$0xff]   ;;  %v14539_v49 = vld [vmem:[%s17443_s24 + $0x134] ss:$8 sps:$4 sm:$0xff]   ;;  %v14537_v51 = vld [vmem:[%s17443_s24 + $0x130] ss:$8 sps:$4 sm:$0xff]  }
 0x361   : > { %12424 = vmatpush1.bf16.msra.mxu0 %v14458_v60  ;;  %11909 = vmatprep.subr.bf16.mxu1 %v14459_v61  ;;  %v14534_v48 = vld [vmem:[%s17443_s24 + $0xd20] ss:$8 sps:$4 sm:$0xff]   ;;  %v14542_v50 = vld [vmem:[%s17443_s24 + $0xd34] ss:$8 sps:$4 sm:$0xff]   ;;  %v14540_v52 = vld [vmem:[%s17443_s24 + $0xd30] ss:$8 sps:$4 sm:$0xff]  }
 0x362   : > { %12425 = vmatprep.subr.bf16.mxu0 %v14461_v62  ;;  %v14545_v53 = vld [vmem:[%s17443_s24 + $0x144] ss:$8 sps:$4 sm:$0xff]   ;;  %v14543_v55 = vld [vmem:[%s17443_s24 + $0x140] ss:$8 sps:$4 sm:$0xff]   ;;  %v14551_v57 = vld [vmem:[%s17443_s24 + $0x154] ss:$8 sps:$4 sm:$0xff]  }
 0x363   : > { %v14548_v54 = vld [vmem:[%s17443_s24 + $0xd44] ss:$8 sps:$4 sm:$0xff]   ;;  %v14546_v56 = vld [vmem:[%s17443_s24 + $0xd40] ss:$8 sps:$4 sm:$0xff]   ;;  %v14554_v58 = vld [vmem:[%s17443_s24 + $0xd54] ss:$8 sps:$4 sm:$0xff]  }
 0x364   : > { %11910 = vmatpush1.bf16.msra.mxu1 %v14463_v63  ;;  %v14549_v59 = vld [vmem:[%s17443_s24 + $0x150] ss:$8 sps:$4 sm:$0xff]   ;;  %v14557_v61 = vld [vmem:[%s17443_s24 + $0x164] ss:$8 sps:$4 sm:$0xff]   ;;  %v14555_v63 = vld [vmem:[%s17443_s24 + $0x160] ss:$8 sps:$4 sm:$0xff]  }
 0x365   : > { %12426 = vmatpush1.bf16.msra.mxu0 %v14464_v0  ;;  %11911 = vmatprep.subr.bf16.mxu1 %v14465_v1  ;;  %v14552_v60 = vld [vmem:[%s17443_s24 + $0xd50] ss:$8 sps:$4 sm:$0xff]   ;;  %v14560_v62 = vld [vmem:[%s17443_s24 + $0xd64] ss:$8 sps:$4 sm:$0xff]   ;;  %v14558_v0 = vld [vmem:[%s17443_s24 + $0xd60] ss:$8 sps:$4 sm:$0xff]  }
 0x366   : > { %12427 = vmatprep.subr.bf16.mxu0 %v14467_v2  ;;  %v14563_v1 = vld [vmem:[%s17443_s24 + $0x174] ss:$8 sps:$4 sm:$0xff]   ;;  %v14579_v17 = vld [vmem:[%s17443_s24 + $0x1a0] ss:$8 sps:$4 sm:$0xff]   ;;  %p14223_p11 = scmp.ne.s32.totalorder %s15803_s27, 3 }
 0x367   : > { %v14566_v2 = vld [vmem:[%s17443_s24 + $0xd74] ss:$8 sps:$4 sm:$0xff]   ;;  %vm15746_vm0 = vmmov (!%p14223_p11), 0  }
 0x368   : > { %11912 = vmatpush1.bf16.msra.mxu1 %v14469_v3  ;;  %v14617_v3 = vld [vmem:[%s18464_s0 + $0xc] ss:$200 sps:$4 sm:$0xff]  }
 0x369   : > { %12428 = vmatpush1.bf16.msra.mxu0 %v14470_v4  ;;  %11913 = vmatprep.subr.bf16.mxu1 %v14471_v5  ;;  %v14561_v4 = vld [vmem:[%s17443_s24 + $0x170] ss:$8 sps:$4 sm:$0xff]   ;;  %v14590_v20 = vld [vmem:[%s17443_s24 + $0xdb4] ss:$8 sps:$4 sm:$0xff]  }
 0x36a   : > { %12429 = vmatprep.subr.bf16.mxu0 %v14473_v6  ;;  %v14564_v5 = vld [vmem:[%s17443_s24 + $0xd70] ss:$8 sps:$4 sm:$0xff]   ;;  %v14623_v6 = vld [vmem:[%s18464_s0 + $0x6c] ss:$200 sps:$4 sm:$0xff]  }
 0x36c   : > { %11914 = vmatpush1.bf16.msra.mxu1 %v14475_v7  ;;  %v14569_v7 = vld [vmem:[%s17443_s24 + $0x184] ss:$8 sps:$4 sm:$0xff]  }
 0x36d   : > { %12430 = vmatpush1.bf16.msra.mxu0 %v14476_v8  ;;  %11915 = vmatprep.subr.bf16.mxu1 %v14477_v9  ;;  %v14572_v8 = vld [vmem:[%s17443_s24 + $0xd84] ss:$8 sps:$4 sm:$0xff]   ;;  %v14567_v9 = vld [vmem:[%s17443_s24 + $0x180] ss:$8 sps:$4 sm:$0xff]  }
 0x36e   : > { %12431 = vmatprep.subr.bf16.mxu0 %v14479_v10  ;;  %v14570_v10 = vld [vmem:[%s17443_s24 + $0xd80] ss:$8 sps:$4 sm:$0xff]  }
 0x370   : > { %11916 = vmatpush1.bf16.msra.mxu1 %v14481_v11  ;;  %v14575_v11 = vld [vmem:[%s17443_s24 + $0x194] ss:$8 sps:$4 sm:$0xff]  }
 0x371   : > { %12432 = vmatpush1.bf16.msra.mxu0 %v14482_v12  ;;  %11917 = vmatprep.subr.bf16.mxu1 %v14483_v13  ;;  %v14578_v12 = vld [vmem:[%s17443_s24 + $0xd94] ss:$8 sps:$4 sm:$0xff]   ;;  %v14573_v13 = vld [vmem:[%s17443_s24 + $0x190] ss:$8 sps:$4 sm:$0xff]  }
 0x372   : > { %12433 = vmatprep.subr.bf16.mxu0 %v14485_v14  ;;  %v14576_v14 = vld [vmem:[%s17443_s24 + $0xd90] ss:$8 sps:$4 sm:$0xff]  }
 0x374   : > { %11918 = vmatpush1.bf16.msra.mxu1 %v14487_v15  ;;  %v14581_v15 = vld [vmem:[%s17443_s24 + $0x1a4] ss:$8 sps:$4 sm:$0xff]  }
 0x375   : > { %12434 = vmatpush1.bf16.msra.mxu0 %v14488_v16  ;;  %11919 = vmatprep.subr.bf16.mxu1 %v14489_v18  ;;  %v14584_v16 = vld [vmem:[%s17443_s24 + $0xda4] ss:$8 sps:$4 sm:$0xff]   ;;  %v14582_v18 = vld [vmem:[%s17443_s24 + $0xda0] ss:$8 sps:$4 sm:$0xff]  }
 0x376   : > { %12435 = vmatprep.subr.bf16.mxu0 %v14491_v19  ;;  %v14587_v19 = vld [vmem:[%s17443_s24 + $0x1b4] ss:$8 sps:$4 sm:$0xff]  }
 0x378   : > { %11920 = vmatpush1.bf16.msra.mxu1 %v14493_v21  ;;  %v14585_v21 = vld [vmem:[%s17443_s24 + $0x1b0] ss:$8 sps:$4 sm:$0xff]  }
 0x379   : > { %12436 = vmatpush1.bf16.msra.mxu0 %v14494_v22  ;;  %11921 = vmatprep.subr.bf16.mxu1 %v14495_v23  ;;  %v14588_v22 = vld [vmem:[%s17443_s24 + $0xdb0] ss:$8 sps:$4 sm:$0xff]   ;;  %v14593_v23 = vld [vmem:[%s17443_s24 + $0x1c4] ss:$8 sps:$4 sm:$0xff]  }
 0x37a   : > { %12437 = vmatprep.subr.bf16.mxu0 %v14497_v24  ;;  %v14596_v24 = vld [vmem:[%s17443_s24 + $0xdc4] ss:$8 sps:$4 sm:$0xff]  }
 0x37c   : > { %11922 = vmatpush1.bf16.msra.mxu1 %v14499_v25  ;;  %v14591_v25 = vld [vmem:[%s17443_s24 + $0x1c0] ss:$8 sps:$4 sm:$0xff]  }
 0x37d   : > { %12438 = vmatpush1.bf16.msra.mxu0 %v14500_v26  ;;  %11923 = vmatprep.subr.bf16.mxu1 %v14501_v27  ;;  %v14594_v26 = vld [vmem:[%s17443_s24 + $0xdc0] ss:$8 sps:$4 sm:$0xff]   ;;  %v14599_v27 = vld [vmem:[%s17443_s24 + $0x1d4] ss:$8 sps:$4 sm:$0xff]  }
 0x37e   : > { %12439 = vmatprep.subr.bf16.mxu0 %v14503_v28  ;;  %v14602_v28 = vld [vmem:[%s17443_s24 + $0xdd4] ss:$8 sps:$4 sm:$0xff]  }
 0x380   : > { %11924 = vmatpush1.bf16.msra.mxu1 %v14505_v29  ;;  %v14597_v29 = vld [vmem:[%s17443_s24 + $0x1d0] ss:$8 sps:$4 sm:$0xff]  }
 0x381   : > { %12440 = vmatpush1.bf16.msra.mxu0 %v14506_v30  ;;  %11925 = vmatprep.subr.bf16.mxu1 %v14507_v31  ;;  %v14600_v30 = vld [vmem:[%s17443_s24 + $0xdd0] ss:$8 sps:$4 sm:$0xff]   ;;  %v14605_v31 = vld [vmem:[%s17443_s24 + $0x1e4] ss:$8 sps:$4 sm:$0xff]  }
 0x382   : > { %12441 = vmatprep.subr.bf16.mxu0 %v14509_v32  ;;  %v14608_v32 = vld [vmem:[%s17443_s24 + $0xde4] ss:$8 sps:$4 sm:$0xff]  }
 0x384   : > { %11926 = vmatpush1.bf16.msra.mxu1 %v14511_v33  ;;  %v14603_v33 = vld [vmem:[%s17443_s24 + $0x1e0] ss:$8 sps:$4 sm:$0xff]  }
 0x385   : > { %12442 = vmatpush1.bf16.msra.mxu0 %v14512_v34  ;;  %11938 = vmatprep.subr.bf16.mxu1 %v14518_v35  ;;  %v14606_v34 = vld [vmem:[%s17443_s24 + $0xde0] ss:$8 sps:$4 sm:$0xff]   ;;  %v14611_v35 = vld [vmem:[%s17443_s24 + $0x1f4] ss:$8 sps:$4 sm:$0xff]  }
 0x386   : > { %12454 = vmatprep.subr.bf16.mxu0 %v14524_v36  ;;  %v14614_v36 = vld [vmem:[%s17443_s24 + $0xdf4] ss:$8 sps:$4 sm:$0xff]  }
 0x387   : > { %11928 = vmatmul.mubr.bf16.vlgmr.msra.gmra.mrb[0].mxu1 %v14513_v37  ;;  %v14609_v37 = vld [vmem:[%s17443_s24 + $0x1f0] ss:$8 sps:$4 sm:$0xff]  }
 0x388   : > { %12444 = vmatmul.mubr.bf16.vlgmr.msra.gmra.mrb[0].mxu0 %v14519_v39  ;;  %11939 = vmatpush1.bf16.msra.mxu1 %v14516_v38  ;;  %v14612_v38 = vld [vmem:[%s17443_s24 + $0xdf0] ss:$8 sps:$4 sm:$0xff]   ;;  %v14620_v39 = vld [vmem:[%s17443_s24 + $0x204] ss:$8 sps:$4 sm:$0xff]  }
 0x389   : > { %12455 = vmatpush1.bf16.msra.mxu0 %v14522_v40  ;;  %11940 = vmatprep.subr.bf16.mxu1 %v14527_v41  ;;  %v14626_v40 = vld [vmem:[%s17443_s24 + $0xe04] ss:$8 sps:$4 sm:$0xff]   ;;  %v14615_v41 = vld [vmem:[%s18464_s0 + $0x8] ss:$200 sps:$4 sm:$0xff]  }
 0x38a   : > { %12456 = vmatprep.subr.bf16.mxu0 %v14530_v42  ;;  %11970 = vmatprep.mubr.bf16.mxu1 %v14617_v3  ;;  %v14618_v42 = vld [vmem:[%s17443_s24 + $0x200] ss:$8 sps:$4 sm:$0xff]   ;;  %v14659_v3 = vld [vmem:[%s17443_s24 + $0x264] ss:$8 sps:$4 sm:$0xff]  }
 0x38b   : > { %12486 = vmatprep.mubr.bf16.mxu0 %v14623_v6  ;;  %v14660_v6 = vld [vmem:[%s17443_s24 + $0xe60] ss:$8 sps:$4 sm:$0xff]  }
 0x38c   : > { %11941 = vmatpush1.bf16.msra.mxu1 %v14525_v43  ;;  %v14621_v43 = vld [vmem:[%s18464_s0 + $0x68] ss:$200 sps:$4 sm:$0xff]  }
 0x38d   : > { %12457 = vmatpush1.bf16.msra.mxu0 %v14528_v44  ;;  %11942 = vmatprep.subr.bf16.mxu1 %v14533_v45  ;;  %v14624_v44 = vld [vmem:[%s17443_s24 + $0xe00] ss:$8 sps:$4 sm:$0xff]   ;;  %v14629_v45 = vld [vmem:[%s17443_s24 + $0x214] ss:$8 sps:$4 sm:$0xff]  }
 0x38e   : > { %12458 = vmatprep.subr.bf16.mxu0 %v14536_v46  ;;  %v14632_v46 = vld [vmem:[%s17443_s24 + $0xe14] ss:$8 sps:$4 sm:$0xff]  }
 0x390   : > { %11943 = vmatpush1.bf16.msra.mxu1 %v14531_v47  ;;  %v14627_v47 = vld [vmem:[%s17443_s24 + $0x210] ss:$8 sps:$4 sm:$0xff]  }
 0x391   : > { %12459 = vmatpush1.bf16.msra.mxu0 %v14534_v48  ;;  %11944 = vmatprep.subr.bf16.mxu1 %v14539_v49  ;;  %v14630_v48 = vld [vmem:[%s17443_s24 + $0xe10] ss:$8 sps:$4 sm:$0xff]   ;;  %v14635_v49 = vld [vmem:[%s17443_s24 + $0x224] ss:$8 sps:$4 sm:$0xff]  }
 0x392   : > { %12460 = vmatprep.subr.bf16.mxu0 %v14542_v50  ;;  %v14638_v50 = vld [vmem:[%s17443_s24 + $0xe24] ss:$8 sps:$4 sm:$0xff]  }
 0x394   : > { %11945 = vmatpush1.bf16.msra.mxu1 %v14537_v51  ;;  %v14633_v51 = vld [vmem:[%s17443_s24 + $0x220] ss:$8 sps:$4 sm:$0xff]  }
 0x395   : > { %12461 = vmatpush1.bf16.msra.mxu0 %v14540_v52  ;;  %11946 = vmatprep.subr.bf16.mxu1 %v14545_v53  ;;  %v14719_v52 = vld [vmem:[%s18464_s0 + $0x14] ss:$200 sps:$4 sm:$0xff]   ;;  %v14636_v53 = vld [vmem:[%s17443_s24 + $0xe20] ss:$8 sps:$4 sm:$0xff]  }
 0x396   : > { %12462 = vmatprep.subr.bf16.mxu0 %v14548_v54  ;;  %v14641_v54 = vld [vmem:[%s17443_s24 + $0x234] ss:$8 sps:$4 sm:$0xff]  }
 0x398   : > { %11947 = vmatpush1.bf16.msra.mxu1 %v14543_v55  ;;  %v14644_v55 = vld [vmem:[%s17443_s24 + $0xe34] ss:$8 sps:$4 sm:$0xff]  }
 0x399   : > { %12463 = vmatpush1.bf16.msra.mxu0 %v14546_v56  ;;  %11948 = vmatprep.subr.bf16.mxu1 %v14551_v57  ;;  %v14725_v56 = vld [vmem:[%s18464_s0 + $0x74] ss:$200 sps:$4 sm:$0xff]   ;;  %v14639_v57 = vld [vmem:[%s17443_s24 + $0x230] ss:$8 sps:$4 sm:$0xff]  }
 0x39a   : > { %12464 = vmatprep.subr.bf16.mxu0 %v14554_v58  ;;  %v14642_v58 = vld [vmem:[%s17443_s24 + $0xe30] ss:$8 sps:$4 sm:$0xff]  }
 0x39c   : > { %11949 = vmatpush1.bf16.msra.mxu1 %v14549_v59  ;;  %v14647_v59 = vld [vmem:[%s17443_s24 + $0x244] ss:$8 sps:$4 sm:$0xff]  }
 0x39d   : > { %12465 = vmatpush1.bf16.msra.mxu0 %v14552_v60  ;;  %11950 = vmatprep.subr.bf16.mxu1 %v14557_v61  ;;  %v14650_v60 = vld [vmem:[%s17443_s24 + $0xe44] ss:$8 sps:$4 sm:$0xff]   ;;  %v14645_v61 = vld [vmem:[%s17443_s24 + $0x240] ss:$8 sps:$4 sm:$0xff]  }
 0x39e   : > { %12466 = vmatprep.subr.bf16.mxu0 %v14560_v62  ;;  %v14648_v62 = vld [vmem:[%s17443_s24 + $0xe40] ss:$8 sps:$4 sm:$0xff]  }
 0x3a0   : > { %11951 = vmatpush1.bf16.msra.mxu1 %v14555_v63  ;;  %v14653_v63 = vld [vmem:[%s17443_s24 + $0x254] ss:$8 sps:$4 sm:$0xff]  }
 0x3a1   : > { %12467 = vmatpush1.bf16.msra.mxu0 %v14558_v0  ;;  %11952 = vmatprep.subr.bf16.mxu1 %v14563_v1  ;;  %v14656_v0 = vld [vmem:[%s17443_s24 + $0xe54] ss:$8 sps:$4 sm:$0xff]   ;;  %v14651_v1 = vld [vmem:[%s17443_s24 + $0x250] ss:$8 sps:$4 sm:$0xff]  }
 0x3a2   : > { %12468 = vmatprep.subr.bf16.mxu0 %v14566_v2  ;;  %v14654_v2 = vld [vmem:[%s17443_s24 + $0xe50] ss:$8 sps:$4 sm:$0xff]  }
 0x3a4   : > { %11953 = vmatpush1.bf16.msra.mxu1 %v14561_v4  ;;  %v14662_v4 = vld [vmem:[%s17443_s24 + $0xe64] ss:$8 sps:$4 sm:$0xff]  }
 0x3a5   : > { %12469 = vmatpush1.bf16.msra.mxu0 %v14564_v5  ;;  %11954 = vmatprep.subr.bf16.mxu1 %v14569_v7  ;;  %v14657_v5 = vld [vmem:[%s17443_s24 + $0x260] ss:$8 sps:$4 sm:$0xff]   ;;  %v14665_v7 = vld [vmem:[%s17443_s24 + $0x274] ss:$8 sps:$4 sm:$0xff]  }
 0x3a6   : > { %12470 = vmatprep.subr.bf16.mxu0 %v14572_v8  ;;  %v14668_v8 = vld [vmem:[%s17443_s24 + $0xe74] ss:$8 sps:$4 sm:$0xff]  }
 0x3a8   : > { %11955 = vmatpush1.bf16.msra.mxu1 %v14567_v9  ;;  %v14663_v9 = vld [vmem:[%s17443_s24 + $0x270] ss:$8 sps:$4 sm:$0xff]  }
 0x3a9   : > { %12471 = vmatpush1.bf16.msra.mxu0 %v14570_v10  ;;  %11956 = vmatprep.subr.bf16.mxu1 %v14575_v11  ;;  %v14666_v10 = vld [vmem:[%s17443_s24 + $0xe70] ss:$8 sps:$4 sm:$0xff]   ;;  %v14671_v11 = vld [vmem:[%s17443_s24 + $0x284] ss:$8 sps:$4 sm:$0xff]  }
 0x3aa   : > { %12472 = vmatprep.subr.bf16.mxu0 %v14578_v12  ;;  %v14674_v12 = vld [vmem:[%s17443_s24 + $0xe84] ss:$8 sps:$4 sm:$0xff]  }
 0x3ac   : > { %11957 = vmatpush1.bf16.msra.mxu1 %v14573_v13  ;;  %v14669_v13 = vld [vmem:[%s17443_s24 + $0x280] ss:$8 sps:$4 sm:$0xff]  }
 0x3ad   : > { %12473 = vmatpush1.bf16.msra.mxu0 %v14576_v14  ;;  %11958 = vmatprep.subr.bf16.mxu1 %v14581_v15  ;;  %v14672_v14 = vld [vmem:[%s17443_s24 + $0xe80] ss:$8 sps:$4 sm:$0xff]   ;;  %v14677_v15 = vld [vmem:[%s17443_s24 + $0x294] ss:$8 sps:$4 sm:$0xff]  }
 0x3ae   : > { %12474 = vmatprep.subr.bf16.mxu0 %v14584_v16  ;;  %v14680_v16 = vld [vmem:[%s17443_s24 + $0xe94] ss:$8 sps:$4 sm:$0xff]  }
 0x3b0   : > { %11959 = vmatpush1.bf16.msra.mxu1 %v14579_v17  ;;  %v14675_v17 = vld [vmem:[%s17443_s24 + $0x290] ss:$8 sps:$4 sm:$0xff]  }
 0x3b1   : > { %12475 = vmatpush1.bf16.msra.mxu0 %v14582_v18  ;;  %11960 = vmatprep.subr.bf16.mxu1 %v14587_v19  ;;  %v14678_v18 = vld [vmem:[%s17443_s24 + $0xe90] ss:$8 sps:$4 sm:$0xff]   ;;  %v14683_v19 = vld [vmem:[%s17443_s24 + $0x2a4] ss:$8 sps:$4 sm:$0xff]  }
 0x3b2   : > { %12476 = vmatprep.subr.bf16.mxu0 %v14590_v20  ;;  %v14686_v20 = vld [vmem:[%s17443_s24 + $0xea4] ss:$8 sps:$4 sm:$0xff]  }
 0x3b4   : > { %11961 = vmatpush1.bf16.msra.mxu1 %v14585_v21  ;;  %v14681_v21 = vld [vmem:[%s17443_s24 + $0x2a0] ss:$8 sps:$4 sm:$0xff]  }
 0x3b5   : > { %12477 = vmatpush1.bf16.msra.mxu0 %v14588_v22  ;;  %11962 = vmatprep.subr.bf16.mxu1 %v14593_v23  ;;  %v14684_v22 = vld [vmem:[%s17443_s24 + $0xea0] ss:$8 sps:$4 sm:$0xff]   ;;  %v14689_v23 = vld [vmem:[%s17443_s24 + $0x2b4] ss:$8 sps:$4 sm:$0xff]  }
 0x3b6   : > { %12478 = vmatprep.subr.bf16.mxu0 %v14596_v24  ;;  %v14692_v24 = vld [vmem:[%s17443_s24 + $0xeb4] ss:$8 sps:$4 sm:$0xff]  }
 0x3b8   : > { %11963 = vmatpush1.bf16.msra.mxu1 %v14591_v25  ;;  %v14687_v25 = vld [vmem:[%s17443_s24 + $0x2b0] ss:$8 sps:$4 sm:$0xff]  }
 0x3b9   : > { %12479 = vmatpush1.bf16.msra.mxu0 %v14594_v26  ;;  %11964 = vmatprep.subr.bf16.mxu1 %v14599_v27  ;;  %v14690_v26 = vld [vmem:[%s17443_s24 + $0xeb0] ss:$8 sps:$4 sm:$0xff]   ;;  %v14695_v27 = vld [vmem:[%s17443_s24 + $0x2c4] ss:$8 sps:$4 sm:$0xff]  }
 0x3ba   : > { %12480 = vmatprep.subr.bf16.mxu0 %v14602_v28  ;;  %v14698_v28 = vld [vmem:[%s17443_s24 + $0xec4] ss:$8 sps:$4 sm:$0xff]  }
 0x3bc   : > { %11965 = vmatpush1.bf16.msra.mxu1 %v14597_v29  ;;  %v14693_v29 = vld [vmem:[%s17443_s24 + $0x2c0] ss:$8 sps:$4 sm:$0xff]  }
 0x3bd   : > { %12481 = vmatpush1.bf16.msra.mxu0 %v14600_v30  ;;  %11966 = vmatprep.subr.bf16.mxu1 %v14605_v31  ;;  %v14696_v30 = vld [vmem:[%s17443_s24 + $0xec0] ss:$8 sps:$4 sm:$0xff]   ;;  %v14701_v31 = vld [vmem:[%s17443_s24 + $0x2d4] ss:$8 sps:$4 sm:$0xff]  }
 0x3be   : > { %12482 = vmatprep.subr.bf16.mxu0 %v14608_v32  ;;  %v14704_v32 = vld [vmem:[%s17443_s24 + $0xed4] ss:$8 sps:$4 sm:$0xff]  }
 0x3c0   : > { %11967 = vmatpush1.bf16.msra.mxu1 %v14603_v33  ;;  %v14699_v33 = vld [vmem:[%s17443_s24 + $0x2d0] ss:$8 sps:$4 sm:$0xff]  }
 0x3c1   : > { %12483 = vmatpush1.bf16.msra.mxu0 %v14606_v34  ;;  %11968 = vmatprep.subr.bf16.mxu1 %v14611_v35  ;;  %v14702_v34 = vld [vmem:[%s17443_s24 + $0xed0] ss:$8 sps:$4 sm:$0xff]   ;;  %v14707_v35 = vld [vmem:[%s17443_s24 + $0x2e4] ss:$8 sps:$4 sm:$0xff]  }
 0x3c2   : > { %12484 = vmatprep.subr.bf16.mxu0 %v14614_v36  ;;  %v14710_v36 = vld [vmem:[%s17443_s24 + $0xee4] ss:$8 sps:$4 sm:$0xff]  }
 0x3c4   : > { %11969 = vmatpush1.bf16.msra.mxu1 %v14609_v37  ;;  %v14705_v37 = vld [vmem:[%s17443_s24 + $0x2e0] ss:$8 sps:$4 sm:$0xff]  }
 0x3c5   : > { %12485 = vmatpush1.bf16.msra.mxu0 %v14612_v38  ;;  %11981 = vmatprep.subr.bf16.mxu1 %v14620_v39  ;;  %v14708_v38 = vld [vmem:[%s17443_s24 + $0xee0] ss:$8 sps:$4 sm:$0xff]   ;;  %v14713_v39 = vld [vmem:[%s17443_s24 + $0x2f4] ss:$8 sps:$4 sm:$0xff]  }
 0x3c6   : > { %12497 = vmatprep.subr.bf16.mxu0 %v14626_v40  ;;  %v14716_v40 = vld [vmem:[%s17443_s24 + $0xef4] ss:$8 sps:$4 sm:$0xff]  }
 0x3c7   : > { %11971 = vmatmul.mubr.bf16.vlgmr.msra.gmra.mrb[0].mxu1 %v14615_v41  ;;  %v14711_v41 = vld [vmem:[%s17443_s24 + $0x2f0] ss:$8 sps:$4 sm:$0xff]  }
 0x3c8   : > { %12487 = vmatmul.mubr.bf16.vlgmr.msra.gmra.mrb[0].mxu0 %v14621_v43  ;;  %11982 = vmatpush1.bf16.msra.mxu1 %v14618_v42  ;;  %v14714_v42 = vld [vmem:[%s17443_s24 + $0xef0] ss:$8 sps:$4 sm:$0xff]   ;;  %v14722_v43 = vld [vmem:[%s17443_s24 + $0x304] ss:$8 sps:$4 sm:$0xff]  }
 0x3c9   : > { %12498 = vmatpush1.bf16.msra.mxu0 %v14624_v44  ;;  %11983 = vmatprep.subr.bf16.mxu1 %v14629_v45  ;;  %v14728_v44 = vld [vmem:[%s17443_s24 + $0xf04] ss:$8 sps:$4 sm:$0xff]   ;;  %v14717_v45 = vld [vmem:[%s18464_s0 + $0x10] ss:$200 sps:$4 sm:$0xff]  }
 0x3ca   : > { %12499 = vmatprep.subr.bf16.mxu0 %v14632_v46  ;;  %12013 = vmatprep.mubr.bf16.mxu1 %v14719_v52  ;;  %v14720_v46 = vld [vmem:[%s17443_s24 + $0x300] ss:$8 sps:$4 sm:$0xff]   ;;  %v14827_v52 = vld [vmem:[%s18464_s0 + $0x7c] ss:$200 sps:$4 sm:$0xff]  }
 0x3cb   : > { %12529 = vmatprep.mubr.bf16.mxu0 %v14725_v56  ;;  %v14740_v56 = vld [vmem:[%s17443_s24 + $0xf24] ss:$8 sps:$4 sm:$0xff]  }
 0x3cc   : > { %11984 = vmatpush1.bf16.msra.mxu1 %v14627_v47  ;;  %v14723_v47 = vld [vmem:[%s18464_s0 + $0x70] ss:$200 sps:$4 sm:$0xff]  }
 0x3cd   : > { %12500 = vmatpush1.bf16.msra.mxu0 %v14630_v48  ;;  %11985 = vmatprep.subr.bf16.mxu1 %v14635_v49  ;;  %v14726_v48 = vld [vmem:[%s17443_s24 + $0xf00] ss:$8 sps:$4 sm:$0xff]   ;;  %v14731_v49 = vld [vmem:[%s17443_s24 + $0x314] ss:$8 sps:$4 sm:$0xff]  }
 0x3ce   : > { %12501 = vmatprep.subr.bf16.mxu0 %v14638_v50  ;;  %v14734_v50 = vld [vmem:[%s17443_s24 + $0xf14] ss:$8 sps:$4 sm:$0xff]  }
 0x3d0   : > { %11986 = vmatpush1.bf16.msra.mxu1 %v14633_v51  ;;  %v14821_v51 = vld [vmem:[%s18464_s0 + $0x1c] ss:$200 sps:$4 sm:$0xff]  }
 0x3d1   : > { %12502 = vmatpush1.bf16.msra.mxu0 %v14636_v53  ;;  %11987 = vmatprep.subr.bf16.mxu1 %v14641_v54  ;;  %v14729_v53 = vld [vmem:[%s17443_s24 + $0x310] ss:$8 sps:$4 sm:$0xff]  }
 0x3d2   : > { %12503 = vmatprep.subr.bf16.mxu0 %v14644_v55  ;;  %v14732_v54 = vld [vmem:[%s17443_s24 + $0xf10] ss:$8 sps:$4 sm:$0xff]   ;;  %v14737_v55 = vld [vmem:[%s17443_s24 + $0x324] ss:$8 sps:$4 sm:$0xff]  }
 0x3d4   : > { %11988 = vmatpush1.bf16.msra.mxu1 %v14639_v57  ;;  %v14735_v57 = vld [vmem:[%s17443_s24 + $0x320] ss:$8 sps:$4 sm:$0xff]  }
 0x3d5   : > { %12504 = vmatpush1.bf16.msra.mxu0 %v14642_v58  ;;  %11989 = vmatprep.subr.bf16.mxu1 %v14647_v59  ;;  %v14738_v58 = vld [vmem:[%s17443_s24 + $0xf20] ss:$8 sps:$4 sm:$0xff]   ;;  %v14743_v59 = vld [vmem:[%s17443_s24 + $0x334] ss:$8 sps:$4 sm:$0xff]  }
 0x3d6   : > { %12505 = vmatprep.subr.bf16.mxu0 %v14650_v60  ;;  %v14746_v60 = vld [vmem:[%s17443_s24 + $0xf34] ss:$8 sps:$4 sm:$0xff]  }
 0x3d8   : > { %11990 = vmatpush1.bf16.msra.mxu1 %v14645_v61  ;;  %v14741_v61 = vld [vmem:[%s17443_s24 + $0x330] ss:$8 sps:$4 sm:$0xff]  }
 0x3d9   : > { %12506 = vmatpush1.bf16.msra.mxu0 %v14648_v62  ;;  %11991 = vmatprep.subr.bf16.mxu1 %v14653_v63  ;;  %v14744_v62 = vld [vmem:[%s17443_s24 + $0xf30] ss:$8 sps:$4 sm:$0xff]   ;;  %v14749_v63 = vld [vmem:[%s17443_s24 + $0x344] ss:$8 sps:$4 sm:$0xff]  }
 0x3da   : > { %12507 = vmatprep.subr.bf16.mxu0 %v14656_v0  ;;  %v14752_v0 = vld [vmem:[%s17443_s24 + $0xf44] ss:$8 sps:$4 sm:$0xff]  }
 0x3dc   : > { %11992 = vmatpush1.bf16.msra.mxu1 %v14651_v1  ;;  %v14747_v1 = vld [vmem:[%s17443_s24 + $0x340] ss:$8 sps:$4 sm:$0xff]  }
 0x3dd   : > { %12508 = vmatpush1.bf16.msra.mxu0 %v14654_v2  ;;  %11993 = vmatprep.subr.bf16.mxu1 %v14659_v3  ;;  %v14750_v2 = vld [vmem:[%s17443_s24 + $0xf40] ss:$8 sps:$4 sm:$0xff]   ;;  %v14755_v3 = vld [vmem:[%s17443_s24 + $0x354] ss:$8 sps:$4 sm:$0xff]  }
 0x3de   : > { %12509 = vmatprep.subr.bf16.mxu0 %v14662_v4  ;;  %v14758_v4 = vld [vmem:[%s17443_s24 + $0xf54] ss:$8 sps:$4 sm:$0xff]  }
 0x3e0   : > { %11994 = vmatpush1.bf16.msra.mxu1 %v14657_v5  ;;  %v14753_v5 = vld [vmem:[%s17443_s24 + $0x350] ss:$8 sps:$4 sm:$0xff]  }
 0x3e1   : > { %12510 = vmatpush1.bf16.msra.mxu0 %v14660_v6  ;;  %11995 = vmatprep.subr.bf16.mxu1 %v14665_v7  ;;  %v14756_v6 = vld [vmem:[%s17443_s24 + $0xf50] ss:$8 sps:$4 sm:$0xff]   ;;  %v14761_v7 = vld [vmem:[%s17443_s24 + $0x364] ss:$8 sps:$4 sm:$0xff]  }
 0x3e2   : > { %12511 = vmatprep.subr.bf16.mxu0 %v14668_v8  ;;  %v14764_v8 = vld [vmem:[%s17443_s24 + $0xf64] ss:$8 sps:$4 sm:$0xff]  }
 0x3e4   : > { %11996 = vmatpush1.bf16.msra.mxu1 %v14663_v9  ;;  %v14759_v9 = vld [vmem:[%s17443_s24 + $0x360] ss:$8 sps:$4 sm:$0xff]  }
 0x3e5   : > { %12512 = vmatpush1.bf16.msra.mxu0 %v14666_v10  ;;  %11997 = vmatprep.subr.bf16.mxu1 %v14671_v11  ;;  %v14762_v10 = vld [vmem:[%s17443_s24 + $0xf60] ss:$8 sps:$4 sm:$0xff]   ;;  %v14767_v11 = vld [vmem:[%s17443_s24 + $0x374] ss:$8 sps:$4 sm:$0xff]  }
 0x3e6   : > { %12513 = vmatprep.subr.bf16.mxu0 %v14674_v12  ;;  %v14770_v12 = vld [vmem:[%s17443_s24 + $0xf74] ss:$8 sps:$4 sm:$0xff]  }
 0x3e8   : > { %11998 = vmatpush1.bf16.msra.mxu1 %v14669_v13  ;;  %v14765_v13 = vld [vmem:[%s17443_s24 + $0x370] ss:$8 sps:$4 sm:$0xff]  }
 0x3e9   : > { %12514 = vmatpush1.bf16.msra.mxu0 %v14672_v14  ;;  %11999 = vmatprep.subr.bf16.mxu1 %v14677_v15  ;;  %v14768_v14 = vld [vmem:[%s17443_s24 + $0xf70] ss:$8 sps:$4 sm:$0xff]   ;;  %v14773_v15 = vld [vmem:[%s17443_s24 + $0x384] ss:$8 sps:$4 sm:$0xff]  }
 0x3ea   : > { %12515 = vmatprep.subr.bf16.mxu0 %v14680_v16  ;;  %v14776_v16 = vld [vmem:[%s17443_s24 + $0xf84] ss:$8 sps:$4 sm:$0xff]  }
 0x3ec   : > { %12000 = vmatpush1.bf16.msra.mxu1 %v14675_v17  ;;  %v14771_v17 = vld [vmem:[%s17443_s24 + $0x380] ss:$8 sps:$4 sm:$0xff]  }
 0x3ed   : > { %12516 = vmatpush1.bf16.msra.mxu0 %v14678_v18  ;;  %12001 = vmatprep.subr.bf16.mxu1 %v14683_v19  ;;  %v14774_v18 = vld [vmem:[%s17443_s24 + $0xf80] ss:$8 sps:$4 sm:$0xff]   ;;  %v14779_v19 = vld [vmem:[%s17443_s24 + $0x394] ss:$8 sps:$4 sm:$0xff]  }
 0x3ee   : > { %12517 = vmatprep.subr.bf16.mxu0 %v14686_v20  ;;  %v14782_v20 = vld [vmem:[%s17443_s24 + $0xf94] ss:$8 sps:$4 sm:$0xff]  }
 0x3f0   : > { %12002 = vmatpush1.bf16.msra.mxu1 %v14681_v21  ;;  %v14777_v21 = vld [vmem:[%s17443_s24 + $0x390] ss:$8 sps:$4 sm:$0xff]  }
 0x3f1   : > { %12518 = vmatpush1.bf16.msra.mxu0 %v14684_v22  ;;  %12003 = vmatprep.subr.bf16.mxu1 %v14689_v23  ;;  %v14780_v22 = vld [vmem:[%s17443_s24 + $0xf90] ss:$8 sps:$4 sm:$0xff]   ;;  %v14785_v23 = vld [vmem:[%s17443_s24 + $0x3a4] ss:$8 sps:$4 sm:$0xff]  }
 0x3f2   : > { %12519 = vmatprep.subr.bf16.mxu0 %v14692_v24  ;;  %v14788_v24 = vld [vmem:[%s17443_s24 + $0xfa4] ss:$8 sps:$4 sm:$0xff]  }
 0x3f4   : > { %12004 = vmatpush1.bf16.msra.mxu1 %v14687_v25  ;;  %v14783_v25 = vld [vmem:[%s17443_s24 + $0x3a0] ss:$8 sps:$4 sm:$0xff]  }
 0x3f5   : > { %12520 = vmatpush1.bf16.msra.mxu0 %v14690_v26  ;;  %12005 = vmatprep.subr.bf16.mxu1 %v14695_v27  ;;  %v14786_v26 = vld [vmem:[%s17443_s24 + $0xfa0] ss:$8 sps:$4 sm:$0xff]   ;;  %v14791_v27 = vld [vmem:[%s17443_s24 + $0x3b4] ss:$8 sps:$4 sm:$0xff]  }
 0x3f6   : > { %12521 = vmatprep.subr.bf16.mxu0 %v14698_v28  ;;  %v14794_v28 = vld [vmem:[%s17443_s24 + $0xfb4] ss:$8 sps:$4 sm:$0xff]  }
 0x3f8   : > { %12006 = vmatpush1.bf16.msra.mxu1 %v14693_v29  ;;  %v14789_v29 = vld [vmem:[%s17443_s24 + $0x3b0] ss:$8 sps:$4 sm:$0xff]  }
 0x3f9   : > { %12522 = vmatpush1.bf16.msra.mxu0 %v14696_v30  ;;  %12007 = vmatprep.subr.bf16.mxu1 %v14701_v31  ;;  %v14792_v30 = vld [vmem:[%s17443_s24 + $0xfb0] ss:$8 sps:$4 sm:$0xff]   ;;  %v14797_v31 = vld [vmem:[%s17443_s24 + $0x3c4] ss:$8 sps:$4 sm:$0xff]  }
 0x3fa   : > { %12523 = vmatprep.subr.bf16.mxu0 %v14704_v32  ;;  %v14800_v32 = vld [vmem:[%s17443_s24 + $0xfc4] ss:$8 sps:$4 sm:$0xff]  }
 0x3fc   : > { %12008 = vmatpush1.bf16.msra.mxu1 %v14699_v33  ;;  %v14795_v33 = vld [vmem:[%s17443_s24 + $0x3c0] ss:$8 sps:$4 sm:$0xff]  }
 0x3fd   : > { %12524 = vmatpush1.bf16.msra.mxu0 %v14702_v34  ;;  %12009 = vmatprep.subr.bf16.mxu1 %v14707_v35  ;;  %v14798_v34 = vld [vmem:[%s17443_s24 + $0xfc0] ss:$8 sps:$4 sm:$0xff]   ;;  %v14803_v35 = vld [vmem:[%s17443_s24 + $0x3d4] ss:$8 sps:$4 sm:$0xff]  }
 0x3fe   : > { %12525 = vmatprep.subr.bf16.mxu0 %v14710_v36  ;;  %v14806_v36 = vld [vmem:[%s17443_s24 + $0xfd4] ss:$8 sps:$4 sm:$0xff]  }
 0x400   : > { %12010 = vmatpush1.bf16.msra.mxu1 %v14705_v37  ;;  %v14801_v37 = vld [vmem:[%s17443_s24 + $0x3d0] ss:$8 sps:$4 sm:$0xff]  }
 0x401   : > { %12526 = vmatpush1.bf16.msra.mxu0 %v14708_v38  ;;  %12011 = vmatprep.subr.bf16.mxu1 %v14713_v39  ;;  %v14804_v38 = vld [vmem:[%s17443_s24 + $0xfd0] ss:$8 sps:$4 sm:$0xff]   ;;  %v14809_v39 = vld [vmem:[%s17443_s24 + $0x3e4] ss:$8 sps:$4 sm:$0xff]  }
 0x402   : > { %12527 = vmatprep.subr.bf16.mxu0 %v14716_v40  ;;  %v14812_v40 = vld [vmem:[%s17443_s24 + $0xfe4] ss:$8 sps:$4 sm:$0xff]  }
 0x404   : > { %12012 = vmatpush1.bf16.msra.mxu1 %v14711_v41  ;;  %v14807_v41 = vld [vmem:[%s17443_s24 + $0x3e0] ss:$8 sps:$4 sm:$0xff]  }
 0x405   : > { %12528 = vmatpush1.bf16.msra.mxu0 %v14714_v42  ;;  %12024 = vmatprep.subr.bf16.mxu1 %v14722_v43  ;;  %v14810_v42 = vld [vmem:[%s17443_s24 + $0xfe0] ss:$8 sps:$4 sm:$0xff]   ;;  %v14815_v43 = vld [vmem:[%s17443_s24 + $0x3f4] ss:$8 sps:$4 sm:$0xff]  }
 0x406   : > { %12540 = vmatprep.subr.bf16.mxu0 %v14728_v44  ;;  %v14818_v44 = vld [vmem:[%s17443_s24 + $0xff4] ss:$8 sps:$4 sm:$0xff]  }
 0x407   : > { %12014 = vmatmul.mubr.bf16.vlgmr.msra.gmra.mrb[0].mxu1 %v14717_v45  ;;  %v14813_v45 = vld [vmem:[%s17443_s24 + $0x3f0] ss:$8 sps:$4 sm:$0xff]  }
 0x408   : > { %12530 = vmatmul.mubr.bf16.vlgmr.msra.gmra.mrb[0].mxu0 %v14723_v47  ;;  %12025 = vmatpush1.bf16.msra.mxu1 %v14720_v46  ;;  %v14816_v46 = vld [vmem:[%s17443_s24 + $0xff0] ss:$8 sps:$4 sm:$0xff]   ;;  %v14824_v47 = vld [vmem:[%s17443_s24 + $0x404] ss:$8 sps:$4 sm:$0xff]  }
 0x409   : > { %12541 = vmatpush1.bf16.msra.mxu0 %v14726_v48  ;;  %12026 = vmatprep.subr.bf16.mxu1 %v14731_v49  ;;  %v14830_v48 = vld [vmem:[%s17443_s24 + $0x1004] ss:$8 sps:$4 sm:$0xff]   ;;  %v14819_v49 = vld [vmem:[%s18464_s0 + $0x18] ss:$200 sps:$4 sm:$0xff]  }
 0x40a   : > { %12542 = vmatprep.subr.bf16.mxu0 %v14734_v50  ;;  %12056 = vmatprep.mubr.bf16.mxu1 %v14821_v51  ;;  %v14822_v50 = vld [vmem:[%s17443_s24 + $0x400] ss:$8 sps:$4 sm:$0xff]  }
 0x40b   : > { %12572 = vmatprep.mubr.bf16.mxu0 %v14827_v52  ;;  %v14825_v51 = vld [vmem:[%s18464_s0 + $0x78] ss:$200 sps:$4 sm:$0xff]  }
 0x40c   : > { %12027 = vmatpush1.bf16.msra.mxu1 %v14729_v53  ;;  %v14828_v52 = vld [vmem:[%s17443_s24 + $0x1000] ss:$8 sps:$4 sm:$0xff]   ;;  %v14833_v53 = vld [vmem:[%s17443_s24 + $0x414] ss:$8 sps:$4 sm:$0xff]  }
 0x40d   : > { %12543 = vmatpush1.bf16.msra.mxu0 %v14732_v54  ;;  %12028 = vmatprep.subr.bf16.mxu1 %v14737_v55  ;;  %v14836_v54 = vld [vmem:[%s17443_s24 + $0x1014] ss:$8 sps:$4 sm:$0xff]  }
 0x40e   : > { %12544 = vmatprep.subr.bf16.mxu0 %v14740_v56  ;;  %v14923_v55 = vld [vmem:[%s18464_s0 + $0x24] ss:$200 sps:$4 sm:$0xff]  }
 0x40f   : > { %v14929_v56 = vld [vmem:[%s18464_s0 + $0x84] ss:$200 sps:$4 sm:$0xff]  }
 0x410   : > { %12029 = vmatpush1.bf16.msra.mxu1 %v14735_v57  ;;  %v14831_v57 = vld [vmem:[%s17443_s24 + $0x410] ss:$8 sps:$4 sm:$0xff]  }
 0x411   : > { %12545 = vmatpush1.bf16.msra.mxu0 %v14738_v58  ;;  %12030 = vmatprep.subr.bf16.mxu1 %v14743_v59  ;;  %v14834_v58 = vld [vmem:[%s17443_s24 + $0x1010] ss:$8 sps:$4 sm:$0xff]   ;;  %v14839_v59 = vld [vmem:[%s17443_s24 + $0x424] ss:$8 sps:$4 sm:$0xff]  }
 0x412   : > { %12546 = vmatprep.subr.bf16.mxu0 %v14746_v60  ;;  %v14842_v60 = vld [vmem:[%s17443_s24 + $0x1024] ss:$8 sps:$4 sm:$0xff]  }
 0x414   : > { %12031 = vmatpush1.bf16.msra.mxu1 %v14741_v61  ;;  %v14837_v61 = vld [vmem:[%s17443_s24 + $0x420] ss:$8 sps:$4 sm:$0xff]  }
 0x415   : > { %12547 = vmatpush1.bf16.msra.mxu0 %v14744_v62  ;;  %12032 = vmatprep.subr.bf16.mxu1 %v14749_v63  ;;  %v14840_v62 = vld [vmem:[%s17443_s24 + $0x1020] ss:$8 sps:$4 sm:$0xff]   ;;  %v14845_v63 = vld [vmem:[%s17443_s24 + $0x434] ss:$8 sps:$4 sm:$0xff]  }
 0x416   : > { %12548 = vmatprep.subr.bf16.mxu0 %v14752_v0  ;;  %v14848_v0 = vld [vmem:[%s17443_s24 + $0x1034] ss:$8 sps:$4 sm:$0xff]  }
 0x418   : > { %12033 = vmatpush1.bf16.msra.mxu1 %v14747_v1  ;;  %v14843_v1 = vld [vmem:[%s17443_s24 + $0x430] ss:$8 sps:$4 sm:$0xff]  }
 0x419   : > { %12549 = vmatpush1.bf16.msra.mxu0 %v14750_v2  ;;  %12034 = vmatprep.subr.bf16.mxu1 %v14755_v3  ;;  %v14846_v2 = vld [vmem:[%s17443_s24 + $0x1030] ss:$8 sps:$4 sm:$0xff]   ;;  %v14851_v3 = vld [vmem:[%s17443_s24 + $0x444] ss:$8 sps:$4 sm:$0xff]  }
 0x41a   : > { %12550 = vmatprep.subr.bf16.mxu0 %v14758_v4  ;;  %v14854_v4 = vld [vmem:[%s17443_s24 + $0x1044] ss:$8 sps:$4 sm:$0xff]  }
 0x41c   : > { %12035 = vmatpush1.bf16.msra.mxu1 %v14753_v5  ;;  %v14849_v5 = vld [vmem:[%s17443_s24 + $0x440] ss:$8 sps:$4 sm:$0xff]  }
 0x41d   : > { %12551 = vmatpush1.bf16.msra.mxu0 %v14756_v6  ;;  %12036 = vmatprep.subr.bf16.mxu1 %v14761_v7  ;;  %v14852_v6 = vld [vmem:[%s17443_s24 + $0x1040] ss:$8 sps:$4 sm:$0xff]   ;;  %v14857_v7 = vld [vmem:[%s17443_s24 + $0x454] ss:$8 sps:$4 sm:$0xff]  }
 0x41e   : > { %12552 = vmatprep.subr.bf16.mxu0 %v14764_v8  ;;  %v14860_v8 = vld [vmem:[%s17443_s24 + $0x1054] ss:$8 sps:$4 sm:$0xff]  }
 0x420   : > { %12037 = vmatpush1.bf16.msra.mxu1 %v14759_v9  ;;  %v14855_v9 = vld [vmem:[%s17443_s24 + $0x450] ss:$8 sps:$4 sm:$0xff]  }
 0x421   : > { %12553 = vmatpush1.bf16.msra.mxu0 %v14762_v10  ;;  %12038 = vmatprep.subr.bf16.mxu1 %v14767_v11  ;;  %v14858_v10 = vld [vmem:[%s17443_s24 + $0x1050] ss:$8 sps:$4 sm:$0xff]   ;;  %v14863_v11 = vld [vmem:[%s17443_s24 + $0x464] ss:$8 sps:$4 sm:$0xff]  }
 0x422   : > { %12554 = vmatprep.subr.bf16.mxu0 %v14770_v12  ;;  %v14866_v12 = vld [vmem:[%s17443_s24 + $0x1064] ss:$8 sps:$4 sm:$0xff]  }
 0x424   : > { %12039 = vmatpush1.bf16.msra.mxu1 %v14765_v13  ;;  %v14861_v13 = vld [vmem:[%s17443_s24 + $0x460] ss:$8 sps:$4 sm:$0xff]  }
 0x425   : > { %12555 = vmatpush1.bf16.msra.mxu0 %v14768_v14  ;;  %12040 = vmatprep.subr.bf16.mxu1 %v14773_v15  ;;  %v14864_v14 = vld [vmem:[%s17443_s24 + $0x1060] ss:$8 sps:$4 sm:$0xff]   ;;  %v14869_v15 = vld [vmem:[%s17443_s24 + $0x474] ss:$8 sps:$4 sm:$0xff]  }
 0x426   : > { %12556 = vmatprep.subr.bf16.mxu0 %v14776_v16  ;;  %v14872_v16 = vld [vmem:[%s17443_s24 + $0x1074] ss:$8 sps:$4 sm:$0xff]  }
 0x428   : > { %12041 = vmatpush1.bf16.msra.mxu1 %v14771_v17  ;;  %v14867_v17 = vld [vmem:[%s17443_s24 + $0x470] ss:$8 sps:$4 sm:$0xff]  }
 0x429   : > { %12557 = vmatpush1.bf16.msra.mxu0 %v14774_v18  ;;  %12042 = vmatprep.subr.bf16.mxu1 %v14779_v19  ;;  %v14870_v18 = vld [vmem:[%s17443_s24 + $0x1070] ss:$8 sps:$4 sm:$0xff]   ;;  %v14875_v19 = vld [vmem:[%s17443_s24 + $0x484] ss:$8 sps:$4 sm:$0xff]  }
 0x42a   : > { %12558 = vmatprep.subr.bf16.mxu0 %v14782_v20  ;;  %v14878_v20 = vld [vmem:[%s17443_s24 + $0x1084] ss:$8 sps:$4 sm:$0xff]  }
 0x42c   : > { %12043 = vmatpush1.bf16.msra.mxu1 %v14777_v21  ;;  %v14873_v21 = vld [vmem:[%s17443_s24 + $0x480] ss:$8 sps:$4 sm:$0xff]  }
 0x42d   : > { %12559 = vmatpush1.bf16.msra.mxu0 %v14780_v22  ;;  %12044 = vmatprep.subr.bf16.mxu1 %v14785_v23  ;;  %v14876_v22 = vld [vmem:[%s17443_s24 + $0x1080] ss:$8 sps:$4 sm:$0xff]   ;;  %v14881_v23 = vld [vmem:[%s17443_s24 + $0x494] ss:$8 sps:$4 sm:$0xff]  }
 0x42e   : > { %12560 = vmatprep.subr.bf16.mxu0 %v14788_v24  ;;  %v14884_v24 = vld [vmem:[%s17443_s24 + $0x1094] ss:$8 sps:$4 sm:$0xff]  }
 0x430   : > { %12045 = vmatpush1.bf16.msra.mxu1 %v14783_v25  ;;  %v14879_v25 = vld [vmem:[%s17443_s24 + $0x490] ss:$8 sps:$4 sm:$0xff]  }
 0x431   : > { %12561 = vmatpush1.bf16.msra.mxu0 %v14786_v26  ;;  %12046 = vmatprep.subr.bf16.mxu1 %v14791_v27  ;;  %v14882_v26 = vld [vmem:[%s17443_s24 + $0x1090] ss:$8 sps:$4 sm:$0xff]   ;;  %v14887_v27 = vld [vmem:[%s17443_s24 + $0x4a4] ss:$8 sps:$4 sm:$0xff]  }
 0x432   : > { %12562 = vmatprep.subr.bf16.mxu0 %v14794_v28  ;;  %v14890_v28 = vld [vmem:[%s17443_s24 + $0x10a4] ss:$8 sps:$4 sm:$0xff]  }
 0x434   : > { %12047 = vmatpush1.bf16.msra.mxu1 %v14789_v29  ;;  %v14885_v29 = vld [vmem:[%s17443_s24 + $0x4a0] ss:$8 sps:$4 sm:$0xff]  }
 0x435   : > { %12563 = vmatpush1.bf16.msra.mxu0 %v14792_v30  ;;  %12048 = vmatprep.subr.bf16.mxu1 %v14797_v31  ;;  %v14888_v30 = vld [vmem:[%s17443_s24 + $0x10a0] ss:$8 sps:$4 sm:$0xff]   ;;  %v14893_v31 = vld [vmem:[%s17443_s24 + $0x4b4] ss:$8 sps:$4 sm:$0xff]  }
 0x436   : > { %12564 = vmatprep.subr.bf16.mxu0 %v14800_v32  ;;  %v14896_v32 = vld [vmem:[%s17443_s24 + $0x10b4] ss:$8 sps:$4 sm:$0xff]  }
 0x438   : > { %12049 = vmatpush1.bf16.msra.mxu1 %v14795_v33  ;;  %v14891_v33 = vld [vmem:[%s17443_s24 + $0x4b0] ss:$8 sps:$4 sm:$0xff]  }
 0x439   : > { %12565 = vmatpush1.bf16.msra.mxu0 %v14798_v34  ;;  %12050 = vmatprep.subr.bf16.mxu1 %v14803_v35  ;;  %v14894_v34 = vld [vmem:[%s17443_s24 + $0x10b0] ss:$8 sps:$4 sm:$0xff]   ;;  %v14899_v35 = vld [vmem:[%s17443_s24 + $0x4c4] ss:$8 sps:$4 sm:$0xff]  }
 0x43a   : > { %12566 = vmatprep.subr.bf16.mxu0 %v14806_v36  ;;  %v14902_v36 = vld [vmem:[%s17443_s24 + $0x10c4] ss:$8 sps:$4 sm:$0xff]  }
 0x43c   : > { %12051 = vmatpush1.bf16.msra.mxu1 %v14801_v37  ;;  %v14897_v37 = vld [vmem:[%s17443_s24 + $0x4c0] ss:$8 sps:$4 sm:$0xff]  }
 0x43d   : > { %12567 = vmatpush1.bf16.msra.mxu0 %v14804_v38  ;;  %12052 = vmatprep.subr.bf16.mxu1 %v14809_v39  ;;  %v14900_v38 = vld [vmem:[%s17443_s24 + $0x10c0] ss:$8 sps:$4 sm:$0xff]   ;;  %v14905_v39 = vld [vmem:[%s17443_s24 + $0x4d4] ss:$8 sps:$4 sm:$0xff]  }
 0x43e   : > { %12568 = vmatprep.subr.bf16.mxu0 %v14812_v40  ;;  %v14908_v40 = vld [vmem:[%s17443_s24 + $0x10d4] ss:$8 sps:$4 sm:$0xff]  }
 0x440   : > { %12053 = vmatpush1.bf16.msra.mxu1 %v14807_v41  ;;  %v14903_v41 = vld [vmem:[%s17443_s24 + $0x4d0] ss:$8 sps:$4 sm:$0xff]  }
 0x441   : > { %12569 = vmatpush1.bf16.msra.mxu0 %v14810_v42  ;;  %12054 = vmatprep.subr.bf16.mxu1 %v14815_v43  ;;  %v14906_v42 = vld [vmem:[%s17443_s24 + $0x10d0] ss:$8 sps:$4 sm:$0xff]   ;;  %v14911_v43 = vld [vmem:[%s17443_s24 + $0x4e4] ss:$8 sps:$4 sm:$0xff]  }
 0x442   : > { %12570 = vmatprep.subr.bf16.mxu0 %v14818_v44  ;;  %v14914_v44 = vld [vmem:[%s17443_s24 + $0x10e4] ss:$8 sps:$4 sm:$0xff]  }
 0x444   : > { %12055 = vmatpush1.bf16.msra.mxu1 %v14813_v45  ;;  %v14909_v45 = vld [vmem:[%s17443_s24 + $0x4e0] ss:$8 sps:$4 sm:$0xff]  }
 0x445   : > { %12571 = vmatpush1.bf16.msra.mxu0 %v14816_v46  ;;  %12067 = vmatprep.subr.bf16.mxu1 %v14824_v47  ;;  %v14912_v46 = vld [vmem:[%s17443_s24 + $0x10e0] ss:$8 sps:$4 sm:$0xff]   ;;  %v14917_v47 = vld [vmem:[%s17443_s24 + $0x4f4] ss:$8 sps:$4 sm:$0xff]  }
 0x446   : > { %12583 = vmatprep.subr.bf16.mxu0 %v14830_v48  ;;  %v14920_v48 = vld [vmem:[%s17443_s24 + $0x10f4] ss:$8 sps:$4 sm:$0xff]  }
 0x447   : > { %12057 = vmatmul.mubr.bf16.vlgmr.msra.gmra.mrb[0].mxu1 %v14819_v49  ;;  %v14915_v49 = vld [vmem:[%s17443_s24 + $0x4f0] ss:$8 sps:$4 sm:$0xff]  }
 0x448   : > { %12573 = vmatmul.mubr.bf16.vlgmr.msra.gmra.mrb[0].mxu0 %v14825_v51  ;;  %12068 = vmatpush1.bf16.msra.mxu1 %v14822_v50  ;;  %v14918_v50 = vld [vmem:[%s17443_s24 + $0x10f0] ss:$8 sps:$4 sm:$0xff]   ;;  %v14926_v51 = vld [vmem:[%s17443_s24 + $0x504] ss:$8 sps:$4 sm:$0xff]  }
 0x449   : > { %12584 = vmatpush1.bf16.msra.mxu0 %v14828_v52  ;;  %12069 = vmatprep.subr.bf16.mxu1 %v14833_v53  ;;  %v14921_v52 = vld [vmem:[%s18464_s0 + $0x20] ss:$200 sps:$4 sm:$0xff]  }
 0x44a   : > { %12585 = vmatprep.subr.bf16.mxu0 %v14836_v54  ;;  %12099 = vmatprep.mubr.bf16.mxu1 %v14923_v55  ;;  %v14927_v53 = vld [vmem:[%s18464_s0 + $0x80] ss:$200 sps:$4 sm:$0xff]   ;;  %v14932_v54 = vld [vmem:[%s17443_s24 + $0x1104] ss:$8 sps:$4 sm:$0xff]   ;;  %v14924_v55 = vld [vmem:[%s17443_s24 + $0x500] ss:$8 sps:$4 sm:$0xff]  }
 0x44b   : > { %12615 = vmatprep.mubr.bf16.mxu0 %v14929_v56  ;;  %v14930_v56 = vld [vmem:[%s17443_s24 + $0x1100] ss:$8 sps:$4 sm:$0xff]  }
 0x44c   : > { %12070 = vmatpush1.bf16.msra.mxu1 %v14831_v57  ;;  %v14935_v57 = vld [vmem:[%s17443_s24 + $0x514] ss:$8 sps:$4 sm:$0xff]  }
 0x44d   : > { %12586 = vmatpush1.bf16.msra.mxu0 %v14834_v58  ;;  %12071 = vmatprep.subr.bf16.mxu1 %v14839_v59  ;;  %v14938_v58 = vld [vmem:[%s17443_s24 + $0x1114] ss:$8 sps:$4 sm:$0xff]  }
 0x44e   : > { %12587 = vmatprep.subr.bf16.mxu0 %v14842_v60  ;;  %v15025_v59 = vld [vmem:[%s18464_s0 + $0x2c] ss:$200 sps:$4 sm:$0xff]  }
 0x44f   : > { %v15031_v60 = vld [vmem:[%s18464_s0 + $0x8c] ss:$200 sps:$4 sm:$0xff]  }
 0x450   : > { %12072 = vmatpush1.bf16.msra.mxu1 %v14837_v61  ;;  %v14933_v61 = vld [vmem:[%s17443_s24 + $0x510] ss:$8 sps:$4 sm:$0xff]  }
 0x451   : > { %12588 = vmatpush1.bf16.msra.mxu0 %v14840_v62  ;;  %12073 = vmatprep.subr.bf16.mxu1 %v14845_v63  ;;  %v14936_v62 = vld [vmem:[%s17443_s24 + $0x1110] ss:$8 sps:$4 sm:$0xff]   ;;  %v14941_v63 = vld [vmem:[%s17443_s24 + $0x524] ss:$8 sps:$4 sm:$0xff]  }
 0x452   : > { %12589 = vmatprep.subr.bf16.mxu0 %v14848_v0  ;;  %v14944_v0 = vld [vmem:[%s17443_s24 + $0x1124] ss:$8 sps:$4 sm:$0xff]  }
 0x454   : > { %12074 = vmatpush1.bf16.msra.mxu1 %v14843_v1  ;;  %v14939_v1 = vld [vmem:[%s17443_s24 + $0x520] ss:$8 sps:$4 sm:$0xff]  }
 0x455   : > { %12590 = vmatpush1.bf16.msra.mxu0 %v14846_v2  ;;  %12075 = vmatprep.subr.bf16.mxu1 %v14851_v3  ;;  %v14942_v2 = vld [vmem:[%s17443_s24 + $0x1120] ss:$8 sps:$4 sm:$0xff]   ;;  %v14947_v3 = vld [vmem:[%s17443_s24 + $0x534] ss:$8 sps:$4 sm:$0xff]  }
 0x456   : > { %12591 = vmatprep.subr.bf16.mxu0 %v14854_v4  ;;  %v14950_v4 = vld [vmem:[%s17443_s24 + $0x1134] ss:$8 sps:$4 sm:$0xff]  }
 0x458   : > { %12076 = vmatpush1.bf16.msra.mxu1 %v14849_v5  ;;  %v14945_v5 = vld [vmem:[%s17443_s24 + $0x530] ss:$8 sps:$4 sm:$0xff]  }
 0x459   : > { %12592 = vmatpush1.bf16.msra.mxu0 %v14852_v6  ;;  %12077 = vmatprep.subr.bf16.mxu1 %v14857_v7  ;;  %v14948_v6 = vld [vmem:[%s17443_s24 + $0x1130] ss:$8 sps:$4 sm:$0xff]   ;;  %v14953_v7 = vld [vmem:[%s17443_s24 + $0x544] ss:$8 sps:$4 sm:$0xff]  }
 0x45a   : > { %12593 = vmatprep.subr.bf16.mxu0 %v14860_v8  ;;  %v14956_v8 = vld [vmem:[%s17443_s24 + $0x1144] ss:$8 sps:$4 sm:$0xff]  }
 0x45c   : > { %12078 = vmatpush1.bf16.msra.mxu1 %v14855_v9  ;;  %v14951_v9 = vld [vmem:[%s17443_s24 + $0x540] ss:$8 sps:$4 sm:$0xff]  }
 0x45d   : > { %12594 = vmatpush1.bf16.msra.mxu0 %v14858_v10  ;;  %12079 = vmatprep.subr.bf16.mxu1 %v14863_v11  ;;  %v14954_v10 = vld [vmem:[%s17443_s24 + $0x1140] ss:$8 sps:$4 sm:$0xff]   ;;  %v14959_v11 = vld [vmem:[%s17443_s24 + $0x554] ss:$8 sps:$4 sm:$0xff]  }
 0x45e   : > { %12595 = vmatprep.subr.bf16.mxu0 %v14866_v12  ;;  %v14962_v12 = vld [vmem:[%s17443_s24 + $0x1154] ss:$8 sps:$4 sm:$0xff]  }
 0x460   : > { %12080 = vmatpush1.bf16.msra.mxu1 %v14861_v13  ;;  %v14957_v13 = vld [vmem:[%s17443_s24 + $0x550] ss:$8 sps:$4 sm:$0xff]  }
 0x461   : > { %12596 = vmatpush1.bf16.msra.mxu0 %v14864_v14  ;;  %12081 = vmatprep.subr.bf16.mxu1 %v14869_v15  ;;  %v14960_v14 = vld [vmem:[%s17443_s24 + $0x1150] ss:$8 sps:$4 sm:$0xff]   ;;  %v14965_v15 = vld [vmem:[%s17443_s24 + $0x564] ss:$8 sps:$4 sm:$0xff]  }
 0x462   : > { %12597 = vmatprep.subr.bf16.mxu0 %v14872_v16  ;;  %v14968_v16 = vld [vmem:[%s17443_s24 + $0x1164] ss:$8 sps:$4 sm:$0xff]  }
 0x464   : > { %12082 = vmatpush1.bf16.msra.mxu1 %v14867_v17  ;;  %v14963_v17 = vld [vmem:[%s17443_s24 + $0x560] ss:$8 sps:$4 sm:$0xff]  }
 0x465   : > { %12598 = vmatpush1.bf16.msra.mxu0 %v14870_v18  ;;  %12083 = vmatprep.subr.bf16.mxu1 %v14875_v19  ;;  %v14966_v18 = vld [vmem:[%s17443_s24 + $0x1160] ss:$8 sps:$4 sm:$0xff]   ;;  %v14971_v19 = vld [vmem:[%s17443_s24 + $0x574] ss:$8 sps:$4 sm:$0xff]  }
 0x466   : > { %12599 = vmatprep.subr.bf16.mxu0 %v14878_v20  ;;  %v14974_v20 = vld [vmem:[%s17443_s24 + $0x1174] ss:$8 sps:$4 sm:$0xff]  }
 0x468   : > { %12084 = vmatpush1.bf16.msra.mxu1 %v14873_v21  ;;  %v14969_v21 = vld [vmem:[%s17443_s24 + $0x570] ss:$8 sps:$4 sm:$0xff]  }
 0x469   : > { %12600 = vmatpush1.bf16.msra.mxu0 %v14876_v22  ;;  %12085 = vmatprep.subr.bf16.mxu1 %v14881_v23  ;;  %v14972_v22 = vld [vmem:[%s17443_s24 + $0x1170] ss:$8 sps:$4 sm:$0xff]   ;;  %v14977_v23 = vld [vmem:[%s17443_s24 + $0x584] ss:$8 sps:$4 sm:$0xff]  }
 0x46a   : > { %12601 = vmatprep.subr.bf16.mxu0 %v14884_v24  ;;  %v14980_v24 = vld [vmem:[%s17443_s24 + $0x1184] ss:$8 sps:$4 sm:$0xff]  }
 0x46c   : > { %12086 = vmatpush1.bf16.msra.mxu1 %v14879_v25  ;;  %v14975_v25 = vld [vmem:[%s17443_s24 + $0x580] ss:$8 sps:$4 sm:$0xff]  }
 0x46d   : > { %12602 = vmatpush1.bf16.msra.mxu0 %v14882_v26  ;;  %12087 = vmatprep.subr.bf16.mxu1 %v14887_v27  ;;  %v14978_v26 = vld [vmem:[%s17443_s24 + $0x1180] ss:$8 sps:$4 sm:$0xff]   ;;  %v14983_v27 = vld [vmem:[%s17443_s24 + $0x594] ss:$8 sps:$4 sm:$0xff]  }
 0x46e   : > { %12603 = vmatprep.subr.bf16.mxu0 %v14890_v28  ;;  %v14986_v28 = vld [vmem:[%s17443_s24 + $0x1194] ss:$8 sps:$4 sm:$0xff]  }
 0x470   : > { %12088 = vmatpush1.bf16.msra.mxu1 %v14885_v29  ;;  %v14981_v29 = vld [vmem:[%s17443_s24 + $0x590] ss:$8 sps:$4 sm:$0xff]  }
 0x471   : > { %12604 = vmatpush1.bf16.msra.mxu0 %v14888_v30  ;;  %12089 = vmatprep.subr.bf16.mxu1 %v14893_v31  ;;  %v14984_v30 = vld [vmem:[%s17443_s24 + $0x1190] ss:$8 sps:$4 sm:$0xff]   ;;  %v14989_v31 = vld [vmem:[%s17443_s24 + $0x5a4] ss:$8 sps:$4 sm:$0xff]  }
 0x472   : > { %12605 = vmatprep.subr.bf16.mxu0 %v14896_v32  ;;  %v14992_v32 = vld [vmem:[%s17443_s24 + $0x11a4] ss:$8 sps:$4 sm:$0xff]  }
 0x474   : > { %12090 = vmatpush1.bf16.msra.mxu1 %v14891_v33  ;;  %v14987_v33 = vld [vmem:[%s17443_s24 + $0x5a0] ss:$8 sps:$4 sm:$0xff]  }
 0x475   : > { %12606 = vmatpush1.bf16.msra.mxu0 %v14894_v34  ;;  %12091 = vmatprep.subr.bf16.mxu1 %v14899_v35  ;;  %v14990_v34 = vld [vmem:[%s17443_s24 + $0x11a0] ss:$8 sps:$4 sm:$0xff]   ;;  %v14995_v35 = vld [vmem:[%s17443_s24 + $0x5b4] ss:$8 sps:$4 sm:$0xff]  }
 0x476   : > { %12607 = vmatprep.subr.bf16.mxu0 %v14902_v36  ;;  %v14998_v36 = vld [vmem:[%s17443_s24 + $0x11b4] ss:$8 sps:$4 sm:$0xff]  }
 0x478   : > { %12092 = vmatpush1.bf16.msra.mxu1 %v14897_v37  ;;  %v14993_v37 = vld [vmem:[%s17443_s24 + $0x5b0] ss:$8 sps:$4 sm:$0xff]  }
 0x479   : > { %12608 = vmatpush1.bf16.msra.mxu0 %v14900_v38  ;;  %12093 = vmatprep.subr.bf16.mxu1 %v14905_v39  ;;  %v14996_v38 = vld [vmem:[%s17443_s24 + $0x11b0] ss:$8 sps:$4 sm:$0xff]   ;;  %v15001_v39 = vld [vmem:[%s17443_s24 + $0x5c4] ss:$8 sps:$4 sm:$0xff]  }
 0x47a   : > { %12609 = vmatprep.subr.bf16.mxu0 %v14908_v40  ;;  %v15004_v40 = vld [vmem:[%s17443_s24 + $0x11c4] ss:$8 sps:$4 sm:$0xff]  }
 0x47c   : > { %12094 = vmatpush1.bf16.msra.mxu1 %v14903_v41  ;;  %v14999_v41 = vld [vmem:[%s17443_s24 + $0x5c0] ss:$8 sps:$4 sm:$0xff]  }
 0x47d   : > { %12610 = vmatpush1.bf16.msra.mxu0 %v14906_v42  ;;  %12095 = vmatprep.subr.bf16.mxu1 %v14911_v43  ;;  %v15002_v42 = vld [vmem:[%s17443_s24 + $0x11c0] ss:$8 sps:$4 sm:$0xff]   ;;  %v15007_v43 = vld [vmem:[%s17443_s24 + $0x5d4] ss:$8 sps:$4 sm:$0xff]  }
 0x47e   : > { %12611 = vmatprep.subr.bf16.mxu0 %v14914_v44  ;;  %v15010_v44 = vld [vmem:[%s17443_s24 + $0x11d4] ss:$8 sps:$4 sm:$0xff]  }
 0x480   : > { %12096 = vmatpush1.bf16.msra.mxu1 %v14909_v45  ;;  %v15005_v45 = vld [vmem:[%s17443_s24 + $0x5d0] ss:$8 sps:$4 sm:$0xff]  }
 0x481   : > { %12612 = vmatpush1.bf16.msra.mxu0 %v14912_v46  ;;  %12097 = vmatprep.subr.bf16.mxu1 %v14917_v47  ;;  %v15008_v46 = vld [vmem:[%s17443_s24 + $0x11d0] ss:$8 sps:$4 sm:$0xff]   ;;  %v15013_v47 = vld [vmem:[%s17443_s24 + $0x5e4] ss:$8 sps:$4 sm:$0xff]  }
 0x482   : > { %12613 = vmatprep.subr.bf16.mxu0 %v14920_v48  ;;  %v15016_v48 = vld [vmem:[%s17443_s24 + $0x11e4] ss:$8 sps:$4 sm:$0xff]  }
 0x484   : > { %12098 = vmatpush1.bf16.msra.mxu1 %v14915_v49  ;;  %v15011_v49 = vld [vmem:[%s17443_s24 + $0x5e0] ss:$8 sps:$4 sm:$0xff]  }
 0x485   : > { %12614 = vmatpush1.bf16.msra.mxu0 %v14918_v50  ;;  %12110 = vmatprep.subr.bf16.mxu1 %v14926_v51  ;;  %v15014_v50 = vld [vmem:[%s17443_s24 + $0x11e0] ss:$8 sps:$4 sm:$0xff]   ;;  %v15019_v51 = vld [vmem:[%s17443_s24 + $0x5f4] ss:$8 sps:$4 sm:$0xff]  }
 0x486   : > { %12626 = vmatprep.subr.bf16.mxu0 %v14932_v54  ;;  %v15020_v54 = vld [vmem:[%s17443_s24 + $0x11f0] ss:$8 sps:$4 sm:$0xff]  }
 0x487   : > { %12100 = vmatmul.mubr.bf16.vlgmr.msra.gmra.mrb[0].mxu1 %v14921_v52  ;;  %v15022_v52 = vld [vmem:[%s17443_s24 + $0x11f4] ss:$8 sps:$4 sm:$0xff]  }
 0x488   : > { %12616 = vmatmul.mubr.bf16.vlgmr.msra.gmra.mrb[0].mxu0 %v14927_v53  ;;  %12111 = vmatpush1.bf16.msra.mxu1 %v14924_v55  ;;  %v15017_v53 = vld [vmem:[%s17443_s24 + $0x5f0] ss:$8 sps:$4 sm:$0xff]   ;;  %v15028_v55 = vld [vmem:[%s17443_s24 + $0x604] ss:$8 sps:$4 sm:$0xff]  }
 0x489   : > { %12627 = vmatpush1.bf16.msra.mxu0 %v14930_v56  ;;  %12112 = vmatprep.subr.bf16.mxu1 %v14935_v57  ;;  %v15023_v56 = vld [vmem:[%s18464_s0 + $0x28] ss:$200 sps:$4 sm:$0xff]  }
 0x48a   : > { %12628 = vmatprep.subr.bf16.mxu0 %v14938_v58  ;;  %12142 = vmatprep.mubr.bf16.mxu1 %v15025_v59  ;;  %v15029_v57 = vld [vmem:[%s18464_s0 + $0x88] ss:$200 sps:$4 sm:$0xff]   ;;  %v15034_v58 = vld [vmem:[%s17443_s24 + $0x1204] ss:$8 sps:$4 sm:$0xff]  }
 0x48b   : > { %12658 = vmatprep.mubr.bf16.mxu0 %v15031_v60  ;;  %v15026_v59 = vld [vmem:[%s17443_s24 + $0x600] ss:$8 sps:$4 sm:$0xff]  }
 0x48c   : > { %12113 = vmatpush1.bf16.msra.mxu1 %v14933_v61  ;;  %v15032_v60 = vld [vmem:[%s17443_s24 + $0x1200] ss:$8 sps:$4 sm:$0xff]   ;;  %v15037_v61 = vld [vmem:[%s17443_s24 + $0x614] ss:$8 sps:$4 sm:$0xff]  }
 0x48d   : > { %12629 = vmatpush1.bf16.msra.mxu0 %v14936_v62  ;;  %12114 = vmatprep.subr.bf16.mxu1 %v14941_v63  ;;  %v15040_v62 = vld [vmem:[%s17443_s24 + $0x1214] ss:$8 sps:$4 sm:$0xff]   ;;  %v15127_v63 = vld [vmem:[%s18464_s0 + $0x34] ss:$200 sps:$4 sm:$0xff]  }
 0x48e   : > { %12630 = vmatprep.subr.bf16.mxu0 %v14944_v0  ;;  %v15133_v0 = vld [vmem:[%s18464_s0 + $0x94] ss:$200 sps:$4 sm:$0xff]  }
 0x490   : > { %12115 = vmatpush1.bf16.msra.mxu1 %v14939_v1  ;;  %v15035_v1 = vld [vmem:[%s17443_s24 + $0x610] ss:$8 sps:$4 sm:$0xff]  }
 0x491   : > { %12631 = vmatpush1.bf16.msra.mxu0 %v14942_v2  ;;  %12116 = vmatprep.subr.bf16.mxu1 %v14947_v3  ;;  %v15038_v2 = vld [vmem:[%s17443_s24 + $0x1210] ss:$8 sps:$4 sm:$0xff]   ;;  %v15043_v3 = vld [vmem:[%s17443_s24 + $0x624] ss:$8 sps:$4 sm:$0xff]  }
 0x492   : > { %12632 = vmatprep.subr.bf16.mxu0 %v14950_v4  ;;  %v15046_v4 = vld [vmem:[%s17443_s24 + $0x1224] ss:$8 sps:$4 sm:$0xff]  }
 0x494   : > { %12117 = vmatpush1.bf16.msra.mxu1 %v14945_v5  ;;  %v15041_v5 = vld [vmem:[%s17443_s24 + $0x620] ss:$8 sps:$4 sm:$0xff]  }
 0x495   : > { %12633 = vmatpush1.bf16.msra.mxu0 %v14948_v6  ;;  %12118 = vmatprep.subr.bf16.mxu1 %v14953_v7  ;;  %v15044_v6 = vld [vmem:[%s17443_s24 + $0x1220] ss:$8 sps:$4 sm:$0xff]   ;;  %v15049_v7 = vld [vmem:[%s17443_s24 + $0x634] ss:$8 sps:$4 sm:$0xff]  }
 0x496   : > { %12634 = vmatprep.subr.bf16.mxu0 %v14956_v8  ;;  %v15052_v8 = vld [vmem:[%s17443_s24 + $0x1234] ss:$8 sps:$4 sm:$0xff]  }
 0x498   : > { %12119 = vmatpush1.bf16.msra.mxu1 %v14951_v9  ;;  %v15047_v9 = vld [vmem:[%s17443_s24 + $0x630] ss:$8 sps:$4 sm:$0xff]  }
 0x499   : > { %12635 = vmatpush1.bf16.msra.mxu0 %v14954_v10  ;;  %12120 = vmatprep.subr.bf16.mxu1 %v14959_v11  ;;  %v15050_v10 = vld [vmem:[%s17443_s24 + $0x1230] ss:$8 sps:$4 sm:$0xff]   ;;  %v15055_v11 = vld [vmem:[%s17443_s24 + $0x644] ss:$8 sps:$4 sm:$0xff]  }
 0x49a   : > { %12636 = vmatprep.subr.bf16.mxu0 %v14962_v12  ;;  %v15058_v12 = vld [vmem:[%s17443_s24 + $0x1244] ss:$8 sps:$4 sm:$0xff]  }
 0x49c   : > { %12121 = vmatpush1.bf16.msra.mxu1 %v14957_v13  ;;  %v15053_v13 = vld [vmem:[%s17443_s24 + $0x640] ss:$8 sps:$4 sm:$0xff]  }
 0x49d   : > { %12637 = vmatpush1.bf16.msra.mxu0 %v14960_v14  ;;  %12122 = vmatprep.subr.bf16.mxu1 %v14965_v15  ;;  %v15056_v14 = vld [vmem:[%s17443_s24 + $0x1240] ss:$8 sps:$4 sm:$0xff]   ;;  %v15061_v15 = vld [vmem:[%s17443_s24 + $0x654] ss:$8 sps:$4 sm:$0xff]  }
 0x49e   : > { %12638 = vmatprep.subr.bf16.mxu0 %v14968_v16  ;;  %v15064_v16 = vld [vmem:[%s17443_s24 + $0x1254] ss:$8 sps:$4 sm:$0xff]  }
 0x4a0   : > { %12123 = vmatpush1.bf16.msra.mxu1 %v14963_v17  ;;  %v15059_v17 = vld [vmem:[%s17443_s24 + $0x650] ss:$8 sps:$4 sm:$0xff]  }
 0x4a1   : > { %12639 = vmatpush1.bf16.msra.mxu0 %v14966_v18  ;;  %12124 = vmatprep.subr.bf16.mxu1 %v14971_v19  ;;  %v15062_v18 = vld [vmem:[%s17443_s24 + $0x1250] ss:$8 sps:$4 sm:$0xff]   ;;  %v15067_v19 = vld [vmem:[%s17443_s24 + $0x664] ss:$8 sps:$4 sm:$0xff]  }
 0x4a2   : > { %12640 = vmatprep.subr.bf16.mxu0 %v14974_v20  ;;  %v15070_v20 = vld [vmem:[%s17443_s24 + $0x1264] ss:$8 sps:$4 sm:$0xff]  }
 0x4a4   : > { %12125 = vmatpush1.bf16.msra.mxu1 %v14969_v21  ;;  %v15065_v21 = vld [vmem:[%s17443_s24 + $0x660] ss:$8 sps:$4 sm:$0xff]  }
 0x4a5   : > { %12641 = vmatpush1.bf16.msra.mxu0 %v14972_v22  ;;  %12126 = vmatprep.subr.bf16.mxu1 %v14977_v23  ;;  %v15068_v22 = vld [vmem:[%s17443_s24 + $0x1260] ss:$8 sps:$4 sm:$0xff]   ;;  %v15073_v23 = vld [vmem:[%s17443_s24 + $0x674] ss:$8 sps:$4 sm:$0xff]  }
 0x4a6   : > { %12642 = vmatprep.subr.bf16.mxu0 %v14980_v24  ;;  %v15076_v24 = vld [vmem:[%s17443_s24 + $0x1274] ss:$8 sps:$4 sm:$0xff]  }
 0x4a8   : > { %12127 = vmatpush1.bf16.msra.mxu1 %v14975_v25  ;;  %v15071_v25 = vld [vmem:[%s17443_s24 + $0x670] ss:$8 sps:$4 sm:$0xff]  }
 0x4a9   : > { %12643 = vmatpush1.bf16.msra.mxu0 %v14978_v26  ;;  %12128 = vmatprep.subr.bf16.mxu1 %v14983_v27  ;;  %v15074_v26 = vld [vmem:[%s17443_s24 + $0x1270] ss:$8 sps:$4 sm:$0xff]   ;;  %v15079_v27 = vld [vmem:[%s17443_s24 + $0x684] ss:$8 sps:$4 sm:$0xff]  }
 0x4aa   : > { %12644 = vmatprep.subr.bf16.mxu0 %v14986_v28  ;;  %v15082_v28 = vld [vmem:[%s17443_s24 + $0x1284] ss:$8 sps:$4 sm:$0xff]  }
 0x4ac   : > { %12129 = vmatpush1.bf16.msra.mxu1 %v14981_v29  ;;  %v15077_v29 = vld [vmem:[%s17443_s24 + $0x680] ss:$8 sps:$4 sm:$0xff]  }
 0x4ad   : > { %12645 = vmatpush1.bf16.msra.mxu0 %v14984_v30  ;;  %12130 = vmatprep.subr.bf16.mxu1 %v14989_v31  ;;  %v15080_v30 = vld [vmem:[%s17443_s24 + $0x1280] ss:$8 sps:$4 sm:$0xff]   ;;  %v15085_v31 = vld [vmem:[%s17443_s24 + $0x694] ss:$8 sps:$4 sm:$0xff]  }
 0x4ae   : > { %12646 = vmatprep.subr.bf16.mxu0 %v14992_v32  ;;  %v15088_v32 = vld [vmem:[%s17443_s24 + $0x1294] ss:$8 sps:$4 sm:$0xff]  }
 0x4b0   : > { %12131 = vmatpush1.bf16.msra.mxu1 %v14987_v33  ;;  %v15083_v33 = vld [vmem:[%s17443_s24 + $0x690] ss:$8 sps:$4 sm:$0xff]  }
 0x4b1   : > { %12647 = vmatpush1.bf16.msra.mxu0 %v14990_v34  ;;  %12132 = vmatprep.subr.bf16.mxu1 %v14995_v35  ;;  %v15086_v34 = vld [vmem:[%s17443_s24 + $0x1290] ss:$8 sps:$4 sm:$0xff]   ;;  %v15091_v35 = vld [vmem:[%s17443_s24 + $0x6a4] ss:$8 sps:$4 sm:$0xff]  }
 0x4b2   : > { %12648 = vmatprep.subr.bf16.mxu0 %v14998_v36  ;;  %v15094_v36 = vld [vmem:[%s17443_s24 + $0x12a4] ss:$8 sps:$4 sm:$0xff]  }
 0x4b4   : > { %12133 = vmatpush1.bf16.msra.mxu1 %v14993_v37  ;;  %v15089_v37 = vld [vmem:[%s17443_s24 + $0x6a0] ss:$8 sps:$4 sm:$0xff]  }
 0x4b5   : > { %12649 = vmatpush1.bf16.msra.mxu0 %v14996_v38  ;;  %12134 = vmatprep.subr.bf16.mxu1 %v15001_v39  ;;  %v15092_v38 = vld [vmem:[%s17443_s24 + $0x12a0] ss:$8 sps:$4 sm:$0xff]   ;;  %v15097_v39 = vld [vmem:[%s17443_s24 + $0x6b4] ss:$8 sps:$4 sm:$0xff]  }
 0x4b6   : > { %12650 = vmatprep.subr.bf16.mxu0 %v15004_v40  ;;  %v15100_v40 = vld [vmem:[%s17443_s24 + $0x12b4] ss:$8 sps:$4 sm:$0xff]  }
 0x4b8   : > { %12135 = vmatpush1.bf16.msra.mxu1 %v14999_v41  ;;  %v15095_v41 = vld [vmem:[%s17443_s24 + $0x6b0] ss:$8 sps:$4 sm:$0xff]  }
 0x4b9   : > { %12651 = vmatpush1.bf16.msra.mxu0 %v15002_v42  ;;  %12136 = vmatprep.subr.bf16.mxu1 %v15007_v43  ;;  %v15098_v42 = vld [vmem:[%s17443_s24 + $0x12b0] ss:$8 sps:$4 sm:$0xff]   ;;  %v15103_v43 = vld [vmem:[%s17443_s24 + $0x6c4] ss:$8 sps:$4 sm:$0xff]  }
 0x4ba   : > { %12652 = vmatprep.subr.bf16.mxu0 %v15010_v44  ;;  %v15106_v44 = vld [vmem:[%s17443_s24 + $0x12c4] ss:$8 sps:$4 sm:$0xff]  }
 0x4bc   : > { %12137 = vmatpush1.bf16.msra.mxu1 %v15005_v45  ;;  %v15101_v45 = vld [vmem:[%s17443_s24 + $0x6c0] ss:$8 sps:$4 sm:$0xff]  }
 0x4bd   : > { %12653 = vmatpush1.bf16.msra.mxu0 %v15008_v46  ;;  %12138 = vmatprep.subr.bf16.mxu1 %v15013_v47  ;;  %v15104_v46 = vld [vmem:[%s17443_s24 + $0x12c0] ss:$8 sps:$4 sm:$0xff]   ;;  %v15109_v47 = vld [vmem:[%s17443_s24 + $0x6d4] ss:$8 sps:$4 sm:$0xff]  }
 0x4be   : > { %12654 = vmatprep.subr.bf16.mxu0 %v15016_v48  ;;  %v15112_v48 = vld [vmem:[%s17443_s24 + $0x12d4] ss:$8 sps:$4 sm:$0xff]  }
 0x4c0   : > { %12139 = vmatpush1.bf16.msra.mxu1 %v15011_v49  ;;  %v15107_v49 = vld [vmem:[%s17443_s24 + $0x6d0] ss:$8 sps:$4 sm:$0xff]  }
 0x4c1   : > { %12655 = vmatpush1.bf16.msra.mxu0 %v15014_v50  ;;  %12140 = vmatprep.subr.bf16.mxu1 %v15019_v51  ;;  %v15110_v50 = vld [vmem:[%s17443_s24 + $0x12d0] ss:$8 sps:$4 sm:$0xff]   ;;  %v15115_v51 = vld [vmem:[%s17443_s24 + $0x6e4] ss:$8 sps:$4 sm:$0xff]  }
 0x4c2   : > { %12656 = vmatprep.subr.bf16.mxu0 %v15022_v52  ;;  %v15118_v52 = vld [vmem:[%s17443_s24 + $0x12e4] ss:$8 sps:$4 sm:$0xff]  }
 0x4c4   : > { %12141 = vmatpush1.bf16.msra.mxu1 %v15017_v53  ;;  %v15113_v53 = vld [vmem:[%s17443_s24 + $0x6e0] ss:$8 sps:$4 sm:$0xff]  }
 0x4c5   : > { %12657 = vmatpush1.bf16.msra.mxu0 %v15020_v54  ;;  %12153 = vmatprep.subr.bf16.mxu1 %v15028_v55  ;;  %v15116_v54 = vld [vmem:[%s17443_s24 + $0x12e0] ss:$8 sps:$4 sm:$0xff]   ;;  %v15121_v55 = vld [vmem:[%s17443_s24 + $0x6f4] ss:$8 sps:$4 sm:$0xff]  }
 0x4c6   : > { %12669 = vmatprep.subr.bf16.mxu0 %v15034_v58  ;;  %v15122_v58 = vld [vmem:[%s17443_s24 + $0x12f0] ss:$8 sps:$4 sm:$0xff]  }
 0x4c7   : > { %12143 = vmatmul.mubr.bf16.vlgmr.msra.gmra.mrb[0].mxu1 %v15023_v56  ;;  %v15124_v56 = vld [vmem:[%s17443_s24 + $0x12f4] ss:$8 sps:$4 sm:$0xff]  }
 0x4c8   : > { %12659 = vmatmul.mubr.bf16.vlgmr.msra.gmra.mrb[0].mxu0 %v15029_v57  ;;  %12154 = vmatpush1.bf16.msra.mxu1 %v15026_v59  ;;  %v15119_v57 = vld [vmem:[%s17443_s24 + $0x6f0] ss:$8 sps:$4 sm:$0xff]   ;;  %v15130_v59 = vld [vmem:[%s17443_s24 + $0x704] ss:$8 sps:$4 sm:$0xff]  }
 0x4c9   : > { %12670 = vmatpush1.bf16.msra.mxu0 %v15032_v60  ;;  %12155 = vmatprep.subr.bf16.mxu1 %v15037_v61  ;;  %v15125_v60 = vld [vmem:[%s18464_s0 + $0x30] ss:$200 sps:$4 sm:$0xff]  }
 0x4ca   : > { %12671 = vmatprep.subr.bf16.mxu0 %v15040_v62  ;;  %12185 = vmatprep.mubr.bf16.mxu1 %v15127_v63  ;;  %v15131_v61 = vld [vmem:[%s18464_s0 + $0x90] ss:$200 sps:$4 sm:$0xff]   ;;  %v15136_v62 = vld [vmem:[%s17443_s24 + $0x1304] ss:$8 sps:$4 sm:$0xff]  }
 0x4cb   : > { %12701 = vmatprep.mubr.bf16.mxu0 %v15133_v0  ;;  %v15128_v63 = vld [vmem:[%s17443_s24 + $0x700] ss:$8 sps:$4 sm:$0xff]  }
 0x4cc   : > { %12156 = vmatpush1.bf16.msra.mxu1 %v15035_v1  ;;  %v15134_v0 = vld [vmem:[%s17443_s24 + $0x1300] ss:$8 sps:$4 sm:$0xff]   ;;  %v15139_v1 = vld [vmem:[%s17443_s24 + $0x714] ss:$8 sps:$4 sm:$0xff]  }
 0x4cd   : > { %12672 = vmatpush1.bf16.msra.mxu0 %v15038_v2  ;;  %12157 = vmatprep.subr.bf16.mxu1 %v15043_v3  ;;  %v15142_v2 = vld [vmem:[%s17443_s24 + $0x1314] ss:$8 sps:$4 sm:$0xff]  }
 0x4ce   : > { %12673 = vmatprep.subr.bf16.mxu0 %v15046_v4  ;;  %v15229_v3 = vld [vmem:[%s18464_s0 + $0x3c] ss:$200 sps:$4 sm:$0xff]  }
 0x4cf   : > { %v15235_v4 = vld [vmem:[%s18464_s0 + $0x9c] ss:$200 sps:$4 sm:$0xff]  }
 0x4d0   : > { %12158 = vmatpush1.bf16.msra.mxu1 %v15041_v5  ;;  %v15137_v5 = vld [vmem:[%s17443_s24 + $0x710] ss:$8 sps:$4 sm:$0xff]  }
 0x4d1   : > { %12674 = vmatpush1.bf16.msra.mxu0 %v15044_v6  ;;  %12159 = vmatprep.subr.bf16.mxu1 %v15049_v7  ;;  %v15140_v6 = vld [vmem:[%s17443_s24 + $0x1310] ss:$8 sps:$4 sm:$0xff]   ;;  %v15145_v7 = vld [vmem:[%s17443_s24 + $0x724] ss:$8 sps:$4 sm:$0xff]  }
 0x4d2   : > { %12675 = vmatprep.subr.bf16.mxu0 %v15052_v8  ;;  %v15148_v8 = vld [vmem:[%s17443_s24 + $0x1324] ss:$8 sps:$4 sm:$0xff]  }
 0x4d4   : > { %12160 = vmatpush1.bf16.msra.mxu1 %v15047_v9  ;;  %v15143_v9 = vld [vmem:[%s17443_s24 + $0x720] ss:$8 sps:$4 sm:$0xff]  }
 0x4d5   : > { %12676 = vmatpush1.bf16.msra.mxu0 %v15050_v10  ;;  %12161 = vmatprep.subr.bf16.mxu1 %v15055_v11  ;;  %v15146_v10 = vld [vmem:[%s17443_s24 + $0x1320] ss:$8 sps:$4 sm:$0xff]   ;;  %v15151_v11 = vld [vmem:[%s17443_s24 + $0x734] ss:$8 sps:$4 sm:$0xff]  }
 0x4d6   : > { %12677 = vmatprep.subr.bf16.mxu0 %v15058_v12  ;;  %v15154_v12 = vld [vmem:[%s17443_s24 + $0x1334] ss:$8 sps:$4 sm:$0xff]  }
 0x4d8   : > { %12162 = vmatpush1.bf16.msra.mxu1 %v15053_v13  ;;  %v15149_v13 = vld [vmem:[%s17443_s24 + $0x730] ss:$8 sps:$4 sm:$0xff]  }
 0x4d9   : > { %12678 = vmatpush1.bf16.msra.mxu0 %v15056_v14  ;;  %12163 = vmatprep.subr.bf16.mxu1 %v15061_v15  ;;  %v15152_v14 = vld [vmem:[%s17443_s24 + $0x1330] ss:$8 sps:$4 sm:$0xff]   ;;  %v15157_v15 = vld [vmem:[%s17443_s24 + $0x744] ss:$8 sps:$4 sm:$0xff]  }
 0x4da   : > { %12679 = vmatprep.subr.bf16.mxu0 %v15064_v16  ;;  %v15160_v16 = vld [vmem:[%s17443_s24 + $0x1344] ss:$8 sps:$4 sm:$0xff]  }
 0x4dc   : > { %12164 = vmatpush1.bf16.msra.mxu1 %v15059_v17  ;;  %v15155_v17 = vld [vmem:[%s17443_s24 + $0x740] ss:$8 sps:$4 sm:$0xff]  }
 0x4dd   : > { %12680 = vmatpush1.bf16.msra.mxu0 %v15062_v18  ;;  %12165 = vmatprep.subr.bf16.mxu1 %v15067_v19  ;;  %v15158_v18 = vld [vmem:[%s17443_s24 + $0x1340] ss:$8 sps:$4 sm:$0xff]   ;;  %v15163_v19 = vld [vmem:[%s17443_s24 + $0x754] ss:$8 sps:$4 sm:$0xff]  }
 0x4de   : > { %12681 = vmatprep.subr.bf16.mxu0 %v15070_v20  ;;  %v15166_v20 = vld [vmem:[%s17443_s24 + $0x1354] ss:$8 sps:$4 sm:$0xff]  }
 0x4e0   : > { %12166 = vmatpush1.bf16.msra.mxu1 %v15065_v21  ;;  %v15161_v21 = vld [vmem:[%s17443_s24 + $0x750] ss:$8 sps:$4 sm:$0xff]  }
 0x4e1   : > { %12682 = vmatpush1.bf16.msra.mxu0 %v15068_v22  ;;  %12167 = vmatprep.subr.bf16.mxu1 %v15073_v23  ;;  %v15164_v22 = vld [vmem:[%s17443_s24 + $0x1350] ss:$8 sps:$4 sm:$0xff]   ;;  %v15169_v23 = vld [vmem:[%s17443_s24 + $0x764] ss:$8 sps:$4 sm:$0xff]  }
 0x4e2   : > { %12683 = vmatprep.subr.bf16.mxu0 %v15076_v24  ;;  %v15172_v24 = vld [vmem:[%s17443_s24 + $0x1364] ss:$8 sps:$4 sm:$0xff]  }
 0x4e4   : > { %12168 = vmatpush1.bf16.msra.mxu1 %v15071_v25  ;;  %v15167_v25 = vld [vmem:[%s17443_s24 + $0x760] ss:$8 sps:$4 sm:$0xff]  }
 0x4e5   : > { %12684 = vmatpush1.bf16.msra.mxu0 %v15074_v26  ;;  %12169 = vmatprep.subr.bf16.mxu1 %v15079_v27  ;;  %v15170_v26 = vld [vmem:[%s17443_s24 + $0x1360] ss:$8 sps:$4 sm:$0xff]   ;;  %v15175_v27 = vld [vmem:[%s17443_s24 + $0x774] ss:$8 sps:$4 sm:$0xff]  }
 0x4e6   : > { %12685 = vmatprep.subr.bf16.mxu0 %v15082_v28  ;;  %v15178_v28 = vld [vmem:[%s17443_s24 + $0x1374] ss:$8 sps:$4 sm:$0xff]  }
 0x4e8   : > { %12170 = vmatpush1.bf16.msra.mxu1 %v15077_v29  ;;  %v15173_v29 = vld [vmem:[%s17443_s24 + $0x770] ss:$8 sps:$4 sm:$0xff]  }
 0x4e9   : > { %12686 = vmatpush1.bf16.msra.mxu0 %v15080_v30  ;;  %12171 = vmatprep.subr.bf16.mxu1 %v15085_v31  ;;  %v15176_v30 = vld [vmem:[%s17443_s24 + $0x1370] ss:$8 sps:$4 sm:$0xff]   ;;  %v15181_v31 = vld [vmem:[%s17443_s24 + $0x784] ss:$8 sps:$4 sm:$0xff]  }
 0x4ea   : > { %12687 = vmatprep.subr.bf16.mxu0 %v15088_v32  ;;  %v15184_v32 = vld [vmem:[%s17443_s24 + $0x1384] ss:$8 sps:$4 sm:$0xff]  }
 0x4ec   : > { %12172 = vmatpush1.bf16.msra.mxu1 %v15083_v33  ;;  %v15179_v33 = vld [vmem:[%s17443_s24 + $0x780] ss:$8 sps:$4 sm:$0xff]  }
 0x4ed   : > { %12688 = vmatpush1.bf16.msra.mxu0 %v15086_v34  ;;  %12173 = vmatprep.subr.bf16.mxu1 %v15091_v35  ;;  %v15182_v34 = vld [vmem:[%s17443_s24 + $0x1380] ss:$8 sps:$4 sm:$0xff]   ;;  %v15187_v35 = vld [vmem:[%s17443_s24 + $0x794] ss:$8 sps:$4 sm:$0xff]  }
 0x4ee   : > { %12689 = vmatprep.subr.bf16.mxu0 %v15094_v36  ;;  %v15190_v36 = vld [vmem:[%s17443_s24 + $0x1394] ss:$8 sps:$4 sm:$0xff]  }
 0x4f0   : > { %12174 = vmatpush1.bf16.msra.mxu1 %v15089_v37  ;;  %v15185_v37 = vld [vmem:[%s17443_s24 + $0x790] ss:$8 sps:$4 sm:$0xff]  }
 0x4f1   : > { %12690 = vmatpush1.bf16.msra.mxu0 %v15092_v38  ;;  %12175 = vmatprep.subr.bf16.mxu1 %v15097_v39  ;;  %v15188_v38 = vld [vmem:[%s17443_s24 + $0x1390] ss:$8 sps:$4 sm:$0xff]   ;;  %v15193_v39 = vld [vmem:[%s17443_s24 + $0x7a4] ss:$8 sps:$4 sm:$0xff]  }
 0x4f2   : > { %12691 = vmatprep.subr.bf16.mxu0 %v15100_v40  ;;  %v15196_v40 = vld [vmem:[%s17443_s24 + $0x13a4] ss:$8 sps:$4 sm:$0xff]  }
 0x4f4   : > { %12176 = vmatpush1.bf16.msra.mxu1 %v15095_v41  ;;  %v15191_v41 = vld [vmem:[%s17443_s24 + $0x7a0] ss:$8 sps:$4 sm:$0xff]  }
 0x4f5   : > { %12692 = vmatpush1.bf16.msra.mxu0 %v15098_v42  ;;  %12177 = vmatprep.subr.bf16.mxu1 %v15103_v43  ;;  %v15194_v42 = vld [vmem:[%s17443_s24 + $0x13a0] ss:$8 sps:$4 sm:$0xff]   ;;  %v15199_v43 = vld [vmem:[%s17443_s24 + $0x7b4] ss:$8 sps:$4 sm:$0xff]  }
 0x4f6   : > { %12693 = vmatprep.subr.bf16.mxu0 %v15106_v44  ;;  %v15202_v44 = vld [vmem:[%s17443_s24 + $0x13b4] ss:$8 sps:$4 sm:$0xff]  }
 0x4f8   : > { %12178 = vmatpush1.bf16.msra.mxu1 %v15101_v45  ;;  %v15197_v45 = vld [vmem:[%s17443_s24 + $0x7b0] ss:$8 sps:$4 sm:$0xff]  }
 0x4f9   : > { %12694 = vmatpush1.bf16.msra.mxu0 %v15104_v46  ;;  %12179 = vmatprep.subr.bf16.mxu1 %v15109_v47  ;;  %v15200_v46 = vld [vmem:[%s17443_s24 + $0x13b0] ss:$8 sps:$4 sm:$0xff]   ;;  %v15205_v47 = vld [vmem:[%s17443_s24 + $0x7c4] ss:$8 sps:$4 sm:$0xff]  }
 0x4fa   : > { %12695 = vmatprep.subr.bf16.mxu0 %v15112_v48  ;;  %v15208_v48 = vld [vmem:[%s17443_s24 + $0x13c4] ss:$8 sps:$4 sm:$0xff]  }
 0x4fc   : > { %12180 = vmatpush1.bf16.msra.mxu1 %v15107_v49  ;;  %v15203_v49 = vld [vmem:[%s17443_s24 + $0x7c0] ss:$8 sps:$4 sm:$0xff]  }
 0x4fd   : > { %12696 = vmatpush1.bf16.msra.mxu0 %v15110_v50  ;;  %12181 = vmatprep.subr.bf16.mxu1 %v15115_v51  ;;  %v15206_v50 = vld [vmem:[%s17443_s24 + $0x13c0] ss:$8 sps:$4 sm:$0xff]   ;;  %v15211_v51 = vld [vmem:[%s17443_s24 + $0x7d4] ss:$8 sps:$4 sm:$0xff]  }
 0x4fe   : > { %12697 = vmatprep.subr.bf16.mxu0 %v15118_v52  ;;  %v15214_v52 = vld [vmem:[%s17443_s24 + $0x13d4] ss:$8 sps:$4 sm:$0xff]  }
 0x500   : > { %12182 = vmatpush1.bf16.msra.mxu1 %v15113_v53  ;;  %v15209_v53 = vld [vmem:[%s17443_s24 + $0x7d0] ss:$8 sps:$4 sm:$0xff]  }
 0x501   : > { %12698 = vmatpush1.bf16.msra.mxu0 %v15116_v54  ;;  %12183 = vmatprep.subr.bf16.mxu1 %v15121_v55  ;;  %v15212_v54 = vld [vmem:[%s17443_s24 + $0x13d0] ss:$8 sps:$4 sm:$0xff]   ;;  %v15217_v55 = vld [vmem:[%s17443_s24 + $0x7e4] ss:$8 sps:$4 sm:$0xff]  }
 0x502   : > { %12699 = vmatprep.subr.bf16.mxu0 %v15124_v56  ;;  %v15220_v56 = vld [vmem:[%s17443_s24 + $0x13e4] ss:$8 sps:$4 sm:$0xff]  }
 0x504   : > { %12184 = vmatpush1.bf16.msra.mxu1 %v15119_v57  ;;  %v15215_v57 = vld [vmem:[%s17443_s24 + $0x7e0] ss:$8 sps:$4 sm:$0xff]  }
 0x505   : > { %12700 = vmatpush1.bf16.msra.mxu0 %v15122_v58  ;;  %12196 = vmatprep.subr.bf16.mxu1 %v15130_v59  ;;  %v15218_v58 = vld [vmem:[%s17443_s24 + $0x13e0] ss:$8 sps:$4 sm:$0xff]   ;;  %v15223_v59 = vld [vmem:[%s17443_s24 + $0x7f4] ss:$8 sps:$4 sm:$0xff]  }
 0x506   : > { %12712 = vmatprep.subr.bf16.mxu0 %v15136_v62  ;;  %v15224_v62 = vld [vmem:[%s17443_s24 + $0x13f0] ss:$8 sps:$4 sm:$0xff]  }
 0x507   : > { %12186 = vmatmul.mubr.bf16.vlgmr.msra.gmra.mrb[0].mxu1 %v15125_v60  ;;  %v15226_v60 = vld [vmem:[%s17443_s24 + $0x13f4] ss:$8 sps:$4 sm:$0xff]  }
 0x508   : > { %12702 = vmatmul.mubr.bf16.vlgmr.msra.gmra.mrb[0].mxu0 %v15131_v61  ;;  %12197 = vmatpush1.bf16.msra.mxu1 %v15128_v63  ;;  %v15221_v61 = vld [vmem:[%s17443_s24 + $0x7f0] ss:$8 sps:$4 sm:$0xff]   ;;  %v15232_v63 = vld [vmem:[%s17443_s24 + $0x804] ss:$8 sps:$4 sm:$0xff]  }
 0x509   : > { %12713 = vmatpush1.bf16.msra.mxu0 %v15134_v0  ;;  %12198 = vmatprep.subr.bf16.mxu1 %v15139_v1  ;;  %v15227_v0 = vld [vmem:[%s18464_s0 + $0x38] ss:$200 sps:$4 sm:$0xff]  }
 0x50a   : > { %12714 = vmatprep.subr.bf16.mxu0 %v15142_v2  ;;  %12228 = vmatprep.mubr.bf16.mxu1 %v15229_v3  ;;  %v15233_v1 = vld [vmem:[%s18464_s0 + $0x98] ss:$200 sps:$4 sm:$0xff]   ;;  %v15238_v2 = vld [vmem:[%s17443_s24 + $0x1404] ss:$8 sps:$4 sm:$0xff]  }
 0x50b   : > { %12744 = vmatprep.mubr.bf16.mxu0 %v15235_v4  ;;  %v15230_v3 = vld [vmem:[%s17443_s24 + $0x800] ss:$8 sps:$4 sm:$0xff]  }
 0x50c   : > { %12199 = vmatpush1.bf16.msra.mxu1 %v15137_v5  ;;  %v15236_v4 = vld [vmem:[%s17443_s24 + $0x1400] ss:$8 sps:$4 sm:$0xff]   ;;  %v15241_v5 = vld [vmem:[%s17443_s24 + $0x814] ss:$8 sps:$4 sm:$0xff]  }
 0x50d   : > { %12715 = vmatpush1.bf16.msra.mxu0 %v15140_v6  ;;  %12200 = vmatprep.subr.bf16.mxu1 %v15145_v7  ;;  %v15244_v6 = vld [vmem:[%s17443_s24 + $0x1414] ss:$8 sps:$4 sm:$0xff]  }
 0x50e   : > { %12716 = vmatprep.subr.bf16.mxu0 %v15148_v8  ;;  %v15331_v7 = vld [vmem:[%s18464_s0 + $0x44] ss:$200 sps:$4 sm:$0xff]  }
 0x50f   : > { %v15337_v8 = vld [vmem:[%s18464_s0 + $0xa4] ss:$200 sps:$4 sm:$0xff]  }
 0x510   : > { %12201 = vmatpush1.bf16.msra.mxu1 %v15143_v9  ;;  %v15239_v9 = vld [vmem:[%s17443_s24 + $0x810] ss:$8 sps:$4 sm:$0xff]  }
 0x511   : > { %12717 = vmatpush1.bf16.msra.mxu0 %v15146_v10  ;;  %12202 = vmatprep.subr.bf16.mxu1 %v15151_v11  ;;  %v15242_v10 = vld [vmem:[%s17443_s24 + $0x1410] ss:$8 sps:$4 sm:$0xff]   ;;  %v15247_v11 = vld [vmem:[%s17443_s24 + $0x824] ss:$8 sps:$4 sm:$0xff]  }
 0x512   : > { %12718 = vmatprep.subr.bf16.mxu0 %v15154_v12  ;;  %v15250_v12 = vld [vmem:[%s17443_s24 + $0x1424] ss:$8 sps:$4 sm:$0xff]  }
 0x514   : > { %12203 = vmatpush1.bf16.msra.mxu1 %v15149_v13  ;;  %v15245_v13 = vld [vmem:[%s17443_s24 + $0x820] ss:$8 sps:$4 sm:$0xff]  }
 0x515   : > { %12719 = vmatpush1.bf16.msra.mxu0 %v15152_v14  ;;  %12204 = vmatprep.subr.bf16.mxu1 %v15157_v15  ;;  %v15248_v14 = vld [vmem:[%s17443_s24 + $0x1420] ss:$8 sps:$4 sm:$0xff]   ;;  %v15253_v15 = vld [vmem:[%s17443_s24 + $0x834] ss:$8 sps:$4 sm:$0xff]  }
 0x516   : > { %12720 = vmatprep.subr.bf16.mxu0 %v15160_v16  ;;  %v15256_v16 = vld [vmem:[%s17443_s24 + $0x1434] ss:$8 sps:$4 sm:$0xff]  }
 0x518   : > { %12205 = vmatpush1.bf16.msra.mxu1 %v15155_v17  ;;  %v15251_v17 = vld [vmem:[%s17443_s24 + $0x830] ss:$8 sps:$4 sm:$0xff]  }
 0x519   : > { %12721 = vmatpush1.bf16.msra.mxu0 %v15158_v18  ;;  %12206 = vmatprep.subr.bf16.mxu1 %v15163_v19  ;;  %v15254_v18 = vld [vmem:[%s17443_s24 + $0x1430] ss:$8 sps:$4 sm:$0xff]   ;;  %v15259_v19 = vld [vmem:[%s17443_s24 + $0x844] ss:$8 sps:$4 sm:$0xff]  }
 0x51a   : > { %12722 = vmatprep.subr.bf16.mxu0 %v15166_v20  ;;  %v15262_v20 = vld [vmem:[%s17443_s24 + $0x1444] ss:$8 sps:$4 sm:$0xff]  }
 0x51c   : > { %12207 = vmatpush1.bf16.msra.mxu1 %v15161_v21  ;;  %v15257_v21 = vld [vmem:[%s17443_s24 + $0x840] ss:$8 sps:$4 sm:$0xff]  }
 0x51d   : > { %12723 = vmatpush1.bf16.msra.mxu0 %v15164_v22  ;;  %12208 = vmatprep.subr.bf16.mxu1 %v15169_v23  ;;  %v15260_v22 = vld [vmem:[%s17443_s24 + $0x1440] ss:$8 sps:$4 sm:$0xff]   ;;  %v15265_v23 = vld [vmem:[%s17443_s24 + $0x854] ss:$8 sps:$4 sm:$0xff]  }
 0x51e   : > { %12724 = vmatprep.subr.bf16.mxu0 %v15172_v24  ;;  %v15268_v24 = vld [vmem:[%s17443_s24 + $0x1454] ss:$8 sps:$4 sm:$0xff]  }
 0x520   : > { %12209 = vmatpush1.bf16.msra.mxu1 %v15167_v25  ;;  %v15263_v25 = vld [vmem:[%s17443_s24 + $0x850] ss:$8 sps:$4 sm:$0xff]  }
 0x521   : > { %12725 = vmatpush1.bf16.msra.mxu0 %v15170_v26  ;;  %12210 = vmatprep.subr.bf16.mxu1 %v15175_v27  ;;  %v15266_v26 = vld [vmem:[%s17443_s24 + $0x1450] ss:$8 sps:$4 sm:$0xff]   ;;  %v15271_v27 = vld [vmem:[%s17443_s24 + $0x864] ss:$8 sps:$4 sm:$0xff]  }
 0x522   : > { %12726 = vmatprep.subr.bf16.mxu0 %v15178_v28  ;;  %v15274_v28 = vld [vmem:[%s17443_s24 + $0x1464] ss:$8 sps:$4 sm:$0xff]  }
 0x524   : > { %12211 = vmatpush1.bf16.msra.mxu1 %v15173_v29  ;;  %v15269_v29 = vld [vmem:[%s17443_s24 + $0x860] ss:$8 sps:$4 sm:$0xff]  }
 0x525   : > { %12727 = vmatpush1.bf16.msra.mxu0 %v15176_v30  ;;  %12212 = vmatprep.subr.bf16.mxu1 %v15181_v31  ;;  %v15272_v30 = vld [vmem:[%s17443_s24 + $0x1460] ss:$8 sps:$4 sm:$0xff]   ;;  %v15277_v31 = vld [vmem:[%s17443_s24 + $0x874] ss:$8 sps:$4 sm:$0xff]  }
 0x526   : > { %12728 = vmatprep.subr.bf16.mxu0 %v15184_v32  ;;  %v15280_v32 = vld [vmem:[%s17443_s24 + $0x1474] ss:$8 sps:$4 sm:$0xff]  }
 0x528   : > { %12213 = vmatpush1.bf16.msra.mxu1 %v15179_v33  ;;  %v15275_v33 = vld [vmem:[%s17443_s24 + $0x870] ss:$8 sps:$4 sm:$0xff]  }
 0x529   : > { %12729 = vmatpush1.bf16.msra.mxu0 %v15182_v34  ;;  %12214 = vmatprep.subr.bf16.mxu1 %v15187_v35  ;;  %v15278_v34 = vld [vmem:[%s17443_s24 + $0x1470] ss:$8 sps:$4 sm:$0xff]   ;;  %v15283_v35 = vld [vmem:[%s17443_s24 + $0x884] ss:$8 sps:$4 sm:$0xff]  }
 0x52a   : > { %12730 = vmatprep.subr.bf16.mxu0 %v15190_v36  ;;  %v15286_v36 = vld [vmem:[%s17443_s24 + $0x1484] ss:$8 sps:$4 sm:$0xff]  }
 0x52c   : > { %12215 = vmatpush1.bf16.msra.mxu1 %v15185_v37  ;;  %v15281_v37 = vld [vmem:[%s17443_s24 + $0x880] ss:$8 sps:$4 sm:$0xff]  }
 0x52d   : > { %12731 = vmatpush1.bf16.msra.mxu0 %v15188_v38  ;;  %12216 = vmatprep.subr.bf16.mxu1 %v15193_v39  ;;  %v15284_v38 = vld [vmem:[%s17443_s24 + $0x1480] ss:$8 sps:$4 sm:$0xff]   ;;  %v15289_v39 = vld [vmem:[%s17443_s24 + $0x894] ss:$8 sps:$4 sm:$0xff]  }
 0x52e   : > { %12732 = vmatprep.subr.bf16.mxu0 %v15196_v40  ;;  %v15292_v40 = vld [vmem:[%s17443_s24 + $0x1494] ss:$8 sps:$4 sm:$0xff]  }
 0x530   : > { %12217 = vmatpush1.bf16.msra.mxu1 %v15191_v41  ;;  %v15287_v41 = vld [vmem:[%s17443_s24 + $0x890] ss:$8 sps:$4 sm:$0xff]  }
 0x531   : > { %12733 = vmatpush1.bf16.msra.mxu0 %v15194_v42  ;;  %12218 = vmatprep.subr.bf16.mxu1 %v15199_v43  ;;  %v15290_v42 = vld [vmem:[%s17443_s24 + $0x1490] ss:$8 sps:$4 sm:$0xff]   ;;  %v15295_v43 = vld [vmem:[%s17443_s24 + $0x8a4] ss:$8 sps:$4 sm:$0xff]  }
 0x532   : > { %12734 = vmatprep.subr.bf16.mxu0 %v15202_v44  ;;  %v15298_v44 = vld [vmem:[%s17443_s24 + $0x14a4] ss:$8 sps:$4 sm:$0xff]  }
 0x534   : > { %12219 = vmatpush1.bf16.msra.mxu1 %v15197_v45  ;;  %v15293_v45 = vld [vmem:[%s17443_s24 + $0x8a0] ss:$8 sps:$4 sm:$0xff]  }
 0x535   : > { %12735 = vmatpush1.bf16.msra.mxu0 %v15200_v46  ;;  %12220 = vmatprep.subr.bf16.mxu1 %v15205_v47  ;;  %v15296_v46 = vld [vmem:[%s17443_s24 + $0x14a0] ss:$8 sps:$4 sm:$0xff]   ;;  %v15301_v47 = vld [vmem:[%s17443_s24 + $0x8b4] ss:$8 sps:$4 sm:$0xff]  }
 0x536   : > { %12736 = vmatprep.subr.bf16.mxu0 %v15208_v48  ;;  %v15304_v48 = vld [vmem:[%s17443_s24 + $0x14b4] ss:$8 sps:$4 sm:$0xff]  }
 0x538   : > { %12221 = vmatpush1.bf16.msra.mxu1 %v15203_v49  ;;  %v15299_v49 = vld [vmem:[%s17443_s24 + $0x8b0] ss:$8 sps:$4 sm:$0xff]  }
 0x539   : > { %12737 = vmatpush1.bf16.msra.mxu0 %v15206_v50  ;;  %12222 = vmatprep.subr.bf16.mxu1 %v15211_v51  ;;  %v15302_v50 = vld [vmem:[%s17443_s24 + $0x14b0] ss:$8 sps:$4 sm:$0xff]   ;;  %v15307_v51 = vld [vmem:[%s17443_s24 + $0x8c4] ss:$8 sps:$4 sm:$0xff]  }
 0x53a   : > { %12738 = vmatprep.subr.bf16.mxu0 %v15214_v52  ;;  %v15310_v52 = vld [vmem:[%s17443_s24 + $0x14c4] ss:$8 sps:$4 sm:$0xff]  }
 0x53c   : > { %12223 = vmatpush1.bf16.msra.mxu1 %v15209_v53  ;;  %v15305_v53 = vld [vmem:[%s17443_s24 + $0x8c0] ss:$8 sps:$4 sm:$0xff]  }
 0x53d   : > { %12739 = vmatpush1.bf16.msra.mxu0 %v15212_v54  ;;  %12224 = vmatprep.subr.bf16.mxu1 %v15217_v55  ;;  %v15308_v54 = vld [vmem:[%s17443_s24 + $0x14c0] ss:$8 sps:$4 sm:$0xff]   ;;  %v15313_v55 = vld [vmem:[%s17443_s24 + $0x8d4] ss:$8 sps:$4 sm:$0xff]  }
 0x53e   : > { %12740 = vmatprep.subr.bf16.mxu0 %v15220_v56  ;;  %v15316_v56 = vld [vmem:[%s17443_s24 + $0x14d4] ss:$8 sps:$4 sm:$0xff]  }
 0x540   : > { %12225 = vmatpush1.bf16.msra.mxu1 %v15215_v57  ;;  %v15311_v57 = vld [vmem:[%s17443_s24 + $0x8d0] ss:$8 sps:$4 sm:$0xff]  }
 0x541   : > { %12741 = vmatpush1.bf16.msra.mxu0 %v15218_v58  ;;  %12226 = vmatprep.subr.bf16.mxu1 %v15223_v59  ;;  %v15314_v58 = vld [vmem:[%s17443_s24 + $0x14d0] ss:$8 sps:$4 sm:$0xff]   ;;  %v15319_v59 = vld [vmem:[%s17443_s24 + $0x8e4] ss:$8 sps:$4 sm:$0xff]  }
 0x542   : > { %12742 = vmatprep.subr.bf16.mxu0 %v15226_v60  ;;  %v15322_v60 = vld [vmem:[%s17443_s24 + $0x14e4] ss:$8 sps:$4 sm:$0xff]  }
 0x544   : > { %12227 = vmatpush1.bf16.msra.mxu1 %v15221_v61  ;;  %v15317_v61 = vld [vmem:[%s17443_s24 + $0x8e0] ss:$8 sps:$4 sm:$0xff]  }
 0x545   : > { %12743 = vmatpush1.bf16.msra.mxu0 %v15224_v62  ;;  %12239 = vmatprep.subr.bf16.mxu1 %v15232_v63  ;;  %v15320_v62 = vld [vmem:[%s17443_s24 + $0x14e0] ss:$8 sps:$4 sm:$0xff]   ;;  %v15325_v63 = vld [vmem:[%s17443_s24 + $0x8f4] ss:$8 sps:$4 sm:$0xff]  }
 0x546   : > { %12755 = vmatprep.subr.bf16.mxu0 %v15238_v2  ;;  %v15326_v2 = vld [vmem:[%s17443_s24 + $0x14f0] ss:$8 sps:$4 sm:$0xff]  }
 0x547   : > { %12229 = vmatmul.mubr.bf16.vlgmr.msra.gmra.mrb[0].mxu1 %v15227_v0  ;;  %v15328_v0 = vld [vmem:[%s17443_s24 + $0x14f4] ss:$8 sps:$4 sm:$0xff]  }
 0x548   : > { %12745 = vmatmul.mubr.bf16.vlgmr.msra.gmra.mrb[0].mxu0 %v15233_v1  ;;  %12240 = vmatpush1.bf16.msra.mxu1 %v15230_v3  ;;  %v15323_v1 = vld [vmem:[%s17443_s24 + $0x8f0] ss:$8 sps:$4 sm:$0xff]   ;;  %v15334_v3 = vld [vmem:[%s17443_s24 + $0x904] ss:$8 sps:$4 sm:$0xff]  }
 0x549   : > { %12756 = vmatpush1.bf16.msra.mxu0 %v15236_v4  ;;  %12241 = vmatprep.subr.bf16.mxu1 %v15241_v5  ;;  %v15340_v4 = vld [vmem:[%s17443_s24 + $0x1504] ss:$8 sps:$4 sm:$0xff]   ;;  %v15329_v5 = vld [vmem:[%s18464_s0 + $0x40] ss:$200 sps:$4 sm:$0xff]  }
 0x54a   : > { %12757 = vmatprep.subr.bf16.mxu0 %v15244_v6  ;;  %12271 = vmatprep.mubr.bf16.mxu1 %v15331_v7  ;;  %v15335_v6 = vld [vmem:[%s18464_s0 + $0xa0] ss:$200 sps:$4 sm:$0xff]   ;;  %v15332_v7 = vld [vmem:[%s17443_s24 + $0x900] ss:$8 sps:$4 sm:$0xff]  }
 0x54b   : > { %12787 = vmatprep.mubr.bf16.mxu0 %v15337_v8  ;;  %v15338_v8 = vld [vmem:[%s17443_s24 + $0x1500] ss:$8 sps:$4 sm:$0xff]  }
 0x54c   : > { %12242 = vmatpush1.bf16.msra.mxu1 %v15239_v9  ;;  %v15343_v9 = vld [vmem:[%s17443_s24 + $0x914] ss:$8 sps:$4 sm:$0xff]  }
 0x54d   : > { %12758 = vmatpush1.bf16.msra.mxu0 %v15242_v10  ;;  %12243 = vmatprep.subr.bf16.mxu1 %v15247_v11  ;;  %v15346_v10 = vld [vmem:[%s17443_s24 + $0x1514] ss:$8 sps:$4 sm:$0xff]  }
 0x54e   : > { %12759 = vmatprep.subr.bf16.mxu0 %v15250_v12  ;;  %v15433_v11 = vld [vmem:[%s18464_s0 + $0x4c] ss:$200 sps:$4 sm:$0xff]  }
 0x54f   : > { %v15439_v12 = vld [vmem:[%s18464_s0 + $0xac] ss:$200 sps:$4 sm:$0xff]  }
 0x550   : > { %12244 = vmatpush1.bf16.msra.mxu1 %v15245_v13  ;;  %v15341_v13 = vld [vmem:[%s17443_s24 + $0x910] ss:$8 sps:$4 sm:$0xff]  }
 0x551   : > { %12760 = vmatpush1.bf16.msra.mxu0 %v15248_v14  ;;  %12245 = vmatprep.subr.bf16.mxu1 %v15253_v15  ;;  %v15344_v14 = vld [vmem:[%s17443_s24 + $0x1510] ss:$8 sps:$4 sm:$0xff]   ;;  %v15349_v15 = vld [vmem:[%s17443_s24 + $0x924] ss:$8 sps:$4 sm:$0xff]  }
 0x552   : > { %12761 = vmatprep.subr.bf16.mxu0 %v15256_v16  ;;  %v15352_v16 = vld [vmem:[%s17443_s24 + $0x1524] ss:$8 sps:$4 sm:$0xff]  }
 0x554   : > { %12246 = vmatpush1.bf16.msra.mxu1 %v15251_v17  ;;  %v15347_v17 = vld [vmem:[%s17443_s24 + $0x920] ss:$8 sps:$4 sm:$0xff]  }
 0x555   : > { %12762 = vmatpush1.bf16.msra.mxu0 %v15254_v18  ;;  %12247 = vmatprep.subr.bf16.mxu1 %v15259_v19  ;;  %v15350_v18 = vld [vmem:[%s17443_s24 + $0x1520] ss:$8 sps:$4 sm:$0xff]   ;;  %v15355_v19 = vld [vmem:[%s17443_s24 + $0x934] ss:$8 sps:$4 sm:$0xff]  }
 0x556   : > { %12763 = vmatprep.subr.bf16.mxu0 %v15262_v20  ;;  %v15358_v20 = vld [vmem:[%s17443_s24 + $0x1534] ss:$8 sps:$4 sm:$0xff]  }
 0x558   : > { %12248 = vmatpush1.bf16.msra.mxu1 %v15257_v21  ;;  %v15353_v21 = vld [vmem:[%s17443_s24 + $0x930] ss:$8 sps:$4 sm:$0xff]  }
 0x559   : > { %12764 = vmatpush1.bf16.msra.mxu0 %v15260_v22  ;;  %12249 = vmatprep.subr.bf16.mxu1 %v15265_v23  ;;  %v15356_v22 = vld [vmem:[%s17443_s24 + $0x1530] ss:$8 sps:$4 sm:$0xff]   ;;  %v15361_v23 = vld [vmem:[%s17443_s24 + $0x944] ss:$8 sps:$4 sm:$0xff]  }
 0x55a   : > { %12765 = vmatprep.subr.bf16.mxu0 %v15268_v24  ;;  %v15364_v24 = vld [vmem:[%s17443_s24 + $0x1544] ss:$8 sps:$4 sm:$0xff]  }
 0x55c   : > { %12250 = vmatpush1.bf16.msra.mxu1 %v15263_v25  ;;  %v15359_v25 = vld [vmem:[%s17443_s24 + $0x940] ss:$8 sps:$4 sm:$0xff]  }
 0x55d   : > { %12766 = vmatpush1.bf16.msra.mxu0 %v15266_v26  ;;  %12251 = vmatprep.subr.bf16.mxu1 %v15271_v27  ;;  %v15362_v26 = vld [vmem:[%s17443_s24 + $0x1540] ss:$8 sps:$4 sm:$0xff]   ;;  %v15367_v27 = vld [vmem:[%s17443_s24 + $0x954] ss:$8 sps:$4 sm:$0xff]  }
 0x55e   : > { %12767 = vmatprep.subr.bf16.mxu0 %v15274_v28  ;;  %v15370_v28 = vld [vmem:[%s17443_s24 + $0x1554] ss:$8 sps:$4 sm:$0xff]  }
 0x560   : > { %12252 = vmatpush1.bf16.msra.mxu1 %v15269_v29  ;;  %v15365_v29 = vld [vmem:[%s17443_s24 + $0x950] ss:$8 sps:$4 sm:$0xff]  }
 0x561   : > { %12768 = vmatpush1.bf16.msra.mxu0 %v15272_v30  ;;  %12253 = vmatprep.subr.bf16.mxu1 %v15277_v31  ;;  %v15368_v30 = vld [vmem:[%s17443_s24 + $0x1550] ss:$8 sps:$4 sm:$0xff]   ;;  %v15373_v31 = vld [vmem:[%s17443_s24 + $0x964] ss:$8 sps:$4 sm:$0xff]  }
 0x562   : > { %12769 = vmatprep.subr.bf16.mxu0 %v15280_v32  ;;  %v15376_v32 = vld [vmem:[%s17443_s24 + $0x1564] ss:$8 sps:$4 sm:$0xff]  }
 0x564   : > { %12254 = vmatpush1.bf16.msra.mxu1 %v15275_v33  ;;  %v15371_v33 = vld [vmem:[%s17443_s24 + $0x960] ss:$8 sps:$4 sm:$0xff]  }
 0x565   : > { %12770 = vmatpush1.bf16.msra.mxu0 %v15278_v34  ;;  %12255 = vmatprep.subr.bf16.mxu1 %v15283_v35  ;;  %v15374_v34 = vld [vmem:[%s17443_s24 + $0x1560] ss:$8 sps:$4 sm:$0xff]   ;;  %v15379_v35 = vld [vmem:[%s17443_s24 + $0x974] ss:$8 sps:$4 sm:$0xff]  }
 0x566   : > { %12771 = vmatprep.subr.bf16.mxu0 %v15286_v36  ;;  %v15382_v36 = vld [vmem:[%s17443_s24 + $0x1574] ss:$8 sps:$4 sm:$0xff]  }
 0x568   : > { %12256 = vmatpush1.bf16.msra.mxu1 %v15281_v37  ;;  %v15377_v37 = vld [vmem:[%s17443_s24 + $0x970] ss:$8 sps:$4 sm:$0xff]  }
 0x569   : > { %12772 = vmatpush1.bf16.msra.mxu0 %v15284_v38  ;;  %12257 = vmatprep.subr.bf16.mxu1 %v15289_v39  ;;  %v15380_v38 = vld [vmem:[%s17443_s24 + $0x1570] ss:$8 sps:$4 sm:$0xff]   ;;  %v15385_v39 = vld [vmem:[%s17443_s24 + $0x984] ss:$8 sps:$4 sm:$0xff]  }
 0x56a   : > { %12773 = vmatprep.subr.bf16.mxu0 %v15292_v40  ;;  %v15388_v40 = vld [vmem:[%s17443_s24 + $0x1584] ss:$8 sps:$4 sm:$0xff]  }
 0x56c   : > { %12258 = vmatpush1.bf16.msra.mxu1 %v15287_v41  ;;  %v15383_v41 = vld [vmem:[%s17443_s24 + $0x980] ss:$8 sps:$4 sm:$0xff]  }
 0x56d   : > { %12774 = vmatpush1.bf16.msra.mxu0 %v15290_v42  ;;  %12259 = vmatprep.subr.bf16.mxu1 %v15295_v43  ;;  %v15386_v42 = vld [vmem:[%s17443_s24 + $0x1580] ss:$8 sps:$4 sm:$0xff]   ;;  %v15391_v43 = vld [vmem:[%s17443_s24 + $0x994] ss:$8 sps:$4 sm:$0xff]  }
 0x56e   : > { %12775 = vmatprep.subr.bf16.mxu0 %v15298_v44  ;;  %v15394_v44 = vld [vmem:[%s17443_s24 + $0x1594] ss:$8 sps:$4 sm:$0xff]  }
 0x570   : > { %12260 = vmatpush1.bf16.msra.mxu1 %v15293_v45  ;;  %v15389_v45 = vld [vmem:[%s17443_s24 + $0x990] ss:$8 sps:$4 sm:$0xff]  }
 0x571   : > { %12776 = vmatpush1.bf16.msra.mxu0 %v15296_v46  ;;  %12261 = vmatprep.subr.bf16.mxu1 %v15301_v47  ;;  %v15392_v46 = vld [vmem:[%s17443_s24 + $0x1590] ss:$8 sps:$4 sm:$0xff]   ;;  %v15397_v47 = vld [vmem:[%s17443_s24 + $0x9a4] ss:$8 sps:$4 sm:$0xff]  }
 0x572   : > { %12777 = vmatprep.subr.bf16.mxu0 %v15304_v48  ;;  %v15400_v48 = vld [vmem:[%s17443_s24 + $0x15a4] ss:$8 sps:$4 sm:$0xff]  }
 0x574   : > { %12262 = vmatpush1.bf16.msra.mxu1 %v15299_v49  ;;  %v15395_v49 = vld [vmem:[%s17443_s24 + $0x9a0] ss:$8 sps:$4 sm:$0xff]  }
 0x575   : > { %12778 = vmatpush1.bf16.msra.mxu0 %v15302_v50  ;;  %12263 = vmatprep.subr.bf16.mxu1 %v15307_v51  ;;  %v15398_v50 = vld [vmem:[%s17443_s24 + $0x15a0] ss:$8 sps:$4 sm:$0xff]   ;;  %v15403_v51 = vld [vmem:[%s17443_s24 + $0x9b4] ss:$8 sps:$4 sm:$0xff]  }
 0x576   : > { %12779 = vmatprep.subr.bf16.mxu0 %v15310_v52  ;;  %v15406_v52 = vld [vmem:[%s17443_s24 + $0x15b4] ss:$8 sps:$4 sm:$0xff]  }
 0x578   : > { %12264 = vmatpush1.bf16.msra.mxu1 %v15305_v53  ;;  %v15401_v53 = vld [vmem:[%s17443_s24 + $0x9b0] ss:$8 sps:$4 sm:$0xff]  }
 0x579   : > { %12780 = vmatpush1.bf16.msra.mxu0 %v15308_v54  ;;  %12265 = vmatprep.subr.bf16.mxu1 %v15313_v55  ;;  %v15404_v54 = vld [vmem:[%s17443_s24 + $0x15b0] ss:$8 sps:$4 sm:$0xff]   ;;  %v15409_v55 = vld [vmem:[%s17443_s24 + $0x9c4] ss:$8 sps:$4 sm:$0xff]  }
 0x57a   : > { %12781 = vmatprep.subr.bf16.mxu0 %v15316_v56  ;;  %v15412_v56 = vld [vmem:[%s17443_s24 + $0x15c4] ss:$8 sps:$4 sm:$0xff]  }
 0x57c   : > { %12266 = vmatpush1.bf16.msra.mxu1 %v15311_v57  ;;  %v15407_v57 = vld [vmem:[%s17443_s24 + $0x9c0] ss:$8 sps:$4 sm:$0xff]  }
 0x57d   : > { %12782 = vmatpush1.bf16.msra.mxu0 %v15314_v58  ;;  %12267 = vmatprep.subr.bf16.mxu1 %v15319_v59  ;;  %v15410_v58 = vld [vmem:[%s17443_s24 + $0x15c0] ss:$8 sps:$4 sm:$0xff]   ;;  %v15415_v59 = vld [vmem:[%s17443_s24 + $0x9d4] ss:$8 sps:$4 sm:$0xff]  }
 0x57e   : > { %12783 = vmatprep.subr.bf16.mxu0 %v15322_v60  ;;  %v15418_v60 = vld [vmem:[%s17443_s24 + $0x15d4] ss:$8 sps:$4 sm:$0xff]  }
 0x580   : > { %12268 = vmatpush1.bf16.msra.mxu1 %v15317_v61  ;;  %v15413_v61 = vld [vmem:[%s17443_s24 + $0x9d0] ss:$8 sps:$4 sm:$0xff]  }
 0x581   : > { %12784 = vmatpush1.bf16.msra.mxu0 %v15320_v62  ;;  %12269 = vmatprep.subr.bf16.mxu1 %v15325_v63  ;;  %v15416_v62 = vld [vmem:[%s17443_s24 + $0x15d0] ss:$8 sps:$4 sm:$0xff]   ;;  %v15421_v63 = vld [vmem:[%s17443_s24 + $0x9e4] ss:$8 sps:$4 sm:$0xff]  }
 0x582   : > { %12785 = vmatprep.subr.bf16.mxu0 %v15328_v0  ;;  %v15424_v0 = vld [vmem:[%s17443_s24 + $0x15e4] ss:$8 sps:$4 sm:$0xff]  }
 0x584   : > { %12270 = vmatpush1.bf16.msra.mxu1 %v15323_v1  ;;  %v15419_v1 = vld [vmem:[%s17443_s24 + $0x9e0] ss:$8 sps:$4 sm:$0xff]  }
 0x585   : > { %12786 = vmatpush1.bf16.msra.mxu0 %v15326_v2  ;;  %12282 = vmatprep.subr.bf16.mxu1 %v15334_v3  ;;  %v15422_v2 = vld [vmem:[%s17443_s24 + $0x15e0] ss:$8 sps:$4 sm:$0xff]   ;;  %v15427_v3 = vld [vmem:[%s17443_s24 + $0x9f4] ss:$8 sps:$4 sm:$0xff]  }
 0x586   : > { %12798 = vmatprep.subr.bf16.mxu0 %v15340_v4  ;;  %v15430_v4 = vld [vmem:[%s17443_s24 + $0x15f4] ss:$8 sps:$4 sm:$0xff]  }
 0x587   : > { %12272 = vmatmul.mubr.bf16.vlgmr.msra.gmra.mrb[0].mxu1 %v15329_v5  ;;  %v15425_v5 = vld [vmem:[%s17443_s24 + $0x9f0] ss:$8 sps:$4 sm:$0xff]  }
 0x588   : > { %12788 = vmatmul.mubr.bf16.vlgmr.msra.gmra.mrb[0].mxu0 %v15335_v6  ;;  %12283 = vmatpush1.bf16.msra.mxu1 %v15332_v7  ;;  %v15428_v6 = vld [vmem:[%s17443_s24 + $0x15f0] ss:$8 sps:$4 sm:$0xff]   ;;  %v15436_v7 = vld [vmem:[%s17443_s24 + $0xa04] ss:$8 sps:$4 sm:$0xff]  }
 0x589   : > { %12799 = vmatpush1.bf16.msra.mxu0 %v15338_v8  ;;  %12284 = vmatprep.subr.bf16.mxu1 %v15343_v9  ;;  %v15442_v8 = vld [vmem:[%s17443_s24 + $0x1604] ss:$8 sps:$4 sm:$0xff]   ;;  %v15431_v9 = vld [vmem:[%s18464_s0 + $0x48] ss:$200 sps:$4 sm:$0xff]  }
 0x58a   : > { %12800 = vmatprep.subr.bf16.mxu0 %v15346_v10  ;;  %12314 = vmatprep.mubr.bf16.mxu1 %v15433_v11  ;;  %v15437_v10 = vld [vmem:[%s18464_s0 + $0xa8] ss:$200 sps:$4 sm:$0xff]  }
 0x58b   : > { %12830 = vmatprep.mubr.bf16.mxu0 %v15439_v12  ;;  %v15434_v11 = vld [vmem:[%s17443_s24 + $0xa00] ss:$8 sps:$4 sm:$0xff]  }
 0x58c   : > { %12285 = vmatpush1.bf16.msra.mxu1 %v15341_v13  ;;  %v15440_v12 = vld [vmem:[%s17443_s24 + $0x1600] ss:$8 sps:$4 sm:$0xff]   ;;  %v15445_v13 = vld [vmem:[%s17443_s24 + $0xa14] ss:$8 sps:$4 sm:$0xff]  }
 0x58d   : > { %12801 = vmatpush1.bf16.msra.mxu0 %v15344_v14  ;;  %12286 = vmatprep.subr.bf16.mxu1 %v15349_v15  ;;  %v15448_v14 = vld [vmem:[%s17443_s24 + $0x1614] ss:$8 sps:$4 sm:$0xff]   ;;  %v15535_v15 = vld [vmem:[%s18464_s0 + $0x54] ss:$200 sps:$4 sm:$0xff]  }
 0x58e   : > { %12802 = vmatprep.subr.bf16.mxu0 %v15352_v16  ;;  %v15541_v16 = vld [vmem:[%s18464_s0 + $0xb4] ss:$200 sps:$4 sm:$0xff]  }
 0x590   : > { %12287 = vmatpush1.bf16.msra.mxu1 %v15347_v17  ;;  %v15443_v17 = vld [vmem:[%s17443_s24 + $0xa10] ss:$8 sps:$4 sm:$0xff]  }
 0x591   : > { %12803 = vmatpush1.bf16.msra.mxu0 %v15350_v18  ;;  %12288 = vmatprep.subr.bf16.mxu1 %v15355_v19  ;;  %v15446_v18 = vld [vmem:[%s17443_s24 + $0x1610] ss:$8 sps:$4 sm:$0xff]   ;;  %v15451_v19 = vld [vmem:[%s17443_s24 + $0xa24] ss:$8 sps:$4 sm:$0xff]  }
 0x592   : > { %12804 = vmatprep.subr.bf16.mxu0 %v15358_v20  ;;  %v15454_v20 = vld [vmem:[%s17443_s24 + $0x1624] ss:$8 sps:$4 sm:$0xff]  }
 0x594   : > { %12289 = vmatpush1.bf16.msra.mxu1 %v15353_v21  ;;  %v15449_v21 = vld [vmem:[%s17443_s24 + $0xa20] ss:$8 sps:$4 sm:$0xff]  }
 0x595   : > { %12805 = vmatpush1.bf16.msra.mxu0 %v15356_v22  ;;  %12290 = vmatprep.subr.bf16.mxu1 %v15361_v23  ;;  %v15452_v22 = vld [vmem:[%s17443_s24 + $0x1620] ss:$8 sps:$4 sm:$0xff]   ;;  %v15457_v23 = vld [vmem:[%s17443_s24 + $0xa34] ss:$8 sps:$4 sm:$0xff]  }
 0x596   : > { %12806 = vmatprep.subr.bf16.mxu0 %v15364_v24  ;;  %v15460_v24 = vld [vmem:[%s17443_s24 + $0x1634] ss:$8 sps:$4 sm:$0xff]  }
 0x598   : > { %12291 = vmatpush1.bf16.msra.mxu1 %v15359_v25  ;;  %v15455_v25 = vld [vmem:[%s17443_s24 + $0xa30] ss:$8 sps:$4 sm:$0xff]  }
 0x599   : > { %12807 = vmatpush1.bf16.msra.mxu0 %v15362_v26  ;;  %12292 = vmatprep.subr.bf16.mxu1 %v15367_v27  ;;  %v15458_v26 = vld [vmem:[%s17443_s24 + $0x1630] ss:$8 sps:$4 sm:$0xff]   ;;  %v15463_v27 = vld [vmem:[%s17443_s24 + $0xa44] ss:$8 sps:$4 sm:$0xff]  }
 0x59a   : > { %12808 = vmatprep.subr.bf16.mxu0 %v15370_v28  ;;  %v15466_v28 = vld [vmem:[%s17443_s24 + $0x1644] ss:$8 sps:$4 sm:$0xff]  }
 0x59c   : > { %12293 = vmatpush1.bf16.msra.mxu1 %v15365_v29  ;;  %v15461_v29 = vld [vmem:[%s17443_s24 + $0xa40] ss:$8 sps:$4 sm:$0xff]  }
 0x59d   : > { %12809 = vmatpush1.bf16.msra.mxu0 %v15368_v30  ;;  %12294 = vmatprep.subr.bf16.mxu1 %v15373_v31  ;;  %v15464_v30 = vld [vmem:[%s17443_s24 + $0x1640] ss:$8 sps:$4 sm:$0xff]   ;;  %v15469_v31 = vld [vmem:[%s17443_s24 + $0xa54] ss:$8 sps:$4 sm:$0xff]  }
 0x59e   : > { %12810 = vmatprep.subr.bf16.mxu0 %v15376_v32  ;;  %v15472_v32 = vld [vmem:[%s17443_s24 + $0x1654] ss:$8 sps:$4 sm:$0xff]  }
 0x5a0   : > { %12295 = vmatpush1.bf16.msra.mxu1 %v15371_v33  ;;  %v15467_v33 = vld [vmem:[%s17443_s24 + $0xa50] ss:$8 sps:$4 sm:$0xff]  }
 0x5a1   : > { %12811 = vmatpush1.bf16.msra.mxu0 %v15374_v34  ;;  %12296 = vmatprep.subr.bf16.mxu1 %v15379_v35  ;;  %v15470_v34 = vld [vmem:[%s17443_s24 + $0x1650] ss:$8 sps:$4 sm:$0xff]   ;;  %v15475_v35 = vld [vmem:[%s17443_s24 + $0xa64] ss:$8 sps:$4 sm:$0xff]  }
 0x5a2   : > { %12812 = vmatprep.subr.bf16.mxu0 %v15382_v36  ;;  %v15478_v36 = vld [vmem:[%s17443_s24 + $0x1664] ss:$8 sps:$4 sm:$0xff]  }
 0x5a4   : > { %12297 = vmatpush1.bf16.msra.mxu1 %v15377_v37  ;;  %v15473_v37 = vld [vmem:[%s17443_s24 + $0xa60] ss:$8 sps:$4 sm:$0xff]  }
 0x5a5   : > { %12813 = vmatpush1.bf16.msra.mxu0 %v15380_v38  ;;  %12298 = vmatprep.subr.bf16.mxu1 %v15385_v39  ;;  %v15476_v38 = vld [vmem:[%s17443_s24 + $0x1660] ss:$8 sps:$4 sm:$0xff]   ;;  %v15481_v39 = vld [vmem:[%s17443_s24 + $0xa74] ss:$8 sps:$4 sm:$0xff]  }
 0x5a6   : > { %12814 = vmatprep.subr.bf16.mxu0 %v15388_v40  ;;  %v15484_v40 = vld [vmem:[%s17443_s24 + $0x1674] ss:$8 sps:$4 sm:$0xff]  }
 0x5a8   : > { %12299 = vmatpush1.bf16.msra.mxu1 %v15383_v41  ;;  %v15479_v41 = vld [vmem:[%s17443_s24 + $0xa70] ss:$8 sps:$4 sm:$0xff]  }
 0x5a9   : > { %12815 = vmatpush1.bf16.msra.mxu0 %v15386_v42  ;;  %12300 = vmatprep.subr.bf16.mxu1 %v15391_v43  ;;  %v15482_v42 = vld [vmem:[%s17443_s24 + $0x1670] ss:$8 sps:$4 sm:$0xff]   ;;  %v15487_v43 = vld [vmem:[%s17443_s24 + $0xa84] ss:$8 sps:$4 sm:$0xff]  }
 0x5aa   : > { %12816 = vmatprep.subr.bf16.mxu0 %v15394_v44  ;;  %v15490_v44 = vld [vmem:[%s17443_s24 + $0x1684] ss:$8 sps:$4 sm:$0xff]  }
 0x5ac   : > { %12301 = vmatpush1.bf16.msra.mxu1 %v15389_v45  ;;  %v15485_v45 = vld [vmem:[%s17443_s24 + $0xa80] ss:$8 sps:$4 sm:$0xff]  }
 0x5ad   : > { %12817 = vmatpush1.bf16.msra.mxu0 %v15392_v46  ;;  %12302 = vmatprep.subr.bf16.mxu1 %v15397_v47  ;;  %v15488_v46 = vld [vmem:[%s17443_s24 + $0x1680] ss:$8 sps:$4 sm:$0xff]   ;;  %v15493_v47 = vld [vmem:[%s17443_s24 + $0xa94] ss:$8 sps:$4 sm:$0xff]  }
 0x5ae   : > { %12818 = vmatprep.subr.bf16.mxu0 %v15400_v48  ;;  %v15496_v48 = vld [vmem:[%s17443_s24 + $0x1694] ss:$8 sps:$4 sm:$0xff]  }
 0x5b0   : > { %12303 = vmatpush1.bf16.msra.mxu1 %v15395_v49  ;;  %v15491_v49 = vld [vmem:[%s17443_s24 + $0xa90] ss:$8 sps:$4 sm:$0xff]  }
 0x5b1   : > { %12819 = vmatpush1.bf16.msra.mxu0 %v15398_v50  ;;  %12304 = vmatprep.subr.bf16.mxu1 %v15403_v51  ;;  %v15494_v50 = vld [vmem:[%s17443_s24 + $0x1690] ss:$8 sps:$4 sm:$0xff]   ;;  %v15499_v51 = vld [vmem:[%s17443_s24 + $0xaa4] ss:$8 sps:$4 sm:$0xff]  }
 0x5b2   : > { %12820 = vmatprep.subr.bf16.mxu0 %v15406_v52  ;;  %v15502_v52 = vld [vmem:[%s17443_s24 + $0x16a4] ss:$8 sps:$4 sm:$0xff]  }
 0x5b4   : > { %12305 = vmatpush1.bf16.msra.mxu1 %v15401_v53  ;;  %v15497_v53 = vld [vmem:[%s17443_s24 + $0xaa0] ss:$8 sps:$4 sm:$0xff]  }
 0x5b5   : > { %12821 = vmatpush1.bf16.msra.mxu0 %v15404_v54  ;;  %12306 = vmatprep.subr.bf16.mxu1 %v15409_v55  ;;  %v15500_v54 = vld [vmem:[%s17443_s24 + $0x16a0] ss:$8 sps:$4 sm:$0xff]   ;;  %v15505_v55 = vld [vmem:[%s17443_s24 + $0xab4] ss:$8 sps:$4 sm:$0xff]  }
 0x5b6   : > { %12822 = vmatprep.subr.bf16.mxu0 %v15412_v56  ;;  %v15508_v56 = vld [vmem:[%s17443_s24 + $0x16b4] ss:$8 sps:$4 sm:$0xff]  }
 0x5b8   : > { %12307 = vmatpush1.bf16.msra.mxu1 %v15407_v57  ;;  %v15503_v57 = vld [vmem:[%s17443_s24 + $0xab0] ss:$8 sps:$4 sm:$0xff]  }
 0x5b9   : > { %12823 = vmatpush1.bf16.msra.mxu0 %v15410_v58  ;;  %12308 = vmatprep.subr.bf16.mxu1 %v15415_v59  ;;  %v15506_v58 = vld [vmem:[%s17443_s24 + $0x16b0] ss:$8 sps:$4 sm:$0xff]   ;;  %v15511_v59 = vld [vmem:[%s17443_s24 + $0xac4] ss:$8 sps:$4 sm:$0xff]  }
 0x5ba   : > { %12824 = vmatprep.subr.bf16.mxu0 %v15418_v60  ;;  %v15514_v60 = vld [vmem:[%s17443_s24 + $0x16c4] ss:$8 sps:$4 sm:$0xff]  }
 0x5bc   : > { %12309 = vmatpush1.bf16.msra.mxu1 %v15413_v61  ;;  %v15509_v61 = vld [vmem:[%s17443_s24 + $0xac0] ss:$8 sps:$4 sm:$0xff]  }
 0x5bd   : > { %12825 = vmatpush1.bf16.msra.mxu0 %v15416_v62  ;;  %12310 = vmatprep.subr.bf16.mxu1 %v15421_v63  ;;  %v15512_v62 = vld [vmem:[%s17443_s24 + $0x16c0] ss:$8 sps:$4 sm:$0xff]   ;;  %v15517_v63 = vld [vmem:[%s17443_s24 + $0xad4] ss:$8 sps:$4 sm:$0xff]  }
 0x5be   : > { %12826 = vmatprep.subr.bf16.mxu0 %v15424_v0  ;;  %v15520_v0 = vld [vmem:[%s17443_s24 + $0x16d4] ss:$8 sps:$4 sm:$0xff]  }
 0x5c0   : > { %12311 = vmatpush1.bf16.msra.mxu1 %v15419_v1  ;;  %v15515_v1 = vld [vmem:[%s17443_s24 + $0xad0] ss:$8 sps:$4 sm:$0xff]  }
 0x5c1   : > { %12827 = vmatpush1.bf16.msra.mxu0 %v15422_v2  ;;  %12312 = vmatprep.subr.bf16.mxu1 %v15427_v3  ;;  %v15518_v2 = vld [vmem:[%s17443_s24 + $0x16d0] ss:$8 sps:$4 sm:$0xff]   ;;  %v15523_v3 = vld [vmem:[%s17443_s24 + $0xae4] ss:$8 sps:$4 sm:$0xff]  }
 0x5c2   : > { %12828 = vmatprep.subr.bf16.mxu0 %v15430_v4  ;;  %v15526_v4 = vld [vmem:[%s17443_s24 + $0x16e4] ss:$8 sps:$4 sm:$0xff]  }
 0x5c4   : > { %12313 = vmatpush1.bf16.msra.mxu1 %v15425_v5  ;;  %v15521_v5 = vld [vmem:[%s17443_s24 + $0xae0] ss:$8 sps:$4 sm:$0xff]  }
 0x5c5   : > { %12829 = vmatpush1.bf16.msra.mxu0 %v15428_v6  ;;  %12325 = vmatprep.subr.bf16.mxu1 %v15436_v7  ;;  %v15524_v6 = vld [vmem:[%s17443_s24 + $0x16e0] ss:$8 sps:$4 sm:$0xff]   ;;  %v15529_v7 = vld [vmem:[%s17443_s24 + $0xaf4] ss:$8 sps:$4 sm:$0xff]  }
 0x5c6   : > { %12841 = vmatprep.subr.bf16.mxu0 %v15442_v8  ;;  %v15532_v8 = vld [vmem:[%s17443_s24 + $0x16f4] ss:$8 sps:$4 sm:$0xff]  }
 0x5c7   : > { %12315 = vmatmul.mubr.bf16.vlgmr.msra.gmra.mrb[0].mxu1 %v15431_v9  ;;  %v15527_v9 = vld [vmem:[%s17443_s24 + $0xaf0] ss:$8 sps:$4 sm:$0xff]  }
 0x5c8   : > { %12831 = vmatmul.mubr.bf16.vlgmr.msra.gmra.mrb[0].mxu0 %v15437_v10  ;;  %12326 = vmatpush1.bf16.msra.mxu1 %v15434_v11  ;;  %v15530_v10 = vld [vmem:[%s17443_s24 + $0x16f0] ss:$8 sps:$4 sm:$0xff]   ;;  %v15538_v11 = vld [vmem:[%s17443_s24 + $0xb04] ss:$8 sps:$4 sm:$0xff]  }
 0x5c9   : > { %12842 = vmatpush1.bf16.msra.mxu0 %v15440_v12  ;;  %12327 = vmatprep.subr.bf16.mxu1 %v15445_v13  ;;  %v15544_v12 = vld [vmem:[%s17443_s24 + $0x1704] ss:$8 sps:$4 sm:$0xff]   ;;  %v15533_v13 = vld [vmem:[%s18464_s0 + $0x50] ss:$200 sps:$4 sm:$0xff]  }
 0x5ca   : > { %12843 = vmatprep.subr.bf16.mxu0 %v15448_v14  ;;  %12357 = vmatprep.mubr.bf16.mxu1 %v15535_v15  ;;  %v15539_v14 = vld [vmem:[%s18464_s0 + $0xb0] ss:$200 sps:$4 sm:$0xff]  }
 0x5cb   : > { %12873 = vmatprep.mubr.bf16.mxu0 %v15541_v16  ;;  %v15536_v15 = vld [vmem:[%s17443_s24 + $0xb00] ss:$8 sps:$4 sm:$0xff]  }
 0x5cc   : > { %12328 = vmatpush1.bf16.msra.mxu1 %v15443_v17  ;;  %v15542_v16 = vld [vmem:[%s17443_s24 + $0x1700] ss:$8 sps:$4 sm:$0xff]   ;;  %v15547_v17 = vld [vmem:[%s17443_s24 + $0xb14] ss:$8 sps:$4 sm:$0xff]  }
 0x5cd   : > { %12844 = vmatpush1.bf16.msra.mxu0 %v15446_v18  ;;  %12329 = vmatprep.subr.bf16.mxu1 %v15451_v19  ;;  %v15550_v18 = vld [vmem:[%s17443_s24 + $0x1714] ss:$8 sps:$4 sm:$0xff]  }
 0x5ce   : > { %12845 = vmatprep.subr.bf16.mxu0 %v15454_v20  ;;  %v15637_v19 = vld [vmem:[%s18464_s0 + $0x5c] ss:$200 sps:$4 sm:$0xff]  }
 0x5cf   : > { %v15640_v20 = vld [vmem:[%s18464_s0 + $0xbc] ss:$200 sps:$4 sm:$0xff]  }
 0x5d0   : > { %12330 = vmatpush1.bf16.msra.mxu1 %v15449_v21  ;;  %v15545_v21 = vld [vmem:[%s17443_s24 + $0xb10] ss:$8 sps:$4 sm:$0xff]  }
 0x5d1   : > { %12846 = vmatpush1.bf16.msra.mxu0 %v15452_v22  ;;  %12331 = vmatprep.subr.bf16.mxu1 %v15457_v23  ;;  %v15548_v22 = vld [vmem:[%s17443_s24 + $0x1710] ss:$8 sps:$4 sm:$0xff]   ;;  %v15553_v23 = vld [vmem:[%s17443_s24 + $0xb24] ss:$8 sps:$4 sm:$0xff]  }
 0x5d2   : > { %12847 = vmatprep.subr.bf16.mxu0 %v15460_v24  ;;  %v15556_v24 = vld [vmem:[%s17443_s24 + $0x1724] ss:$8 sps:$4 sm:$0xff]  }
 0x5d4   : > { %12332 = vmatpush1.bf16.msra.mxu1 %v15455_v25  ;;  %v15551_v25 = vld [vmem:[%s17443_s24 + $0xb20] ss:$8 sps:$4 sm:$0xff]  }
 0x5d5   : > { %12848 = vmatpush1.bf16.msra.mxu0 %v15458_v26  ;;  %12333 = vmatprep.subr.bf16.mxu1 %v15463_v27  ;;  %v15554_v26 = vld [vmem:[%s17443_s24 + $0x1720] ss:$8 sps:$4 sm:$0xff]   ;;  %v15559_v27 = vld [vmem:[%s17443_s24 + $0xb34] ss:$8 sps:$4 sm:$0xff]  }
 0x5d6   : > { %12849 = vmatprep.subr.bf16.mxu0 %v15466_v28  ;;  %v15562_v28 = vld [vmem:[%s17443_s24 + $0x1734] ss:$8 sps:$4 sm:$0xff]  }
 0x5d8   : > { %12334 = vmatpush1.bf16.msra.mxu1 %v15461_v29  ;;  %v15557_v29 = vld [vmem:[%s17443_s24 + $0xb30] ss:$8 sps:$4 sm:$0xff]  }
 0x5d9   : > { %12850 = vmatpush1.bf16.msra.mxu0 %v15464_v30  ;;  %12335 = vmatprep.subr.bf16.mxu1 %v15469_v31  ;;  %v15560_v30 = vld [vmem:[%s17443_s24 + $0x1730] ss:$8 sps:$4 sm:$0xff]   ;;  %v15565_v31 = vld [vmem:[%s17443_s24 + $0xb44] ss:$8 sps:$4 sm:$0xff]  }
 0x5da   : > { %12851 = vmatprep.subr.bf16.mxu0 %v15472_v32  ;;  %v15568_v32 = vld [vmem:[%s17443_s24 + $0x1744] ss:$8 sps:$4 sm:$0xff]  }
 0x5dc   : > { %12336 = vmatpush1.bf16.msra.mxu1 %v15467_v33  ;;  %v15563_v33 = vld [vmem:[%s17443_s24 + $0xb40] ss:$8 sps:$4 sm:$0xff]  }
 0x5dd   : > { %12852 = vmatpush1.bf16.msra.mxu0 %v15470_v34  ;;  %12337 = vmatprep.subr.bf16.mxu1 %v15475_v35  ;;  %v15566_v34 = vld [vmem:[%s17443_s24 + $0x1740] ss:$8 sps:$4 sm:$0xff]   ;;  %v15571_v35 = vld [vmem:[%s17443_s24 + $0xb54] ss:$8 sps:$4 sm:$0xff]  }
 0x5de   : > { %12853 = vmatprep.subr.bf16.mxu0 %v15478_v36  ;;  %v15574_v36 = vld [vmem:[%s17443_s24 + $0x1754] ss:$8 sps:$4 sm:$0xff]  }
 0x5e0   : > { %12338 = vmatpush1.bf16.msra.mxu1 %v15473_v37  ;;  %v15569_v37 = vld [vmem:[%s17443_s24 + $0xb50] ss:$8 sps:$4 sm:$0xff]  }
 0x5e1   : > { %12854 = vmatpush1.bf16.msra.mxu0 %v15476_v38  ;;  %12339 = vmatprep.subr.bf16.mxu1 %v15481_v39  ;;  %v15572_v38 = vld [vmem:[%s17443_s24 + $0x1750] ss:$8 sps:$4 sm:$0xff]   ;;  %v15577_v39 = vld [vmem:[%s17443_s24 + $0xb64] ss:$8 sps:$4 sm:$0xff]  }
 0x5e2   : > { %12855 = vmatprep.subr.bf16.mxu0 %v15484_v40  ;;  %v15580_v40 = vld [vmem:[%s17443_s24 + $0x1764] ss:$8 sps:$4 sm:$0xff]  }
 0x5e4   : > { %12340 = vmatpush1.bf16.msra.mxu1 %v15479_v41  ;;  %v15575_v41 = vld [vmem:[%s17443_s24 + $0xb60] ss:$8 sps:$4 sm:$0xff]  }
 0x5e5   : > { %12856 = vmatpush1.bf16.msra.mxu0 %v15482_v42  ;;  %12341 = vmatprep.subr.bf16.mxu1 %v15487_v43  ;;  %v15578_v42 = vld [vmem:[%s17443_s24 + $0x1760] ss:$8 sps:$4 sm:$0xff]   ;;  %v15583_v43 = vld [vmem:[%s17443_s24 + $0xb74] ss:$8 sps:$4 sm:$0xff]  }
 0x5e6   : > { %12857 = vmatprep.subr.bf16.mxu0 %v15490_v44  ;;  %v15586_v44 = vld [vmem:[%s17443_s24 + $0x1774] ss:$8 sps:$4 sm:$0xff]  }
 0x5e8   : > { %12342 = vmatpush1.bf16.msra.mxu1 %v15485_v45  ;;  %v15581_v45 = vld [vmem:[%s17443_s24 + $0xb70] ss:$8 sps:$4 sm:$0xff]  }
 0x5e9   : > { %12858 = vmatpush1.bf16.msra.mxu0 %v15488_v46  ;;  %12343 = vmatprep.subr.bf16.mxu1 %v15493_v47  ;;  %v15584_v46 = vld [vmem:[%s17443_s24 + $0x1770] ss:$8 sps:$4 sm:$0xff]   ;;  %v15589_v47 = vld [vmem:[%s17443_s24 + $0xb84] ss:$8 sps:$4 sm:$0xff]  }
 0x5ea   : > { %12859 = vmatprep.subr.bf16.mxu0 %v15496_v48  ;;  %v15592_v48 = vld [vmem:[%s17443_s24 + $0x1784] ss:$8 sps:$4 sm:$0xff]  }
 0x5ec   : > { %12344 = vmatpush1.bf16.msra.mxu1 %v15491_v49  ;;  %v15587_v49 = vld [vmem:[%s17443_s24 + $0xb80] ss:$8 sps:$4 sm:$0xff]  }
 0x5ed   : > { %12860 = vmatpush1.bf16.msra.mxu0 %v15494_v50  ;;  %12345 = vmatprep.subr.bf16.mxu1 %v15499_v51  ;;  %v15590_v50 = vld [vmem:[%s17443_s24 + $0x1780] ss:$8 sps:$4 sm:$0xff]   ;;  %v15595_v51 = vld [vmem:[%s17443_s24 + $0xb94] ss:$8 sps:$4 sm:$0xff]  }
 0x5ee   : > { %12861 = vmatprep.subr.bf16.mxu0 %v15502_v52  ;;  %v15598_v52 = vld [vmem:[%s17443_s24 + $0x1794] ss:$8 sps:$4 sm:$0xff]  }
 0x5f0   : > { %12346 = vmatpush1.bf16.msra.mxu1 %v15497_v53  ;;  %v15593_v53 = vld [vmem:[%s17443_s24 + $0xb90] ss:$8 sps:$4 sm:$0xff]  }
 0x5f1   : > { %12862 = vmatpush1.bf16.msra.mxu0 %v15500_v54  ;;  %12347 = vmatprep.subr.bf16.mxu1 %v15505_v55  ;;  %v15596_v54 = vld [vmem:[%s17443_s24 + $0x1790] ss:$8 sps:$4 sm:$0xff]   ;;  %v15601_v55 = vld [vmem:[%s17443_s24 + $0xba4] ss:$8 sps:$4 sm:$0xff]  }
 0x5f2   : > { %12863 = vmatprep.subr.bf16.mxu0 %v15508_v56  ;;  %v15604_v56 = vld [vmem:[%s17443_s24 + $0x17a4] ss:$8 sps:$4 sm:$0xff]  }
 0x5f4   : > { %12348 = vmatpush1.bf16.msra.mxu1 %v15503_v57  ;;  %v15599_v57 = vld [vmem:[%s17443_s24 + $0xba0] ss:$8 sps:$4 sm:$0xff]  }
 0x5f5   : > { %12864 = vmatpush1.bf16.msra.mxu0 %v15506_v58  ;;  %12349 = vmatprep.subr.bf16.mxu1 %v15511_v59  ;;  %v15602_v58 = vld [vmem:[%s17443_s24 + $0x17a0] ss:$8 sps:$4 sm:$0xff]   ;;  %v15607_v59 = vld [vmem:[%s17443_s24 + $0xbb4] ss:$8 sps:$4 sm:$0xff]  }
 0x5f6   : > { %12865 = vmatprep.subr.bf16.mxu0 %v15514_v60  ;;  %v15610_v60 = vld [vmem:[%s17443_s24 + $0x17b4] ss:$8 sps:$4 sm:$0xff]  }
 0x5f8   : > { %12350 = vmatpush1.bf16.msra.mxu1 %v15509_v61  ;;  %v15605_v61 = vld [vmem:[%s17443_s24 + $0xbb0] ss:$8 sps:$4 sm:$0xff]  }
 0x5f9   : > { %12866 = vmatpush1.bf16.msra.mxu0 %v15512_v62  ;;  %12351 = vmatprep.subr.bf16.mxu1 %v15517_v63  ;;  %v15608_v62 = vld [vmem:[%s17443_s24 + $0x17b0] ss:$8 sps:$4 sm:$0xff]   ;;  %v15613_v63 = vld [vmem:[%s17443_s24 + $0xbc4] ss:$8 sps:$4 sm:$0xff]  }
 0x5fa   : > { %12867 = vmatprep.subr.bf16.mxu0 %v15520_v0  ;;  %v15616_v0 = vld [vmem:[%s17443_s24 + $0x17c4] ss:$8 sps:$4 sm:$0xff]  }
 0x5fc   : > { %12352 = vmatpush1.bf16.msra.mxu1 %v15515_v1  ;;  %v15611_v1 = vld [vmem:[%s17443_s24 + $0xbc0] ss:$8 sps:$4 sm:$0xff]  }
 0x5fd   : > { %12868 = vmatpush1.bf16.msra.mxu0 %v15518_v2  ;;  %12353 = vmatprep.subr.bf16.mxu1 %v15523_v3  ;;  %v15614_v2 = vld [vmem:[%s17443_s24 + $0x17c0] ss:$8 sps:$4 sm:$0xff]   ;;  %v15619_v3 = vld [vmem:[%s17443_s24 + $0xbd4] ss:$8 sps:$4 sm:$0xff]  }
 0x5fe   : > { %12869 = vmatprep.subr.bf16.mxu0 %v15526_v4  ;;  %v15622_v4 = vld [vmem:[%s17443_s24 + $0x17d4] ss:$8 sps:$4 sm:$0xff]  }
 0x600   : > { %12354 = vmatpush1.bf16.msra.mxu1 %v15521_v5  ;;  %v15617_v5 = vld [vmem:[%s17443_s24 + $0xbd0] ss:$8 sps:$4 sm:$0xff]  }
 0x601   : > { %12870 = vmatpush1.bf16.msra.mxu0 %v15524_v6  ;;  %12355 = vmatprep.subr.bf16.mxu1 %v15529_v7  ;;  %v15620_v6 = vld [vmem:[%s17443_s24 + $0x17d0] ss:$8 sps:$4 sm:$0xff]   ;;  %v15625_v7 = vld [vmem:[%s17443_s24 + $0xbe4] ss:$8 sps:$4 sm:$0xff]  }
 0x602   : > { %12871 = vmatprep.subr.bf16.mxu0 %v15532_v8  ;;  %v15628_v8 = vld [vmem:[%s17443_s24 + $0x17e4] ss:$8 sps:$4 sm:$0xff]  }
 0x604   : > { %12356 = vmatpush1.bf16.msra.mxu1 %v15527_v9  ;;  %v15623_v9 = vld [vmem:[%s17443_s24 + $0xbe0] ss:$8 sps:$4 sm:$0xff]  }
 0x605   : > { %12872 = vmatpush1.bf16.msra.mxu0 %v15530_v10  ;;  %12368 = vmatprep.subr.bf16.mxu1 %v15538_v11  ;;  %v15626_v10 = vld [vmem:[%s17443_s24 + $0x17e0] ss:$8 sps:$4 sm:$0xff]   ;;  %v15631_v11 = vld [vmem:[%s17443_s24 + $0xbf4] ss:$8 sps:$4 sm:$0xff]  }
 0x606   : > { %12884 = vmatprep.subr.bf16.mxu0 %v15544_v12  ;;  %v15634_v12 = vld [vmem:[%s17443_s24 + $0x17f4] ss:$8 sps:$4 sm:$0xff]  }
 0x607   : > { %12358 = vmatmul.mubr.bf16.vlgmr.msra.gmra.mrb[0].mxu1 %v15533_v13  ;;  %v15629_v13 = vld [vmem:[%s17443_s24 + $0xbf0] ss:$8 sps:$4 sm:$0xff]  }
 0x608   : > { %12874 = vmatmul.mubr.bf16.vlgmr.msra.gmra.mrb[0].mxu0 %v15539_v14  ;;  %12369 = vmatpush1.bf16.msra.mxu1 %v15536_v15  ;;  %v15632_v14 = vld [vmem:[%s17443_s24 + $0x17f0] ss:$8 sps:$4 sm:$0xff]   ;;  %v15643_v15 = vld [vmem:[%s17443_s24 + $0x1804] ss:$8 sps:$4 sm:$0xff]  }
 0x609   : > { %12885 = vmatpush1.bf16.msra.mxu0 %v15542_v16  ;;  %12370 = vmatprep.subr.bf16.mxu1 %v15547_v17  ;;  %v15635_v16 = vld [vmem:[%s18464_s0 + $0x58] ss:$200 sps:$4 sm:$0xff]  }
 0x60a   : > { %12886 = vmatprep.subr.bf16.mxu0 %v15550_v18  ;;  %12400 = vmatprep.mubr.bf16.mxu1 %v15637_v19  ;;  %v15638_v17 = vld [vmem:[%s18464_s0 + $0xb8] ss:$200 sps:$4 sm:$0xff]   ;;  %v15691_v19 = vld [vmem:[%s18464_s0 + $0xc4] ss:$200 sps:$4 sm:$0xff]  }
 0x60b   : > { %12916 = vmatprep.mubr.bf16.mxu0 %v15640_v20  ;;  %v15641_v18 = vld [vmem:[%s17443_s24 + $0x1800] ss:$8 sps:$4 sm:$0xff]   ;;  %v15646_v20 = vld [vmem:[%s17443_s24 + $0x1814] ss:$8 sps:$4 sm:$0xff]  }
 0x60c   : > { %12371 = vmatpush1.bf16.msra.mxu1 %v15545_v21  ;;  %v15644_v21 = vld [vmem:[%s17443_s24 + $0x1810] ss:$8 sps:$4 sm:$0xff]  }
 0x60d   : > { %12887 = vmatpush1.bf16.msra.mxu0 %v15548_v22  ;;  %12372 = vmatprep.subr.bf16.mxu1 %v15553_v23  ;;  %v15649_v22 = vld [vmem:[%s17443_s24 + $0x1824] ss:$8 sps:$4 sm:$0xff]   ;;  %v15647_v23 = vld [vmem:[%s17443_s24 + $0x1820] ss:$8 sps:$4 sm:$0xff]  }
 0x60e   : > { %12888 = vmatprep.subr.bf16.mxu0 %v15556_v24  ;;  %v15652_v24 = vld [vmem:[%s17443_s24 + $0x1834] ss:$8 sps:$4 sm:$0xff]  }
 0x610   : > { %12373 = vmatpush1.bf16.msra.mxu1 %v15551_v25  ;;  %v15650_v25 = vld [vmem:[%s17443_s24 + $0x1830] ss:$8 sps:$4 sm:$0xff]  }
 0x611   : > { %12889 = vmatpush1.bf16.msra.mxu0 %v15554_v26  ;;  %12374 = vmatprep.subr.bf16.mxu1 %v15559_v27  ;;  %v15655_v26 = vld [vmem:[%s17443_s24 + $0x1844] ss:$8 sps:$4 sm:$0xff]   ;;  %v15653_v27 = vld [vmem:[%s17443_s24 + $0x1840] ss:$8 sps:$4 sm:$0xff]  }
 0x612   : > { %12890 = vmatprep.subr.bf16.mxu0 %v15562_v28  ;;  %v15658_v28 = vld [vmem:[%s17443_s24 + $0x1854] ss:$8 sps:$4 sm:$0xff]  }
 0x614   : > { %12375 = vmatpush1.bf16.msra.mxu1 %v15557_v29  ;;  %v15656_v29 = vld [vmem:[%s17443_s24 + $0x1850] ss:$8 sps:$4 sm:$0xff]  }
 0x615   : > { %12891 = vmatpush1.bf16.msra.mxu0 %v15560_v30  ;;  %12376 = vmatprep.subr.bf16.mxu1 %v15565_v31  ;;  %v15661_v30 = vld [vmem:[%s17443_s24 + $0x1864] ss:$8 sps:$4 sm:$0xff]   ;;  %v15659_v31 = vld [vmem:[%s17443_s24 + $0x1860] ss:$8 sps:$4 sm:$0xff]  }
 0x616   : > { %12892 = vmatprep.subr.bf16.mxu0 %v15568_v32  ;;  %v15664_v32 = vld [vmem:[%s17443_s24 + $0x1874] ss:$8 sps:$4 sm:$0xff]  }
 0x618   : > { %12377 = vmatpush1.bf16.msra.mxu1 %v15563_v33  ;;  %v15662_v33 = vld [vmem:[%s17443_s24 + $0x1870] ss:$8 sps:$4 sm:$0xff]  }
 0x619   : > { %12893 = vmatpush1.bf16.msra.mxu0 %v15566_v34  ;;  %12378 = vmatprep.subr.bf16.mxu1 %v15571_v35  ;;  %v15667_v34 = vld [vmem:[%s17443_s24 + $0x1884] ss:$8 sps:$4 sm:$0xff]   ;;  %v15665_v35 = vld [vmem:[%s17443_s24 + $0x1880] ss:$8 sps:$4 sm:$0xff]  }
 0x61a   : > { %12894 = vmatprep.subr.bf16.mxu0 %v15574_v36  ;;  %v15670_v36 = vld [vmem:[%s17443_s24 + $0x1894] ss:$8 sps:$4 sm:$0xff]  }
 0x61c   : > { %12379 = vmatpush1.bf16.msra.mxu1 %v15569_v37  ;;  %v15668_v37 = vld [vmem:[%s17443_s24 + $0x1890] ss:$8 sps:$4 sm:$0xff]  }
 0x61d   : > { %12895 = vmatpush1.bf16.msra.mxu0 %v15572_v38  ;;  %12380 = vmatprep.subr.bf16.mxu1 %v15577_v39  ;;  %v15673_v38 = vld [vmem:[%s17443_s24 + $0x18a4] ss:$8 sps:$4 sm:$0xff]   ;;  %v15671_v39 = vld [vmem:[%s17443_s24 + $0x18a0] ss:$8 sps:$4 sm:$0xff]  }
 0x61e   : > { %12896 = vmatprep.subr.bf16.mxu0 %v15580_v40  ;;  %v15676_v40 = vld [vmem:[%s17443_s24 + $0x18b4] ss:$8 sps:$4 sm:$0xff]  }
 0x620   : > { %12381 = vmatpush1.bf16.msra.mxu1 %v15575_v41  ;;  %v15674_v41 = vld [vmem:[%s17443_s24 + $0x18b0] ss:$8 sps:$4 sm:$0xff]  }
 0x621   : > { %12897 = vmatpush1.bf16.msra.mxu0 %v15578_v42  ;;  %12382 = vmatprep.subr.bf16.mxu1 %v15583_v43  ;;  %v15679_v42 = vld [vmem:[%s17443_s24 + $0x18c4] ss:$8 sps:$4 sm:$0xff]   ;;  %v15677_v43 = vld [vmem:[%s17443_s24 + $0x18c0] ss:$8 sps:$4 sm:$0xff]  }
 0x622   : > { %12898 = vmatprep.subr.bf16.mxu0 %v15586_v44  ;;  %v15682_v44 = vld [vmem:[%s17443_s24 + $0x18d4] ss:$8 sps:$4 sm:$0xff]  }
 0x624   : > { %12383 = vmatpush1.bf16.msra.mxu1 %v15581_v45  ;;  %v15680_v45 = vld [vmem:[%s17443_s24 + $0x18d0] ss:$8 sps:$4 sm:$0xff]  }
 0x625   : > { %12899 = vmatpush1.bf16.msra.mxu0 %v15584_v46  ;;  %12384 = vmatprep.subr.bf16.mxu1 %v15589_v47  ;;  %v15685_v46 = vld [vmem:[%s17443_s24 + $0x18e4] ss:$8 sps:$4 sm:$0xff]   ;;  %v15683_v47 = vld [vmem:[%s17443_s24 + $0x18e0] ss:$8 sps:$4 sm:$0xff]  }
 0x626   : > { %12900 = vmatprep.subr.bf16.mxu0 %v15592_v48  ;;  %v15688_v48 = vld [vmem:[%s17443_s24 + $0x18f4] ss:$8 sps:$4 sm:$0xff]  }
 0x628   : > { %12385 = vmatpush1.bf16.msra.mxu1 %v15587_v49  ;;  %v15686_v49 = vld [vmem:[%s17443_s24 + $0x18f0] ss:$8 sps:$4 sm:$0xff]  }
 0x629   : > { %12901 = vmatpush1.bf16.msra.mxu0 %v15590_v50  ;;  %12386 = vmatprep.subr.bf16.mxu1 %v15595_v51  ;;  %v15689_v50 = vld [vmem:[%s18464_s0 + $0xc0] ss:$200 sps:$4 sm:$0xff]  }
 0x62a   : > { %12902 = vmatprep.subr.bf16.mxu0 %v15598_v52  ;;  %v15692_v51 = vld [vmem:[%s17441_s30 + $0x40] sm:$0xff]  }
 0x62b   : > { %v15693_v52 = vld [vmem:[%s17441_s30] sm:$0xff]  }
 0x62c   : > { %12387 = vmatpush1.bf16.msra.mxu1 %v15593_v53  ;;  %v15694_v53 = vld [vmem:[%s17441_s30 + $0x48] sm:$0xff]  }
 0x62d   : > { %12903 = vmatpush1.bf16.msra.mxu0 %v15596_v54  ;;  %12388 = vmatprep.subr.bf16.mxu1 %v15601_v55  ;;  %v15695_v54 = vld [vmem:[%s17441_s30 + $0x8] sm:$0xff]   ;;  %v15696_v55 = vld [vmem:[%s17441_s30 + $0x50] sm:$0xff]  }
 0x62e   : > { %12904 = vmatprep.subr.bf16.mxu0 %v15604_v56  ;;  %v15697_v56 = vld [vmem:[%s17441_s30 + $0x10] sm:$0xff]  }
 0x630   : > { %12389 = vmatpush1.bf16.msra.mxu1 %v15599_v57  ;;  %v15698_v57 = vld [vmem:[%s17441_s30 + $0x58] sm:$0xff]  }
 0x631   : > { %12905 = vmatpush1.bf16.msra.mxu0 %v15602_v58  ;;  %12390 = vmatprep.subr.bf16.mxu1 %v15607_v59  ;;  %v15699_v58 = vld [vmem:[%s17441_s30 + $0x18] sm:$0xff]   ;;  %v15700_v59 = vld [vmem:[%s17441_s30 + $0x60] sm:$0xff]  }
 0x632   : > { %12906 = vmatprep.subr.bf16.mxu0 %v15610_v60  ;;  %v15701_v60 = vld [vmem:[%s17441_s30 + $0x20] sm:$0xff]  }
 0x634   : > { %12391 = vmatpush1.bf16.msra.mxu1 %v15605_v61  ;;  %v15702_v61 = vld [vmem:[%s17441_s30 + $0x68] sm:$0xff]  }
 0x635   : > { %12907 = vmatpush1.bf16.msra.mxu0 %v15608_v62  ;;  %12392 = vmatprep.subr.bf16.mxu1 %v15613_v63  ;;  %v15703_v62 = vld [vmem:[%s17441_s30 + $0x28] sm:$0xff]   ;;  %v15704_v63 = vld [vmem:[%s17441_s30 + $0x70] sm:$0xff]  }
 0x636   : > { %12908 = vmatprep.subr.bf16.mxu0 %v15616_v0  ;;  %v15705_v0 = vld [vmem:[%s17441_s30 + $0x30] sm:$0xff]  }
 0x638   : > { %12393 = vmatpush1.bf16.msra.mxu1 %v15611_v1  ;;  %v15706_v1 = vld [vmem:[%s17441_s30 + $0x78] sm:$0xff]  }
 0x639   : > { %12909 = vmatpush1.bf16.msra.mxu0 %v15614_v2  ;;  %12394 = vmatprep.subr.bf16.mxu1 %v15619_v3  ;;  %v15707_v2 = vld [vmem:[%s17441_s30 + $0x38] sm:$0xff]  }
 0x63a   : > { %12910 = vmatprep.subr.bf16.mxu0 %v15622_v4 }
 0x63c   : > { %12395 = vmatpush1.bf16.msra.mxu1 %v15617_v5 }
 0x63d   : > { %12911 = vmatpush1.bf16.msra.mxu0 %v15620_v6  ;;  %12396 = vmatprep.subr.bf16.mxu1 %v15625_v7  ;;  %v7635_v7 = vlaneseq }
 0x63e   : > { %12912 = vmatprep.subr.bf16.mxu0 %v15628_v8 }
 0x63f   : > { %v7636_v8 = vshrl.u32 %v7635_v7, 7 }
 0x640   : > { %12397 = vmatpush1.bf16.msra.mxu1 %v15623_v9 }
 0x641   : > { %12913 = vmatpush1.bf16.msra.mxu0 %v15626_v10  ;;  %12398 = vmatprep.subr.bf16.mxu1 %v15631_v11  ;;  %v7637_v9 = vsub.s32 0, %v7636_v8  ;;  %v7633_v10 = vld [vmem:[%s6768_s22] sm:$0x3]  ;;  %v7641_v11 = vsub.s32 1, %v7636_v8 }
 0x642   : > { %12914 = vmatprep.subr.bf16.mxu0 %v15634_v12 }
 0x643   : > { %v7638_v12 = vrot.slane %v7633_v10, %v7637_v9 }
 0x644   : > { %12399 = vmatpush1.bf16.msra.mxu1 %v15629_v13  ;;  %v7642_v13 = vrot.slane %v7633_v10, %v7641_v11 }
 0x645   : > { %12915 = vmatpush1.bf16.msra.mxu0 %v15632_v14  ;;  %14237 = vmatprep.subr.bf16.mxu1 %v15692_v51 }
 0x646   : > { %12927 = vmatprep.subr.bf16.mxu0 %v15643_v15 }
 0x647   : > { %12401 = vmatmul.mubr.bf16.vlgmr.msra.gmra.mrb[0].mxu1 %v15635_v16 }
 0x648   : > { %12917 = vmatmul.mubr.bf16.vlgmr.msra.gmra.mrb[0].mxu0 %v15638_v17  ;;  %14238 = vmatpush3.bf16.msra.mxu1 %v15693_v52  ;;  %v15712_v52 = vld [vmem:[%s18469_s5 + $0x20] sm:$0xff] (!%p14223_p11)  }
 0x649   : > { %12928 = vmatpush1.bf16.msra.mxu0 %v15641_v18  ;;  %12959 = vmatprep.mubr.bf16.mxu0 %v15691_v19 }
 0x64a   : > { %12929 = vmatprep.subr.bf16.mxu0 %v15646_v20  ;;  %14239 = vmatprep.subr.bf16.mxu1 %v15694_v53  ;;  %v15713_v53 = vld [vmem:[%s18469_s5 + $0x28] sm:$0xff] (!%p14223_p11)  }
 0x64c   : > { %14240 = vmatpush3.bf16.msra.mxu1 %v15695_v54  ;;  %v15714_v54 = vld [vmem:[%s18469_s5 + $0x30] sm:$0xff] (!%p14223_p11)  }
 0x64d   : > { %12930 = vmatpush1.bf16.msra.mxu0 %v15644_v21  ;;  %14241 = vmatprep.subr.bf16.mxu1 %v15696_v55 }
 0x64e   : > { %12931 = vmatprep.subr.bf16.mxu0 %v15649_v22 }
 0x650   : > { %14242 = vmatpush3.bf16.msra.mxu1 %v15697_v56 }
 0x651   : > { %12932 = vmatpush1.bf16.msra.mxu0 %v15647_v23  ;;  %14243 = vmatprep.subr.bf16.mxu1 %v15698_v57  ;;  %v15715_v57 = vld [vmem:[%s18469_s5 + $0x38] sm:$0xff] (!%p14223_p11)  }
 0x652   : > { %12933 = vmatprep.subr.bf16.mxu0 %v15652_v24 }
 0x654   : > { %14244 = vmatpush3.bf16.msra.mxu1 %v15699_v58 }
 0x655   : > { %12934 = vmatpush1.bf16.msra.mxu0 %v15650_v25  ;;  %14245 = vmatprep.subr.bf16.mxu1 %v15700_v59  ;;  %v14225_v59 = vld [vmem:[%s18470_s6] ss:$0 sm:$0xff] (!%p14223_p11) }
 0x656   : > { %12935 = vmatprep.subr.bf16.mxu0 %v15655_v26 }
 0x658   : > { %14246 = vmatpush3.bf16.msra.mxu1 %v15701_v60 }
 0x659   : > { %12936 = vmatpush1.bf16.msra.mxu0 %v15653_v27  ;;  %14247 = vmatprep.subr.bf16.mxu1 %v15702_v61 }
 0x65a   : > { %12937 = vmatprep.subr.bf16.mxu0 %v15658_v28 }
 0x65c   : > { %14248 = vmatpush3.bf16.msra.mxu1 %v15703_v62 }
 0x65d   : > { %12938 = vmatpush1.bf16.msra.mxu0 %v15656_v29  ;;  %14249 = vmatprep.subr.bf16.mxu1 %v15704_v63 }
 0x65e   : > { %12939 = vmatprep.subr.bf16.mxu0 %v15661_v30 }
 0x660   : > { %14250 = vmatpush3.bf16.msra.mxu1 %v15705_v0 }
 0x661   : > { %12940 = vmatpush1.bf16.msra.mxu0 %v15659_v31  ;;  %14251 = vmatprep.subr.bf16.mxu1 %v15706_v1 }
 0x662   : > { %12941 = vmatprep.subr.bf16.mxu0 %v15664_v32 }
 0x664   : > { %14252 = vmatpush3.bf16.msra.mxu1 %v15707_v2 }
 0x665   : > { %12942 = vmatpush1.bf16.msra.mxu0 %v15662_v33  ;;  %v12974_v33 = vld [vmem:[#allocation2] sm:$0xff] }
 0x666   : > { %12943 = vmatprep.subr.bf16.mxu0 %v15667_v34 }
 0x669   : > { %12944 = vmatpush1.bf16.msra.mxu0 %v15665_v35 }
 0x66a   : > { %12945 = vmatprep.subr.bf16.mxu0 %v15670_v36 }
 0x66d   : > { %12946 = vmatpush1.bf16.msra.mxu0 %v15668_v37  ;;  %v12975_v37 = vld [vmem:[#allocation2 + $0x8] sm:$0xff] }
 0x66e   : > { %12947 = vmatprep.subr.bf16.mxu0 %v15673_v38 }
 0x671   : > { %12948 = vmatpush1.bf16.msra.mxu0 %v15671_v39 }
 0x672   : > { %12949 = vmatprep.subr.bf16.mxu0 %v15676_v40 }
 0x675   : > { %12950 = vmatpush1.bf16.msra.mxu0 %v15674_v41 }
 0x676   : > { %12951 = vmatprep.subr.bf16.mxu0 %v15679_v42  ;;  %v15708_v42 = vld [vmem:[%s18469_s5] sm:$0xff] (!%p14223_p11)  }
 0x679   : > { %12952 = vmatpush1.bf16.msra.mxu0 %v15677_v43  ;;  %v15745_v43 = vmov (!%p14223_p11), 0.0  }
 0x67a   : > { %12953 = vmatprep.subr.bf16.mxu0 %v15682_v44  ;;  %v15709_v44 = vld [vmem:[%s18469_s5 + $0x8] sm:$0xff] (!%p14223_p11)  }
 0x67d   : > { %12954 = vmatpush1.bf16.msra.mxu0 %v15680_v45  ;;  %v15710_v45 = vld [vmem:[%s18469_s5 + $0x10] sm:$0xff] (!%p14223_p11)  }
 0x67e   : > { %12955 = vmatprep.subr.bf16.mxu0 %v15685_v46 }
 0x681   : > { %12956 = vmatpush1.bf16.msra.mxu0 %v15683_v47  ;;  %v14224_v47 = vld [vmem:[%s18468_s4] ss:$0 sm:$0xff] (!%p14223_p11) }
 0x682   : > { %12957 = vmatprep.subr.bf16.mxu0 %v15688_v48 }
 0x685   : > { %12958 = vmatpush1.bf16.msra.mxu0 %v15686_v49  ;;  %v15711_v49 = vld [vmem:[%s18469_s5 + $0x18] sm:$0xff] (!%p14223_p11)  }
 0x686   : > { %14268 = vmatprep.subr.bf16.mxu0 (!%p14223_p11), %v15745_v43 }
 0x688   : > { %12960 = vmatmul.mubr.bf16.vlgmr.msra.gmra.mrb[0].mxu0 %v15689_v50 }
 0x689   : > { %14269 = vmatpush3.bf16.msra.mxu0 (!%p14223_p11), %v15708_v42  ;;  %14284 = vmatprep.mubr.msk.bf16.mxu0 (!%p14223_p11), %vm15746_vm0, %v15745_v43 }
 0x68a   : > { %14270 = vmatprep.subr.bf16.mxu0 (!%p14223_p11), %v15745_v43 }
 0x68d   : > { %14271 = vmatpush3.bf16.msra.mxu0 (!%p14223_p11), %v15709_v44 }
 0x68e   : > { %14272 = vmatprep.subr.bf16.mxu0 (!%p14223_p11), %v15745_v43 }
 0x691   : > { %14273 = vmatpush3.bf16.msra.mxu0 (!%p14223_p11), %v15710_v45 }
 0x692   : > { %14274 = vmatprep.subr.bf16.mxu0 (!%p14223_p11), %v15745_v43 }
 0x695   : > { %14275 = vmatpush3.bf16.msra.mxu0 (!%p14223_p11), %v15711_v49 }
 0x696   : > { %14276 = vmatprep.subr.bf16.mxu0 (!%p14223_p11), %v15745_v43 }
 0x699   : > { %14277 = vmatpush3.bf16.msra.mxu0 (!%p14223_p11), %v15712_v52 }
 0x69a   : > { %14278 = vmatprep.subr.bf16.mxu0 (!%p14223_p11), %v15745_v43 }
 0x69d   : > { %14279 = vmatpush3.bf16.msra.mxu0 (!%p14223_p11), %v15713_v53 }
 0x69e   : > { %14280 = vmatprep.subr.bf16.mxu0 (!%p14223_p11), %v15745_v43 }
 0x6a1   : > { %14281 = vmatpush3.bf16.msra.mxu0 (!%p14223_p11), %v15714_v54 }
 0x6a2   : > { %14282 = vmatprep.subr.bf16.mxu0 (!%p14223_p11), %v15745_v43 }
 0x6a5   : > { %14283 = vmatpush3.bf16.msra.mxu0 (!%p14223_p11), %v15715_v57 }
 0x71a   : > { %v12402_v3 = vpop.f32.mrb[0].mxu1 }
 0x71b   : > { %v12404_v4 = vpop.f32.mrb[1].mxu1  ;;  %v14288_v14 = vadd.f32 %v12402_v3, %v7638_v12 }
 0x71c   : > { %v12406_v5 = vpop.f32.mrb[2].mxu1  ;;  %v14290_v15 = vadd.f32 %v12404_v4, %v7642_v13 }
 0x71d   : > { %v12408_v6 = vpop.f32.mrb[3].mxu1  ;;  %v14292_v17 = vadd.f32 %v12406_v5, %v7638_v12 }
 0x71e   : > { %v14294_v20 = vadd.f32 %v12408_v6, %v7642_v13 }
 0x75b   : > { %v12961_v16 = vpop.f32.mrb[0].mxu0 }
 0x75c   : > { %v14289_v18 = vadd.f32 %v14288_v14, %v12961_v16  ;;  %v12963_v19 = vpop.f32.mrb[1].mxu0 }
 0x75d   : > { %v14291_v21 = vadd.f32 %v14290_v15, %v12963_v19  ;;  %v12965_v22 = vpop.f32.mrb[2].mxu0 }
 0x75e   : > { %v14293_v23 = vadd.f32 %v14292_v17, %v12965_v22  ;;  %v12967_v24 = vpop.f32.mrb[3].mxu0  ;;  %v12970_v26 = vmax.f32 %v14289_v18, 0.0 }
 0x75f   : > { %v14295_v25 = vadd.f32 %v14294_v20, %v12967_v24  ;;  %v12971_v28 = vmax.f32 %v14291_v21, 0.0 }
 0x760   : > { %v12972_v27 = vmax.f32 %v14293_v23, 0.0 }
 0x761   : > { %v12973_v29 = vmax.f32 %v14295_v25, 0.0 }
 0x762   : > { %v12976_v30 = vpack.c.bf16 %v12972_v27, %v12970_v26 }
 0x763   : > { %v12977_v31 = vpack.c.bf16 %v12973_v29, %v12971_v28 }
 0x765   : > { %13138 = vmatprep.mubr.bf16.mxu1 %v12977_v31 }
 0x766   : > { %13139 = vmatmul.mubr.bf16.vlgmr.msra.gmra.mrb[4].mxu1 %v12976_v30 }
 0x839   : > { %v14253_v32 = vpop.f32.mrb[4].mxu1 }
 0x83a   : > { %v14254_v34 = vpop.f32.mrb[5].mxu1 }
 0x83b   : > { %v14255_v35 = vadd.f32 %v14254_v34, %v14253_v32  ;;  %v14256_v36 = vpop.f32.mrb[6].mxu1  ;;  %13154 = sbr.rel (%p14223_p11) target bundleno = 2353 (0x931), region = 108 }
 0x83c   : > { %v14257_v38 = vpop.f32.mrb[7].mxu1 }
 0x83d   : > { %v13147_v39 = vadd.f32 %v14255_v35, %v12974_v33  ;;  %v14258_v40 = vadd.f32 %v14257_v38, %v14256_v36 }
 0x83f   : > { %13149 = vst [vmem:[#allocation2] sm:$0xff] %v13147_v39  ;;  %v13148_v41 = vadd.f32 %v14258_v40, %v12975_v37 }
 0x841   : > { %13150 = vst [vmem:[#allocation2 + $0x8] sm:$0xff] %v13148_v41 }
 0x846   : > { %v13155_v46 = vld [vmem:[#allocation2] sm:$0xff] }
 0x847   : > { %v13164_v50 = vadd.f32 %v14224_v47, %v13155_v46 }
 0x848   : > { %v13156_v48 = vld [vmem:[#allocation2 + $0x8] sm:$0xff] }
 0x849   : > { %v13165_v51 = vadd.f32 %v14224_v47, %v13156_v48  ;;  %15716 = vtanh.f32 %v13164_v50 }
 0x84b   : > { %15718 = vtanh.f32 %v13165_v51 }
 0x853   : > { %v15717_v55 = vpop.eup %15716 }
 0x855   : > { %v15719_v56 = vpop.eup %15718 }
 0x856   : > { %v13168_v58 = vpack.c.bf16 %v15719_v56, %v15717_v55 }
 0x858   : > { %14285 = vmatmul.mubr.bf16.vlgmr.msra.gmra.mrb[0].mxu0 %v13168_v58 }
 0x92b   : > { %v13274_v60 = vpop.f32.mrb[0].mxu0 }
 0x92c   : > { %v13275_v61 = vadd.f32 %v14225_v59, %v13274_v60  ;;  %v14286_v62 = vpop.f32.mrb[1].mxu0 }
 0x92d   : > { %v13277_v63 = vpop.f32.mrb[2].mxu0 }
 0x92e   : > { %13281 = vst [vmem:[%s18471_s7] sm:$0xff] %v13275_v61  ;;  %v13278_v0 = vadd.f32 %v14225_v59, %v13277_v63  ;;  %v14287_v1 = vpop.f32.mrb[3].mxu0 }
 0x930   : > { %13282 = vst [vmem:[%s18471_s7 + $0x8] sm:$0xff] %v13278_v0 }
 0x931 PF: > { %p14_p12 = scmp.ge.s32.totalorder %s15806_s28, 6   ;;  %s18472_s24 = smov %s15738_s25 }
 0x932   : > { %s18473_s25 = smov %s15815_s8  ;;  %s18474_s26 = smov %s15806_s28 }
 0x933   :  { %16 = sbr.rel (!%p14_p12) target bundleno = 2 (0x2), region = 151 }

</bundles_post_ra>
